<compile_context>
chip_gen: v5e
topology: v5e:2x2
jax: 0.10.0
libtpu: 0.0.40
codegen_flags: <defaults>
</compile_context>

<pallas_src>
import functools

import jax
import jax.numpy as jnp
from jax import lax
from jax.experimental import pallas as pl
from jax.experimental.pallas import tpu as pltpu


def _silu(x):
    return x * jax.nn.sigmoid(x)


def _full_spec(shape):
    """Whole-array VMEM block (same block every grid step -> DMA'd once)."""
    nd = len(shape)
    return pl.BlockSpec(shape, lambda t, _nd=nd: (0,) * _nd)


# ---------------------------------------------------------------- kernel ----

def egnn_fused_kernel(row_ref, col_ref, emask_ref, h0_ref, pos_ref,
                      nmask_c_ref, nmask_l_ref,
                      h0w_ref, emb_b_ref,
                      w1st_ref, w1r_ref, b1_ref, w2_ref, b2_ref,
                      wnh_ref, wna_ref, bn1_ref, wn2_ref, bn2_ref,
                      wd1_ref, bd1_ref, wd2_ref, bd2_ref,
                      wg1_ref, bg1_ref, wg2_ref, bg2_ref,
                      ac_ref, pred_ref,
                      *, n_nodes, n_layers, hidden_nf, graphs_per_step):
    f32 = jnp.float32
    H = hidden_nf
    G = graphs_per_step
    gn = G * n_nodes                         # packed node rows this step

    row = row_ref[0]                         # [1, GEg] int32 (within-step ids)
    col = col_ref[0]                         # [1, GEg]
    emask = emask_ref[0]                     # [1, GEg] f32
    geg = row.shape[1]

    # Block-diagonal transposed gather/scatter one-hots, built in-kernel
    # (VPU iota + compare); reused by every layer.  Edge mask is folded into
    # the scatter matrix (equivalent to masking edge features before agg).
    node_iota = lax.broadcasted_iota(jnp.int32, (gn, geg), 0)
    growT = (node_iota == row).astype(f32)            # [Gn, GEg]
    gcolT = (node_iota == col).astype(f32)            # [Gn, GEg]
    scatT = growT * emask                              # masked scatter matrix

    # coord2radial (norm_diff=False): one merged position gather on the MXU.
    pos = pos_ref[...]                                 # [Gn, 3]
    diff = lax.dot_general(growT - gcolT, pos, (((0,), (0,)), ((), ())),
                           preferred_element_type=f32)             # [GEg, 3]
    radial = jnp.sum(diff * diff, axis=1, keepdims=True)           # [GEg, 1]

    # embedding + all per-layer h0 @ wn0 terms in ONE lane-dense matmul.
    h0 = h0_ref[...]                                   # [Gn, F]
    h0p = jnp.dot(h0, h0w_ref[...], preferred_element_type=f32)    # [Gn,(L+1)H]
    h = h0p[:, :H] + emb_b_ref[...]                                 # embedding

    # E_GCL layers (unrolled; L=4 is small enough for static live ranges).
    for l in range(n_layers):
        # edge_mlp first linear hoisted to node level & fused (source|target).
        hst = jnp.dot(h, w1st_ref[l], preferred_element_type=f32)   # [Gn, 2H]
        e = (lax.dot_general(growT, hst[:, :H], (((0,), (0,)), ((), ())),
                             preferred_element_type=f32)
             + lax.dot_general(gcolT, hst[:, H:], (((0,), (0,)), ((), ())),
                               preferred_element_type=f32)
             + radial * w1r_ref[l]
             + b1_ref[l])                                            # [GEg, H]
        e = _silu(e)
        e = _silu(jnp.dot(e, w2_ref[l], preferred_element_type=f32) + b2_ref[l])

        # unsorted_segment_sum(e * edge_mask, row)  ==  (growT * emask) @ e
        agg = jnp.dot(scatT, e, preferred_element_type=f32)         # [Gn, H]

        # node_mlp on concat([h, agg, h0]) via split weights + hoisted h0 term.
        nf = (jnp.dot(h, wnh_ref[l], preferred_element_type=f32)
              + jnp.dot(agg, wna_ref[l], preferred_element_type=f32)
              + h0p[:, (l + 1) * H:(l + 2) * H]
              + bn1_ref[l])
        nf = _silu(nf)
        h = jnp.dot(nf, wn2_ref[l], preferred_element_type=f32) + bn2_ref[l]

    # node_dec
    x = _silu(jnp.dot(h, wd1_ref[...], preferred_element_type=f32) + bd1_ref[...])
    x = jnp.dot(x, wd2_ref[...], preferred_element_type=f32) + bd2_ref[...]
    x = x * nmask_c_ref[...]                                         # [Gn, H]

    # graph_dec (per-node atomic contribution); the final H->1 projection is a
    # transposed-RHS dot -> lane-dense [1, Gn] row (no masked [.,1] stores).
    y = _silu(jnp.dot(x, wg1_ref[...], preferred_element_type=f32) + bg1_ref[...])
    nmask_l = nmask_l_ref[0]                                         # [1, Gn]
    ac = (lax.dot_general(wg2_ref[...], y, (((1,), (1,)), ((), ())),
                          preferred_element_type=f32)
          + bg2_ref[...]) * nmask_l                                  # [1, Gn]
    ac_ref[0] = ac

    # per-graph energy: sum each graph's n_nodes lanes via a tiny block one-hot.
    gi = lax.broadcasted_iota(jnp.int32, (G, gn), 0)
    ji = lax.broadcasted_iota(jnp.int32, (G, gn), 1)
    gsum = jnp.logical_and(ji >= gi * n_nodes,
                           ji < (gi + 1) * n_nodes).astype(f32)      # [G, Gn]
    pred_ref[0] = lax.dot_general(ac, gsum, (((1,), (1,)), ((), ())),
                                  preferred_element_type=f32)        # [1, G]


# ----------------------------------------------------------- parameters ----

def init_linear(key, fan_in, fan_out):
    # matches torch.nn.Linear default init (uniform +/- 1/sqrt(fan_in))
    k1, k2 = jax.random.split(key)
    bound = 1.0 / (fan_in ** 0.5)
    w = jax.random.uniform(k1, (fan_in, fan_out), jnp.float32, -bound, bound)
    b = jax.random.uniform(k2, (1, fan_out), jnp.float32, -bound, bound)
    return w, b


def init_params(key, in_node_nf, hidden_nf, n_layers):
    H, F = hidden_nf, in_node_nf
    keys = jax.random.split(key, n_layers + 2)
    emb_w, emb_b = init_linear(keys[0], F, H)
    layers = []
    for i in range(n_layers):
        lk = jax.random.split(keys[1 + i], 4)
        w1, b1 = init_linear(lk[0], 2 * H + 1, H)     # edge_mlp lin1 (edges_in_d=0)
        w2, b2 = init_linear(lk[1], H, H)             # edge_mlp lin2
        wn1, bn1 = init_linear(lk[2], 2 * H + F, H)   # node_mlp lin1 (node_attr=h0)
        wn2, bn2 = init_linear(lk[3], H, H)           # node_mlp lin2
        layers.append(dict(w1=w1, b1=b1, w2=w2, b2=b2,
                           wn1=wn1, bn1=bn1, wn2=wn2, bn2=bn2))
    dk = jax.random.split(keys[-1], 4)
    wd1, bd1 = init_linear(dk[0], H, H)
    wd2, bd2 = init_linear(dk[1], H, H)
    wg1, bg1 = init_linear(dk[2], H, H)
    wg2, bg2 = init_linear(dk[3], H, 1)
    dec = dict(wd1=wd1, bd1=bd1, wd2=wd2, bd2=bd2,
               wg1=wg1, bg1=bg1, wg2=wg2, bg2=bg2)
    return dict(emb_w=emb_w, emb_b=emb_b, layers=layers, dec=dec)


def _pack_weights(params):
    """Repack natural (PyTorch-layout) params into kernel layout."""
    H = params["emb_w"].shape[1]
    w1st, w1r, b1, w2, b2 = [], [], [], [], []
    wnh, wna, wn0, bn1, wn2, bn2 = [], [], [], [], [], []
    for lp in params["layers"]:
        w1 = lp["w1"]                               # [2H+1, H]
        w1st.append(jnp.concatenate([w1[:H], w1[H:2 * H]], axis=1))   # [H, 2H]
        w1r.append(w1[2 * H:2 * H + 1])
        b1.append(lp["b1"]); w2.append(lp["w2"]); b2.append(lp["b2"])
        wn1 = lp["wn1"]                             # [2H+F, H]
        wnh.append(wn1[:H]); wna.append(wn1[H:2 * H]); wn0.append(wn1[2 * H:])
        bn1.append(lp["bn1"]); wn2.append(lp["wn2"]); bn2.append(lp["bn2"])
    d = params["dec"]
    h0w = jnp.concatenate([params["emb_w"]] + wn0, axis=1)            # [F,(L+1)H]
    return (h0w, params["emb_b"],
            jnp.stack(w1st), jnp.stack(w1r), jnp.stack(b1),
            jnp.stack(w2), jnp.stack(b2),
            jnp.stack(wnh), jnp.stack(wna), jnp.stack(bn1),
            jnp.stack(wn2), jnp.stack(bn2),
            d["wd1"], d["bd1"], d["wd2"], d["bd2"],
            d["wg1"], d["bg1"], d["wg2"].T, d["bg2"])


# ------------------------------------------------------------- forward -----

def pick_graphs_per_step(batch, n_nodes, target_rows=256):
    """Largest G dividing batch with G*n_nodes <= target_rows (256 fills the
    v6e/v7x MXU; use 128 for v5e), legal block shape, and >=2 grid steps when
    possible (so megacore 'parallel' sharding has work to split)."""
    cands = [g for g in range(1, batch + 1)
             if batch % g == 0 and g * n_nodes <= target_rows
             and ((g * n_nodes) % 8 == 0 or g == batch)]
    if not cands:
        return 1
    multi = [g for g in cands if batch // g >= 2]
    return max(multi) if multi else max(cands)


def egnn_atomic_forward(params, h0, positions, row, col, n_nodes,
                        node_mask, edge_mask, graphs_per_step=None,
                        target_rows=256):
    N, F = h0.shape
    B = N // n_nodes
    E = row.shape[0]
    assert E % B == 0, "edges must be grouped per graph with equal counts"
    Eg = E // B
    H = params["emb_w"].shape[1]
    L = len(params["layers"])

    G = graphs_per_step or pick_graphs_per_step(B, n_nodes, target_rows)
    assert B % G == 0
    T = B // G
    Gn, GEg = G * n_nodes, G * Eg
    assert Gn % 8 == 0 or T == 1, "packed node block violates (8,128) rule"

    # within-step (block-diagonal) edge endpoints, lane-dense layouts
    step_off = (jnp.arange(T, dtype=jnp.int32) * Gn)[:, None]
    row_s = (row.reshape(T, GEg).astype(jnp.int32) - step_off).reshape(T, 1, GEg)
    col_s = (col.reshape(T, GEg).astype(jnp.int32) - step_off).reshape(T, 1, GEg)
    emask_s = edge_mask.astype(jnp.float32).reshape(T, 1, GEg)
    nmask_c = node_mask.astype(jnp.float32)                 # [N, 1] (row form)
    nmask_l = nmask_c.reshape(T, 1, Gn)                     # lane form

    weights = _pack_weights(params)

    edge_spec = pl.BlockSpec((1, 1, GEg), lambda t: (t, 0, 0))
    lane_spec = pl.BlockSpec((1, 1, Gn), lambda t: (t, 0, 0))
    in_specs = ([edge_spec, edge_spec, edge_spec,
                 pl.BlockSpec((Gn, F), lambda t: (t, 0)),
                 pl.BlockSpec((Gn, 3), lambda t: (t, 0)),
                 pl.BlockSpec((Gn, 1), lambda t: (t, 0)),
                 lane_spec]
                + [_full_spec(w.shape) for w in weights])
    out_specs = (pl.BlockSpec((1, 1, Gn), lambda t: (t, 0, 0)),
                 pl.BlockSpec((1, 1, G), lambda t: (t, 0, 0)))
    out_shape = (jax.ShapeDtypeStruct((T, 1, Gn), jnp.float32),
                 jax.ShapeDtypeStruct((T, 1, G), jnp.float32))

    # advisory cost estimate for XLA scheduling around the custom call
    flops_layer = (2 * Gn * H * (2 * H) + 4 * GEg * Gn * H + 2 * GEg * H * H
                   + 2 * Gn * GEg * H + 6 * Gn * H * H)
    flops_step = (2 * GEg * Gn * 3 + 2 * Gn * F * (L + 1) * H + L * flops_layer
                  + 6 * Gn * H * H + 2 * Gn * H + 2 * G * Gn)
    transc_step = L * (2 * GEg * H + Gn * H) + 2 * Gn * H
    all_ins = (row_s, col_s, emask_s, h0, positions, nmask_c, nmask_l) + weights
    bytes_acc = sum(int(a.size) * a.dtype.itemsize for a in all_ins) \
        + (T * Gn + T * G) * 4
    cost = pl.CostEstimate(flops=int(T * flops_step),
                           transcendentals=int(T * transc_step),
                           bytes_accessed=int(bytes_acc))

    kernel = functools.partial(egnn_fused_kernel, n_nodes=n_nodes, n_layers=L,
                               hidden_nf=H, graphs_per_step=G)
    ac_out, pred_out = pl.pallas_call(
        kernel,
        out_shape=out_shape,
        grid_spec=pltpu.PrefetchScalarGridSpec(
            num_scalar_prefetch=0,
            grid=(T,),
            in_specs=in_specs,
            out_specs=out_specs),
        compiler_params=pltpu.CompilerParams(
            dimension_semantics=("parallel",),
            vmem_limit_bytes=32 * 1024 * 1024),   # explicit; fits v7x's 64 MiB
        cost_estimate=cost,
    )(row_s, col_s, emask_s, h0, positions, nmask_c, nmask_l, *weights)

    ac = ac_out.reshape(B, n_nodes)
    pred = pred_out.reshape(B)
    return pred, ac


# pure-JAX reference mirroring the PyTorch module (for correctness check)
def reference_forward(params, h0, positions, row, col, n_nodes,
                      node_mask, edge_mask):
    N = h0.shape[0]
    h = h0 @ params["emb_w"] + params["emb_b"]
    for lp in params["layers"]:
        cd = positions[row] - positions[col]
        radial = jnp.sum(cd ** 2, axis=1, keepdims=True)
        e_in = jnp.concatenate([h[row], h[col], radial], axis=1)
        e = _silu(e_in @ lp["w1"] + lp["b1"])
        e = _silu(e @ lp["w2"] + lp["b2"])
        e = e * edge_mask
        agg = jnp.zeros((N, e.shape[1]), jnp.float32).at[row].add(e)
        n_in = jnp.concatenate([h, agg, h0], axis=1)
        nfe = _silu(n_in @ lp["wn1"] + lp["bn1"])
        h = nfe @ lp["wn2"] + lp["bn2"]
    d = params["dec"]
    x = _silu(h @ d["wd1"] + d["bd1"]) @ d["wd2"] + d["bd2"]
    x = x * node_mask
    y = _silu(x @ d["wg1"] + d["bg1"]) @ d["wg2"] + d["bg2"]
    y = y * node_mask
    ac = y.reshape(-1, n_nodes)
    return jnp.sum(ac, axis=1), ac


# ---------------------------------------------------------------- main -----

if __name__ == "__main__":
    B, n_nodes = 4, 8
    in_node_nf, hidden_nf, n_layers = 4, 32, 4
    N = B * n_nodes

    key = jax.random.PRNGKey(0)
    k = jax.random.split(key, 4)

    h0 = jax.random.normal(k[0], (N, in_node_nf), jnp.float32)
    positions = jax.random.normal(k[1], (N, 3), jnp.float32)

    # fully connected edges within each graph (no self-loops), grouped per graph
    rows, cols = [], []
    for b in range(B):
        for i in range(n_nodes):
            for j in range(n_nodes):
                if i != j:
                    rows.append(b * n_nodes + i)
                    cols.append(b * n_nodes + j)
    row = jnp.array(rows, dtype=jnp.int32)        # [E], E = B * 56
    col = jnp.array(cols, dtype=jnp.int32)

    node_mask = (jax.random.uniform(k[2], (N, 1)) > 0.2).astype(jnp.float32)
    edge_mask = node_mask[row] * node_mask[col]                        # [E, 1]

    params = init_params(k[3], in_node_nf, hidden_nf, n_layers)

    pred, ac = egnn_atomic_forward(params, h0, positions, row, col,
                                   n_nodes, node_mask, edge_mask)
    jax.block_until_ready((pred, ac))

    pred_ref, ac_ref = reference_forward(params, h0, positions, row, col,
                                         n_nodes, node_mask, edge_mask)
    assert jnp.allclose(pred, pred_ref, atol=5e-4, rtol=5e-4), (pred, pred_ref)
    assert jnp.allclose(ac, ac_ref, atol=5e-4, rtol=5e-4)

    print("KERNEL_OK")
</pallas_src>

<mosaic_0001>
module attributes {stable_mosaic.version = 11 : i64} {
  func.func @egnn_fused_kernel(%arg0: i32, %arg1: memref<1x1x112xi32, #tpu.memory_space<vmem>>, %arg2: memref<1x1x112xi32, #tpu.memory_space<vmem>>, %arg3: memref<1x1x112xf32, #tpu.memory_space<vmem>>, %arg4: memref<16x4xf32, #tpu.memory_space<vmem>>, %arg5: memref<16x3xf32, #tpu.memory_space<vmem>>, %arg6: memref<16x1xf32, #tpu.memory_space<vmem>>, %arg7: memref<1x1x16xf32, #tpu.memory_space<vmem>>, %arg8: memref<4x160xf32, #tpu.memory_space<vmem>>, %arg9: memref<1x32xf32, #tpu.memory_space<vmem>>, %arg10: memref<4x32x64xf32, #tpu.memory_space<vmem>>, %arg11: memref<4x1x32xf32, #tpu.memory_space<vmem>>, %arg12: memref<4x1x32xf32, #tpu.memory_space<vmem>>, %arg13: memref<4x32x32xf32, #tpu.memory_space<vmem>>, %arg14: memref<4x1x32xf32, #tpu.memory_space<vmem>>, %arg15: memref<4x32x32xf32, #tpu.memory_space<vmem>>, %arg16: memref<4x32x32xf32, #tpu.memory_space<vmem>>, %arg17: memref<4x1x32xf32, #tpu.memory_space<vmem>>, %arg18: memref<4x32x32xf32, #tpu.memory_space<vmem>>, %arg19: memref<4x1x32xf32, #tpu.memory_space<vmem>>, %arg20: memref<32x32xf32, #tpu.memory_space<vmem>>, %arg21: memref<1x32xf32, #tpu.memory_space<vmem>>, %arg22: memref<32x32xf32, #tpu.memory_space<vmem>>, %arg23: memref<1x32xf32, #tpu.memory_space<vmem>>, %arg24: memref<32x32xf32, #tpu.memory_space<vmem>>, %arg25: memref<1x32xf32, #tpu.memory_space<vmem>>, %arg26: memref<1x32xf32, #tpu.memory_space<vmem>>, %arg27: memref<1x1xf32, #tpu.memory_space<vmem>>, %arg28: memref<1x1x16xf32, #tpu.memory_space<vmem>>, %arg29: memref<1x1x2xf32, #tpu.memory_space<vmem>>) attributes {dimension_semantics = [#tpu.dimension_semantics<parallel>], iteration_bounds = array<i64: 2>, scalar_prefetch = 0 : i64, scratch_operands = 0 : i64, tpu.core_type = #tpu.core_type<tc>, window_params = [{transform_indices = @transform_0, window_bounds = array<i64: 1, 1, 112>}, {transform_indices = @transform_1, window_bounds = array<i64: 1, 1, 112>}, {transform_indices = @transform_2, window_bounds = array<i64: 1, 1, 112>}, {transform_indices = @transform_3, window_bounds = array<i64: 16, 4>}, {transform_indices = @transform_4, window_bounds = array<i64: 16, 3>}, {transform_indices = @transform_5, window_bounds = array<i64: 16, 1>}, {transform_indices = @transform_6, window_bounds = array<i64: 1, 1, 16>}, {pipeline_mode = #tpu.pipeline_mode<synchronous>, transform_indices = @transform_7, window_bounds = array<i64: 4, 160>}, {pipeline_mode = #tpu.pipeline_mode<synchronous>, transform_indices = @transform_8, window_bounds = array<i64: 1, 32>}, {pipeline_mode = #tpu.pipeline_mode<synchronous>, transform_indices = @transform_9, window_bounds = array<i64: 4, 32, 64>}, {pipeline_mode = #tpu.pipeline_mode<synchronous>, transform_indices = @transform_10, window_bounds = array<i64: 4, 1, 32>}, {pipeline_mode = #tpu.pipeline_mode<synchronous>, transform_indices = @transform_11, window_bounds = array<i64: 4, 1, 32>}, {pipeline_mode = #tpu.pipeline_mode<synchronous>, transform_indices = @transform_12, window_bounds = array<i64: 4, 32, 32>}, {pipeline_mode = #tpu.pipeline_mode<synchronous>, transform_indices = @transform_13, window_bounds = array<i64: 4, 1, 32>}, {pipeline_mode = #tpu.pipeline_mode<synchronous>, transform_indices = @transform_14, window_bounds = array<i64: 4, 32, 32>}, {pipeline_mode = #tpu.pipeline_mode<synchronous>, transform_indices = @transform_15, window_bounds = array<i64: 4, 32, 32>}, {pipeline_mode = #tpu.pipeline_mode<synchronous>, transform_indices = @transform_16, window_bounds = array<i64: 4, 1, 32>}, {pipeline_mode = #tpu.pipeline_mode<synchronous>, transform_indices = @transform_17, window_bounds = array<i64: 4, 32, 32>}, {pipeline_mode = #tpu.pipeline_mode<synchronous>, transform_indices = @transform_18, window_bounds = array<i64: 4, 1, 32>}, {pipeline_mode = #tpu.pipeline_mode<synchronous>, transform_indices = @transform_19, window_bounds = array<i64: 32, 32>}, {pipeline_mode = #tpu.pipeline_mode<synchronous>, transform_indices = @transform_20, window_bounds = array<i64: 1, 32>}, {pipeline_mode = #tpu.pipeline_mode<synchronous>, transform_indices = @transform_21, window_bounds = array<i64: 32, 32>}, {pipeline_mode = #tpu.pipeline_mode<synchronous>, transform_indices = @transform_22, window_bounds = array<i64: 1, 32>}, {pipeline_mode = #tpu.pipeline_mode<synchronous>, transform_indices = @transform_23, window_bounds = array<i64: 32, 32>}, {pipeline_mode = #tpu.pipeline_mode<synchronous>, transform_indices = @transform_24, window_bounds = array<i64: 1, 32>}, {pipeline_mode = #tpu.pipeline_mode<synchronous>, transform_indices = @transform_25, window_bounds = array<i64: 1, 32>}, {pipeline_mode = #tpu.pipeline_mode<synchronous>, transform_indices = @transform_26, window_bounds = array<i64: 1, 1>}, {transform_indices = @transform_27, window_bounds = array<i64: 1, 1, 16>}, {transform_indices = @transform_28, window_bounds = array<i64: 1, 1, 2>}]} {
    %c0 = arith.constant 0 : index
    %c0_0 = arith.constant 0 : index
    %c0_1 = arith.constant 0 : index
    %0 = vector.load %arg1[%c0, %c0_0, %c0_1] : memref<1x1x112xi32, #tpu.memory_space<vmem>>, vector<1x1x112xi32>
    %1 = vector.shape_cast %0 : vector<1x1x112xi32> to vector<1x112xi32>
    %c0_2 = arith.constant 0 : index
    %c0_3 = arith.constant 0 : index
    %c0_4 = arith.constant 0 : index
    %2 = vector.load %arg2[%c0_2, %c0_3, %c0_4] : memref<1x1x112xi32, #tpu.memory_space<vmem>>, vector<1x1x112xi32>
    %3 = vector.shape_cast %2 : vector<1x1x112xi32> to vector<1x112xi32>
    %c0_5 = arith.constant 0 : index
    %c0_6 = arith.constant 0 : index
    %c0_7 = arith.constant 0 : index
    %4 = vector.load %arg3[%c0_5, %c0_6, %c0_7] : memref<1x1x112xf32, #tpu.memory_space<vmem>>, vector<1x1x112xf32>
    %5 = vector.shape_cast %4 : vector<1x1x112xf32> to vector<1x112xf32>
    %6 = tpu.iota {dimensions = array<i32: 0>} : vector<16x112xi32>
    %7 = vector.broadcast %1 : vector<1x112xi32> to vector<16x112xi32>
    %8 = arith.cmpi eq, %6, %7 : vector<16x112xi32>
    %9 = arith.extui %8 : vector<16x112xi1> to vector<16x112xi32>
    %10 = arith.sitofp %9 : vector<16x112xi32> to vector<16x112xf32>
    %11 = vector.broadcast %3 : vector<1x112xi32> to vector<16x112xi32>
    %12 = arith.cmpi eq, %6, %11 : vector<16x112xi32>
    %13 = arith.extui %12 : vector<16x112xi1> to vector<16x112xi32>
    %14 = arith.sitofp %13 : vector<16x112xi32> to vector<16x112xf32>
    %15 = vector.broadcast %5 : vector<1x112xf32> to vector<16x112xf32>
    %16 = arith.mulf %10, %15 : vector<16x112xf32>
    %c0_8 = arith.constant 0 : index
    %c0_9 = arith.constant 0 : index
    %17 = vector.load %arg5[%c0_8, %c0_9] : memref<16x3xf32, #tpu.memory_space<vmem>>, vector<16x3xf32>
    %18 = arith.subf %10, %14 : vector<16x112xf32>
    %cst = arith.constant dense<0.000000e+00> : vector<112x3xf32>
    %19 = tpu.matmul %18, %17, %cst {dimension_numbers = #tpu.dot_dimension_numbers<[0], [0], [1], [1], [0, 1, 1, 1], [], []>} : vector<16x112xf32>, vector<16x3xf32>, vector<112x3xf32> -> vector<112x3xf32>
    %20 = arith.mulf %19, %19 : vector<112x3xf32>
    %cst_10 = arith.constant dense<0.000000e+00> : vector<112xf32>
    %21 = vector.multi_reduction <add>, %20, %cst_10 [1] : vector<112x3xf32> to vector<112xf32>
    %22 = vector.shape_cast %21 : vector<112xf32> to vector<112x1xf32>
    %c0_11 = arith.constant 0 : index
    %c0_12 = arith.constant 0 : index
    %23 = vector.load %arg4[%c0_11, %c0_12] : memref<16x4xf32, #tpu.memory_space<vmem>>, vector<16x4xf32>
    %c0_13 = arith.constant 0 : index
    %c0_14 = arith.constant 0 : index
    %24 = vector.load %arg8[%c0_13, %c0_14] : memref<4x160xf32, #tpu.memory_space<vmem>>, vector<4x160xf32>
    %cst_15 = arith.constant dense<0.000000e+00> : vector<16x160xf32>
    %25 = tpu.matmul %23, %24, %cst_15 {dimension_numbers = #tpu.dot_dimension_numbers<[1], [0], [0], [1], [0, 0, 1, 1], [], []>} : vector<16x4xf32>, vector<4x160xf32>, vector<16x160xf32> -> vector<16x160xf32>
    %26 = vector.extract_strided_slice %25 {offsets = [0, 0], sizes = [16, 32], strides = [1, 1]} : vector<16x160xf32> to vector<16x32xf32>
    %c0_16 = arith.constant 0 : index
    %c0_17 = arith.constant 0 : index
    %27 = vector.load %arg9[%c0_16, %c0_17] : memref<1x32xf32, #tpu.memory_space<vmem>>, vector<1x32xf32>
    %28 = vector.broadcast %27 : vector<1x32xf32> to vector<16x32xf32>
    %29 = arith.addf %26, %28 : vector<16x32xf32>
    %c0_18 = arith.constant 0 : index
    %c0_19 = arith.constant 0 : index
    %c0_20 = arith.constant 0 : index
    %30 = vector.load %arg10[%c0_18, %c0_19, %c0_20] : memref<4x32x64xf32, #tpu.memory_space<vmem>>, vector<1x32x64xf32>
    %31 = vector.shape_cast %30 : vector<1x32x64xf32> to vector<32x64xf32>
    %cst_21 = arith.constant dense<0.000000e+00> : vector<16x64xf32>
    %32 = tpu.matmul %29, %31, %cst_21 {dimension_numbers = #tpu.dot_dimension_numbers<[1], [0], [0], [1], [0, 0, 1, 1], [], []>} : vector<16x32xf32>, vector<32x64xf32>, vector<16x64xf32> -> vector<16x64xf32>
    %33 = vector.extract_strided_slice %32 {offsets = [0, 0], sizes = [16, 32], strides = [1, 1]} : vector<16x64xf32> to vector<16x32xf32>
    %cst_22 = arith.constant dense<0.000000e+00> : vector<112x32xf32>
    %34 = tpu.matmul %10, %33, %cst_22 {dimension_numbers = #tpu.dot_dimension_numbers<[0], [0], [1], [1], [0, 1, 1, 1], [], []>} : vector<16x112xf32>, vector<16x32xf32>, vector<112x32xf32> -> vector<112x32xf32>
    %35 = vector.extract_strided_slice %32 {offsets = [0, 32], sizes = [16, 32], strides = [1, 1]} : vector<16x64xf32> to vector<16x32xf32>
    %cst_23 = arith.constant dense<0.000000e+00> : vector<112x32xf32>
    %36 = tpu.matmul %14, %35, %cst_23 {dimension_numbers = #tpu.dot_dimension_numbers<[0], [0], [1], [1], [0, 1, 1, 1], [], []>} : vector<16x112xf32>, vector<16x32xf32>, vector<112x32xf32> -> vector<112x32xf32>
    %37 = arith.addf %34, %36 : vector<112x32xf32>
    %c0_24 = arith.constant 0 : index
    %c0_25 = arith.constant 0 : index
    %c0_26 = arith.constant 0 : index
    %38 = vector.load %arg11[%c0_24, %c0_25, %c0_26] : memref<4x1x32xf32, #tpu.memory_space<vmem>>, vector<1x1x32xf32>
    %39 = vector.shape_cast %38 : vector<1x1x32xf32> to vector<1x32xf32>
    %40 = vector.broadcast %22 : vector<112x1xf32> to vector<112x32xf32>
    %41 = vector.broadcast %39 : vector<1x32xf32> to vector<112x32xf32>
    %42 = arith.mulf %40, %41 : vector<112x32xf32>
    %43 = arith.addf %37, %42 : vector<112x32xf32>
    %c0_27 = arith.constant 0 : index
    %c0_28 = arith.constant 0 : index
    %c0_29 = arith.constant 0 : index
    %44 = vector.load %arg12[%c0_27, %c0_28, %c0_29] : memref<4x1x32xf32, #tpu.memory_space<vmem>>, vector<1x1x32xf32>
    %45 = vector.shape_cast %44 : vector<1x1x32xf32> to vector<1x32xf32>
    %46 = vector.broadcast %45 : vector<1x32xf32> to vector<112x32xf32>
    %47 = arith.addf %43, %46 : vector<112x32xf32>
    %48 = arith.negf %47 : vector<112x32xf32>
    %49 = math.exp %48 : vector<112x32xf32>
    %cst_30 = arith.constant 1.000000e+00 : f32
    %50 = vector.broadcast %cst_30 : f32 to vector<112x32xf32>
    %51 = arith.addf %50, %49 : vector<112x32xf32>
    %52 = arith.divf %50, %51 : vector<112x32xf32>
    %53 = arith.mulf %47, %52 : vector<112x32xf32>
    %c0_31 = arith.constant 0 : index
    %c0_32 = arith.constant 0 : index
    %c0_33 = arith.constant 0 : index
    %54 = vector.load %arg13[%c0_31, %c0_32, %c0_33] : memref<4x32x32xf32, #tpu.memory_space<vmem>>, vector<1x32x32xf32>
    %55 = vector.shape_cast %54 : vector<1x32x32xf32> to vector<32x32xf32>
    %cst_34 = arith.constant dense<0.000000e+00> : vector<112x32xf32>
    %56 = tpu.matmul %53, %55, %cst_34 {dimension_numbers = #tpu.dot_dimension_numbers<[1], [0], [0], [1], [0, 0, 1, 1], [], []>} : vector<112x32xf32>, vector<32x32xf32>, vector<112x32xf32> -> vector<112x32xf32>
    %c0_35 = arith.constant 0 : index
    %c0_36 = arith.constant 0 : index
    %c0_37 = arith.constant 0 : index
    %57 = vector.load %arg14[%c0_35, %c0_36, %c0_37] : memref<4x1x32xf32, #tpu.memory_space<vmem>>, vector<1x1x32xf32>
    %58 = vector.shape_cast %57 : vector<1x1x32xf32> to vector<1x32xf32>
    %59 = vector.broadcast %58 : vector<1x32xf32> to vector<112x32xf32>
    %60 = arith.addf %56, %59 : vector<112x32xf32>
    %61 = arith.negf %60 : vector<112x32xf32>
    %62 = math.exp %61 : vector<112x32xf32>
    %cst_38 = arith.constant 1.000000e+00 : f32
    %63 = vector.broadcast %cst_38 : f32 to vector<112x32xf32>
    %64 = arith.addf %63, %62 : vector<112x32xf32>
    %65 = arith.divf %63, %64 : vector<112x32xf32>
    %66 = arith.mulf %60, %65 : vector<112x32xf32>
    %cst_39 = arith.constant dense<0.000000e+00> : vector<16x32xf32>
    %67 = tpu.matmul %16, %66, %cst_39 {dimension_numbers = #tpu.dot_dimension_numbers<[1], [0], [0], [1], [0, 0, 1, 1], [], []>} : vector<16x112xf32>, vector<112x32xf32>, vector<16x32xf32> -> vector<16x32xf32>
    %c0_40 = arith.constant 0 : index
    %c0_41 = arith.constant 0 : index
    %c0_42 = arith.constant 0 : index
    %68 = vector.load %arg15[%c0_40, %c0_41, %c0_42] : memref<4x32x32xf32, #tpu.memory_space<vmem>>, vector<1x32x32xf32>
    %69 = vector.shape_cast %68 : vector<1x32x32xf32> to vector<32x32xf32>
    %cst_43 = arith.constant dense<0.000000e+00> : vector<16x32xf32>
    %70 = tpu.matmul %29, %69, %cst_43 {dimension_numbers = #tpu.dot_dimension_numbers<[1], [0], [0], [1], [0, 0, 1, 1], [], []>} : vector<16x32xf32>, vector<32x32xf32>, vector<16x32xf32> -> vector<16x32xf32>
    %c0_44 = arith.constant 0 : index
    %c0_45 = arith.constant 0 : index
    %c0_46 = arith.constant 0 : index
    %71 = vector.load %arg16[%c0_44, %c0_45, %c0_46] : memref<4x32x32xf32, #tpu.memory_space<vmem>>, vector<1x32x32xf32>
    %72 = vector.shape_cast %71 : vector<1x32x32xf32> to vector<32x32xf32>
    %cst_47 = arith.constant dense<0.000000e+00> : vector<16x32xf32>
    %73 = tpu.matmul %67, %72, %cst_47 {dimension_numbers = #tpu.dot_dimension_numbers<[1], [0], [0], [1], [0, 0, 1, 1], [], []>} : vector<16x32xf32>, vector<32x32xf32>, vector<16x32xf32> -> vector<16x32xf32>
    %74 = arith.addf %70, %73 : vector<16x32xf32>
    %75 = vector.extract_strided_slice %25 {offsets = [0, 32], sizes = [16, 32], strides = [1, 1]} : vector<16x160xf32> to vector<16x32xf32>
    %76 = arith.addf %74, %75 : vector<16x32xf32>
    %c0_48 = arith.constant 0 : index
    %c0_49 = arith.constant 0 : index
    %c0_50 = arith.constant 0 : index
    %77 = vector.load %arg17[%c0_48, %c0_49, %c0_50] : memref<4x1x32xf32, #tpu.memory_space<vmem>>, vector<1x1x32xf32>
    %78 = vector.shape_cast %77 : vector<1x1x32xf32> to vector<1x32xf32>
    %79 = vector.broadcast %78 : vector<1x32xf32> to vector<16x32xf32>
    %80 = arith.addf %76, %79 : vector<16x32xf32>
    %81 = arith.negf %80 : vector<16x32xf32>
    %82 = math.exp %81 : vector<16x32xf32>
    %cst_51 = arith.constant 1.000000e+00 : f32
    %83 = vector.broadcast %cst_51 : f32 to vector<16x32xf32>
    %84 = arith.addf %83, %82 : vector<16x32xf32>
    %85 = arith.divf %83, %84 : vector<16x32xf32>
    %86 = arith.mulf %80, %85 : vector<16x32xf32>
    %c0_52 = arith.constant 0 : index
    %c0_53 = arith.constant 0 : index
    %c0_54 = arith.constant 0 : index
    %87 = vector.load %arg18[%c0_52, %c0_53, %c0_54] : memref<4x32x32xf32, #tpu.memory_space<vmem>>, vector<1x32x32xf32>
    %88 = vector.shape_cast %87 : vector<1x32x32xf32> to vector<32x32xf32>
    %cst_55 = arith.constant dense<0.000000e+00> : vector<16x32xf32>
    %89 = tpu.matmul %86, %88, %cst_55 {dimension_numbers = #tpu.dot_dimension_numbers<[1], [0], [0], [1], [0, 0, 1, 1], [], []>} : vector<16x32xf32>, vector<32x32xf32>, vector<16x32xf32> -> vector<16x32xf32>
    %c0_56 = arith.constant 0 : index
    %c0_57 = arith.constant 0 : index
    %c0_58 = arith.constant 0 : index
    %90 = vector.load %arg19[%c0_56, %c0_57, %c0_58] : memref<4x1x32xf32, #tpu.memory_space<vmem>>, vector<1x1x32xf32>
    %91 = vector.shape_cast %90 : vector<1x1x32xf32> to vector<1x32xf32>
    %92 = vector.broadcast %91 : vector<1x32xf32> to vector<16x32xf32>
    %93 = arith.addf %89, %92 : vector<16x32xf32>
    %c1 = arith.constant 1 : index
    %c0_59 = arith.constant 0 : index
    %c0_60 = arith.constant 0 : index
    %94 = vector.load %arg10[%c1, %c0_59, %c0_60] : memref<4x32x64xf32, #tpu.memory_space<vmem>>, vector<1x32x64xf32>
    %95 = vector.shape_cast %94 : vector<1x32x64xf32> to vector<32x64xf32>
    %cst_61 = arith.constant dense<0.000000e+00> : vector<16x64xf32>
    %96 = tpu.matmul %93, %95, %cst_61 {dimension_numbers = #tpu.dot_dimension_numbers<[1], [0], [0], [1], [0, 0, 1, 1], [], []>} : vector<16x32xf32>, vector<32x64xf32>, vector<16x64xf32> -> vector<16x64xf32>
    %97 = vector.extract_strided_slice %96 {offsets = [0, 0], sizes = [16, 32], strides = [1, 1]} : vector<16x64xf32> to vector<16x32xf32>
    %cst_62 = arith.constant dense<0.000000e+00> : vector<112x32xf32>
    %98 = tpu.matmul %10, %97, %cst_62 {dimension_numbers = #tpu.dot_dimension_numbers<[0], [0], [1], [1], [0, 1, 1, 1], [], []>} : vector<16x112xf32>, vector<16x32xf32>, vector<112x32xf32> -> vector<112x32xf32>
    %99 = vector.extract_strided_slice %96 {offsets = [0, 32], sizes = [16, 32], strides = [1, 1]} : vector<16x64xf32> to vector<16x32xf32>
    %cst_63 = arith.constant dense<0.000000e+00> : vector<112x32xf32>
    %100 = tpu.matmul %14, %99, %cst_63 {dimension_numbers = #tpu.dot_dimension_numbers<[0], [0], [1], [1], [0, 1, 1, 1], [], []>} : vector<16x112xf32>, vector<16x32xf32>, vector<112x32xf32> -> vector<112x32xf32>
    %101 = arith.addf %98, %100 : vector<112x32xf32>
    %c1_64 = arith.constant 1 : index
    %c0_65 = arith.constant 0 : index
    %c0_66 = arith.constant 0 : index
    %102 = vector.load %arg11[%c1_64, %c0_65, %c0_66] : memref<4x1x32xf32, #tpu.memory_space<vmem>>, vector<1x1x32xf32>
    %103 = vector.shape_cast %102 : vector<1x1x32xf32> to vector<1x32xf32>
    %104 = vector.broadcast %22 : vector<112x1xf32> to vector<112x32xf32>
    %105 = vector.broadcast %103 : vector<1x32xf32> to vector<112x32xf32>
    %106 = arith.mulf %104, %105 : vector<112x32xf32>
    %107 = arith.addf %101, %106 : vector<112x32xf32>
    %c1_67 = arith.constant 1 : index
    %c0_68 = arith.constant 0 : index
    %c0_69 = arith.constant 0 : index
    %108 = vector.load %arg12[%c1_67, %c0_68, %c0_69] : memref<4x1x32xf32, #tpu.memory_space<vmem>>, vector<1x1x32xf32>
    %109 = vector.shape_cast %108 : vector<1x1x32xf32> to vector<1x32xf32>
    %110 = vector.broadcast %109 : vector<1x32xf32> to vector<112x32xf32>
    %111 = arith.addf %107, %110 : vector<112x32xf32>
    %112 = arith.negf %111 : vector<112x32xf32>
    %113 = math.exp %112 : vector<112x32xf32>
    %cst_70 = arith.constant 1.000000e+00 : f32
    %114 = vector.broadcast %cst_70 : f32 to vector<112x32xf32>
    %115 = arith.addf %114, %113 : vector<112x32xf32>
    %116 = arith.divf %114, %115 : vector<112x32xf32>
    %117 = arith.mulf %111, %116 : vector<112x32xf32>
    %c1_71 = arith.constant 1 : index
    %c0_72 = arith.constant 0 : index
    %c0_73 = arith.constant 0 : index
    %118 = vector.load %arg13[%c1_71, %c0_72, %c0_73] : memref<4x32x32xf32, #tpu.memory_space<vmem>>, vector<1x32x32xf32>
    %119 = vector.shape_cast %118 : vector<1x32x32xf32> to vector<32x32xf32>
    %cst_74 = arith.constant dense<0.000000e+00> : vector<112x32xf32>
    %120 = tpu.matmul %117, %119, %cst_74 {dimension_numbers = #tpu.dot_dimension_numbers<[1], [0], [0], [1], [0, 0, 1, 1], [], []>} : vector<112x32xf32>, vector<32x32xf32>, vector<112x32xf32> -> vector<112x32xf32>
    %c1_75 = arith.constant 1 : index
    %c0_76 = arith.constant 0 : index
    %c0_77 = arith.constant 0 : index
    %121 = vector.load %arg14[%c1_75, %c0_76, %c0_77] : memref<4x1x32xf32, #tpu.memory_space<vmem>>, vector<1x1x32xf32>
    %122 = vector.shape_cast %121 : vector<1x1x32xf32> to vector<1x32xf32>
    %123 = vector.broadcast %122 : vector<1x32xf32> to vector<112x32xf32>
    %124 = arith.addf %120, %123 : vector<112x32xf32>
    %125 = arith.negf %124 : vector<112x32xf32>
    %126 = math.exp %125 : vector<112x32xf32>
    %cst_78 = arith.constant 1.000000e+00 : f32
    %127 = vector.broadcast %cst_78 : f32 to vector<112x32xf32>
    %128 = arith.addf %127, %126 : vector<112x32xf32>
    %129 = arith.divf %127, %128 : vector<112x32xf32>
    %130 = arith.mulf %124, %129 : vector<112x32xf32>
    %cst_79 = arith.constant dense<0.000000e+00> : vector<16x32xf32>
    %131 = tpu.matmul %16, %130, %cst_79 {dimension_numbers = #tpu.dot_dimension_numbers<[1], [0], [0], [1], [0, 0, 1, 1], [], []>} : vector<16x112xf32>, vector<112x32xf32>, vector<16x32xf32> -> vector<16x32xf32>
    %c1_80 = arith.constant 1 : index
    %c0_81 = arith.constant 0 : index
    %c0_82 = arith.constant 0 : index
    %132 = vector.load %arg15[%c1_80, %c0_81, %c0_82] : memref<4x32x32xf32, #tpu.memory_space<vmem>>, vector<1x32x32xf32>
    %133 = vector.shape_cast %132 : vector<1x32x32xf32> to vector<32x32xf32>
    %cst_83 = arith.constant dense<0.000000e+00> : vector<16x32xf32>
    %134 = tpu.matmul %93, %133, %cst_83 {dimension_numbers = #tpu.dot_dimension_numbers<[1], [0], [0], [1], [0, 0, 1, 1], [], []>} : vector<16x32xf32>, vector<32x32xf32>, vector<16x32xf32> -> vector<16x32xf32>
    %c1_84 = arith.constant 1 : index
    %c0_85 = arith.constant 0 : index
    %c0_86 = arith.constant 0 : index
    %135 = vector.load %arg16[%c1_84, %c0_85, %c0_86] : memref<4x32x32xf32, #tpu.memory_space<vmem>>, vector<1x32x32xf32>
    %136 = vector.shape_cast %135 : vector<1x32x32xf32> to vector<32x32xf32>
    %cst_87 = arith.constant dense<0.000000e+00> : vector<16x32xf32>
    %137 = tpu.matmul %131, %136, %cst_87 {dimension_numbers = #tpu.dot_dimension_numbers<[1], [0], [0], [1], [0, 0, 1, 1], [], []>} : vector<16x32xf32>, vector<32x32xf32>, vector<16x32xf32> -> vector<16x32xf32>
    %138 = arith.addf %134, %137 : vector<16x32xf32>
    %139 = vector.extract_strided_slice %25 {offsets = [0, 64], sizes = [16, 32], strides = [1, 1]} : vector<16x160xf32> to vector<16x32xf32>
    %140 = arith.addf %138, %139 : vector<16x32xf32>
    %c1_88 = arith.constant 1 : index
    %c0_89 = arith.constant 0 : index
    %c0_90 = arith.constant 0 : index
    %141 = vector.load %arg17[%c1_88, %c0_89, %c0_90] : memref<4x1x32xf32, #tpu.memory_space<vmem>>, vector<1x1x32xf32>
    %142 = vector.shape_cast %141 : vector<1x1x32xf32> to vector<1x32xf32>
    %143 = vector.broadcast %142 : vector<1x32xf32> to vector<16x32xf32>
    %144 = arith.addf %140, %143 : vector<16x32xf32>
    %145 = arith.negf %144 : vector<16x32xf32>
    %146 = math.exp %145 : vector<16x32xf32>
    %cst_91 = arith.constant 1.000000e+00 : f32
    %147 = vector.broadcast %cst_91 : f32 to vector<16x32xf32>
    %148 = arith.addf %147, %146 : vector<16x32xf32>
    %149 = arith.divf %147, %148 : vector<16x32xf32>
    %150 = arith.mulf %144, %149 : vector<16x32xf32>
    %c1_92 = arith.constant 1 : index
    %c0_93 = arith.constant 0 : index
    %c0_94 = arith.constant 0 : index
    %151 = vector.load %arg18[%c1_92, %c0_93, %c0_94] : memref<4x32x32xf32, #tpu.memory_space<vmem>>, vector<1x32x32xf32>
    %152 = vector.shape_cast %151 : vector<1x32x32xf32> to vector<32x32xf32>
    %cst_95 = arith.constant dense<0.000000e+00> : vector<16x32xf32>
    %153 = tpu.matmul %150, %152, %cst_95 {dimension_numbers = #tpu.dot_dimension_numbers<[1], [0], [0], [1], [0, 0, 1, 1], [], []>} : vector<16x32xf32>, vector<32x32xf32>, vector<16x32xf32> -> vector<16x32xf32>
    %c1_96 = arith.constant 1 : index
    %c0_97 = arith.constant 0 : index
    %c0_98 = arith.constant 0 : index
    %154 = vector.load %arg19[%c1_96, %c0_97, %c0_98] : memref<4x1x32xf32, #tpu.memory_space<vmem>>, vector<1x1x32xf32>
    %155 = vector.shape_cast %154 : vector<1x1x32xf32> to vector<1x32xf32>
    %156 = vector.broadcast %155 : vector<1x32xf32> to vector<16x32xf32>
    %157 = arith.addf %153, %156 : vector<16x32xf32>
    %c2 = arith.constant 2 : index
    %c0_99 = arith.constant 0 : index
    %c0_100 = arith.constant 0 : index
    %158 = vector.load %arg10[%c2, %c0_99, %c0_100] : memref<4x32x64xf32, #tpu.memory_space<vmem>>, vector<1x32x64xf32>
    %159 = vector.shape_cast %158 : vector<1x32x64xf32> to vector<32x64xf32>
    %cst_101 = arith.constant dense<0.000000e+00> : vector<16x64xf32>
    %160 = tpu.matmul %157, %159, %cst_101 {dimension_numbers = #tpu.dot_dimension_numbers<[1], [0], [0], [1], [0, 0, 1, 1], [], []>} : vector<16x32xf32>, vector<32x64xf32>, vector<16x64xf32> -> vector<16x64xf32>
    %161 = vector.extract_strided_slice %160 {offsets = [0, 0], sizes = [16, 32], strides = [1, 1]} : vector<16x64xf32> to vector<16x32xf32>
    %cst_102 = arith.constant dense<0.000000e+00> : vector<112x32xf32>
    %162 = tpu.matmul %10, %161, %cst_102 {dimension_numbers = #tpu.dot_dimension_numbers<[0], [0], [1], [1], [0, 1, 1, 1], [], []>} : vector<16x112xf32>, vector<16x32xf32>, vector<112x32xf32> -> vector<112x32xf32>
    %163 = vector.extract_strided_slice %160 {offsets = [0, 32], sizes = [16, 32], strides = [1, 1]} : vector<16x64xf32> to vector<16x32xf32>
    %cst_103 = arith.constant dense<0.000000e+00> : vector<112x32xf32>
    %164 = tpu.matmul %14, %163, %cst_103 {dimension_numbers = #tpu.dot_dimension_numbers<[0], [0], [1], [1], [0, 1, 1, 1], [], []>} : vector<16x112xf32>, vector<16x32xf32>, vector<112x32xf32> -> vector<112x32xf32>
    %165 = arith.addf %162, %164 : vector<112x32xf32>
    %c2_104 = arith.constant 2 : index
    %c0_105 = arith.constant 0 : index
    %c0_106 = arith.constant 0 : index
    %166 = vector.load %arg11[%c2_104, %c0_105, %c0_106] : memref<4x1x32xf32, #tpu.memory_space<vmem>>, vector<1x1x32xf32>
    %167 = vector.shape_cast %166 : vector<1x1x32xf32> to vector<1x32xf32>
    %168 = vector.broadcast %22 : vector<112x1xf32> to vector<112x32xf32>
    %169 = vector.broadcast %167 : vector<1x32xf32> to vector<112x32xf32>
    %170 = arith.mulf %168, %169 : vector<112x32xf32>
    %171 = arith.addf %165, %170 : vector<112x32xf32>
    %c2_107 = arith.constant 2 : index
    %c0_108 = arith.constant 0 : index
    %c0_109 = arith.constant 0 : index
    %172 = vector.load %arg12[%c2_107, %c0_108, %c0_109] : memref<4x1x32xf32, #tpu.memory_space<vmem>>, vector<1x1x32xf32>
    %173 = vector.shape_cast %172 : vector<1x1x32xf32> to vector<1x32xf32>
    %174 = vector.broadcast %173 : vector<1x32xf32> to vector<112x32xf32>
    %175 = arith.addf %171, %174 : vector<112x32xf32>
    %176 = arith.negf %175 : vector<112x32xf32>
    %177 = math.exp %176 : vector<112x32xf32>
    %cst_110 = arith.constant 1.000000e+00 : f32
    %178 = vector.broadcast %cst_110 : f32 to vector<112x32xf32>
    %179 = arith.addf %178, %177 : vector<112x32xf32>
    %180 = arith.divf %178, %179 : vector<112x32xf32>
    %181 = arith.mulf %175, %180 : vector<112x32xf32>
    %c2_111 = arith.constant 2 : index
    %c0_112 = arith.constant 0 : index
    %c0_113 = arith.constant 0 : index
    %182 = vector.load %arg13[%c2_111, %c0_112, %c0_113] : memref<4x32x32xf32, #tpu.memory_space<vmem>>, vector<1x32x32xf32>
    %183 = vector.shape_cast %182 : vector<1x32x32xf32> to vector<32x32xf32>
    %cst_114 = arith.constant dense<0.000000e+00> : vector<112x32xf32>
    %184 = tpu.matmul %181, %183, %cst_114 {dimension_numbers = #tpu.dot_dimension_numbers<[1], [0], [0], [1], [0, 0, 1, 1], [], []>} : vector<112x32xf32>, vector<32x32xf32>, vector<112x32xf32> -> vector<112x32xf32>
    %c2_115 = arith.constant 2 : index
    %c0_116 = arith.constant 0 : index
    %c0_117 = arith.constant 0 : index
    %185 = vector.load %arg14[%c2_115, %c0_116, %c0_117] : memref<4x1x32xf32, #tpu.memory_space<vmem>>, vector<1x1x32xf32>
    %186 = vector.shape_cast %185 : vector<1x1x32xf32> to vector<1x32xf32>
    %187 = vector.broadcast %186 : vector<1x32xf32> to vector<112x32xf32>
    %188 = arith.addf %184, %187 : vector<112x32xf32>
    %189 = arith.negf %188 : vector<112x32xf32>
    %190 = math.exp %189 : vector<112x32xf32>
    %cst_118 = arith.constant 1.000000e+00 : f32
    %191 = vector.broadcast %cst_118 : f32 to vector<112x32xf32>
    %192 = arith.addf %191, %190 : vector<112x32xf32>
    %193 = arith.divf %191, %192 : vector<112x32xf32>
    %194 = arith.mulf %188, %193 : vector<112x32xf32>
    %cst_119 = arith.constant dense<0.000000e+00> : vector<16x32xf32>
    %195 = tpu.matmul %16, %194, %cst_119 {dimension_numbers = #tpu.dot_dimension_numbers<[1], [0], [0], [1], [0, 0, 1, 1], [], []>} : vector<16x112xf32>, vector<112x32xf32>, vector<16x32xf32> -> vector<16x32xf32>
    %c2_120 = arith.constant 2 : index
    %c0_121 = arith.constant 0 : index
    %c0_122 = arith.constant 0 : index
    %196 = vector.load %arg15[%c2_120, %c0_121, %c0_122] : memref<4x32x32xf32, #tpu.memory_space<vmem>>, vector<1x32x32xf32>
    %197 = vector.shape_cast %196 : vector<1x32x32xf32> to vector<32x32xf32>
    %cst_123 = arith.constant dense<0.000000e+00> : vector<16x32xf32>
    %198 = tpu.matmul %157, %197, %cst_123 {dimension_numbers = #tpu.dot_dimension_numbers<[1], [0], [0], [1], [0, 0, 1, 1], [], []>} : vector<16x32xf32>, vector<32x32xf32>, vector<16x32xf32> -> vector<16x32xf32>
    %c2_124 = arith.constant 2 : index
    %c0_125 = arith.constant 0 : index
    %c0_126 = arith.constant 0 : index
    %199 = vector.load %arg16[%c2_124, %c0_125, %c0_126] : memref<4x32x32xf32, #tpu.memory_space<vmem>>, vector<1x32x32xf32>
    %200 = vector.shape_cast %199 : vector<1x32x32xf32> to vector<32x32xf32>
    %cst_127 = arith.constant dense<0.000000e+00> : vector<16x32xf32>
    %201 = tpu.matmul %195, %200, %cst_127 {dimension_numbers = #tpu.dot_dimension_numbers<[1], [0], [0], [1], [0, 0, 1, 1], [], []>} : vector<16x32xf32>, vector<32x32xf32>, vector<16x32xf32> -> vector<16x32xf32>
    %202 = arith.addf %198, %201 : vector<16x32xf32>
    %203 = vector.extract_strided_slice %25 {offsets = [0, 96], sizes = [16, 32], strides = [1, 1]} : vector<16x160xf32> to vector<16x32xf32>
    %204 = arith.addf %202, %203 : vector<16x32xf32>
    %c2_128 = arith.constant 2 : index
    %c0_129 = arith.constant 0 : index
    %c0_130 = arith.constant 0 : index
    %205 = vector.load %arg17[%c2_128, %c0_129, %c0_130] : memref<4x1x32xf32, #tpu.memory_space<vmem>>, vector<1x1x32xf32>
    %206 = vector.shape_cast %205 : vector<1x1x32xf32> to vector<1x32xf32>
    %207 = vector.broadcast %206 : vector<1x32xf32> to vector<16x32xf32>
    %208 = arith.addf %204, %207 : vector<16x32xf32>
    %209 = arith.negf %208 : vector<16x32xf32>
    %210 = math.exp %209 : vector<16x32xf32>
    %cst_131 = arith.constant 1.000000e+00 : f32
    %211 = vector.broadcast %cst_131 : f32 to vector<16x32xf32>
    %212 = arith.addf %211, %210 : vector<16x32xf32>
    %213 = arith.divf %211, %212 : vector<16x32xf32>
    %214 = arith.mulf %208, %213 : vector<16x32xf32>
    %c2_132 = arith.constant 2 : index
    %c0_133 = arith.constant 0 : index
    %c0_134 = arith.constant 0 : index
    %215 = vector.load %arg18[%c2_132, %c0_133, %c0_134] : memref<4x32x32xf32, #tpu.memory_space<vmem>>, vector<1x32x32xf32>
    %216 = vector.shape_cast %215 : vector<1x32x32xf32> to vector<32x32xf32>
    %cst_135 = arith.constant dense<0.000000e+00> : vector<16x32xf32>
    %217 = tpu.matmul %214, %216, %cst_135 {dimension_numbers = #tpu.dot_dimension_numbers<[1], [0], [0], [1], [0, 0, 1, 1], [], []>} : vector<16x32xf32>, vector<32x32xf32>, vector<16x32xf32> -> vector<16x32xf32>
    %c2_136 = arith.constant 2 : index
    %c0_137 = arith.constant 0 : index
    %c0_138 = arith.constant 0 : index
    %218 = vector.load %arg19[%c2_136, %c0_137, %c0_138] : memref<4x1x32xf32, #tpu.memory_space<vmem>>, vector<1x1x32xf32>
    %219 = vector.shape_cast %218 : vector<1x1x32xf32> to vector<1x32xf32>
    %220 = vector.broadcast %219 : vector<1x32xf32> to vector<16x32xf32>
    %221 = arith.addf %217, %220 : vector<16x32xf32>
    %c3 = arith.constant 3 : index
    %c0_139 = arith.constant 0 : index
    %c0_140 = arith.constant 0 : index
    %222 = vector.load %arg10[%c3, %c0_139, %c0_140] : memref<4x32x64xf32, #tpu.memory_space<vmem>>, vector<1x32x64xf32>
    %223 = vector.shape_cast %222 : vector<1x32x64xf32> to vector<32x64xf32>
    %cst_141 = arith.constant dense<0.000000e+00> : vector<16x64xf32>
    %224 = tpu.matmul %221, %223, %cst_141 {dimension_numbers = #tpu.dot_dimension_numbers<[1], [0], [0], [1], [0, 0, 1, 1], [], []>} : vector<16x32xf32>, vector<32x64xf32>, vector<16x64xf32> -> vector<16x64xf32>
    %225 = vector.extract_strided_slice %224 {offsets = [0, 0], sizes = [16, 32], strides = [1, 1]} : vector<16x64xf32> to vector<16x32xf32>
    %cst_142 = arith.constant dense<0.000000e+00> : vector<112x32xf32>
    %226 = tpu.matmul %10, %225, %cst_142 {dimension_numbers = #tpu.dot_dimension_numbers<[0], [0], [1], [1], [0, 1, 1, 1], [], []>} : vector<16x112xf32>, vector<16x32xf32>, vector<112x32xf32> -> vector<112x32xf32>
    %227 = vector.extract_strided_slice %224 {offsets = [0, 32], sizes = [16, 32], strides = [1, 1]} : vector<16x64xf32> to vector<16x32xf32>
    %cst_143 = arith.constant dense<0.000000e+00> : vector<112x32xf32>
    %228 = tpu.matmul %14, %227, %cst_143 {dimension_numbers = #tpu.dot_dimension_numbers<[0], [0], [1], [1], [0, 1, 1, 1], [], []>} : vector<16x112xf32>, vector<16x32xf32>, vector<112x32xf32> -> vector<112x32xf32>
    %229 = arith.addf %226, %228 : vector<112x32xf32>
    %c3_144 = arith.constant 3 : index
    %c0_145 = arith.constant 0 : index
    %c0_146 = arith.constant 0 : index
    %230 = vector.load %arg11[%c3_144, %c0_145, %c0_146] : memref<4x1x32xf32, #tpu.memory_space<vmem>>, vector<1x1x32xf32>
    %231 = vector.shape_cast %230 : vector<1x1x32xf32> to vector<1x32xf32>
    %232 = vector.broadcast %22 : vector<112x1xf32> to vector<112x32xf32>
    %233 = vector.broadcast %231 : vector<1x32xf32> to vector<112x32xf32>
    %234 = arith.mulf %232, %233 : vector<112x32xf32>
    %235 = arith.addf %229, %234 : vector<112x32xf32>
    %c3_147 = arith.constant 3 : index
    %c0_148 = arith.constant 0 : index
    %c0_149 = arith.constant 0 : index
    %236 = vector.load %arg12[%c3_147, %c0_148, %c0_149] : memref<4x1x32xf32, #tpu.memory_space<vmem>>, vector<1x1x32xf32>
    %237 = vector.shape_cast %236 : vector<1x1x32xf32> to vector<1x32xf32>
    %238 = vector.broadcast %237 : vector<1x32xf32> to vector<112x32xf32>
    %239 = arith.addf %235, %238 : vector<112x32xf32>
    %240 = arith.negf %239 : vector<112x32xf32>
    %241 = math.exp %240 : vector<112x32xf32>
    %cst_150 = arith.constant 1.000000e+00 : f32
    %242 = vector.broadcast %cst_150 : f32 to vector<112x32xf32>
    %243 = arith.addf %242, %241 : vector<112x32xf32>
    %244 = arith.divf %242, %243 : vector<112x32xf32>
    %245 = arith.mulf %239, %244 : vector<112x32xf32>
    %c3_151 = arith.constant 3 : index
    %c0_152 = arith.constant 0 : index
    %c0_153 = arith.constant 0 : index
    %246 = vector.load %arg13[%c3_151, %c0_152, %c0_153] : memref<4x32x32xf32, #tpu.memory_space<vmem>>, vector<1x32x32xf32>
    %247 = vector.shape_cast %246 : vector<1x32x32xf32> to vector<32x32xf32>
    %cst_154 = arith.constant dense<0.000000e+00> : vector<112x32xf32>
    %248 = tpu.matmul %245, %247, %cst_154 {dimension_numbers = #tpu.dot_dimension_numbers<[1], [0], [0], [1], [0, 0, 1, 1], [], []>} : vector<112x32xf32>, vector<32x32xf32>, vector<112x32xf32> -> vector<112x32xf32>
    %c3_155 = arith.constant 3 : index
    %c0_156 = arith.constant 0 : index
    %c0_157 = arith.constant 0 : index
    %249 = vector.load %arg14[%c3_155, %c0_156, %c0_157] : memref<4x1x32xf32, #tpu.memory_space<vmem>>, vector<1x1x32xf32>
    %250 = vector.shape_cast %249 : vector<1x1x32xf32> to vector<1x32xf32>
    %251 = vector.broadcast %250 : vector<1x32xf32> to vector<112x32xf32>
    %252 = arith.addf %248, %251 : vector<112x32xf32>
    %253 = arith.negf %252 : vector<112x32xf32>
    %254 = math.exp %253 : vector<112x32xf32>
    %cst_158 = arith.constant 1.000000e+00 : f32
    %255 = vector.broadcast %cst_158 : f32 to vector<112x32xf32>
    %256 = arith.addf %255, %254 : vector<112x32xf32>
    %257 = arith.divf %255, %256 : vector<112x32xf32>
    %258 = arith.mulf %252, %257 : vector<112x32xf32>
    %cst_159 = arith.constant dense<0.000000e+00> : vector<16x32xf32>
    %259 = tpu.matmul %16, %258, %cst_159 {dimension_numbers = #tpu.dot_dimension_numbers<[1], [0], [0], [1], [0, 0, 1, 1], [], []>} : vector<16x112xf32>, vector<112x32xf32>, vector<16x32xf32> -> vector<16x32xf32>
    %c3_160 = arith.constant 3 : index
    %c0_161 = arith.constant 0 : index
    %c0_162 = arith.constant 0 : index
    %260 = vector.load %arg15[%c3_160, %c0_161, %c0_162] : memref<4x32x32xf32, #tpu.memory_space<vmem>>, vector<1x32x32xf32>
    %261 = vector.shape_cast %260 : vector<1x32x32xf32> to vector<32x32xf32>
    %cst_163 = arith.constant dense<0.000000e+00> : vector<16x32xf32>
    %262 = tpu.matmul %221, %261, %cst_163 {dimension_numbers = #tpu.dot_dimension_numbers<[1], [0], [0], [1], [0, 0, 1, 1], [], []>} : vector<16x32xf32>, vector<32x32xf32>, vector<16x32xf32> -> vector<16x32xf32>
    %c3_164 = arith.constant 3 : index
    %c0_165 = arith.constant 0 : index
    %c0_166 = arith.constant 0 : index
    %263 = vector.load %arg16[%c3_164, %c0_165, %c0_166] : memref<4x32x32xf32, #tpu.memory_space<vmem>>, vector<1x32x32xf32>
    %264 = vector.shape_cast %263 : vector<1x32x32xf32> to vector<32x32xf32>
    %cst_167 = arith.constant dense<0.000000e+00> : vector<16x32xf32>
    %265 = tpu.matmul %259, %264, %cst_167 {dimension_numbers = #tpu.dot_dimension_numbers<[1], [0], [0], [1], [0, 0, 1, 1], [], []>} : vector<16x32xf32>, vector<32x32xf32>, vector<16x32xf32> -> vector<16x32xf32>
    %266 = arith.addf %262, %265 : vector<16x32xf32>
    %267 = vector.extract_strided_slice %25 {offsets = [0, 128], sizes = [16, 32], strides = [1, 1]} : vector<16x160xf32> to vector<16x32xf32>
    %268 = arith.addf %266, %267 : vector<16x32xf32>
    %c3_168 = arith.constant 3 : index
    %c0_169 = arith.constant 0 : index
    %c0_170 = arith.constant 0 : index
    %269 = vector.load %arg17[%c3_168, %c0_169, %c0_170] : memref<4x1x32xf32, #tpu.memory_space<vmem>>, vector<1x1x32xf32>
    %270 = vector.shape_cast %269 : vector<1x1x32xf32> to vector<1x32xf32>
    %271 = vector.broadcast %270 : vector<1x32xf32> to vector<16x32xf32>
    %272 = arith.addf %268, %271 : vector<16x32xf32>
    %273 = arith.negf %272 : vector<16x32xf32>
    %274 = math.exp %273 : vector<16x32xf32>
    %cst_171 = arith.constant 1.000000e+00 : f32
    %275 = vector.broadcast %cst_171 : f32 to vector<16x32xf32>
    %276 = arith.addf %275, %274 : vector<16x32xf32>
    %277 = arith.divf %275, %276 : vector<16x32xf32>
    %278 = arith.mulf %272, %277 : vector<16x32xf32>
    %c3_172 = arith.constant 3 : index
    %c0_173 = arith.constant 0 : index
    %c0_174 = arith.constant 0 : index
    %279 = vector.load %arg18[%c3_172, %c0_173, %c0_174] : memref<4x32x32xf32, #tpu.memory_space<vmem>>, vector<1x32x32xf32>
    %280 = vector.shape_cast %279 : vector<1x32x32xf32> to vector<32x32xf32>
    %cst_175 = arith.constant dense<0.000000e+00> : vector<16x32xf32>
    %281 = tpu.matmul %278, %280, %cst_175 {dimension_numbers = #tpu.dot_dimension_numbers<[1], [0], [0], [1], [0, 0, 1, 1], [], []>} : vector<16x32xf32>, vector<32x32xf32>, vector<16x32xf32> -> vector<16x32xf32>
    %c3_176 = arith.constant 3 : index
    %c0_177 = arith.constant 0 : index
    %c0_178 = arith.constant 0 : index
    %282 = vector.load %arg19[%c3_176, %c0_177, %c0_178] : memref<4x1x32xf32, #tpu.memory_space<vmem>>, vector<1x1x32xf32>
    %283 = vector.shape_cast %282 : vector<1x1x32xf32> to vector<1x32xf32>
    %284 = vector.broadcast %283 : vector<1x32xf32> to vector<16x32xf32>
    %285 = arith.addf %281, %284 : vector<16x32xf32>
    %c0_179 = arith.constant 0 : index
    %c0_180 = arith.constant 0 : index
    %286 = vector.load %arg20[%c0_179, %c0_180] : memref<32x32xf32, #tpu.memory_space<vmem>>, vector<32x32xf32>
    %cst_181 = arith.constant dense<0.000000e+00> : vector<16x32xf32>
    %287 = tpu.matmul %285, %286, %cst_181 {dimension_numbers = #tpu.dot_dimension_numbers<[1], [0], [0], [1], [0, 0, 1, 1], [], []>} : vector<16x32xf32>, vector<32x32xf32>, vector<16x32xf32> -> vector<16x32xf32>
    %c0_182 = arith.constant 0 : index
    %c0_183 = arith.constant 0 : index
    %288 = vector.load %arg21[%c0_182, %c0_183] : memref<1x32xf32, #tpu.memory_space<vmem>>, vector<1x32xf32>
    %289 = vector.broadcast %288 : vector<1x32xf32> to vector<16x32xf32>
    %290 = arith.addf %287, %289 : vector<16x32xf32>
    %291 = arith.negf %290 : vector<16x32xf32>
    %292 = math.exp %291 : vector<16x32xf32>
    %cst_184 = arith.constant 1.000000e+00 : f32
    %293 = vector.broadcast %cst_184 : f32 to vector<16x32xf32>
    %294 = arith.addf %293, %292 : vector<16x32xf32>
    %295 = arith.divf %293, %294 : vector<16x32xf32>
    %296 = arith.mulf %290, %295 : vector<16x32xf32>
    %c0_185 = arith.constant 0 : index
    %c0_186 = arith.constant 0 : index
    %297 = vector.load %arg22[%c0_185, %c0_186] : memref<32x32xf32, #tpu.memory_space<vmem>>, vector<32x32xf32>
    %cst_187 = arith.constant dense<0.000000e+00> : vector<16x32xf32>
    %298 = tpu.matmul %296, %297, %cst_187 {dimension_numbers = #tpu.dot_dimension_numbers<[1], [0], [0], [1], [0, 0, 1, 1], [], []>} : vector<16x32xf32>, vector<32x32xf32>, vector<16x32xf32> -> vector<16x32xf32>
    %c0_188 = arith.constant 0 : index
    %c0_189 = arith.constant 0 : index
    %299 = vector.load %arg23[%c0_188, %c0_189] : memref<1x32xf32, #tpu.memory_space<vmem>>, vector<1x32xf32>
    %300 = vector.broadcast %299 : vector<1x32xf32> to vector<16x32xf32>
    %301 = arith.addf %298, %300 : vector<16x32xf32>
    %c0_190 = arith.constant 0 : index
    %c0_191 = arith.constant 0 : index
    %302 = vector.load %arg6[%c0_190, %c0_191] : memref<16x1xf32, #tpu.memory_space<vmem>>, vector<16x1xf32>
    %303 = vector.broadcast %302 : vector<16x1xf32> to vector<16x32xf32>
    %304 = arith.mulf %301, %303 : vector<16x32xf32>
    %c0_192 = arith.constant 0 : index
    %c0_193 = arith.constant 0 : index
    %305 = vector.load %arg24[%c0_192, %c0_193] : memref<32x32xf32, #tpu.memory_space<vmem>>, vector<32x32xf32>
    %cst_194 = arith.constant dense<0.000000e+00> : vector<16x32xf32>
    %306 = tpu.matmul %304, %305, %cst_194 {dimension_numbers = #tpu.dot_dimension_numbers<[1], [0], [0], [1], [0, 0, 1, 1], [], []>} : vector<16x32xf32>, vector<32x32xf32>, vector<16x32xf32> -> vector<16x32xf32>
    %c0_195 = arith.constant 0 : index
    %c0_196 = arith.constant 0 : index
    %307 = vector.load %arg25[%c0_195, %c0_196] : memref<1x32xf32, #tpu.memory_space<vmem>>, vector<1x32xf32>
    %308 = vector.broadcast %307 : vector<1x32xf32> to vector<16x32xf32>
    %309 = arith.addf %306, %308 : vector<16x32xf32>
    %310 = arith.negf %309 : vector<16x32xf32>
    %311 = math.exp %310 : vector<16x32xf32>
    %cst_197 = arith.constant 1.000000e+00 : f32
    %312 = vector.broadcast %cst_197 : f32 to vector<16x32xf32>
    %313 = arith.addf %312, %311 : vector<16x32xf32>
    %314 = arith.divf %312, %313 : vector<16x32xf32>
    %315 = arith.mulf %309, %314 : vector<16x32xf32>
    %c0_198 = arith.constant 0 : index
    %c0_199 = arith.constant 0 : index
    %c0_200 = arith.constant 0 : index
    %316 = vector.load %arg7[%c0_198, %c0_199, %c0_200] : memref<1x1x16xf32, #tpu.memory_space<vmem>>, vector<1x1x16xf32>
    %317 = vector.shape_cast %316 : vector<1x1x16xf32> to vector<1x16xf32>
    %c0_201 = arith.constant 0 : index
    %c0_202 = arith.constant 0 : index
    %318 = vector.load %arg26[%c0_201, %c0_202] : memref<1x32xf32, #tpu.memory_space<vmem>>, vector<1x32xf32>
    %cst_203 = arith.constant dense<0.000000e+00> : vector<1x16xf32>
    %319 = tpu.matmul %318, %315, %cst_203 {dimension_numbers = #tpu.dot_dimension_numbers<[1], [1], [0], [0], [0, 0, 1, 0], [], []>} : vector<1x32xf32>, vector<16x32xf32>, vector<1x16xf32> -> vector<1x16xf32>
    %c0_204 = arith.constant 0 : index
    %c0_205 = arith.constant 0 : index
    %320 = vector.load %arg27[%c0_204, %c0_205] : memref<1x1xf32, #tpu.memory_space<vmem>>, vector<1x1xf32>
    %321 = vector.broadcast %320 : vector<1x1xf32> to vector<1x16xf32>
    %322 = arith.addf %319, %321 : vector<1x16xf32>
    %323 = arith.mulf %322, %317 : vector<1x16xf32>
    %c0_206 = arith.constant 0 : index
    %c0_207 = arith.constant 0 : index
    %c0_208 = arith.constant 0 : index
    %324 = vector.load %arg28[%c0_206, %c0_207, %c0_208] : memref<1x1x16xf32, #tpu.memory_space<vmem>>, vector<1x1x16xf32>
    %325 = vector.shape_cast %324 : vector<1x1x16xf32> to vector<1x16xf32>
    %326 = vector.shape_cast %323 : vector<1x16xf32> to vector<1x1x16xf32>
    tpu.vector_store %arg28[%c0_206, %c0_207, %c0_208], %326 {strides = array<i32>} : memref<1x1x16xf32, #tpu.memory_space<vmem>>, vector<1x1x16xf32>,
    %327 = tpu.iota {dimensions = array<i32: 0>} : vector<2x16xi32>
    %328 = tpu.iota {dimensions = array<i32: 1>} : vector<2x16xi32>
    %c8_i32 = arith.constant 8 : i32
    %329 = vector.broadcast %c8_i32 : i32 to vector<2x16xi32>
    %330 = arith.muli %327, %329 : vector<2x16xi32>
    %331 = arith.cmpi sge, %328, %330 : vector<2x16xi32>
    %c1_i32 = arith.constant 1 : i32
    %332 = vector.broadcast %c1_i32 : i32 to vector<2x16xi32>
    %333 = arith.addi %327, %332 : vector<2x16xi32>
    %c8_i32_209 = arith.constant 8 : i32
    %334 = vector.broadcast %c8_i32_209 : i32 to vector<2x16xi32>
    %335 = arith.muli %333, %334 : vector<2x16xi32>
    %336 = arith.cmpi slt, %328, %335 : vector<2x16xi32>
    %337 = arith.andi %331, %336 : vector<2x16xi1>
    %338 = arith.extui %337 : vector<2x16xi1> to vector<2x16xi32>
    %339 = arith.sitofp %338 : vector<2x16xi32> to vector<2x16xf32>
    %cst_210 = arith.constant dense<0.000000e+00> : vector<1x2xf32>
    %340 = tpu.matmul %323, %339, %cst_210 {dimension_numbers = #tpu.dot_dimension_numbers<[1], [1], [0], [0], [0, 0, 1, 0], [], []>} : vector<1x16xf32>, vector<2x16xf32>, vector<1x2xf32> -> vector<1x2xf32>
    %c0_211 = arith.constant 0 : index
    %c0_212 = arith.constant 0 : index
    %c0_213 = arith.constant 0 : index
    %341 = vector.load %arg29[%c0_211, %c0_212, %c0_213] : memref<1x1x2xf32, #tpu.memory_space<vmem>>, vector<1x1x2xf32>
    %342 = vector.shape_cast %341 : vector<1x1x2xf32> to vector<1x2xf32>
    %343 = vector.shape_cast %340 : vector<1x2xf32> to vector<1x1x2xf32>
    tpu.vector_store %arg29[%c0_211, %c0_212, %c0_213], %343 {strides = array<i32>} : memref<1x1x2xf32, #tpu.memory_space<vmem>>, vector<1x1x2xf32>,
    return
  }
  func.func @transform_0(%arg0: i32) -> (i32, i32, i32) {
    %c0_i32 = arith.constant 0 : i32
    %c0_i32_0 = arith.constant 0 : i32
    %c0_i32_1 = arith.constant 0 : i32
    return %arg0, %c0_i32, %c0_i32_0 : i32, i32, i32
  }
  func.func @transform_1(%arg0: i32) -> (i32, i32, i32) {
    %c0_i32 = arith.constant 0 : i32
    %c0_i32_0 = arith.constant 0 : i32
    %c0_i32_1 = arith.constant 0 : i32
    return %arg0, %c0_i32, %c0_i32_0 : i32, i32, i32
  }
  func.func @transform_2(%arg0: i32) -> (i32, i32, i32) {
    %c0_i32 = arith.constant 0 : i32
    %c0_i32_0 = arith.constant 0 : i32
    %c0_i32_1 = arith.constant 0 : i32
    return %arg0, %c0_i32, %c0_i32_0 : i32, i32, i32
  }
  func.func @transform_3(%arg0: i32) -> (i32, i32) {
    %c0_i32 = arith.constant 0 : i32
    %c0_i32_0 = arith.constant 0 : i32
    return %arg0, %c0_i32 : i32, i32
  }
  func.func @transform_4(%arg0: i32) -> (i32, i32) {
    %c0_i32 = arith.constant 0 : i32
    %c0_i32_0 = arith.constant 0 : i32
    return %arg0, %c0_i32 : i32, i32
  }
  func.func @transform_5(%arg0: i32) -> (i32, i32) {
    %c0_i32 = arith.constant 0 : i32
    %c0_i32_0 = arith.constant 0 : i32
    return %arg0, %c0_i32 : i32, i32
  }
  func.func @transform_6(%arg0: i32) -> (i32, i32, i32) {
    %c0_i32 = arith.constant 0 : i32
    %c0_i32_0 = arith.constant 0 : i32
    %c0_i32_1 = arith.constant 0 : i32
    return %arg0, %c0_i32, %c0_i32_0 : i32, i32, i32
  }
  func.func @transform_7(%arg0: i32) -> (i32, i32) {
    %c0_i32 = arith.constant 0 : i32
    %c0_i32_0 = arith.constant 0 : i32
    %c0_i32_1 = arith.constant 0 : i32
    return %c0_i32, %c0_i32_0 : i32, i32
  }
  func.func @transform_8(%arg0: i32) -> (i32, i32) {
    %c0_i32 = arith.constant 0 : i32
    %c0_i32_0 = arith.constant 0 : i32
    %c0_i32_1 = arith.constant 0 : i32
    return %c0_i32, %c0_i32_0 : i32, i32
  }
  func.func @transform_9(%arg0: i32) -> (i32, i32, i32) {
    %c0_i32 = arith.constant 0 : i32
    %c0_i32_0 = arith.constant 0 : i32
    %c0_i32_1 = arith.constant 0 : i32
    %c0_i32_2 = arith.constant 0 : i32
    return %c0_i32, %c0_i32_0, %c0_i32_1 : i32, i32, i32
  }
  func.func @transform_10(%arg0: i32) -> (i32, i32, i32) {
    %c0_i32 = arith.constant 0 : i32
    %c0_i32_0 = arith.constant 0 : i32
    %c0_i32_1 = arith.constant 0 : i32
    %c0_i32_2 = arith.constant 0 : i32
    return %c0_i32, %c0_i32_0, %c0_i32_1 : i32, i32, i32
  }
  func.func @transform_11(%arg0: i32) -> (i32, i32, i32) {
    %c0_i32 = arith.constant 0 : i32
    %c0_i32_0 = arith.constant 0 : i32
    %c0_i32_1 = arith.constant 0 : i32
    %c0_i32_2 = arith.constant 0 : i32
    return %c0_i32, %c0_i32_0, %c0_i32_1 : i32, i32, i32
  }
  func.func @transform_12(%arg0: i32) -> (i32, i32, i32) {
    %c0_i32 = arith.constant 0 : i32
    %c0_i32_0 = arith.constant 0 : i32
    %c0_i32_1 = arith.constant 0 : i32
    %c0_i32_2 = arith.constant 0 : i32
    return %c0_i32, %c0_i32_0, %c0_i32_1 : i32, i32, i32
  }
  func.func @transform_13(%arg0: i32) -> (i32, i32, i32) {
    %c0_i32 = arith.constant 0 : i32
    %c0_i32_0 = arith.constant 0 : i32
    %c0_i32_1 = arith.constant 0 : i32
    %c0_i32_2 = arith.constant 0 : i32
    return %c0_i32, %c0_i32_0, %c0_i32_1 : i32, i32, i32
  }
  func.func @transform_14(%arg0: i32) -> (i32, i32, i32) {
    %c0_i32 = arith.constant 0 : i32
    %c0_i32_0 = arith.constant 0 : i32
    %c0_i32_1 = arith.constant 0 : i32
    %c0_i32_2 = arith.constant 0 : i32
    return %c0_i32, %c0_i32_0, %c0_i32_1 : i32, i32, i32
  }
  func.func @transform_15(%arg0: i32) -> (i32, i32, i32) {
    %c0_i32 = arith.constant 0 : i32
    %c0_i32_0 = arith.constant 0 : i32
    %c0_i32_1 = arith.constant 0 : i32
    %c0_i32_2 = arith.constant 0 : i32
    return %c0_i32, %c0_i32_0, %c0_i32_1 : i32, i32, i32
  }
  func.func @transform_16(%arg0: i32) -> (i32, i32, i32) {
    %c0_i32 = arith.constant 0 : i32
    %c0_i32_0 = arith.constant 0 : i32
    %c0_i32_1 = arith.constant 0 : i32
    %c0_i32_2 = arith.constant 0 : i32
    return %c0_i32, %c0_i32_0, %c0_i32_1 : i32, i32, i32
  }
  func.func @transform_17(%arg0: i32) -> (i32, i32, i32) {
    %c0_i32 = arith.constant 0 : i32
    %c0_i32_0 = arith.constant 0 : i32
    %c0_i32_1 = arith.constant 0 : i32
    %c0_i32_2 = arith.constant 0 : i32
    return %c0_i32, %c0_i32_0, %c0_i32_1 : i32, i32, i32
  }
  func.func @transform_18(%arg0: i32) -> (i32, i32, i32) {
    %c0_i32 = arith.constant 0 : i32
    %c0_i32_0 = arith.constant 0 : i32
    %c0_i32_1 = arith.constant 0 : i32
    %c0_i32_2 = arith.constant 0 : i32
    return %c0_i32, %c0_i32_0, %c0_i32_1 : i32, i32, i32
  }
  func.func @transform_19(%arg0: i32) -> (i32, i32) {
    %c0_i32 = arith.constant 0 : i32
    %c0_i32_0 = arith.constant 0 : i32
    %c0_i32_1 = arith.constant 0 : i32
    return %c0_i32, %c0_i32_0 : i32, i32
  }
  func.func @transform_20(%arg0: i32) -> (i32, i32) {
    %c0_i32 = arith.constant 0 : i32
    %c0_i32_0 = arith.constant 0 : i32
    %c0_i32_1 = arith.constant 0 : i32
    return %c0_i32, %c0_i32_0 : i32, i32
  }
  func.func @transform_21(%arg0: i32) -> (i32, i32) {
    %c0_i32 = arith.constant 0 : i32
    %c0_i32_0 = arith.constant 0 : i32
    %c0_i32_1 = arith.constant 0 : i32
    return %c0_i32, %c0_i32_0 : i32, i32
  }
  func.func @transform_22(%arg0: i32) -> (i32, i32) {
    %c0_i32 = arith.constant 0 : i32
    %c0_i32_0 = arith.constant 0 : i32
    %c0_i32_1 = arith.constant 0 : i32
    return %c0_i32, %c0_i32_0 : i32, i32
  }
  func.func @transform_23(%arg0: i32) -> (i32, i32) {
    %c0_i32 = arith.constant 0 : i32
    %c0_i32_0 = arith.constant 0 : i32
    %c0_i32_1 = arith.constant 0 : i32
    return %c0_i32, %c0_i32_0 : i32, i32
  }
  func.func @transform_24(%arg0: i32) -> (i32, i32) {
    %c0_i32 = arith.constant 0 : i32
    %c0_i32_0 = arith.constant 0 : i32
    %c0_i32_1 = arith.constant 0 : i32
    return %c0_i32, %c0_i32_0 : i32, i32
  }
  func.func @transform_25(%arg0: i32) -> (i32, i32) {
    %c0_i32 = arith.constant 0 : i32
    %c0_i32_0 = arith.constant 0 : i32
    %c0_i32_1 = arith.constant 0 : i32
    return %c0_i32, %c0_i32_0 : i32, i32
  }
  func.func @transform_26(%arg0: i32) -> (i32, i32) {
    %c0_i32 = arith.constant 0 : i32
    %c0_i32_0 = arith.constant 0 : i32
    %c0_i32_1 = arith.constant 0 : i32
    return %c0_i32, %c0_i32_0 : i32, i32
  }
  func.func @transform_27(%arg0: i32) -> (i32, i32, i32) {
    %c0_i32 = arith.constant 0 : i32
    %c0_i32_0 = arith.constant 0 : i32
    %c0_i32_1 = arith.constant 0 : i32
    return %arg0, %c0_i32, %c0_i32_0 : i32, i32, i32
  }
  func.func @transform_28(%arg0: i32) -> (i32, i32, i32) {
    %c0_i32 = arith.constant 0 : i32
    %c0_i32_0 = arith.constant 0 : i32
    %c0_i32_1 = arith.constant 0 : i32
    return %arg0, %c0_i32, %c0_i32_0 : i32, i32, i32
  }
}

</mosaic_0001>

<bundles_post_ra>
// kernel: tpu_custom_call.1
= control target key start
LH: loop header
LB: loop body
LE: loop exit
PB: predicated region body
PF: predicated region fallthrough
CT: control target
= control target key end

     0   :  { %s11122_s0 = inlined_call_operand.hbm [shape: s32[2,1,112], index: 0, kind: input, shape index: {}]   ;;  %s11123_s1 = inlined_call_operand.hbm [shape: s32[2,1,112], index: 1, kind: input, shape index: {}]   ;;  %s11124_s2 = inlined_call_operand.hbm [shape: f32[2,1,112], index: 2, kind: input, shape index: {}]   ;;  %s11125_s3 = inlined_call_operand.vmem [shape: f32[32,4], index: 3, kind: input, shape index: {}]   ;;  %s11126_s4 = inlined_call_operand.vmem [shape: f32[32,3], index: 4, kind: input, shape index: {}]   ;;  %s11127_s5 = inlined_call_operand.vmem [shape: f32[32,1], index: 5, kind: input, shape index: {}]   ;;  %s11128_s6 = inlined_call_operand.hbm [shape: f32[2,1,16], index: 6, kind: input, shape index: {}]   ;;  %s11129_s7 = inlined_call_operand.vmem [shape: f32[4,160], index: 7, kind: input, shape index: {}]   ;;  %s11130_s8 = inlined_call_operand.hbm [shape: f32[1,32], index: 8, kind: input, shape index: {}]   ;;  %s11131_s9 = inlined_call_operand.hbm [shape: f32[4,32,64], index: 9, kind: input, shape index: {}]   ;;  %s11132_s10 = inlined_call_operand.vmem [shape: f32[4,1,32], index: 10, kind: input, shape index: {}]   ;;  %s11133_s11 = inlined_call_operand.vmem [shape: f32[4,1,32], index: 11, kind: input, shape index: {}]   ;;  %s11134_s12 = inlined_call_operand.hbm [shape: f32[4,32,32], index: 12, kind: input, shape index: {}]   ;;  %s11135_s13 = inlined_call_operand.vmem [shape: f32[4,1,32], index: 13, kind: input, shape index: {}]   ;;  %s11136_s14 = inlined_call_operand.hbm [shape: f32[4,32,32], index: 14, kind: input, shape index: {}]   ;;  %s11137_s15 = inlined_call_operand.hbm [shape: f32[4,32,32], index: 15, kind: input, shape index: {}]   ;;  %s11138_s16 = inlined_call_operand.vmem [shape: f32[4,1,32], index: 16, kind: input, shape index: {}]   ;;  %s11139_s17 = inlined_call_operand.hbm [shape: f32[4,32,32], index: 17, kind: input, shape index: {}]   ;;  %s11140_s18 = inlined_call_operand.vmem [shape: f32[4,1,32], index: 18, kind: input, shape index: {}]   ;;  %s11141_s19 = inlined_call_operand.vmem [shape: f32[32,32], index: 19, kind: input, shape index: {}]   ;;  %s11142_s20 = inlined_call_operand.vmem [shape: f32[1,32], index: 20, kind: input, shape index: {}]   ;;  %s11143_s21 = inlined_call_operand.vmem [shape: f32[32,32], index: 21, kind: input, shape index: {}]   ;;  %s11144_s22 = inlined_call_operand.vmem [shape: f32[1,32], index: 22, kind: input, shape index: {}]   ;;  %s11145_s23 = inlined_call_operand.vmem [shape: f32[32,32], index: 23, kind: input, shape index: {}]   ;;  %s11146_s24 = inlined_call_operand.vmem [shape: f32[1,32], index: 24, kind: input, shape index: {}]   ;;  %s11147_s25 = inlined_call_operand.vmem [shape: f32[1,32], index: 25, kind: input, shape index: {}]   ;;  %s11148_s26 = inlined_call_operand.<no memory space> [shape: f32[1,1], index: 26, kind: input, shape index: {}]   ;;  %s11149_s27 = inlined_call_operand.hbm [shape: f32[2,1,16], index: 27, kind: output, shape index: {0}]   ;;  %s11150_s28 = inlined_call_operand.hbm [shape: f32[2,1,2], index: 28, kind: output, shape index: {1}]  }
   0x1   :  { %11304 = sst [smem:[#allocation94_spill]] %s11122_s0  ;;  %v34_v0 = vstv %s11148_s26 }
   0x2   :  { %11305 = sst [smem:[#allocation95_spill]] %s11123_s1  ;;  %35 = vst [vmem:[#allocation2] sm:$0x1] %v34_v0 }
   0x3   :  { %11306 = sst [smem:[#allocation96_spill]] %s11124_s2 }
   0x4   :  { %11307 = sst [smem:[#allocation97_spill]] %s11125_s3 }
   0x5   :  { %11308 = sst [smem:[#allocation98_spill]] %s11126_s4 }
   0x6   :  { %11309 = sst [smem:[#allocation99_spill]] %s11127_s5 }
   0x7   :  { %11310 = sst [smem:[#allocation100_spill]] %s11128_s6 }
   0x8   :  { %11311 = sst [smem:[#allocation101_spill]] %s11129_s7 }
   0x9   :  { %11312 = sst [smem:[#allocation102_spill]] %s11130_s8 }
   0xa   :  { %11313 = sst [smem:[#allocation103_spill]] %s11131_s9 }
   0xb   :  { %11314 = sst [smem:[#allocation104_spill]] %s11132_s10 }
   0xc   :  { %11315 = sst [smem:[#allocation105_spill]] %s11133_s11 }
   0xd   :  { %11316 = sst [smem:[#allocation106_spill]] %s11134_s12 }
   0xe   :  { %11317 = sst [smem:[#allocation107_spill]] %s11136_s14 }
   0xf   :  { %11318 = sst [smem:[#allocation108_spill]] %s11137_s15 }
  0x10   :  { %11319 = sst [smem:[#allocation109_spill]] %s11144_s22 }
  0x11   :  { %11320 = sst [smem:[#allocation110_spill]] %s11145_s23 }
  0x12   :  { %11321 = sst [smem:[#allocation111_spill]] %s11146_s24 }
  0x13   :  { %11322 = sst [smem:[#allocation112_spill]] %s11147_s25 }
  0x14   :  { %11323 = sst [smem:[#allocation113_spill]] %s11149_s27 }
  0x15   :  { %11324 = sst [smem:[#allocation114_spill]] %s11150_s28 }
  0x16   :  { %36 = vsyncpa [#allocation4], 0 }
  0x17   :  { %38 = vsyncpa [#allocation4 + $0x1], 0 }
  0x18   :  { %39 = vsyncpa [#allocation7], 0 }
  0x19   :  { %41 = vsyncpa [#allocation7 + $0x1], 0 }
  0x1a   :  { %42 = vsyncpa [#allocation10], 0 }
  0x1b   :  { %44 = vsyncpa [#allocation10 + $0x1], 0 }
  0x1c   :  { %45 = vsyncpa [#allocation13], 0 }
  0x1d   :  { %46 = vsyncpa [#allocation16], 0 }
  0x1e   :  { %47 = vsyncpa [#allocation19], 0 }
  0x1f   :  { %48 = vsyncpa [#allocation5], 0 }
  0x20   :  { %50 = vsyncpa [#allocation5 + $0x1], 0 }
  0x21   :  { %51 = vsyncpa [#allocation22], 0 }
  0x22   :  { %53 = vsyncpa [#allocation22 + $0x1], 0  ;;  %s8113_s9 = smov 0   ;;  %s8115_s30 = smov 0  }
  0x23   :  { %s8117_s3 = smov 0   ;;  %s8119_s26 = smov 0  }
  0x24 LB: > { %11325 = sst [smem:[#allocation32_spill]] %s7938_s9  ;;  %s8137_s29 = sadd.s32 4294967295, %s7950_s26   ;;  %s7950_s26 = sphi %s8119_s26, %s11893_s26   ;;  %s7946_s3 = sphi %s8117_s3, %s11895_s3   ;;  %s7942_s30 = sphi %s8115_s30, %s11897_s30   ;;  %s7938_s9 = sphi %s8113_s9, %s11896_s9  }
  0x25   : > { %11326 = sst [smem:[#allocation33_spill]] %s7946_s3  ;;  %p6368_p0 = scmp.ge.s32.totalorder %s7950_s26, 1 }
  0x26   : > { %s11327_s0 = sld [smem:[#allocation102_spill]]  ;;  %p11170_p1 = scmp.eq.s32.totalorder %s8137_s29, 0 }
  0x27   : > { %p718_p2 = scmp.lt.s32.totalorder %s7950_s26, 3  ;;  %s7952_s7 = smov [#allocation11]  }
  0x28   : > { %s735_s12 = sshll.u32 %s7952_s7, 4  ;;  %s11329_s8 = sld [smem:[#allocation103_spill]]  ;;  %s736_s12 = int_to_ptr.vmem [resolvable:$true] %s735_s12 }
  0x29   : > { %p8142_p3 = pnand %p6368_p0, %p718_p2  ;;  %s7953_s10 = smov [#allocation12]  }
  0x2a   : > { %s11159_s7 = smov 128   ;;  %s11161_s1 = smov 8  }
  0x2b   : > { %p6811_p5 = pneg %p8142_p3  ;;  %s11331_s14 = sld [smem:[#allocation107_spill]] }
  0x2c   : > { %s733_s11 = sshll.u32 %s11327_s0, 4  ;;  %s746_s0 = sshll.u32 %s7953_s10, 4  ;;  %s734_s11 = int_to_ptr.hbm [resolvable:$true] %s733_s11  ;;  %s747_s0 = int_to_ptr.vmem [resolvable:$true] %s746_s0 }
  0x2d   : > { %p8154_p6 = pnand %p6811_p5, %p11170_p1  ;;  %s7956_s28 = smov [#allocation15]  }
  0x2e   : > { %s744_s5 = sshll.u32 %s11329_s8, 4  ;;  %s8175_s27 = sadd.s32 1, %s7950_s26   ;;  %s745_s5 = int_to_ptr.hbm [resolvable:$true] %s744_s5 }
  0x2f   : > { %6814 = dma.hbm_to_vmem [thread:$0]  (!%p8154_p6), %s734_s11, 16, %s736_s12, [#allocation10]  }
  0x30   : > { %6817 = dma.hbm_to_vmem [thread:$0]  (!%p8154_p6), %s745_s5, 2048, %s747_s0, [#allocation13], %s11159_s7, %s11159_s7, %s11161_s1  }
  0x31   : > { %s781_s10 = sshll.u32 %s11331_s14, 4  ;;  %s783_s11 = sshll.u32 %s7956_s28, 4  ;;  %s782_s10 = int_to_ptr.hbm [resolvable:$true] %s781_s10  ;;  %s784_s11 = int_to_ptr.vmem [resolvable:$true] %s783_s11 }
  0x32   : > { %6823 = dma.hbm_to_vmem [thread:$0]  (!%p8154_p6), %s782_s10, 2048, %s784_s11, [#allocation16], %s11159_s7, %s11159_s7, %s11161_s1  }
  0x33   : > { %s6367_s12 = sadd.s32 4294967294, %s7950_s26   ;;  %11332 = sst [smem:[#allocation34_spill]] %s8175_s27 }
  0x34   : > { %s66_s5 = sadd.s32 1, %s7946_s3  ;;  %s63_s0 = ssub.s32 %s7950_s26, %s8175_s27 }
  0x35   : > { %p73_p7 = scmp.ne.s32.totalorder %s7946_s3, %s7942_s30  ;;  %p64_p8 = scmp.eq.s32.totalorder %s63_s0, 0 }
  0x36   : > { %p74_p9 = scmp.eq.s32.totalorder %s7950_s26, 0  ;;  %p79_p10 = scmp.ne.s32.totalorder %s7942_s30, %s7938_s9 }
  0x37   : > { %p679_p11 = scmp.eq.s32.totalorder %s8137_s29, 1  ;;  %p685_p2 = scmp.eq.s32.totalorder %s6367_s12, 1 }
  0x38   : > { %s8187_s28 = scalar_select %p64_p8, %s7946_s3, %s66_s5  }
  0x39   : > { %p75_p12 = por %p74_p9, %p73_p7  ;;  %p8191_p13 = por %p11170_p1, %p79_p10 }
  0x3a   : > { %11333 = sst [smem:[#allocation35_spill]] %s8187_s28  ;;  %p8195_p0 = por %p679_p11, %p73_p7 }
  0x3b   : > { %p6856_p5 = scmp.lt.s32.totalorder %s7950_s26, 2  ;;  %s8201_s10 = sand.u32 1, %s7946_s3  }
  0x3c   : > { %s11335_s8 = scalar_select %p8195_p0, 1, 0 }
  0x3d   : > { %p8203_p4 = por %p685_p2, %p79_p10  ;;  %s11171_s5 = sand.u32 1, %s7950_s26  }
  0x3e   : > { %11336 = sst [smem:[#allocation36_spill]] %s11335_s8  ;;  %p8208_p8 = pnand %p6856_p5, %p75_p12 }
  0x3f   : > { %s11337_s11 = scalar_select %p8203_p4, 1, 0 }
  0x40   : > { %s11340_s14 = sld [smem:[#allocation95_spill]]  ;;  %s875_s3 = scalar_lea.vmem [#allocation6], %s8201_s10 }
  0x41   : > { %11338 = sst [smem:[#allocation37_spill]] %s11337_s11  ;;  %s882_s27 = sshll.u32 %s875_s3, 4  ;;  %s883_s27 = int_to_ptr.vmem [resolvable:$true] %s882_s27 }
  0x42   : > { %s8219_s9 = scalar_lea.sflag [#allocation7], %s11171_s5  ;;  %p7622_p9 = pneg %p8208_p8 }
  0x46   : > { %s878_s28 = scalar_lea.hbm %s11340_s14, %s7950_s26 }
  0x47   : > { %s880_s12 = sshll.u32 %s878_s28, 4  ;;  %s7625_s28 = scalar_lea.hbm %s11340_s14, 2  ;;  %s881_s12 = int_to_ptr.hbm [resolvable:$true] %s880_s12 }
  0x48   : > { %s7618_s11 = sshra.s32 %s881_s12, 4  ;;  %s7619_s11 = int_to_ptr.hbm [resolvable:$true] %s7618_s11 }
  0x49   : > { %s7620_s8 = scalar_lea.hbm %s7619_s11, 1  ;;  %p7626_p12 = scmp.lt.s32.totalorder %s7619_s11, %s11340_s14 }
  0x4a   : > { %p7621_p7 = scmp.ne.s32.totalorder %s7619_s11, %s7620_s8  ;;  %p7627_p2 = scmp.lt.s32.totalorder %s7625_s28, %s7620_s8 }
  0x4c   : > { %p7623_p10 = pnand %p7622_p9, %p7621_p7  ;;  %p7628_p5 = por %p7627_p2, %p7626_p12 }
  0x4e   : > { %p7624_p11 = pneg %p7623_p10 }
  0x50   : > { %p7629_p1 = pnand %p7628_p5, %p7624_p11 }
  0x52   : > { %7632 = shalt.err (!%p7629_p1)
}
  0x53   : > { %6836 = dma.hbm_to_vmem [thread:$0]  (!%p8208_p8), %s881_s12, 16, %s883_s27, %s8219_s9  }
  0x54   : > { %s11341_s22 = sld [smem:[#allocation106_spill]]  ;;  %s7957_s7 = smov [#allocation14]  }
  0x55   : > { %s766_s25 = sshll.u32 %s7957_s7, 4  ;;  %s11342_s15 = sld [smem:[#allocation108_spill]]  ;;  %s767_s25 = int_to_ptr.vmem [resolvable:$true] %s766_s25 }
  0x56   : > { %s11343_s28 = smov 8   ;;  %s11344_s3 = smov 128  }
  0x57   : > { %s7958_s27 = smov [#allocation17]   ;;  %s812_s12 = sshll.u32 %s11139_s17, 4  ;;  %s813_s12 = int_to_ptr.hbm [resolvable:$true] %s812_s12 }
  0x58   : > { %s7959_s7 = smov [#allocation18]   ;;  %s11345_s11 = sld [smem:[#allocation94_spill]] }
  0x59   : > { %s814_s8 = sshll.u32 %s7959_s7, 4  ;;  %s858_s24 = scalar_lea.vmem [#allocation3], %s8201_s10  ;;  %s815_s8 = int_to_ptr.vmem [resolvable:$true] %s814_s8 }
  0x5a   : > { %s764_s23 = sshll.u32 %s11341_s22, 4  ;;  %s797_s22 = sshll.u32 %s7958_s27, 4  ;;  %s765_s23 = int_to_ptr.hbm [resolvable:$true] %s764_s23  ;;  %s798_s22 = int_to_ptr.vmem [resolvable:$true] %s797_s22 }
  0x5b   : > { %s795_s1 = sshll.u32 %s11342_s15, 4  ;;  %s865_s5 = sshll.u32 %s858_s24, 4  ;;  %s796_s1 = int_to_ptr.hbm [resolvable:$true] %s795_s1  ;;  %s866_s5 = int_to_ptr.vmem [resolvable:$true] %s865_s5 }
  0x5c   : > { %6820 = dma.hbm_to_vmem [thread:$0]  (!%p8154_p6), %s765_s23, 2048, %s767_s25, [#allocation13], %s11344_s3, %s11344_s3, %s11343_s28  }
  0x5d   : > { %6826 = dma.hbm_to_vmem [thread:$0]  (!%p8154_p6), %s796_s1, 2048, %s798_s22, [#allocation16], %s11344_s3, %s11344_s3, %s11343_s28  }
  0x5e   : > { %s861_s14 = scalar_lea.hbm %s11345_s11, %s7950_s26  ;;  %s856_s15 = scalar_lea.sflag [#allocation4], %s8201_s10 }
  0x5f   : > { %6829 = dma.hbm_to_vmem [thread:$0]  (!%p8154_p6), %s813_s12, 2048, %s815_s8, [#allocation19], %s11344_s3, %s11344_s3, %s11343_s28  }
  0x60   : > { %s863_s27 = sshll.u32 %s861_s14, 4  ;;  %s7745_s23 = scalar_lea.hbm %s11345_s11, 2  ;;  %s864_s27 = int_to_ptr.hbm [resolvable:$true] %s863_s27 }
  0x61   : > { %s7738_s1 = sshra.s32 %s864_s27, 4  ;;  %s7739_s1 = int_to_ptr.hbm [resolvable:$true] %s7738_s1 }
  0x62   : > { %s7740_s22 = scalar_lea.hbm %s7739_s1, 1  ;;  %p7746_p6 = scmp.lt.s32.totalorder %s7739_s1, %s11345_s11 }
  0x63   : > { %p7741_p1 = scmp.ne.s32.totalorder %s7739_s1, %s7740_s22  ;;  %p7747_p11 = scmp.lt.s32.totalorder %s7745_s23, %s7740_s22 }
  0x65   : > { %p7743_p7 = pnand %p7741_p1, %p7622_p9  ;;  %p7748_p12 = por %p7747_p11, %p7746_p6 }
  0x67   : > { %p7744_p10 = pneg %p7743_p7 }
  0x69   : > { %p7749_p2 = pnand %p7748_p12, %p7744_p10 }
  0x6b   : > { %7752 = shalt.err (!%p7749_p2)
}
  0x6c   : > { %6833 = dma.hbm_to_vmem [thread:$0]  (!%p8208_p8), %s864_s27, 16, %s866_s5, %s856_s15  }
  0x6d   : > { %s11346_s12 = sld [smem:[#allocation96_spill]]  ;;  %s892_s7 = scalar_lea.vmem [#allocation8], %s8201_s10 }
  0x6e   : > { %s899_s6 = sshll.u32 %s892_s7, 4  ;;  %s900_s6 = int_to_ptr.vmem [resolvable:$true] %s899_s6 }
  0x73   : > { %s895_s8 = scalar_lea.hbm %s11346_s12, %s7950_s26  ;;  %s7775_s15 = scalar_lea.hbm %s11346_s12, 2 }
  0x74   : > { %s897_s24 = sshll.u32 %s895_s8, 4  ;;  %s898_s24 = int_to_ptr.hbm [resolvable:$true] %s897_s24 }
  0x75   : > { %s7768_s1 = sshra.s32 %s898_s24, 4  ;;  %s7769_s1 = int_to_ptr.hbm [resolvable:$true] %s7768_s1 }
  0x76   : > { %s7770_s22 = scalar_lea.hbm %s7769_s1, 1  ;;  %p7776_p10 = scmp.lt.s32.totalorder %s7769_s1, %s11346_s12 }
  0x77   : > { %p7771_p5 = scmp.ne.s32.totalorder %s7769_s1, %s7770_s22  ;;  %p7777_p6 = scmp.lt.s32.totalorder %s7775_s15, %s7770_s22 }
  0x79   : > { %p7773_p1 = pnand %p7771_p5, %p7622_p9  ;;  %p7778_p11 = por %p7777_p6, %p7776_p10 }
  0x7b   : > { %p7774_p7 = pneg %p7773_p1 }
  0x7d   : > { %p7779_p12 = pnand %p7778_p11, %p7774_p7 }
  0x7f   : > { %7782 = shalt.err (!%p7779_p12)
}
  0x80   : > { %6839 = dma.hbm_to_vmem [thread:$0]  (!%p8208_p8), %s898_s24, 16, %s900_s6, %s8219_s9  }
  0x81   : > { %s11347_s3 = sld [smem:[#allocation100_spill]]  ;;  %s936_s25 = scalar_lea.vmem [#allocation9], %s8201_s10 }
  0x82   : > { %s943_s27 = sshll.u32 %s936_s25, 4  ;;  %s11349_s1 = sand.u32 1, %s7950_s26   ;;  %s944_s27 = int_to_ptr.vmem [resolvable:$true] %s943_s27 }
  0x83   : > { %s934_s22 = scalar_lea.sflag [#allocation10], %s11349_s1 }
  0x87   : > { %s11348_s8 = smov %s11347_s3  ;;  %s939_s7 = scalar_lea.hbm %s11347_s3, %s7950_s26 }
  0x88   : > { %s941_s23 = sshll.u32 %s939_s7, 4  ;;  %s7805_s6 = scalar_lea.hbm %s11348_s8, 2  ;;  %s942_s23 = int_to_ptr.hbm [resolvable:$true] %s941_s23 }
  0x89   : > { %s7798_s15 = sshra.s32 %s942_s23, 4  ;;  %s7799_s15 = int_to_ptr.hbm [resolvable:$true] %s7798_s15 }
  0x8a   : > { %s7800_s5 = scalar_lea.hbm %s7799_s15, 1  ;;  %p7806_p7 = scmp.lt.s32.totalorder %s7799_s15, %s11348_s8 }
  0x8b   : > { %p7801_p2 = scmp.ne.s32.totalorder %s7799_s15, %s7800_s5  ;;  %p7807_p10 = scmp.lt.s32.totalorder %s7805_s6, %s7800_s5 }
  0x8d   : > { %p7803_p5 = pnand %p7801_p2, %p7622_p9  ;;  %p7808_p6 = por %p7807_p10, %p7806_p7 }
  0x8f   : > { %p7804_p1 = pneg %p7803_p5 }
  0x91   : > { %p7809_p11 = pnand %p7808_p6, %p7804_p1 }
  0x93   : > { %7812 = shalt.err (!%p7809_p11)
}
  0x94   : > { %6842 = dma.hbm_to_vmem [thread:$0]  (!%p8208_p8), %s942_s23, 16, %s944_s27, %s934_s22  }
  0x95   : > { %952 = sbr.rel (%p8142_p3) target bundleno = 5713 (0x1651), region = 128 }
  0x9a   : > { %s8314_s10 = sand.u32 1, %s7942_s30  }
  0x9b   : > { %s955_s3 = scalar_lea.sflag [#allocation4], %s8314_s10  ;;  %s957_s7 = scalar_lea.vmem [#allocation3], %s8314_s10 }
  0x9c   : > { %7901 = dma.done.wait (%p8191_p13), %s955_s3, 16  }
  0x9d   : > { %7903 = vsyncadd (%p8191_p13), %s955_s3, 4294967280  ;;  %s963_s0 = sand.u32 1, %s8137_s29   ;;  %s966_s2 = scalar_lea.vmem [#allocation6], %s8314_s10 }
  0x9e   : > { %s964_s23 = scalar_lea.sflag [#allocation7], %s963_s0 }
  0x9f   : > { %7905 = dma.done.wait (%p8191_p13), %s964_s23, 32  }
  0xa0   : > { %7907 = vsyncadd (%p8191_p13), %s964_s23, 4294967264  ;;  %s975_s25 = scalar_lea.vmem [#allocation8], %s8314_s10  ;;  %s982_s27 = scalar_lea.sflag [#allocation10], %s963_s0 }
  0xa1   : > { %s984_s1 = scalar_lea.vmem [#allocation9], %s8314_s10 }
  0xa2   : > { %7909 = dma.done.wait (%p8191_p13), %s982_s27, 16  }
  0xa3   : > { %7911 = vsyncadd (%p8191_p13), %s982_s27, 4294967280  ;;  %p11350_p3 = scmp.eq.s32.totalorder %s8137_s29, 0 }
  0xa5   : > { %7913 = dma.done.wait (%p11350_p3), [#allocation10], 16   ;;  %p11351_p8 = pmov %p11350_p3 }
  0xa6   : > { %p11352_p9 = pmov %p11350_p3 }
  0xa7   : > { %7915 = vsyncadd (%p11351_p8), [#allocation10], 4294967280 }
  0xa8   : > { %7917 = dma.done.wait (%p11352_p9), [#allocation13], 4096   ;;  %p11353_p12 = pmov %p11350_p3 }
  0xa9   : > { %p11354_p2 = pmov %p11350_p3 }
  0xaa   : > { %7919 = vsyncadd (%p11353_p12), [#allocation13], 4294963200 }
  0xab   : > { %7921 = dma.done.wait (%p11354_p2), [#allocation16], 4096   ;;  %p11355_p5 = pmov %p11354_p2 }
  0xac   : > { %p11356_p13 = pmov %p11354_p2 }
  0xad   : > { %7923 = vsyncadd (%p11355_p5), [#allocation16], 4294963200 }
  0xae   : > { %7925 = dma.done.wait (%p11356_p13), [#allocation19], 2048   ;;  %p11357_p1 = pmov %p11354_p2 }
  0xaf   : > { %v11175_v1 = vlaneseq  ;;  %s6383_s4 = sshll.u32 %s8137_s29, 1  ;;  %v7005_v4 = vld [vmem:[%s957_s7] ss:$0 sm:$0xff]  ;;  %s11359_s9 = sld [smem:[#allocation101_spill]]  ;;  %vm1369_vm0 = vcmask 1043456   ;;  %vm1362_vm1 = vcmask 31744  }
  0xb0   : > { %7927 = vsyncadd (%p11357_p1), [#allocation19], 4294965248  ;;  %p1118_p7 = scmp.lt.s32.totalorder %s6383_s4, 3  ;;  %v7006_v5 = vld [vmem:[%s966_s2] ss:$0 sm:$0xff]  ;;  %v11174_v7 = vmov 0.0  }
  0xb1   : > { %v8352_v2 = vshrl.u32 %v11175_v1, 7  ;;  %s11361_s28 = sld [smem:[#allocation97_spill]]  ;;  %v1429_v16 = vld [vmem:[#allocation12 + $0x18] sm:$0xff]  ;;  %v1428_v18 = vld [vmem:[#allocation12 + $0x10] sm:$0xff]  ;;  %v1427_v20 = vld [vmem:[#allocation12 + $0x8] sm:$0xff]  ;;  %vm11274_vm6 = vcmask 261120  }
  0xb2   : > { %s11899_s4 = smov (!%p1118_p7, %s6383_s4), 3  ;;  %v1426_v21 = vld [vmem:[#allocation12] sm:$0xff]  ;;  %s11363_s0 = sld [smem:[#allocation98_spill]]  ;;  %v7008_v24 = vld [vmem:[#allocation11] ss:$0 sm:$0xff]  ;;  %vm11273_vm7 = vcmask 130048  }
  0xb3   : > { %11358 = vst [vmem:[#allocation38_spill] sm:$0xff] %v8352_v2  ;;  %v1140_v3 = vadd.s32 8, %v8352_v2  ;;  %s8355_s22 = sshll.u32 %s11899_s4, 3  ;;  %vm1142_vm2 = vcmp.eq.s32.totalorder %v8352_v2, %v7005_v4  ;;  %vm1149_vm3 = vcmp.eq.s32.totalorder %v8352_v2, %v7006_v5  ;;  %s7961_s2 = smov 96   ;;  %vm1312_vm8 = vcmask 23552  }
  0xb4   : > { %v8363_v8 = vsel %vm1142_vm2, 1.0, %v11174_v7  ;;  %v8366_v9 = vsel %vm1149_vm3, 1.0, %v11174_v7  ;;  %s11397_s15 = sld [smem:[#allocation104_spill]]  ;;  %s7963_s7 = smov 32  }
  0xb5   : > { %v1357_v6 = vld [vmem:[%s11359_s9] sm:$0xff]  ;;  %vm1143_vm4 = vcmp.eq.s32.totalorder %v1140_v3, %v7005_v4  ;;  %vm1150_vm5 = vcmp.eq.s32.totalorder %v1140_v3, %v7006_v5  ;;  %11360 = vst [vmem:[#allocation39_spill] sm:$0xff] %v8363_v8  ;;  %v1162_v12 = vsub.f32 %v8363_v8, %v8366_v9  ;;  %v6914_v59 = vpack.i.bf16 %v8366_v9, %v8363_v8  ;;  %s11399_s24 = sld [smem:[#allocation105_spill]] }
  0xb6   : > { %1359 = vst [vmem:[#allocation1] ss:$2 sm:$0xff] %v1357_v6  ;;  %v8373_v10 = vsel %vm1143_vm4, 1.0, %v11174_v7  ;;  %v8376_v11 = vsel %vm1150_vm5, 1.0, %v11174_v7  ;;  %s11870_s9 = sld [smem:[#allocation110_spill]] }
  0xb7   : > { %s1121_s14 = scalar_lea.vmem %s11361_s28, %s8355_s22  ;;  %11362 = vst [vmem:[#allocation40_spill] sm:$0xff] %v8373_v10  ;;  %v6916_v13 = vpack.i.bf16 %v8376_v11, %v8373_v10  ;;  %1164 = vxpose.xlu0.b32.start [1/2] (short) (narrow) %v1162_v12, 112  ;;  %v1163_v19 = vsub.f32 %v8373_v10, %v8376_v11  ;;  %s11876_s5 = sld [smem:[#allocation111_spill]] }
  0xb8   : > { %v1355_v14 = vld [vmem:[%s1121_s14] sm:$0xff]  ;;  %v1356_v15 = vld [vmem:[%s1121_s14 + $0x8] sm:$0xff]  ;;  %s1127_s23 = scalar_lea.vmem %s11363_s0, %s8355_s22  ;;  %s7962_s0 = smov 64  }
  0xb9   : > { %v1161_v22 = vld [vmem:[%s1127_s23 + $0x8] sm:$0xff]  ;;  %v1160_v23 = vld [vmem:[%s1127_s23] sm:$0xff]  ;;  %s11869_s23 = sld [smem:[#allocation99_spill]] }
  0xba   : > { %1253 = vmatpush.msra.mxu0 %v1161_v22  ;;  %s11879_s28 = sld [smem:[#allocation112_spill]] }
  0xbb   : > { %s11886_s3 = sld [smem:[#allocation113_spill]] }
  0xbc   : > { %1254 = vmatpush.msra.mxu0 %v1160_v23  ;;  %s11871_s6 = smov %s11870_s9 }
  0xbd   : > { %v1360_v17 = vld.sshfl [vmem:[#allocation1] sm:$0xff pattern:$0x75316420]  ;;  %v1361_v39 = vld.sshfl [vmem:[#allocation1 + $0x8] sm:$0xff pattern:$0x75316420] }
  0xbe   : > { %6407 = vmatpush.msk.msra.mxu1 %vm1369_vm0, %v1360_v17  ;;  %6774 = vmatpush.msk.msra.mxu3 %vm1369_vm0, %v1360_v17 }
  0xbf   : > { %6408 = vmatmul.msk.f32.vlgmr.msra.gmra.mxu1 %vm1362_vm1, %v1355_v14  ;;  %6409 = vmatmul.msk.f32.vlgmr.msra.gmra.mxu3 %vm1362_vm1, %v1356_v15  ;;  %s1133_s27 = scalar_lea.vmem %s11869_s23, %s8355_s22  ;;  %s11873_s23 = sld [smem:[#allocation109_spill]] }
  0xc0   : > { %1449 = vmatpush.msrb.mxu3 %v1429_v16  ;;  %1165 = vxpose.xlu0.b32.end [2/2] (short) (narrow) %v1163_v19, 112 }
  0xc1   : > { %6410 = vmatpush.msk.msra.mxu2 %vm1369_vm0, %v1361_v39 }
  0xc2   : > { %1450 = vmatpush.msrb.mxu3 %v1428_v18  ;;  %6411 = vmatmul.msk.f32.vlgmr.msra.gmra.mxu2 %vm1362_vm1, %v1355_v14 }
  0xc4   : > { %1451 = vmatpush.msrb.mxu3 %v1427_v20 }
  0xc6   : > { %1452 = vmatpush.msrb.mxu3 %v1426_v21 }
  0xca   : > { %6412 = vmatmul.msk.f32.gmra.mxu2 %vm1362_vm1, %v1356_v15 }
 0x13c   : > { %v8392_v25 = vpop.f32.mrf.mxu1 }
 0x13d   : > { %11364 = vst [vmem:[#allocation41_spill] sm:$0xff] %v8392_v25  ;;  %v8395_v26 = vadd.f32 %v7008_v24, %v8392_v25 }
 0x13f   : > { %6413 = vmatmul.msk.f32.vlgmr.msrb.gmra.mxu3 %vm11274_vm6, %v8395_v26 }
 0x142   : > { %v8399_v27 = vpop.f32.mrf.mxu3 }
 0x143   : > { %11365 = vst [vmem:[#allocation42_spill] sm:$0xff] %v8399_v27  ;;  %v8402_v28 = vadd.f32 %v7008_v24, %v8399_v27 }
 0x147   : > { %6414 = vmatmul.msk.f32.gmra.mxu3 %vm11274_vm6, %v8402_v28 }
 0x15c   : > { %v1180_v29 = vpop.trf.xlu0 }
 0x15d   : > { %6393 = vmatmul.msk.f32.vlgmr.msra.gmra.mxu0 %vm11273_vm7, %v1180_v29 }
 0x164   : > { %v1181_v30 = vpop.trf.xlu0 }
 0x165   : > { %6394 = vmatmul.msk.f32.gmra.mxu0 %vm11273_vm7, %v1181_v30 }
 0x16c   : > { %v1182_v31 = vpop.trf.xlu0 }
 0x16d   : > { %6395 = vmatmul.msk.f32.gmra.mxu0 %vm11273_vm7, %v1182_v31 }
 0x174   : > { %v1183_v32 = vpop.trf.xlu0 }
 0x175   : > { %6396 = vmatmul.msk.f32.gmra.mxu0 %vm11273_vm7, %v1183_v32 }
 0x17c   : > { %v1184_v33 = vpop.trf.xlu0 }
 0x17d   : > { %6397 = vmatmul.msk.f32.gmra.mxu0 %vm11273_vm7, %v1184_v33 }
 0x184   : > { %v1185_v34 = vpop.trf.xlu0 }
 0x185   : > { %6398 = vmatmul.msk.f32.gmra.mxu0 %vm11273_vm7, %v1185_v34 }
 0x18c   : > { %v1186_v35 = vpop.trf.xlu0 }
 0x18d   : > { %6399 = vmatmul.msk.f32.gmra.mxu0 %vm11273_vm7, %v1186_v35 }
 0x194   : > { %v1187_v36 = vpop.trf.xlu0 }
 0x195   : > { %6400 = vmatmul.msk.f32.gmra.mxu0 %vm11273_vm7, %v1187_v36 }
 0x19c   : > { %v1188_v37 = vpop.trf.xlu0 }
 0x19d   : > { %6401 = vmatmul.msk.f32.gmra.mxu0 %vm11273_vm7, %v1188_v37 }
 0x1a4   : > { %v1189_v38 = vpop.trf.xlu0 }
 0x1a5   : > { %6402 = vmatmul.msk.f32.gmra.mxu0 %vm11273_vm7, %v1189_v38 }
 0x1ac   : > { %v1190_v40 = vpop.trf.xlu0 }
 0x1ad   : > { %6403 = vmatmul.msk.f32.gmra.mxu0 %vm11273_vm7, %v1190_v40 }
 0x1b4   : > { %v1191_v41 = vpop.trf.xlu0 }
 0x1b5   : > { %6404 = vmatmul.msk.f32.gmra.mxu0 %vm11273_vm7, %v1191_v41 }
 0x1bc   : > { %v1192_v42 = vpop.trf.xlu0 }
 0x1bd   : > { %6405 = vmatmul.msk.f32.gmra.mxu0 %vm11273_vm7, %v1192_v42 }
 0x1c2   : > { %v1454_v43 = vpop.f32.mrf.mxu3 }
 0x1c4   : > { %v1193_v44 = vpop.trf.xlu0 }
 0x1c5   : > { %6406 = vmatmul.msk.f32.gmra.mxu0 %vm11273_vm7, %v1193_v44 }
 0x1ca   : > { %v1457_v45 = vpop.f32.mrf.mxu3 }
 0x1cb   : > { %1689 = vmatpush.msrb.mxu2 %v1457_v45  ;;  %v6909_v46 = vpack.i.bf16 %v1454_v43, %v1457_v45 }
 0x1cd   : > { %6910 = vrot.lane.b32.xlu1 %v6909_v46, %s7961_s2  ;;  %1690 = vmatpush.msrb.mxu2 %v1454_v43 }
 0x1da   : > { %v1256_v47 = vpop.f32.mrf.mxu0 }
 0x1db   : > { %v1298_v48 = vmul.f32 %v1256_v47, %v1256_v47 }
 0x1dd   : > { %v1313_v49 = vsel %vm1312_vm8, %v1298_v48, 0.0 }
 0x1de   : > { %1314 = vadd.xlane.f32.xlu2 %v1313_v49 }
 0x1e2   : > { %v1259_v50 = vpop.f32.mrf.mxu0 }
 0x1e3   : > { %v1299_v51 = vmul.f32 %v1259_v50, %v1259_v50 }
 0x1e5   : > { %v1316_v52 = vsel %vm1312_vm8, %v1299_v51, 0.0 }
 0x1e6   : > { %1317 = vadd.xlane.f32.xlu2 %v1316_v52 }
 0x1ea   : > { %v1262_v53 = vpop.f32.mrf.mxu0 }
 0x1eb   : > { %v1300_v34 = vmul.f32 %v1262_v53, %v1262_v53 }
 0x1ed   : > { %v1319_v38 = vsel %vm1312_vm8, %v1300_v34, 0.0  ;;  %v2067_v34 = vld [vmem:[#allocation14 + $0x18] sm:$0xff] }
 0x1ee   : > { %1320 = vadd.xlane.f32.xlu0 %v1319_v38  ;;  %2126 = vmatpush.msra.mxu3 %v2067_v34  ;;  %v2066_v38 = vld [vmem:[#allocation14 + $0x10] sm:$0xff] }
 0x1f0   : > { %2127 = vmatpush.msra.mxu3 %v2066_v38 }
 0x1f2   : > { %v1265_v54 = vpop.f32.mrf.mxu0 }
 0x1f3   : > { %v1301_v55 = vmul.f32 %v1265_v54, %v1265_v54 }
 0x1f5   : > { %v1322_v56 = vsel %vm1312_vm8, %v1301_v55, 0.0 }
 0x1f6   : > { %1323 = vadd.xlane.f32.xlu2 %v1322_v56 }
 0x1fa   : > { %v1268_v57 = vpop.f32.mrf.mxu0 }
 0x1fb   : > { %v1302_v58 = vmul.f32 %v1268_v57, %v1268_v57 }
 0x1fd   : > { %v1325_v60 = vsel %vm1312_vm8, %v1302_v58, 0.0 }
 0x1fe   : > { %1326 = vadd.xlane.f32.xlu2 %v1325_v60 }
 0x202   : > { %6915 = vxpose.xlu1.b32.start [1/2] (short) (narrow) %v6914_v59, 112  ;;  %v1271_v61 = vpop.f32.mrf.mxu0 }
 0x203   : > { %v1303_v62 = vmul.f32 %v1271_v61, %v1271_v61 }
 0x205   : > { %v1328_v63 = vsel %vm1312_vm8, %v1303_v62, 0.0 }
 0x206   : > { %1329 = vadd.xlane.f32.xlu2 %v1328_v63 }
 0x20a   : > { %6917 = vxpose.xlu1.b32.end [2/2] (short) (narrow) %v6916_v13, 112  ;;  %v1274_v0 = vpop.f32.mrf.mxu0 }
 0x20b   : > { %v1304_v3 = vmul.f32 %v1274_v0, %v1274_v0 }
 0x20d   : > { %v1331_v4 = vsel %vm1312_vm8, %v1304_v3, 0.0 }
 0x20e   : > { %1332 = vadd.xlane.f32.xlu2 %v1331_v4 }
 0x212   : > { %v1277_v5 = vpop.f32.mrf.mxu0 }
 0x213   : > { %v1305_v6 = vmul.f32 %v1277_v5, %v1277_v5 }
 0x215   : > { %v1334_v9 = vsel %vm1312_vm8, %v1305_v6, 0.0  ;;  %v2486_v6 = vld [vmem:[#allocation15 + $0x18] sm:$0xff] }
 0x216   : > { %1335 = vadd.xlane.f32.xlu2 %v1334_v9  ;;  %v2485_v9 = vld [vmem:[#allocation15 + $0x10] sm:$0xff]  ;;  %2532 = vmatpush.msra.mxu2 %v2486_v6 }
 0x218   : > { %2533 = vmatpush.msra.mxu2 %v2485_v9 }
 0x21a   : > { %v1280_v12 = vpop.f32.mrf.mxu0 }
 0x21b   : > { %v1306_v14 = vmul.f32 %v1280_v12, %v1280_v12  ;;  %v2484_v12 = vld [vmem:[#allocation15 + $0x8] sm:$0xff] }
 0x21c   : > { %2534 = vmatpush.msra.mxu2 %v2484_v12 }
 0x21d   : > { %v1337_v15 = vsel %vm1312_vm8, %v1306_v14, 0.0  ;;  %v2483_v14 = vld [vmem:[#allocation15] sm:$0xff] }
 0x21e   : > { %1338 = vadd.xlane.f32.xlu2 %v1337_v15  ;;  %2535 = vmatpush.msra.mxu2 %v2483_v14 }
 0x222   : > { %v1283_v16 = vpop.f32.mrf.mxu0 }
 0x223   : > { %v1307_v17 = vmul.f32 %v1283_v16, %v1283_v16 }
 0x225   : > { %v1340_v11 = vsel %vm1312_vm8, %v1307_v17, 0.0 }
 0x226   : > { %1341 = vadd.xlane.f32.xlu2 %v1340_v11 }
 0x22a   : > { %v8438_v13 = vpop.f32.mrf.mxu0 }
 0x22b   : > { %v1308_v60 = vmul.f32 %v8438_v13, %v8438_v13 }
 0x22d   : > { %v1343_v0 = vsel %vm1312_vm8, %v1308_v60, 0.0 }
 0x232   : > { %v1289_v18 = vpop.f32.mrf.mxu0 }
 0x233   : > { %v1309_v19 = vmul.f32 %v1289_v18, %v1289_v18 }
 0x235   : > { %v1346_v20 = vsel %vm1312_vm8, %v1309_v19, 0.0 }
 0x236   : > { %1347 = vadd.xlane.f32.xlu2 %v1346_v20 }
 0x23a   : > { %v1292_v21 = vpop.f32.mrf.mxu0 }
 0x23b   : > { %v1310_v22 = vmul.f32 %v1292_v21, %v1292_v21 }
 0x23d   : > { %v1349_v24 = vsel %vm1312_vm8, %v1310_v22, 0.0 }
 0x23e   : > { %1350 = vadd.xlane.f32.xlu2 %v1349_v24 }
 0x23f   : > { %v6911_v23 = vpop.permute.xlu1 %6910 }
 0x240   : > { %v6912_v29 = vunpack.i.l.bf16 %v6911_v23  ;;  %v6913_v30 = vunpack.i.h.bf16 %v6911_v23 }
 0x242   : > { %1556 = vmatpush.msrb.mxu1 %v6912_v29  ;;  %v1295_v31 = vpop.f32.mrf.mxu0  ;;  %v8563_v29 = vpop.f32.mrf.mxu2 }
 0x243   : > { %v1311_v32 = vmul.f32 %v1295_v31, %v1295_v31  ;;  %11394 = vst [vmem:[#allocation71_spill] sm:$0xff] %v8563_v29 }
 0x244   : > { %1557 = vmatpush.msrb.mxu1 %v6913_v30 }
 0x245   : > { %v1352_v33 = vsel %vm1312_vm8, %v1311_v32, 0.0 }
 0x246   : > { %1353 = vadd.xlane.f32.xlu2 %v1352_v33  ;;  %v8576_v33 = vld [vmem:[%s11397_s15] ss:$0 sm:$0xff] }
 0x24a   : > { %v8571_v31 = vpop.f32.mrf.mxu2 }
 0x24b   : > { %11396 = vst [vmem:[#allocation73_spill] sm:$0xff] %v8571_v31 }
 0x251   : > { %v8569_v30 = vpop.xlane.xlu2 %1314 }
 0x252   : > { %11395 = vst [vmem:[#allocation72_spill] sm:$0xff] %v8569_v30 }
 0x25e   : > { %2545 = vrot.lane.b32.xlu2 %v8392_v25, %s7961_s2 }
 0x261   : > { %v8592_v14 = vpop.xlane.xlu0 %1320 }
 0x262   : > { %11401 = vst [vmem:[#allocation76_spill] sm:$0xff] %v8592_v14 }
 0x266   : > { %2547 = vrot.lane.b32.xlu2 %v8399_v27, %s7961_s2 }
 0x2a6   : > { %v6918_v35 = vpop.trf.xlu1 }
 0x2a7   : > { %v8447_v36 = vunpack.i.h.bf16 %v6918_v35  ;;  %v8449_v37 = vunpack.i.l.bf16 %v6918_v35  ;;  %v1738_v35 = vmul.f32 %v8576_v33, %v8569_v30 }
 0x2a9   : > { %11366 = vst [vmem:[#allocation43_spill] sm:$0xff] %v8447_v36  ;;  %6415 = vmatmul.msk.f32.vlgmr.msrb.gmra.mxu1 %vm11273_vm7, %v8447_v36  ;;  %6429 = vmatmul.msk.f32.vlgmr.msrb.gmra.mxu2 %vm11273_vm7, %v8449_v37 }
 0x2aa   : > { %11367 = vst [vmem:[#allocation44_spill] sm:$0xff] %v8449_v37 }
 0x2ae   : > { %v6923_v39 = vpop.trf.xlu1 }
 0x2af   : > { %v8456_v40 = vunpack.i.h.bf16 %v6923_v39  ;;  %v8458_v41 = vunpack.i.l.bf16 %v6923_v39 }
 0x2b1   : > { %11368 = vst [vmem:[#allocation45_spill] sm:$0xff] %v8456_v40  ;;  %6416 = vmatmul.msk.f32.gmra.mxu1 %vm11273_vm7, %v8456_v40  ;;  %6430 = vmatmul.msk.f32.gmra.mxu2 %vm11273_vm7, %v8458_v41 }
 0x2b2   : > { %11369 = vst [vmem:[#allocation46_spill] sm:$0xff] %v8458_v41 }
 0x2b6   : > { %v6928_v42 = vpop.trf.xlu1 }
 0x2b7   : > { %v8464_v43 = vunpack.i.h.bf16 %v6928_v42  ;;  %v8466_v44 = vunpack.i.l.bf16 %v6928_v42  ;;  %v8585_v42 = vld [vmem:[%s11399_s24] ss:$0 sm:$0xff] }
 0x2b9   : > { %11370 = vst [vmem:[#allocation47_spill] sm:$0xff] %v8464_v43  ;;  %6417 = vmatmul.msk.f32.gmra.mxu1 %vm11273_vm7, %v8464_v43  ;;  %6431 = vmatmul.msk.f32.gmra.mxu2 %vm11273_vm7, %v8466_v44 }
 0x2ba   : > { %11371 = vst [vmem:[#allocation48_spill] sm:$0xff] %v8466_v44 }
 0x2be   : > { %v6933_v45 = vpop.trf.xlu1 }
 0x2bf   : > { %v8472_v46 = vunpack.i.h.bf16 %v6933_v45  ;;  %v8474_v47 = vunpack.i.l.bf16 %v6933_v45  ;;  %v2065_v45 = vld [vmem:[#allocation14 + $0x8] sm:$0xff] }
 0x2c0   : > { %2128 = vmatpush.msra.mxu3 %v2065_v45 }
 0x2c1   : > { %11372 = vst [vmem:[#allocation49_spill] sm:$0xff] %v8472_v46  ;;  %6418 = vmatmul.msk.f32.gmra.mxu1 %vm11273_vm7, %v8472_v46  ;;  %6432 = vmatmul.msk.f32.gmra.mxu2 %vm11273_vm7, %v8474_v47 }
 0x2c2   : > { %11373 = vst [vmem:[#allocation50_spill] sm:$0xff] %v8474_v47 }
 0x2c6   : > { %v6938_v48 = vpop.trf.xlu1 }
 0x2c7   : > { %v8480_v49 = vunpack.i.h.bf16 %v6938_v48  ;;  %v8482_v50 = vunpack.i.l.bf16 %v6938_v48 }
 0x2c9   : > { %11374 = vst [vmem:[#allocation51_spill] sm:$0xff] %v8480_v49  ;;  %6419 = vmatmul.msk.f32.gmra.mxu1 %vm11273_vm7, %v8480_v49  ;;  %6433 = vmatmul.msk.f32.gmra.mxu2 %vm11273_vm7, %v8482_v50 }
 0x2ca   : > { %11375 = vst [vmem:[#allocation52_spill] sm:$0xff] %v8482_v50  ;;  %1344 = vadd.xlane.f32.xlu1 %v1343_v0 }
 0x2ce   : > { %v6943_v51 = vpop.trf.xlu1 }
 0x2cf   : > { %v8488_v52 = vunpack.i.h.bf16 %v6943_v51  ;;  %v8490_v53 = vunpack.i.l.bf16 %v6943_v51 }
 0x2d1   : > { %11376 = vst [vmem:[#allocation53_spill] sm:$0xff] %v8488_v52  ;;  %6420 = vmatmul.msk.f32.gmra.mxu1 %vm11273_vm7, %v8488_v52  ;;  %6434 = vmatmul.msk.f32.gmra.mxu2 %vm11273_vm7, %v8490_v53 }
 0x2d2   : > { %11377 = vst [vmem:[#allocation54_spill] sm:$0xff] %v8490_v53 }
 0x2d6   : > { %v6948_v54 = vpop.trf.xlu1 }
 0x2d7   : > { %v8496_v55 = vunpack.i.h.bf16 %v6948_v54  ;;  %v8498_v56 = vunpack.i.l.bf16 %v6948_v54  ;;  %v2064_v54 = vld [vmem:[#allocation14] sm:$0xff] }
 0x2d8   : > { %2129 = vmatpush.msra.mxu3 %v2064_v54 }
 0x2d9   : > { %11378 = vst [vmem:[#allocation55_spill] sm:$0xff] %v8496_v55  ;;  %6421 = vmatmul.msk.f32.gmra.mxu1 %vm11273_vm7, %v8496_v55  ;;  %6435 = vmatmul.msk.f32.gmra.mxu2 %vm11273_vm7, %v8498_v56 }
 0x2da   : > { %11379 = vst [vmem:[#allocation56_spill] sm:$0xff] %v8498_v56 }
 0x2de   : > { %v6953_v57 = vpop.trf.xlu1 }
 0x2df   : > { %v8504_v58 = vunpack.i.h.bf16 %v6953_v57  ;;  %v8506_v59 = vunpack.i.l.bf16 %v6953_v57 }
 0x2e1   : > { %11380 = vst [vmem:[#allocation57_spill] sm:$0xff] %v8504_v58  ;;  %6422 = vmatmul.msk.f32.gmra.mxu1 %vm11273_vm7, %v8504_v58  ;;  %6436 = vmatmul.msk.f32.gmra.mxu2 %vm11273_vm7, %v8506_v59 }
 0x2e2   : > { %11381 = vst [vmem:[#allocation58_spill] sm:$0xff] %v8506_v59 }
 0x2e6   : > { %v6958_v61 = vpop.trf.xlu1 }
 0x2e7   : > { %v8514_v62 = vunpack.i.h.bf16 %v6958_v61  ;;  %v8516_v63 = vunpack.i.l.bf16 %v6958_v61 }
 0x2e9   : > { %11382 = vst [vmem:[#allocation59_spill] sm:$0xff] %v8514_v62  ;;  %6423 = vmatmul.msk.f32.gmra.mxu1 %vm11273_vm7, %v8514_v62  ;;  %6437 = vmatmul.msk.f32.gmra.mxu2 %vm11273_vm7, %v8516_v63 }
 0x2ea   : > { %11383 = vst [vmem:[#allocation60_spill] sm:$0xff] %v8516_v63 }
 0x2ee   : > { %v6963_v3 = vpop.trf.xlu1 }
 0x2ef   : > { %v8523_v4 = vunpack.i.h.bf16 %v6963_v3  ;;  %v8525_v5 = vunpack.i.l.bf16 %v6963_v3 }
 0x2f1   : > { %11384 = vst [vmem:[#allocation61_spill] sm:$0xff] %v8523_v4  ;;  %6424 = vmatmul.msk.f32.gmra.mxu1 %vm11273_vm7, %v8523_v4  ;;  %6438 = vmatmul.msk.f32.gmra.mxu2 %vm11273_vm7, %v8525_v5 }
 0x2f2   : > { %11385 = vst [vmem:[#allocation62_spill] sm:$0xff] %v8525_v5 }
 0x2f6   : > { %v6968_v15 = vpop.trf.xlu1 }
 0x2f7   : > { %v8531_v16 = vunpack.i.h.bf16 %v6968_v15  ;;  %v8533_v17 = vunpack.i.l.bf16 %v6968_v15 }
 0x2f9   : > { %11386 = vst [vmem:[#allocation63_spill] sm:$0xff] %v8531_v16  ;;  %6425 = vmatmul.msk.f32.gmra.mxu1 %vm11273_vm7, %v8531_v16  ;;  %6439 = vmatmul.msk.f32.gmra.mxu2 %vm11273_vm7, %v8533_v17 }
 0x2fa   : > { %11387 = vst [vmem:[#allocation64_spill] sm:$0xff] %v8533_v17 }
 0x2fe   : > { %v6973_v11 = vpop.trf.xlu1 }
 0x2ff   : > { %v8539_v13 = vunpack.i.h.bf16 %v6973_v11  ;;  %v8541_v18 = vunpack.i.l.bf16 %v6973_v11 }
 0x301   : > { %11388 = vst [vmem:[#allocation65_spill] sm:$0xff] %v8539_v13  ;;  %6426 = vmatmul.msk.f32.gmra.mxu1 %vm11273_vm7, %v8539_v13  ;;  %6440 = vmatmul.msk.f32.gmra.mxu2 %vm11273_vm7, %v8541_v18 }
 0x302   : > { %11389 = vst [vmem:[#allocation66_spill] sm:$0xff] %v8541_v18 }
 0x306   : > { %v6978_v19 = vpop.trf.xlu1 }
 0x307   : > { %v8547_v20 = vunpack.i.h.bf16 %v6978_v19  ;;  %v8549_v21 = vunpack.i.l.bf16 %v6978_v19 }
 0x309   : > { %11390 = vst [vmem:[#allocation67_spill] sm:$0xff] %v8547_v20  ;;  %6427 = vmatmul.msk.f32.gmra.mxu1 %vm11273_vm7, %v8547_v20  ;;  %6441 = vmatmul.msk.f32.gmra.mxu2 %vm11273_vm7, %v8549_v21 }
 0x30a   : > { %11391 = vst [vmem:[#allocation68_spill] sm:$0xff] %v8549_v21 }
 0x30e   : > { %v6983_v22 = vpop.trf.xlu1 }
 0x30f   : > { %v8555_v23 = vunpack.i.h.bf16 %v6983_v22  ;;  %v8557_v24 = vunpack.i.l.bf16 %v6983_v22  ;;  %v1740_v22 = vmul.f32 %v8576_v33, %v8592_v14 }
 0x311   : > { %11392 = vst [vmem:[#allocation69_spill] sm:$0xff] %v8555_v23  ;;  %6428 = vmatmul.msk.f32.gmra.mxu1 %vm11273_vm7, %v8555_v23  ;;  %6442 = vmatmul.msk.f32.gmra.mxu2 %vm11273_vm7, %v8557_v24 }
 0x312   : > { %11393 = vst [vmem:[#allocation70_spill] sm:$0xff] %v8557_v24 }
 0x319   : > { %6489 = vmatmul.msk.f32.vlgmr.msra.gmra.mxu2 %vm11274_vm6, %v8395_v26  ;;  %v8580_v26 = vpop.xlane.xlu2 %1317 }
 0x31a   : > { %11398 = vst [vmem:[#allocation74_spill] sm:$0xff] %v8580_v26  ;;  %v1739_v61 = vmul.f32 %v8576_v33, %v8580_v26 }
 0x321   : > { %6490 = vmatmul.msk.f32.gmra.mxu2 %vm11274_vm6, %v8402_v28  ;;  %v8590_v6 = vpop.xlane.xlu2 %1323 }
 0x322   : > { %11400 = vst [vmem:[#allocation75_spill] sm:$0xff] %v8590_v6 }
 0x326   : > { %v1559_v32 = vpop.f32.mrf.mxu1 }
 0x32c   : > { %v1692_v39 = vpop.f32.mrf.mxu2 }
 0x32d   : > { %v1693_v28 = vadd.f32 %v1692_v39, %v1559_v32 }
 0x32e   : > { %v1562_v48 = vpop.f32.mrf.mxu1 }
 0x32f   : > { %v1752_v51 = vadd.f32 %v1738_v35, %v1693_v28  ;;  %v8600_v28 = vpop.xlane.xlu2 %1326 }
 0x330   : > { %11402 = vst [vmem:[#allocation77_spill] sm:$0xff] %v8600_v28 }
 0x331   : > { %v1770_v57 = vadd.f32 %v8585_v42, %v1752_v51  ;;  %v1741_v51 = vmul.f32 %v8576_v33, %v8590_v6 }
 0x333   : > { %v6443_v60 = vmul.f32 -1.442695, %v1770_v57 }
 0x334   : > { %v1695_v0 = vpop.f32.mrf.mxu2 }
 0x335   : > { %7032 = vpow2.f32 %v6443_v60  ;;  %v1696_v3 = vadd.f32 %v1695_v0, %v1562_v48 }
 0x336   : > { %v1565_v9 = vpop.f32.mrf.mxu1 }
 0x337   : > { %v1753_v12 = vadd.f32 %v1739_v61, %v1696_v3  ;;  %v8611_v7 = vpop.xlane.xlu2 %1329 }
 0x338   : > { %11403 = vst [vmem:[#allocation78_spill] sm:$0xff] %v8611_v7 }
 0x339   : > { %v8595_v15 = vadd.f32 %v8585_v42, %v1753_v12 }
 0x33b   : > { %v7033_v11 = vpop.eup %7032  ;;  %v6444_v19 = vmul.f32 -1.442695, %v8595_v15 }
 0x33c   : > { %v1826_v32 = vadd.f32 1.0, %v7033_v11  ;;  %v1698_v34 = vpop.f32.mrf.mxu2 }
 0x33d   : > { %7034 = vpow2.f32 %v6444_v19  ;;  %v1699_v35 = vadd.f32 %v1698_v34, %v1565_v9 }
 0x33e   : > { %7036 = vrcp.f32 %v1826_v32  ;;  %v1568_v38 = vpop.f32.mrf.mxu1  ;;  %v1851_v34 = vand.u32 2147483648, %v1826_v32  ;;  %vm1845_vm10 = vweird.f32 %v1826_v32 }
 0x33f   : > { %v1754_v39 = vadd.f32 %v1740_v22, %v1699_v35  ;;  %v1849_v22 = vand.u32 2147483647, %v1826_v32 }
 0x341   : > { %v8603_v45 = vadd.f32 %v8585_v42, %v1754_v39  ;;  %vm1850_vm12 = vcmp.eq.f32.partialorder %v1849_v22, 8.507059e+37 }
 0x343   : > { %v7035_v48 = vpop.eup %7034  ;;  %v6445_v54 = vmul.f32 -1.442695, %v8603_v45 }
 0x344   : > { %v7037_v60 = vpop.eup %7036  ;;  %v1827_v61 = vadd.f32 1.0, %v7035_v48  ;;  %v1701_v0 = vpop.f32.mrf.mxu2 }
 0x345   : > { %v1841_v3 = vmul.f32 %v7037_v60, %v1826_v32  ;;  %v1702_v12 = vadd.f32 %v1701_v0, %v1568_v38  ;;  %7038 = vpow2.f32 %v6445_v54  ;;  %vm1846_vm9 = vweird.f32 %v7037_v60 }
 0x346   : > { %7040 = vrcp.f32 %v1827_v61  ;;  %v1571_v9 = vpop.f32.mrf.mxu1  ;;  %v1742_v38 = vmul.f32 %v8576_v33, %v8600_v28  ;;  %vm1847_vm11 = vmor %vm1845_vm10, %vm1846_vm9  ;;  %v1864_v14 = vand.u32 2147483647, %v1827_v61  ;;  %v1866_v26 = vand.u32 2147483648, %v1827_v61 }
 0x347   : > { %v1842_v11 = vsub.f32 1.0, %v1841_v3  ;;  %v1755_v19 = vadd.f32 %v1741_v51, %v1702_v12  ;;  %v1852_v51 = vor.u32 1.1754944e-38, %v1851_v34  ;;  %vm1860_vm14 = vweird.f32 %v1827_v61 }
 0x348   : > { %vm1865_vm0 = vcmp.eq.f32.partialorder %v1864_v14, 8.507059e+37 }
 0x349   : > { %v1843_v35 = vmul.f32 %v7037_v60, %v1842_v11  ;;  %v8609_v39 = vadd.f32 %v8585_v42, %v1755_v19 }
 0x34b   : > { %v7039_v1 = vpop.eup %7038  ;;  %v1844_v2 = vadd.f32 %v7037_v60, %v1843_v35  ;;  %v6446_v48 = vmul.f32 -1.442695, %v8609_v39 }
 0x34c   : > { %v7041_v54 = vpop.eup %7040  ;;  %v1704_v0 = vpop.f32.mrf.mxu2  ;;  %v1828_v3 = vadd.f32 1.0, %v7039_v1 }
 0x34d   : > { %v1848_v12 = vsel %vm1847_vm11, %v7037_v60, %v1844_v2  ;;  %7042 = vpow2.f32 %v6446_v48  ;;  %v1705_v11 = vadd.f32 %v1704_v0, %v1571_v9  ;;  %v1856_v19 = vmul.f32 %v7041_v54, %v1827_v61 }
 0x34e   : > { %v1853_v31 = vsel %vm1850_vm12, %v1852_v51, %v1848_v12  ;;  %v1574_v29 = vpop.f32.mrf.mxu1  ;;  %7044 = vrcp.f32 %v1828_v3  ;;  %vm1861_vm13 = vweird.f32 %v7041_v54  ;;  %v1743_v60 = vmul.f32 %v8576_v33, %v8611_v7 }
 0x34f   : > { %v2050_v35 = vmul.f32 %v1853_v31, %v1770_v57  ;;  %v1756_v32 = vadd.f32 %v1742_v38, %v1705_v11  ;;  %v1857_v6 = vsub.f32 1.0, %v1856_v19  ;;  %v8623_v57 = vpop.xlane.xlu2 %1332  ;;  %vm1862_vm15 = vmor %vm1860_vm14, %vm1861_vm13  ;;  %v1867_v38 = vor.u32 1.1754944e-38, %v1866_v26 }
 0x350   : > { %11404 = vst [vmem:[#allocation79_spill] sm:$0xff] %v8623_v57  ;;  %v1879_v61 = vand.u32 2147483647, %v1828_v3  ;;  %vm1875_vm2 = vweird.f32 %v1828_v3 }
 0x351   : > { %v8617_v28 = vadd.f32 %v8585_v42, %v1756_v32  ;;  %6457 = vmatmul.msk.f32.vlgmr.msra.gmra.mxu3 %vm11274_vm6, %v2050_v35  ;;  %v1858_v22 = vmul.f32 %v7041_v54, %v1857_v6 }
 0x352   : > { %vm1880_vm4 = vcmp.eq.f32.partialorder %v1879_v61, 8.507059e+37 }
 0x353   : > { %v7043_v1 = vpop.eup %7042  ;;  %v6447_v2 = vmul.f32 -1.442695, %v8617_v28  ;;  %v1859_v9 = vadd.f32 %v7041_v54, %v1858_v22  ;;  %v1881_v22 = vand.u32 2147483648, %v1828_v3 }
 0x354   : > { %v7045_v31 = vpop.eup %7044  ;;  %v1829_v34 = vadd.f32 1.0, %v7043_v1  ;;  %v1707_v48 = vpop.f32.mrf.mxu2 }
 0x355   : > { %7046 = vpow2.f32 %v6447_v2  ;;  %v1708_v51 = vadd.f32 %v1707_v48, %v1574_v29  ;;  %v1863_v6 = vsel %vm1862_vm15, %v7041_v54, %v1859_v9  ;;  %v1871_v0 = vmul.f32 %v7045_v31, %v1828_v3 }
 0x356   : > { %7048 = vrcp.f32 %v1829_v34  ;;  %v1577_v12 = vpop.f32.mrf.mxu1  ;;  %v1868_v11 = vsel %vm1865_vm0, %v1867_v38, %v1863_v6  ;;  %vm1876_vm1 = vweird.f32 %v7045_v31  ;;  %v1744_v54 = vmul.f32 %v8576_v33, %v8623_v57 }
 0x357   : > { %v1757_v19 = vadd.f32 %v1743_v60, %v1708_v51  ;;  %v2051_v35 = vmul.f32 %v1868_v11, %v8595_v15  ;;  %v1872_v32 = vsub.f32 1.0, %v1871_v0  ;;  %vm1877_vm3 = vmor %vm1875_vm2, %vm1876_vm1  ;;  %v1882_v9 = vor.u32 1.1754944e-38, %v1881_v22  ;;  %v8633_v6 = vpop.xlane.xlu2 %1335 }
 0x358   : > { %11405 = vst [vmem:[#allocation80_spill] sm:$0xff] %v8633_v6  ;;  %v1894_v3 = vand.u32 2147483647, %v1829_v34  ;;  %v1745_v22 = vmul.f32 %v8576_v33, %v8633_v6  ;;  %vm1890_vm8 = vweird.f32 %v1829_v34 }
 0x359   : > { %v8627_v7 = vadd.f32 %v8585_v42, %v1757_v19  ;;  %6458 = vmatmul.msk.f32.gmra.mxu3 %vm11274_vm6, %v2051_v35  ;;  %v1873_v14 = vmul.f32 %v7045_v31, %v1872_v32 }
 0x35a   : > { %vm1895_vm10 = vcmp.eq.f32.partialorder %v1894_v3, 8.507059e+37 }
 0x35b   : > { %v7047_v26 = vpop.eup %7046  ;;  %v6448_v29 = vmul.f32 -1.442695, %v8627_v7  ;;  %v1874_v1 = vadd.f32 %v7045_v31, %v1873_v14  ;;  %v1896_v14 = vand.u32 2147483648, %v1829_v34 }
 0x35c   : > { %v7049_v2 = vpop.eup %7048  ;;  %v1830_v15 = vadd.f32 1.0, %v7047_v26  ;;  %v1710_v60 = vpop.f32.mrf.mxu2 }
 0x35d   : > { %7050 = vpow2.f32 %v6448_v29  ;;  %v1711_v48 = vadd.f32 %v1710_v60, %v1577_v12  ;;  %v1878_v38 = vsel %vm1877_vm3, %v7045_v31, %v1874_v1  ;;  %v1886_v51 = vmul.f32 %v7049_v2, %v1829_v34 }
 0x35e   : > { %7052 = vrcp.f32 %v1830_v15  ;;  %v1580_v0 = vpop.f32.mrf.mxu1  ;;  %v1883_v11 = vsel %vm1880_vm4, %v1882_v9, %v1878_v38  ;;  %vm1891_vm5 = vweird.f32 %v7049_v2  ;;  %v1897_v60 = vor.u32 1.1754944e-38, %v1896_v14 }
 0x35f   : > { %v1758_v19 = vadd.f32 %v1744_v54, %v1711_v48  ;;  %v2052_v35 = vmul.f32 %v1883_v11, %v8603_v45  ;;  %v1887_v32 = vsub.f32 1.0, %v1886_v51  ;;  %vm1892_vm9 = vmor %vm1890_vm8, %vm1891_vm5  ;;  %v8644_v6 = vpop.xlane.xlu2 %1338  ;;  %v1909_v34 = vand.u32 2147483647, %v1830_v15 }
 0x360   : > { %11406 = vst [vmem:[#allocation81_spill] sm:$0xff] %v8644_v6  ;;  %v1746_v14 = vmul.f32 %v8576_v33, %v8644_v6  ;;  %vm1905_vm12 = vweird.f32 %v1830_v15 }
 0x361   : > { %v8637_v26 = vadd.f32 %v8585_v42, %v1758_v19  ;;  %6459 = vmatmul.msk.f32.gmra.mxu3 %vm11274_vm6, %v2052_v35  ;;  %v1888_v61 = vmul.f32 %v7049_v2, %v1887_v32  ;;  %vm1910_vm14 = vcmp.eq.f32.partialorder %v1909_v34, 8.507059e+37 }
 0x363   : > { %v7051_v31 = vpop.eup %7050  ;;  %v6449_v12 = vmul.f32 -1.442695, %v8637_v26  ;;  %v1889_v29 = vadd.f32 %v7049_v2, %v1888_v61  ;;  %v1911_v61 = vand.u32 2147483648, %v1830_v15 }
 0x364   : > { %v7053_v54 = vpop.eup %7052  ;;  %v1831_v45 = vadd.f32 1.0, %v7051_v31  ;;  %v1713_v1 = vpop.f32.mrf.mxu2 }
 0x365   : > { %7054 = vpow2.f32 %v6449_v12  ;;  %v1714_v9 = vadd.f32 %v1713_v1, %v1580_v0  ;;  %v1893_v48 = vsel %vm1892_vm9, %v7049_v2, %v1889_v29  ;;  %v1901_v38 = vmul.f32 %v7053_v54, %v1830_v15 }
 0x366   : > { %7056 = vrcp.f32 %v1831_v45  ;;  %v1583_v51 = vpop.f32.mrf.mxu1  ;;  %v1898_v11 = vsel %vm1895_vm10, %v1897_v60, %v1893_v48  ;;  %vm1906_vm11 = vweird.f32 %v7053_v54  ;;  %v1912_v1 = vor.u32 1.1754944e-38, %v1911_v61 }
 0x367   : > { %v1759_v19 = vadd.f32 %v1745_v22, %v1714_v9  ;;  %v2053_v35 = vmul.f32 %v1898_v11, %v8609_v39  ;;  %v1902_v32 = vsub.f32 1.0, %v1901_v38  ;;  %vm1907_vm13 = vmor %vm1905_vm12, %vm1906_vm11  ;;  %v1924_v6 = vand.u32 2147483647, %v1831_v45  ;;  %v8658_v61 = vpop.xlane.xlu2 %1341 }
 0x368   : > { %11407 = vst [vmem:[#allocation82_spill] sm:$0xff] %v8658_v61  ;;  %vm1920_vm0 = vweird.f32 %v1831_v45 }
 0x369   : > { %v8647_v31 = vadd.f32 %v8585_v42, %v1759_v19  ;;  %6460 = vmatmul.msk.f32.gmra.mxu3 %vm11274_vm6, %v2053_v35  ;;  %v1903_v3 = vmul.f32 %v7053_v54, %v1902_v32  ;;  %vm1925_vm2 = vcmp.eq.f32.partialorder %v1924_v6, 8.507059e+37 }
 0x36b   : > { %v7055_v2 = vpop.eup %7054  ;;  %v6450_v0 = vmul.f32 -1.442695, %v8647_v31  ;;  %v1904_v12 = vadd.f32 %v7053_v54, %v1903_v3  ;;  %v1926_v3 = vand.u32 2147483648, %v1831_v45 }
 0x36c   : > { %v7057_v39 = vpop.eup %7056  ;;  %v1832_v22 = vadd.f32 1.0, %v7055_v2  ;;  %v1716_v29 = vpop.f32.mrf.mxu2  ;;  %v1747_v2 = vmul.f32 %v8576_v33, %v8658_v61 }
 0x36d   : > { %7058 = vpow2.f32 %v6450_v0  ;;  %v1717_v60 = vadd.f32 %v1716_v29, %v1583_v51  ;;  %v1908_v9 = vsel %vm1907_vm13, %v7053_v54, %v1904_v12  ;;  %v1916_v48 = vmul.f32 %v7057_v39, %v1831_v45  ;;  %v8667_v45 = vpop.xlane.xlu1 %1344 }
 0x36e   : > { %7060 = vrcp.f32 %v1832_v22  ;;  %v1586_v38 = vpop.f32.mrf.mxu1  ;;  %v1913_v11 = vsel %vm1910_vm14, %v1912_v1, %v1908_v9  ;;  %vm1921_vm15 = vweird.f32 %v7057_v39  ;;  %v1927_v29 = vor.u32 1.1754944e-38, %v1926_v3  ;;  %11408 = vst [vmem:[#allocation83_spill] sm:$0xff] %v8667_v45 }
 0x36f   : > { %v1760_v19 = vadd.f32 %v1746_v14, %v1717_v60  ;;  %v2054_v35 = vmul.f32 %v1913_v11, %v8617_v28  ;;  %v1917_v32 = vsub.f32 1.0, %v1916_v48  ;;  %vm1922_vm1 = vmor %vm1920_vm0, %vm1921_vm15  ;;  %v1748_v3 = vmul.f32 %v8576_v33, %v8667_v45 }
 0x370   : > { %vm1935_vm4 = vweird.f32 %v1832_v22 }
 0x371   : > { %v8655_v15 = vadd.f32 %v8585_v42, %v1760_v19  ;;  %6461 = vmatmul.msk.f32.gmra.mxu3 %vm11274_vm6, %v2054_v35  ;;  %v1918_v34 = vmul.f32 %v7057_v39, %v1917_v32 }
 0x373   : > { %v7059_v54 = vpop.eup %7058  ;;  %v6451_v51 = vmul.f32 -1.442695, %v8655_v15  ;;  %v1919_v0 = vadd.f32 %v7057_v39, %v1918_v34  ;;  %v1939_v34 = vand.u32 2147483647, %v1832_v22 }
 0x374   : > { %v7061_v28 = vpop.eup %7060  ;;  %v8663_v14 = vadd.f32 1.0, %v7059_v54  ;;  %v1719_v12 = vpop.f32.mrf.mxu2  ;;  %v1941_v54 = vand.u32 2147483648, %v1832_v22 }
 0x375   : > { %7062 = vpow2.f32 %v6451_v51  ;;  %v1720_v1 = vadd.f32 %v1719_v12, %v1586_v38  ;;  %v1923_v60 = vsel %vm1922_vm1, %v7057_v39, %v1919_v0  ;;  %v1931_v9 = vmul.f32 %v7061_v28, %v1832_v22 }
 0x376   : > { %7064 = vrcp.f32 %v8663_v14  ;;  %v1589_v48 = vpop.f32.mrf.mxu1  ;;  %v1928_v11 = vsel %vm1925_vm2, %v1927_v29, %v1923_v60  ;;  %vm1936_vm3 = vweird.f32 %v7061_v28  ;;  %vm1940_vm8 = vcmp.eq.f32.partialorder %v1939_v34, 8.507059e+37 }
 0x377   : > { %v1761_v19 = vadd.f32 %v1747_v2, %v1720_v1  ;;  %v2055_v35 = vmul.f32 %v1928_v11, %v8627_v7  ;;  %v1932_v32 = vsub.f32 1.0, %v1931_v9  ;;  %vm1937_vm5 = vmor %vm1935_vm4, %vm1936_vm3  ;;  %v1942_v12 = vor.u32 1.1754944e-38, %v1941_v54  ;;  %v8677_v9 = vpop.xlane.xlu2 %1347 }
 0x378   : > { %11409 = vst [vmem:[#allocation84_spill] sm:$0xff] %v8677_v9  ;;  %vm1950_vm10 = vweird.f32 %v8663_v14 }
 0x379   : > { %v8670_v61 = vadd.f32 %v8585_v42, %v1761_v19  ;;  %6462 = vmatmul.msk.f32.gmra.mxu3 %vm11274_vm6, %v2055_v35  ;;  %v1933_v6 = vmul.f32 %v7061_v28, %v1932_v32 }
 0x37b   : > { %v7063_v39 = vpop.eup %7062  ;;  %v6452_v38 = vmul.f32 -1.442695, %v8670_v61  ;;  %v1934_v51 = vadd.f32 %v7061_v28, %v1933_v6  ;;  %v1956_v6 = vand.u32 2147483648, %v8663_v14 }
 0x37c   : > { %v7065_v7 = vpop.eup %7064  ;;  %v1834_v2 = vadd.f32 1.0, %v7063_v39  ;;  %v1722_v0 = vpop.f32.mrf.mxu2  ;;  %v1749_v39 = vmul.f32 %v8576_v33, %v8677_v9 }
 0x37d   : > { %7066 = vpow2.f32 %v6452_v38  ;;  %v1723_v29 = vadd.f32 %v1722_v0, %v1589_v48  ;;  %v1938_v1 = vsel %vm1937_vm5, %v7061_v28, %v1934_v51  ;;  %v1946_v60 = vmul.f32 %v7065_v7, %v8663_v14 }
 0x37e   : > { %7068 = vrcp.f32 %v1834_v2  ;;  %v1943_v11 = vsel %vm1940_vm8, %v1942_v12, %v1938_v1  ;;  %v1592_v22 = vpop.f32.mrf.mxu1  ;;  %vm1951_vm9 = vweird.f32 %v7065_v7  ;;  %v1954_v48 = vand.u32 2147483647, %v8663_v14 }
 0x37f   : > { %v1762_v19 = vadd.f32 %v1748_v3, %v1723_v29  ;;  %v2056_v35 = vmul.f32 %v1943_v11, %v8637_v26  ;;  %v1947_v32 = vsub.f32 1.0, %v1946_v60  ;;  %vm1952_vm11 = vmor %vm1950_vm10, %vm1951_vm9  ;;  %v1957_v0 = vor.u32 1.1754944e-38, %v1956_v6  ;;  %v8694_v14 = vpop.xlane.xlu2 %1350 }
 0x380   : > { %vm1955_vm12 = vcmp.eq.f32.partialorder %v1954_v48, 8.507059e+37  ;;  %11410 = vst [vmem:[#allocation85_spill] sm:$0xff] %v8694_v14  ;;  %vm1965_vm14 = vweird.f32 %v1834_v2 }
 0x381   : > { %6463 = vmatmul.msk.f32.gmra.mxu3 %vm11274_vm6, %v2056_v35  ;;  %v1948_v34 = vmul.f32 %v7065_v7, %v1947_v32  ;;  %v8684_v28 = vadd.f32 %v8585_v42, %v1762_v19 }
 0x383   : > { %v7067_v54 = vpop.eup %7066  ;;  %v1949_v38 = vadd.f32 %v7065_v7, %v1948_v34  ;;  %v6453_v12 = vmul.f32 -1.442695, %v8684_v28  ;;  %v1969_v34 = vand.u32 2147483647, %v1834_v2 }
 0x384   : > { %v7069_v26 = vpop.eup %7068  ;;  %v8689_v3 = vadd.f32 1.0, %v7067_v54  ;;  %v1725_v51 = vpop.f32.mrf.mxu2  ;;  %v1971_v54 = vand.u32 2147483648, %v1834_v2 }
 0x385   : > { %v1726_v29 = vadd.f32 %v1725_v51, %v1592_v22  ;;  %v1953_v1 = vsel %vm1952_vm11, %v7065_v7, %v1949_v38  ;;  %v1961_v60 = vmul.f32 %v7069_v26, %v1834_v2  ;;  %vm1966_vm13 = vweird.f32 %v7069_v26 }
 0x386   : > { %7070 = vrcp.f32 %v8689_v3  ;;  %v1958_v11 = vsel %vm1955_vm12, %v1957_v0, %v1953_v1  ;;  %v1595_v22 = vpop.f32.mrf.mxu1  ;;  %vm1967_vm15 = vmor %vm1965_vm14, %vm1966_vm13  ;;  %vm1970_vm0 = vcmp.eq.f32.partialorder %v1969_v34, 8.507059e+37  ;;  %v1972_v0 = vor.u32 1.1754944e-38, %v1971_v54 }
 0x387   : > { %v1763_v19 = vadd.f32 %v1749_v39, %v1726_v29  ;;  %v2057_v35 = vmul.f32 %v1958_v11, %v8647_v31  ;;  %v1962_v32 = vsub.f32 1.0, %v1961_v60  ;;  %7072 = vpow2.f32 %v6453_v12 }
 0x388   : > { %v1750_v39 = vmul.f32 %v8576_v33, %v8694_v14  ;;  %v1986_v2 = vand.u32 2147483648, %v8689_v3  ;;  %vm1980_vm2 = vweird.f32 %v8689_v3 }
 0x389   : > { %v8697_v6 = vadd.f32 %v8585_v42, %v1763_v19  ;;  %6464 = vmatmul.msk.f32.gmra.mxu3 %vm11274_vm6, %v2057_v35  ;;  %v1963_v7 = vmul.f32 %v7069_v26, %v1962_v32 }
 0x38b   : > { %v6454_v48 = vmul.f32 -1.442695, %v8697_v6  ;;  %v1964_v31 = vadd.f32 %v7069_v26, %v1963_v7  ;;  %v1984_v7 = vand.u32 2147483647, %v8689_v3 }
 0x38c   : > { %v7071_v38 = vpop.eup %7070  ;;  %v1728_v51 = vpop.f32.mrf.mxu2 }
 0x38d   : > { %7074 = vpow2.f32 %v6454_v48  ;;  %v1729_v12 = vadd.f32 %v1728_v51, %v1595_v22  ;;  %v1968_v29 = vsel %vm1967_vm15, %v7069_v26, %v1964_v31  ;;  %v1976_v1 = vmul.f32 %v7071_v38, %v8689_v3  ;;  %v7073_v60 = vpop.eup %7072  ;;  %v8711_v26 = vpop.xlane.xlu2 %1353 }
 0x38e   : > { %v1973_v11 = vsel %vm1970_vm0, %v1972_v0, %v1968_v29  ;;  %v1836_v9 = vadd.f32 1.0, %v7073_v60  ;;  %vm1981_vm1 = vweird.f32 %v7071_v38  ;;  %11411 = vst [vmem:[#allocation86_spill] sm:$0xff] %v8711_v26  ;;  %v1598_v31 = vpop.f32.mrf.mxu1  ;;  %v1987_v0 = vor.u32 1.1754944e-38, %v1986_v2 }
 0x38f   : > { %v1764_v19 = vadd.f32 %v1750_v39, %v1729_v12  ;;  %v2058_v35 = vmul.f32 %v1973_v11, %v8655_v15  ;;  %v1977_v32 = vsub.f32 1.0, %v1976_v1  ;;  %v1751_v15 = vmul.f32 %v8576_v33, %v8711_v26  ;;  %vm1982_vm3 = vmor %vm1980_vm2, %vm1981_vm1 }
 0x390   : > { %7076 = vrcp.f32 %v1836_v9  ;;  %vm1985_vm4 = vcmp.eq.f32.partialorder %v1984_v7, 8.507059e+37  ;;  %vm1995_vm8 = vweird.f32 %v1836_v9 }
 0x391   : > { %v8708_v14 = vadd.f32 %v8585_v42, %v1764_v19  ;;  %6465 = vmatmul.msk.f32.gmra.mxu3 %vm11274_vm6, %v2058_v35  ;;  %v1978_v34 = vmul.f32 %v7071_v38, %v1977_v32 }
 0x393   : > { %v7075_v54 = vpop.eup %7074  ;;  %v6455_v22 = vmul.f32 -1.442695, %v8708_v14  ;;  %v1979_v48 = vadd.f32 %v7071_v38, %v1978_v34  ;;  %v2001_v34 = vand.u32 2147483648, %v1836_v9 }
 0x394   : > { %v1837_v39 = vadd.f32 1.0, %v7075_v54  ;;  %v1731_v51 = vpop.f32.mrf.mxu2 }
 0x395   : > { %7078 = vpow2.f32 %v6455_v22  ;;  %v1732_v12 = vadd.f32 %v1731_v51, %v1598_v31  ;;  %v1983_v29 = vsel %vm1982_vm3, %v7071_v38, %v1979_v48  ;;  %v1999_v22 = vand.u32 2147483647, %v1836_v9 }
 0x396   : > { %7080 = vrcp.f32 %v1837_v39  ;;  %v1988_v1 = vsel %vm1985_vm4, %v1987_v0, %v1983_v29  ;;  %v7077_v60 = vpop.eup %7076  ;;  %v2016_v51 = vand.u32 2147483648, %v1837_v39  ;;  %v2014_v29 = vand.u32 2147483647, %v1837_v39 }
 0x397   : > { %v1765_v11 = vadd.f32 %v1751_v15, %v1732_v12  ;;  %v2059_v19 = vmul.f32 %v1988_v1, %v8670_v61  ;;  %v1991_v35 = vmul.f32 %v7077_v60, %v1836_v9  ;;  %vm1996_vm5 = vweird.f32 %v7077_v60 }
 0x398   : > { %vm1997_vm9 = vmor %vm1995_vm8, %vm1996_vm5  ;;  %vm2000_vm10 = vcmp.eq.f32.partialorder %v1999_v22, 8.507059e+37  ;;  %vm2010_vm12 = vweird.f32 %v1837_v39  ;;  %v2017_v9 = vor.u32 1.1754944e-38, %v2016_v51  ;;  %vm2015_vm14 = vcmp.eq.f32.partialorder %v2014_v29, 8.507059e+37 }
 0x399   : > { %v8719_v33 = vadd.f32 %v8585_v42, %v1765_v11  ;;  %6466 = vmatmul.msk.f32.gmra.mxu3 %vm11274_vm6, %v2059_v19  ;;  %v1992_v3 = vsub.f32 1.0, %v1991_v35  ;;  %v2002_v42 = vor.u32 1.1754944e-38, %v2001_v34 }
 0x39b   : > { %v7079_v32 = vpop.eup %7078  ;;  %v6456_v2 = vmul.f32 -1.442695, %v8719_v33  ;;  %v1993_v7 = vmul.f32 %v7077_v60, %v1992_v3 }
 0x39c   : > { %v7081_v54 = vpop.eup %7080  ;;  %v1838_v38 = vadd.f32 1.0, %v7079_v32 }
 0x39d   : > { %7082 = vpow2.f32 %v6456_v2  ;;  %v2006_v15 = vmul.f32 %v7081_v54, %v1837_v39  ;;  %v1994_v61 = vadd.f32 %v7077_v60, %v1993_v7  ;;  %vm2011_vm11 = vweird.f32 %v7081_v54 }
 0x39e   : > { %7084 = vrcp.f32 %v1838_v38  ;;  %vm2012_vm13 = vmor %vm2010_vm12, %vm2011_vm11  ;;  %v2031_v22 = vand.u32 2147483648, %v1838_v38  ;;  %vm2025_vm0 = vweird.f32 %v1838_v38 }
 0x39f   : > { %v2007_v48 = vsub.f32 1.0, %v2006_v15  ;;  %v1998_v31 = vsel %vm1997_vm9, %v7077_v60, %v1994_v61 }
 0x3a0   : > { %v2003_v0 = vsel %vm2000_vm10, %v2002_v42, %v1998_v31  ;;  %v2032_v42 = vor.u32 1.1754944e-38, %v2031_v22 }
 0x3a1   : > { %v2008_v12 = vmul.f32 %v7081_v54, %v2007_v48  ;;  %v2060_v1 = vmul.f32 %v2003_v0, %v8684_v28  ;;  %v2029_v28 = vand.u32 2147483647, %v1838_v38 }
 0x3a3   : > { %v7083_v11 = vpop.eup %7082  ;;  %v2009_v19 = vadd.f32 %v7081_v54, %v2008_v12  ;;  %6467 = vmatmul.msk.f32.gmra.mxu3 %vm11274_vm6, %v2060_v1  ;;  %vm2030_vm2 = vcmp.eq.f32.partialorder %v2029_v28, 8.507059e+37  ;;  %v8734_v28 = vld [vmem:[%s11135_s13] ss:$0 sm:$0xff] }
 0x3a4   : > { %v7085_v35 = vpop.eup %7084  ;;  %v1839_v3 = vadd.f32 1.0, %v7083_v11 }
 0x3a5   : > { %v2013_v32 = vsel %vm2012_vm13, %v7081_v54, %v2009_v19  ;;  %v2021_v60 = vmul.f32 %v7085_v35, %v1838_v38  ;;  %vm2026_vm15 = vweird.f32 %v7085_v35 }
 0x3a6   : > { %7086 = vrcp.f32 %v1839_v3  ;;  %v2018_v2 = vsel %vm2015_vm14, %v2017_v9, %v2013_v32  ;;  %vm2027_vm1 = vmor %vm2025_vm0, %vm2026_vm15  ;;  %v2046_v12 = vand.u32 2147483648, %v1839_v3  ;;  %v2044_v29 = vand.u32 2147483647, %v1839_v3 }
 0x3a7   : > { %v2022_v34 = vsub.f32 1.0, %v2021_v60  ;;  %v2061_v7 = vmul.f32 %v2018_v2, %v8697_v6  ;;  %vm2040_vm4 = vweird.f32 %v1839_v3 }
 0x3a8   : > { %v2047_v38 = vor.u32 1.1754944e-38, %v2046_v12  ;;  %vm2045_vm8 = vcmp.eq.f32.partialorder %v2044_v29, 8.507059e+37 }
 0x3a9   : > { %v2023_v15 = vmul.f32 %v7085_v35, %v2022_v34 }
 0x3ab   : > { %v2024_v61 = vadd.f32 %v7085_v35, %v2023_v15  ;;  %6468 = vmatmul.msk.f32.gmra.mxu3 %vm11274_vm6, %v2061_v7 }
 0x3ac   : > { %v7087_v39 = vpop.eup %7086 }
 0x3ad   : > { %v2028_v48 = vsel %vm2027_vm1, %v7085_v35, %v2024_v61  ;;  %v2036_v54 = vmul.f32 %v7087_v39, %v1839_v3  ;;  %vm2041_vm3 = vweird.f32 %v7087_v39 }
 0x3ae   : > { %v2033_v31 = vsel %vm2030_vm2, %v2032_v42, %v2028_v48  ;;  %vm2042_vm5 = vmor %vm2040_vm4, %vm2041_vm3 }
 0x3af   : > { %v2037_v51 = vsub.f32 1.0, %v2036_v54  ;;  %v2062_v0 = vmul.f32 %v2033_v31, %v8708_v14 }
 0x3b1   : > { %v2038_v6 = vmul.f32 %v7087_v39, %v2037_v51 }
 0x3b3   : > { %v2039_v1 = vadd.f32 %v7087_v39, %v2038_v6  ;;  %6469 = vmatmul.msk.f32.gmra.mxu3 %vm11274_vm6, %v2062_v0 }
 0x3b5   : > { %v2043_v11 = vsel %vm2042_vm5, %v7087_v39, %v2039_v1 }
 0x3b6   : > { %v2048_v19 = vsel %vm2045_vm8, %v2047_v38, %v2043_v11 }
 0x3b7   : > { %v2063_v35 = vmul.f32 %v2048_v19, %v8719_v33 }
 0x3bb   : > { %6470 = vmatmul.msk.f32.gmra.mxu3 %vm11274_vm6, %v2063_v35 }
 0x3d4   : > { %v2131_v9 = vpop.f32.mrf.mxu3 }
 0x3d5   : > { %v8737_v61 = vadd.f32 %v8734_v28, %v2131_v9 }
 0x3d7   : > { %11412 = vst [vmem:[#allocation87_spill] sm:$0xff] %v8737_v61  ;;  %v6471_v48 = vmul.f32 -1.442695, %v8737_v61 }
 0x3d9   : > { %7088 = vpow2.f32 %v6471_v48 }
 0x3dc   : > { %v2134_v32 = vpop.f32.mrf.mxu3 }
 0x3dd   : > { %v8740_v33 = vadd.f32 %v8734_v28, %v2134_v32 }
 0x3df   : > { %11413 = vst [vmem:[#allocation88_spill] sm:$0xff] %v8740_v33  ;;  %v6472_v31 = vmul.f32 -1.442695, %v8740_v33 }
 0x3e1   : > { %7090 = vpow2.f32 %v6472_v31 }
 0x3e4   : > { %v2137_v14 = vpop.f32.mrf.mxu3 }
 0x3e5   : > { %v8743_v39 = vadd.f32 %v8734_v28, %v2137_v14 }
 0x3e7   : > { %11414 = vst [vmem:[#allocation89_spill] sm:$0xff] %v8743_v39  ;;  %v6473_v0 = vmul.f32 -1.442695, %v8743_v39 }
 0x3e9   : > { %7092 = vpow2.f32 %v6473_v0 }
 0x3ec   : > { %v2140_v60 = vpop.f32.mrf.mxu3 }
 0x3ed   : > { %v8746_v42 = vadd.f32 %v8734_v28, %v2140_v60 }
 0x3ef   : > { %11415 = vst [vmem:[#allocation90_spill] sm:$0xff] %v8746_v42  ;;  %v6474_v6 = vmul.f32 -1.442695, %v8746_v42 }
 0x3f1   : > { %7094 = vpow2.f32 %v6474_v6 }
 0x3f4   : > { %v2143_v2 = vpop.f32.mrf.mxu3 }
 0x3f5   : > { %v8750_v54 = vadd.f32 %v8734_v28, %v2143_v2 }
 0x3f7   : > { %11416 = vst [vmem:[#allocation91_spill] sm:$0xff] %v8750_v54  ;;  %v6475_v1 = vmul.f32 -1.442695, %v8750_v54 }
 0x3f9   : > { %7096 = vpow2.f32 %v6475_v1 }
 0x3fc   : > { %v2146_v34 = vpop.f32.mrf.mxu3 }
 0x3fd   : > { %v8755_v12 = vadd.f32 %v8734_v28, %v2146_v34  ;;  %v7089_v34 = vpop.eup %7088 }
 0x3fe   : > { %v8784_v0 = vadd.f32 1.0, %v7089_v34 }
 0x3ff   : > { %v6476_v19 = vmul.f32 -1.442695, %v8755_v12 }
 0x401   : > { %7098 = vpow2.f32 %v6476_v19 }
 0x404   : > { %v2149_v7 = vpop.f32.mrf.mxu3 }
 0x405   : > { %v8759_v29 = vadd.f32 %v8734_v28, %v2149_v7 }
 0x407   : > { %v6477_v9 = vmul.f32 -1.442695, %v8759_v29 }
 0x409   : > { %7100 = vpow2.f32 %v6477_v9 }
 0x40c   : > { %v2152_v22 = vpop.f32.mrf.mxu3 }
 0x40d   : > { %v8763_v38 = vadd.f32 %v8734_v28, %v2152_v22 }
 0x40f   : > { %v6478_v14 = vmul.f32 -1.442695, %v8763_v38 }
 0x411   : > { %7102 = vpow2.f32 %v6478_v14 }
 0x414   : > { %v2155_v3 = vpop.f32.mrf.mxu3 }
 0x415   : > { %v8766_v11 = vadd.f32 %v8734_v28, %v2155_v3  ;;  %v7091_v3 = vpop.eup %7090 }
 0x416   : > { %v7093_v48 = vpop.eup %7092  ;;  %v8786_v1 = vadd.f32 1.0, %v7091_v3 }
 0x417   : > { %v6479_v60 = vmul.f32 -1.442695, %v8766_v11  ;;  %v8788_v19 = vadd.f32 1.0, %v7093_v48 }
 0x419   : > { %7104 = vpow2.f32 %v6479_v60 }
 0x41c   : > { %v2158_v15 = vpop.f32.mrf.mxu3 }
 0x41d   : > { %v8770_v35 = vadd.f32 %v8734_v28, %v2158_v15 }
 0x41f   : > { %v6480_v7 = vmul.f32 -1.442695, %v8770_v35 }
 0x421   : > { %7106 = vpow2.f32 %v6480_v7 }
 0x426   : > { %v2161_v51 = vpop.f32.mrf.mxu3 }
 0x427   : > { %v8774_v32 = vadd.f32 %v8734_v28, %v2161_v51  ;;  %v7095_v51 = vpop.eup %7094 }
 0x428   : > { %v7097_v6 = vpop.eup %7096  ;;  %v8790_v26 = vadd.f32 1.0, %v7095_v51 }
 0x429   : > { %v6481_v15 = vmul.f32 -1.442695, %v8774_v32  ;;  %v8793_v14 = vadd.f32 1.0, %v7097_v6 }
 0x42b   : > { %7108 = vpow2.f32 %v6481_v15 }
 0x42e   : > { %v2164_v2 = vpop.f32.mrf.mxu3 }
 0x42f   : > { %v8780_v22 = vadd.f32 %v8734_v28, %v2164_v2  ;;  %v7099_v2 = vpop.eup %7098 }
 0x430   : > { %v7101_v9 = vpop.eup %7100  ;;  %v8800_v3 = vadd.f32 1.0, %v7099_v2 }
 0x431   : > { %v6482_v31 = vmul.f32 -1.442695, %v8780_v22  ;;  %v7103_v34 = vpop.eup %7102  ;;  %v8803_v48 = vadd.f32 1.0, %v7101_v9 }
 0x432   : > { %v7105_v7 = vpop.eup %7104  ;;  %v8807_v6 = vadd.f32 1.0, %v7103_v34 }
 0x433   : > { %7110 = vpow2.f32 %v6482_v31  ;;  %v7107_v15 = vpop.eup %7106 }
 0x434   : > { %7112 = vrcp.f32 %v8784_v0  ;;  %v7109_v51 = vpop.eup %7108  ;;  %v8814_v2 = vadd.f32 1.0, %v7107_v15 }
 0x435   : > { %7114 = vrcp.f32 %v8786_v1  ;;  %v8819_v9 = vadd.f32 1.0, %v7109_v51 }
 0x436   : > { %v2167_v45 = vpop.f32.mrf.mxu3  ;;  %7116 = vrcp.f32 %v8788_v19  ;;  %vm2369_vm13 = vweird.f32 %v8814_v2 }
 0x437   : > { %v8797_v60 = vadd.f32 %v8734_v28, %v2167_v45  ;;  %7118 = vrcp.f32 %v8790_v26  ;;  %v8809_v45 = vadd.f32 1.0, %v7105_v7  ;;  %vm2384_vm10 = vweird.f32 %v8819_v9 }
 0x438   : > { %7120 = vrcp.f32 %v8793_v14 }
 0x439   : > { %v6483_v31 = vmul.f32 -1.442695, %v8797_v60  ;;  %v7111_v57 = vpop.eup %7110  ;;  %vm2354_vm1 = vweird.f32 %v8809_v45 }
 0x43a   : > { %v8811_v30 = vpop.eup %7112  ;;  %v8824_v34 = vadd.f32 1.0, %v7111_v57 }
 0x43b   : > { %7122 = vpow2.f32 %v6483_v31  ;;  %v8816_v23 = vpop.eup %7114  ;;  %v2230_v52 = vmul.f32 %v8811_v30, %v8784_v0 }
 0x43c   : > { %7124 = vrcp.f32 %v8800_v3  ;;  %v8821_v20 = vpop.eup %7116  ;;  %vm2399_vm4 = vweird.f32 %v8824_v34 }
 0x43d   : > { %7126 = vrcp.f32 %v8803_v48  ;;  %v8826_v31 = vpop.eup %7118  ;;  %v2260_v24 = vmul.f32 %v8821_v20, %v8788_v19 }
 0x43e   : > { %7128 = vrcp.f32 %v8807_v6  ;;  %v2170_v7 = vpop.f32.mrf.mxu3  ;;  %v8832_v13 = vpop.eup %7120  ;;  %v2275_v43 = vmul.f32 %v8826_v31, %v8790_v26 }
 0x43f   : > { %7130 = vrcp.f32 %v8809_v45  ;;  %v8830_v15 = vadd.f32 %v8734_v28, %v2170_v7  ;;  %v2261_v41 = vsub.f32 1.0, %v2260_v24 }
 0x440   : > { %7132 = vrcp.f32 %v8814_v2  ;;  %v2276_v27 = vsub.f32 1.0, %v2275_v43 }
 0x441   : > { %v7123_v51 = vpop.eup %7122  ;;  %7134 = vrcp.f32 %v8819_v9  ;;  %v6484_v16 = vmul.f32 -1.442695, %v8830_v15 }
 0x442   : > { %v8837_v4 = vpop.eup %7124  ;;  %7136 = vrcp.f32 %v8824_v34  ;;  %v8840_v57 = vadd.f32 1.0, %v7123_v51  ;;  %v2245_v51 = vmul.f32 %v8816_v23, %v8786_v1  ;;  %v8897_v43 = vmul.f32 %v8826_v31, %v2276_v27 }
 0x443   : > { %v8842_v62 = vpop.eup %7126  ;;  %7138 = vpow2.f32 %v6484_v16  ;;  %v2290_v16 = vmul.f32 %v8832_v13, %v8793_v14  ;;  %v2305_v17 = vmul.f32 %v8837_v4, %v8800_v3 }
 0x444   : > { %v8844_v28 = vpop.eup %7128  ;;  %7140 = vrcp.f32 %v8840_v57  ;;  %v2320_v18 = vmul.f32 %v8842_v62, %v8803_v48  ;;  %v2246_v50 = vsub.f32 1.0, %v2245_v51  ;;  %vm2414_vm15 = vweird.f32 %v8840_v57 }
 0x445   : > { %v8847_v7 = vpop.eup %7130  ;;  %v2335_v36 = vmul.f32 %v8844_v28, %v8807_v6  ;;  %v2291_v44 = vsub.f32 1.0, %v2290_v16  ;;  %v2306_v10 = vsub.f32 1.0, %v2305_v17  ;;  %v2420_v24 = vand.u32 2147483648, %v8840_v57 }
 0x446   : > { %v8849_v58 = vpop.eup %7132  ;;  %v2350_v59 = vmul.f32 %v8847_v7, %v8809_v45  ;;  %v2321_v37 = vsub.f32 1.0, %v2320_v18  ;;  %v8887_v39 = vmul.f32 %v8816_v23, %v2246_v50  ;;  %vm2355_vm14 = vweird.f32 %v8847_v7 }
 0x447   : > { %v8851_v55 = vpop.eup %7134  ;;  %v2365_v53 = vmul.f32 %v8849_v58, %v8814_v2  ;;  %v2336_v25 = vsub.f32 1.0, %v2335_v36  ;;  %v8900_v36 = vmul.f32 %v8821_v20, %v2261_v41  ;;  %vm2370_vm9 = vweird.f32 %v8849_v58 }
 0x448   : > { %v8855_v49 = vpop.eup %7136  ;;  %v2380_v56 = vmul.f32 %v8851_v55, %v8819_v9  ;;  %v2351_v8 = vsub.f32 1.0, %v2350_v59  ;;  %v2418_v18 = vand.u32 2147483647, %v8840_v57  ;;  %vm2340_vm2 = vweird.f32 %v8844_v28 }
 0x449   : > { %v7139_v46 = vpop.eup %7138  ;;  %v2395_v63 = vmul.f32 %v8855_v49, %v8824_v34  ;;  %v8904_v50 = vmul.f32 %v8844_v28, %v2336_v25  ;;  %v2388_v25 = vand.u32 2147483647, %v8819_v9  ;;  %vm2400_vm12 = vweird.f32 %v8855_v49 }
 0x44a   : > { %v8865_v40 = vpop.eup %7140  ;;  %v8867_v21 = vadd.f32 1.0, %v7139_v46  ;;  %v2231_v46 = vsub.f32 1.0, %v2230_v52  ;;  %v2381_v33 = vsub.f32 1.0, %v2380_v56  ;;  %v2366_v52 = vsub.f32 1.0, %v2365_v53 }
 0x44b   : > { %v2410_v5 = vmul.f32 %v8865_v40, %v8840_v57  ;;  %v2396_v61 = vsub.f32 1.0, %v2395_v63  ;;  %v8907_v56 = vmul.f32 %v8842_v62, %v2321_v37  ;;  %v2352_v41 = vmul.f32 %v8847_v7, %v2351_v8 }
 0x44c   : > { %7142 = vrcp.f32 %v8867_v21  ;;  %v8890_v42 = vmul.f32 %v8811_v30, %v2231_v46  ;;  %v2382_v63 = vmul.f32 %v8851_v55, %v2381_v33  ;;  %v2367_v37 = vmul.f32 %v8849_v58, %v2366_v52 }
 0x44d   : > { %v2411_v47 = vsub.f32 1.0, %v2410_v5  ;;  %v8894_v5 = vmul.f32 %v8832_v13, %v2291_v44  ;;  %v2397_v27 = vmul.f32 %v8855_v49, %v2396_v61  ;;  %vm2415_vm11 = vweird.f32 %v8865_v40 }
 0x44e   : > { %v2435_v8 = vand.u32 2147483648, %v8867_v21  ;;  %v2433_v33 = vand.u32 2147483647, %v8867_v21  ;;  %vm8933_vm3 = vmor %vm2414_vm15, %vm2415_vm11  ;;  %v2403_v16 = vand.u32 2147483647, %v8824_v34  ;;  %v2405_v57 = vand.u32 2147483648, %v8824_v34 }
 0x44f   : > { %v2412_v54 = vmul.f32 %v8865_v40, %v2411_v47  ;;  %v8910_v47 = vmul.f32 %v8837_v4, %v2306_v10  ;;  %vm2385_vm5 = vweird.f32 %v8851_v55  ;;  %vm2429_vm8 = vweird.f32 %v8867_v21  ;;  %vm8947_vm11 = vmor %vm2399_vm4, %vm2400_vm12 }
 0x450   : > { %vm2325_vm7 = vweird.f32 %v8842_v62  ;;  %v2436_v34 = vor.u32 1.1754944e-38, %v2435_v8  ;;  %vm2419_vm12 = vcmp.eq.f32.partialorder %v2418_v18, 8.507059e+37  ;;  %vm2324_vm4 = vweird.f32 %v8803_v48 }
 0x451   : > { %v2413_v10 = vadd.f32 %v8865_v40, %v2412_v54  ;;  %v2398_v54 = vadd.f32 %v8855_v49, %v2397_v27  ;;  %v2383_v27 = vadd.f32 %v8851_v55, %v2382_v63  ;;  %vm2310_vm15 = vweird.f32 %v8837_v4 }
 0x452   : > { %v7143_v59 = vpop.eup %7142  ;;  %v2406_v53 = vor.u32 1.1754944e-38, %v2405_v57  ;;  %v2353_v18 = vadd.f32 %v8847_v7, %v2352_v41 }
 0x453   : > { %v2425_v44 = vmul.f32 %v7143_v59, %v8867_v21  ;;  %vm2430_vm0 = vweird.f32 %v7143_v59  ;;  %v2417_v52 = vsel %vm8933_vm3, %v8865_v40, %v2413_v10  ;;  %v2421_v21 = vor.u32 1.1754944e-38, %v2420_v24 }
 0x454   : > { %vm2431_vm6 = vmor %vm2429_vm8, %vm2430_vm0  ;;  %v2368_v40 = vadd.f32 %v8849_v58, %v2367_v37  ;;  %vm2434_vm3 = vcmp.eq.f32.partialorder %v2433_v33, 8.507059e+37  ;;  %vm2309_vm8 = vweird.f32 %v8800_v3  ;;  %v2285_v33 = vand.u32 2147483648, %v8790_v26 }
 0x455   : > { %v2426_v17 = vsub.f32 1.0, %v2425_v44  ;;  %v2422_v51 = vsel %vm2419_vm12, %v2421_v21, %v2417_v52  ;;  %vm8966_vm0 = vmor %vm2384_vm10, %vm2385_vm5  ;;  %vm2389_vm5 = vcmp.eq.f32.partialorder %v2388_v25, 8.507059e+37  ;;  %v2343_v25 = vand.u32 2147483647, %v8807_v6 }
 0x456   : > { %vm8982_vm10 = vmor %vm2369_vm13, %vm2370_vm9  ;;  %v2451_v41 = vmul.f32 %v2422_v51, %v8797_v60  ;;  %vm2294_vm9 = vweird.f32 %v8793_v14  ;;  %vm2280_vm13 = vweird.f32 %v8826_v31  ;;  %v2255_v60 = vand.u32 2147483648, %v8786_v1 }
 0x457   : > { %v2427_v61 = vmul.f32 %v7143_v59, %v2426_v17  ;;  %v2390_v17 = vand.u32 2147483648, %v8819_v9 }
 0x459   : > { %v2428_v46 = vadd.f32 %v7143_v59, %v2427_v61  ;;  %v2402_v61 = vsel %vm8947_vm11, %v8855_v49, %v2398_v54  ;;  %v2387_v49 = vsel %vm8966_vm0, %v8851_v55, %v2383_v27  ;;  %vm2295_vm11 = vweird.f32 %v8832_v13 }
 0x45a   : > { %v2391_v24 = vor.u32 1.1754944e-38, %v2390_v17  ;;  %v2360_v55 = vand.u32 2147483648, %v8809_v45  ;;  %v2338_v54 = vadd.f32 %v8844_v28, %v8904_v50  ;;  %vm11428_vm0 = vweird.f32 %v8807_v6 }
 0x45b   : > { %v2432_v10 = vsel %vm2431_vm6, %v7143_v59, %v2428_v46  ;;  %v2375_v59 = vand.u32 2147483648, %v8814_v2  ;;  %vm2404_vm6 = vcmp.eq.f32.partialorder %v2403_v16, 8.507059e+37  ;;  %v11427_v46 = vand.u32 2147483647, %v8814_v2 }
 0x45c   : > { %v2437_v63 = vsel %vm2434_vm3, %v2436_v34, %v2432_v10  ;;  %v2407_v9 = vsel %vm2404_vm6, %v2406_v53, %v2402_v61  ;;  %v2372_v53 = vsel %vm8982_vm10, %v8849_v58, %v2368_v40  ;;  %v2392_v16 = vsel %vm2389_vm5, %v2391_v24, %v2387_v49  ;;  %vm9000_vm3 = vmor %vm2354_vm1, %vm2355_vm14  ;;  %v2490_v34 = vld [vmem:[#allocation17 + $0x18] sm:$0xff] }
 0x45d   : > { %v2452_v8 = vmul.f32 %v2437_v63, %v8830_v15  ;;  %v2358_v15 = vand.u32 2147483647, %v8809_v45  ;;  %v2376_v57 = vor.u32 1.1754944e-38, %v2375_v59  ;;  %v2345_v58 = vand.u32 2147483648, %v8807_v6  ;;  %vm9020_vm6 = vmor %vm11428_vm0, %vm2340_vm2  ;;  %2509 = vmatpush.msra.mxu1 %v2490_v34 }
 0x45e   : > { %v2450_v50 = vmul.f32 %v2407_v9, %v8780_v22  ;;  %vm2374_vm12 = vcmp.eq.f32.partialorder %v11427_v46, 8.507059e+37  ;;  %v2357_v52 = vsel %vm9000_vm3, %v8847_v7, %v2353_v18  ;;  %v2323_v45 = vadd.f32 %v8842_v62, %v8907_v56  ;;  %v2489_v56 = vld [vmem:[#allocation17 + $0x10] sm:$0xff]  ;;  %vm9038_vm3 = vmor %vm2324_vm4, %vm2325_vm7 }
 0x45f   : > { %2462 = vmatpush.msrb.mxu0 %v2452_v8  ;;  %vm2279_vm14 = vweird.f32 %v8790_v26  ;;  %vm2265_vm1 = vweird.f32 %v8821_v20  ;;  %v2377_v44 = vsel %vm2374_vm12, %v2376_v57, %v2372_v53  ;;  %v2361_v27 = vor.u32 1.1754944e-38, %v2360_v55  ;;  %2510 = vmatpush.msra.mxu1 %v2489_v56  ;;  %vm9056_vm0 = vmor %vm2309_vm8, %vm2310_vm15  ;;  %v11445_v56 = vld [vmem:[#allocation89_spill] sm:$0xff] }
 0x460   : > { %v2328_v2 = vand.u32 2147483647, %v8803_v48  ;;  %v2330_v7 = vand.u32 2147483648, %v8803_v48  ;;  %v2449_v21 = vmul.f32 %v2392_v16, %v8774_v32  ;;  %vm2359_vm10 = vcmp.eq.f32.partialorder %v2358_v15, 8.507059e+37  ;;  %vm9072_vm15 = vmor %vm2294_vm9, %vm2295_vm11 }
 0x461   : > { %2463 = vmatpush.msrb.mxu0 %v2451_v41  ;;  %v2342_v17 = vsel %vm9020_vm6, %v8844_v28, %v2338_v54  ;;  %v2308_v6 = vadd.f32 %v8837_v4, %v8910_v47  ;;  %vm2264_vm2 = vweird.f32 %v8788_v19  ;;  %vm2250_vm5 = vweird.f32 %v8816_v23  ;;  %v2488_v47 = vld [vmem:[#allocation17 + $0x8] sm:$0xff]  ;;  %vm9088_vm11 = vmor %vm2279_vm14, %vm2280_vm13 }
 0x462   : > { %v2362_v40 = vsel %vm2359_vm10, %v2361_v27, %v2357_v52  ;;  %v2346_v10 = vor.u32 1.1754944e-38, %v2345_v58  ;;  %v2313_v28 = vand.u32 2147483647, %v8800_v3  ;;  %v2315_v61 = vand.u32 2147483648, %v8800_v3  ;;  %2511 = vmatpush.msra.mxu1 %v2488_v47  ;;  %vm9104_vm13 = vmor %vm2264_vm2, %vm2265_vm1 }
 0x463   : > { %2464 = vmatpush.msrb.mxu0 %v2450_v50  ;;  %v2448_v63 = vmul.f32 %v2377_v44, %v8770_v35  ;;  %vm2344_vm12 = vcmp.eq.f32.partialorder %v2343_v25, 8.507059e+37  ;;  %v2327_v51 = vsel %vm9038_vm3, %v8842_v62, %v2323_v45  ;;  %v2293_v48 = vadd.f32 %v8832_v13, %v8894_v5  ;;  %v11444_v44 = vld [vmem:[#allocation90_spill] sm:$0xff]  ;;  %v2601_v35 = vld [vmem:[#allocation18 + $0x10] sm:$0xff] }
 0x464   : > { %vm2249_vm7 = vweird.f32 %v8786_v1  ;;  %vm2235_vm4 = vweird.f32 %v8811_v30  ;;  %v2347_v37 = vsel %vm2344_vm12, %v2346_v10, %v2342_v17  ;;  %v2331_v59 = vor.u32 1.1754944e-38, %v2330_v7  ;;  %v11449_v10 = vld [vmem:[#allocation87_spill] sm:$0xff] }
 0x465   : > { %2465 = vmatpush.msrb.mxu0 %v2449_v21  ;;  %v2298_v62 = vand.u32 2147483647, %v8793_v14  ;;  %v2300_v8 = vand.u32 2147483648, %v8793_v14  ;;  %v2447_v5 = vmul.f32 %v2362_v40, %v8766_v11  ;;  %vm2329_vm6 = vcmp.eq.f32.partialorder %v2328_v2, 8.507059e+37  ;;  %vm9120_vm1 = vmor %vm2249_vm7, %vm2250_vm5  ;;  %v7007_v2 = vld [vmem:[%s975_s25] ss:$0 sm:$0xff] }
 0x466   : > { %v2312_v49 = vsel %vm9056_vm0, %v8837_v4, %v2308_v6  ;;  %v2278_v18 = vadd.f32 %v8826_v31, %v8897_v43  ;;  %v2332_v3 = vsel %vm2329_vm6, %v2331_v59, %v2327_v51  ;;  %v2316_v9 = vor.u32 1.1754944e-38, %v2315_v61  ;;  %v11446_v21 = vld [vmem:[#allocation88_spill] sm:$0xff]  ;;  %v11447_v6 = vld [vmem:[#allocation39_spill] sm:$0xff]  ;;  %v2487_v61 = vld [vmem:[#allocation17] sm:$0xff]  ;;  %v2537_v51 = vpop.f32.mrf.mxu2 }
 0x467   : > { %2466 = vmatpush.msrb.mxu0 %v2448_v63  ;;  %v2283_v11 = vand.u32 2147483647, %v8790_v26  ;;  %v2446_v4 = vmul.f32 %v2347_v37, %v8763_v38  ;;  %vm2314_vm8 = vcmp.eq.f32.partialorder %v2313_v28, 8.507059e+37  ;;  %v2297_v43 = vsel %vm9072_vm15, %v8832_v13, %v2293_v48  ;;  %2512 = vmatpush.msra.mxu1 %v2487_v61  ;;  %v2602_v48 = vld [vmem:[#allocation18 + $0x18] sm:$0xff]  ;;  %v2546_v37 = vpop.permute.xlu2 %2545  ;;  %v11463_v61 = vld [vmem:[#allocation46_spill] sm:$0xff] }
 0x468   : > { %v2263_v15 = vadd.f32 %v8821_v20, %v8900_v36  ;;  %v2317_v14 = vsel %vm2314_vm8, %v2316_v9, %v2312_v49  ;;  %v2301_v55 = vor.u32 1.1754944e-38, %v2300_v8  ;;  %v2268_v38 = vand.u32 2147483647, %v8788_v19  ;;  %v7015_v8 = vld [vmem:[%s11138_s16] ss:$0 sm:$0xff] }
 0x469   : > { %2467 = vmatpush.msrb.mxu0 %v2447_v5  ;;  %v2270_v53 = vand.u32 2147483648, %v8788_v19  ;;  %v2445_v13 = vmul.f32 %v2332_v3, %v8759_v29  ;;  %vm2299_vm9 = vcmp.eq.f32.partialorder %v2298_v62, 8.507059e+37  ;;  %v2282_v36 = vsel %vm9088_vm11, %v8826_v31, %v2278_v18  ;;  %v2600_v5 = vld [vmem:[#allocation18 + $0x8] sm:$0xff]  ;;  %v2599_v18 = vld [vmem:[#allocation18] sm:$0xff] }
 0x46a   : > { %v2248_v54 = vadd.f32 %v8816_v23, %v8887_v39  ;;  %v2302_v26 = vsel %vm2299_vm9, %v2301_v55, %v2297_v43  ;;  %v2286_v16 = vor.u32 1.1754944e-38, %v2285_v33  ;;  %v2253_v29 = vand.u32 2147483647, %v8786_v1  ;;  %v2639_v55 = vld [vmem:[#allocation12 + $0x30] sm:$0xff] }
 0x46b   : > { %2468 = vmatpush.msrb.mxu0 %v2446_v4  ;;  %v2444_v31 = vmul.f32 %v2317_v14, %v8755_v12  ;;  %vm2284_vm14 = vcmp.eq.f32.partialorder %v2283_v11, 8.507059e+37  ;;  %v2267_v39 = vsel %vm9104_vm13, %v8821_v20, %v2263_v15  ;;  %v2233_v25 = vadd.f32 %v8811_v30, %v8890_v42  ;;  %v11443_v20 = vld [vmem:[#allocation91_spill] sm:$0xff]  ;;  %v2640_v14 = vld [vmem:[#allocation12 + $0x38] sm:$0xff] }
 0x46c   : > { %v2287_v19 = vsel %vm2284_vm14, %v2286_v16, %v2282_v36  ;;  %v2271_v58 = vor.u32 1.1754944e-38, %v2270_v53  ;;  %vm2234_vm10 = vweird.f32 %v8784_v0  ;;  %v2240_v12 = vand.u32 2147483648, %v8784_v0  ;;  %2659 = vmatpush.msrb.mxu3 %v2640_v14  ;;  %v11497_v14 = vld [vmem:[#allocation51_spill] sm:$0xff] }
 0x46d   : > { %2469 = vmatpush.msrb.mxu0 %v2445_v13  ;;  %v2443_v46 = vmul.f32 %v2302_v26, %v11443_v20  ;;  %vm2269_vm2 = vcmp.eq.f32.partialorder %v2268_v38, 8.507059e+37  ;;  %v2252_v42 = vsel %vm9120_vm1, %v8816_v23, %v2248_v54  ;;  %v2238_v52 = vand.u32 2147483647, %v8784_v0  ;;  %vm2236_vm5 = vmor %vm2234_vm10, %vm2235_vm4 }
 0x46e   : > { %v2272_v1 = vsel %vm2269_vm2, %v2271_v58, %v2267_v39  ;;  %v2256_v45 = vor.u32 1.1754944e-38, %v2255_v60  ;;  %v2442_v27 = vmul.f32 %v2287_v19, %v11444_v44  ;;  %vm2254_vm3 = vcmp.eq.f32.partialorder %v2253_v29, 8.507059e+37  ;;  %v2540_v24 = vpop.f32.mrf.mxu2  ;;  %2660 = vmatpush.msrb.mxu3 %v2639_v55  ;;  %v11499_v55 = vld [vmem:[#allocation53_spill] sm:$0xff] }
 0x46f   : > { %2470 = vmatpush.msrb.mxu0 %v2444_v31  ;;  %v2237_v22 = vsel %vm2236_vm5, %v8811_v30, %v2233_v25  ;;  %v2241_v34 = vor.u32 1.1754944e-38, %v2240_v12  ;;  %v2441_v23 = vmul.f32 %v2272_v1, %v11445_v56  ;;  %vm2239_vm12 = vcmp.eq.f32.partialorder %v2238_v52, 8.507059e+37  ;;  %v11450_v30 = vld [vmem:[#allocation40_spill] sm:$0xff]  ;;  %v2548_v4 = vpop.permute.xlu2 %2547 }
 0x470   : > { %v2257_v7 = vsel %vm2254_vm3, %v2256_v45, %v2252_v42  ;;  %v9140_v40 = vmul.f32 %v7007_v2, %v11447_v6  ;;  %vm11285_vm7 = vcmask 916480   ;;  %v9146_v28 = vmul.f32 %v7007_v2, %v11450_v30  ;;  %v2638_v2 = vld [vmem:[#allocation12 + $0x28] sm:$0xff]  ;;  %v11462_v30 = vld [vmem:[#allocation41_spill] sm:$0xff] }
 0x471   : > { %2471 = vmatpush.msrb.mxu0 %v2443_v46  ;;  %v2242_v0 = vsel %vm2239_vm12, %v2241_v34, %v2237_v22  ;;  %v2440_v17 = vmul.f32 %v2257_v7, %v11446_v21  ;;  %vm11452_vm4 = vcmask 261120   ;;  %2661 = vmatpush.msrb.mxu3 %v2638_v2  ;;  %v2637_v7 = vld [vmem:[#allocation12 + $0x20] sm:$0xff]  ;;  %v7016_v34 = vld [vmem:[%s11140_s18] ss:$0 sm:$0xff]  ;;  %vm11461_vm12 = vcmask 130048  }
 0x472   : > { %11448 = vst [vmem:[#allocation91_spill] sm:$0xff] %v9140_v40  ;;  %v2439_v32 = vmul.f32 %v2242_v0, %v11449_v10  ;;  %vm11453_vm0 = vmmov %vm11452_vm4  ;;  %v11518_v2 = vld [vmem:[#allocation74_spill] sm:$0xff] }
 0x473   : > { %2472 = vmatpush.msrb.mxu0 %v2442_v27  ;;  %11451 = vst [vmem:[#allocation90_spill] sm:$0xff] %v9146_v28  ;;  %vm11454_vm9 = vmmov %vm11453_vm0  ;;  %2662 = vmatpush.msrb.mxu3 %v2637_v7 }
 0x474   : > { %vm11455_vm2 = vmmov %vm11453_vm0 }
 0x475   : > { %2473 = vmatpush.msrb.mxu0 %v2441_v23  ;;  %vm11457_vm5 = vmmov %vm11453_vm0 }
 0x476   : > { %vm11459_vm3 = vmmov %vm11453_vm0 }
 0x477   : > { %2474 = vmatpush.msrb.mxu0 %v2440_v17 }
 0x479   : > { %2475 = vmatpush.msrb.mxu0 %v2439_v32  ;;  %v11460_v32 = vld [vmem:[#allocation44_spill] sm:$0xff] }
 0x47a   : > { %6485 = vmatmul.msk.f32.vlgmr.msrb.gmra.mxu0 %vm11285_vm7, %v9140_v40 }
 0x47b   : > { %2625 = vmatpush.msra.mxu0 %v2602_v48  ;;  %v11470_v48 = vld [vmem:[#allocation52_spill] sm:$0xff] }
 0x47d   : > { %2626 = vmatpush.msra.mxu0 %v2601_v35  ;;  %v11476_v35 = vld [vmem:[#allocation58_spill] sm:$0xff] }
 0x47f   : > { %2627 = vmatpush.msra.mxu0 %v2600_v5  ;;  %v11482_v5 = vld [vmem:[#allocation64_spill] sm:$0xff] }
 0x481   : > { %2628 = vmatpush.msra.mxu0 %v2599_v18 }
 0x482   : > { %6486 = vmatmul.msk.f32.gmra.mxu0 %vm11285_vm7, %v9146_v28 }
 0x4f7   : > { %v2477_v47 = vpop.f32.mrf.mxu0 }
 0x4f8   : > { %6487 = vmatmul.msk.f32.vlgmr.msra.gmra.mxu1 %vm11452_vm4, %v2477_v47  ;;  %vm11464_vm4 = vmmov %vm11461_vm12  ;;  %v11465_v47 = vld [vmem:[#allocation42_spill] sm:$0xff] }
 0x4ff   : > { %v2480_v63 = vpop.f32.mrf.mxu0 }
 0x500   : > { %6488 = vmatmul.msk.f32.gmra.mxu1 %vm11453_vm0, %v2480_v63  ;;  %v11466_v63 = vld [vmem:[#allocation48_spill] sm:$0xff]  ;;  %vm11467_vm0 = vmmov %vm11464_vm4 }
 0x575   : > { %v2514_v59 = vpop.f32.mrf.mxu1 }
 0x576   : > { %v2538_v62 = vadd.f32 %v2537_v51, %v2514_v59  ;;  %v11468_v51 = vld [vmem:[#allocation50_spill] sm:$0xff]  ;;  %v11474_v59 = vld [vmem:[#allocation56_spill] sm:$0xff] }
 0x578   : > { %v2551_v49 = vadd.f32 %v2546_v37, %v2538_v62  ;;  %v11472_v37 = vld [vmem:[#allocation54_spill] sm:$0xff]  ;;  %v11478_v62 = vld [vmem:[#allocation60_spill] sm:$0xff] }
 0x57a   : > { %v2557_v3 = vadd.f32 %v7015_v8, %v2551_v49  ;;  %v11484_v49 = vld [vmem:[#allocation66_spill] sm:$0xff] }
 0x57c   : > { %v6491_v9 = vmul.f32 -1.442695, %v2557_v3 }
 0x57d   : > { %v2517_v11 = vpop.f32.mrf.mxu1 }
 0x57e   : > { %7144 = vpow2.f32 %v6491_v9  ;;  %v2541_v33 = vadd.f32 %v2540_v24, %v2517_v11  ;;  %v11486_v24 = vld [vmem:[#allocation43_spill] sm:$0xff]  ;;  %v11488_v11 = vld [vmem:[#allocation68_spill] sm:$0xff] }
 0x580   : > { %v2552_v43 = vadd.f32 %v2548_v4, %v2541_v33  ;;  %v11490_v33 = vld [vmem:[#allocation45_spill] sm:$0xff]  ;;  %v11492_v4 = vld [vmem:[#allocation70_spill] sm:$0xff] }
 0x582   : > { %v2558_v15 = vadd.f32 %v7015_v8, %v2552_v43  ;;  %v11480_v8 = vld [vmem:[#allocation62_spill] sm:$0xff]  ;;  %v11494_v43 = vld [vmem:[#allocation47_spill] sm:$0xff] }
 0x584   : > { %v7145_v41 = vpop.eup %7144  ;;  %v6492_v38 = vmul.f32 -1.442695, %v2558_v15 }
 0x585   : > { %v2565_v53 = vadd.f32 1.0, %v7145_v41  ;;  %v11501_v41 = vld [vmem:[#allocation55_spill] sm:$0xff] }
 0x586   : > { %7146 = vpow2.f32 %v6492_v38  ;;  %v11503_v38 = vld [vmem:[#allocation57_spill] sm:$0xff] }
 0x587   : > { %7148 = vrcp.f32 %v2565_v53  ;;  %v2578_v57 = vand.u32 2147483648, %v2565_v53  ;;  %v2576_v60 = vand.u32 2147483647, %v2565_v53  ;;  %vm2572_vm15 = vweird.f32 %v2565_v53 }
 0x589   : > { %v2579_v25 = vor.u32 1.1754944e-38, %v2578_v57  ;;  %vm2577_vm11 = vcmp.eq.f32.partialorder %v2576_v60, 8.507059e+37  ;;  %v11515_v57 = vld [vmem:[#allocation69_spill] sm:$0xff] }
 0x58c   : > { %v7147_v13 = vpop.eup %7146 }
 0x58d   : > { %v7149_v36 = vpop.eup %7148  ;;  %v2566_v54 = vadd.f32 1.0, %v7147_v13  ;;  %v11507_v13 = vld [vmem:[#allocation61_spill] sm:$0xff] }
 0x58e   : > { %v2568_v26 = vmul.f32 %v7149_v36, %v2565_v53  ;;  %vm2573_vm6 = vweird.f32 %v7149_v36  ;;  %v11505_v53 = vld [vmem:[#allocation59_spill] sm:$0xff] }
 0x58f   : > { %7150 = vrcp.f32 %v2566_v54  ;;  %vm2574_vm8 = vmor %vm2572_vm15, %vm2573_vm6  ;;  %v2593_v46 = vand.u32 2147483648, %v2566_v54  ;;  %v2591_v52 = vand.u32 2147483647, %v2566_v54  ;;  %vm2587_vm14 = vweird.f32 %v2566_v54 }
 0x590   : > { %v2569_v16 = vsub.f32 1.0, %v2568_v26  ;;  %vm11469_vm6 = vmmov %vm11467_vm0  ;;  %v11513_v26 = vld [vmem:[#allocation67_spill] sm:$0xff] }
 0x591   : > { %v2594_v45 = vor.u32 1.1754944e-38, %v2593_v46  ;;  %vm2592_vm10 = vcmp.eq.f32.partialorder %v2591_v52, 8.507059e+37  ;;  %vm11471_vm15 = vmmov %vm11467_vm0  ;;  %v3130_v46 = vld [vmem:[#allocation14 + $0x28] sm:$0xff] }
 0x592   : > { %v2570_v29 = vmul.f32 %v7149_v36, %v2569_v16 }
 0x594   : > { %v2571_v31 = vadd.f32 %v7149_v36, %v2570_v29 }
 0x595   : > { %v7151_v39 = vpop.eup %7150 }
 0x596   : > { %v2575_v19 = vsel %vm2574_vm8, %v7149_v36, %v2571_v31  ;;  %v2583_v58 = vmul.f32 %v7151_v39, %v2566_v54  ;;  %vm2588_vm13 = vweird.f32 %v7151_v39  ;;  %vm11473_vm8 = vmmov %vm11467_vm0  ;;  %v11509_v36 = vld [vmem:[#allocation63_spill] sm:$0xff]  ;;  %v11511_v54 = vld [vmem:[#allocation65_spill] sm:$0xff] }
 0x597   : > { %v2580_v50 = vsel %vm2577_vm11, %v2579_v25, %v2575_v19  ;;  %vm2589_vm1 = vmor %vm2587_vm14, %vm2588_vm13  ;;  %v9230_v31 = vld [vmem:[%s11397_s15 + $0x1] ss:$0 sm:$0xff]  ;;  %v3131_v19 = vld [vmem:[#allocation14 + $0x30] sm:$0xff] }
 0x598   : > { %v2597_v12 = vmul.f32 %v2580_v50, %v2557_v3  ;;  %v2584_v20 = vsub.f32 1.0, %v2583_v58  ;;  %vm11475_vm11 = vmmov %vm11467_vm0  ;;  %v11517_v50 = vld [vmem:[#allocation72_spill] sm:$0xff]  ;;  %v2802_v7 = vmul.f32 %v9230_v31, %v11518_v2 }
 0x599   : > { %vm11479_vm13 = vmmov %vm11467_vm0 }
 0x59a   : > { %6493 = vmatmul.msk.f32.vlgmr.msra.gmra.mxu0 %vm11454_vm9, %v2597_v12  ;;  %v2585_v42 = vmul.f32 %v7151_v39, %v2584_v20  ;;  %vm11477_vm9 = vmmov %vm11467_vm0  ;;  %v2801_v12 = vmul.f32 %v9230_v31, %v11517_v50  ;;  %v9237_v20 = vld [vmem:[%s11399_s24 + $0x1] ss:$0 sm:$0xff] }
 0x59b   : > { %vm11481_vm14 = vmmov %vm11467_vm0 }
 0x59c   : > { %v2586_v1 = vadd.f32 %v7151_v39, %v2585_v42 }
 0x59e   : > { %v2590_v44 = vsel %vm2589_vm1, %v7151_v39, %v2586_v1  ;;  %vm11483_vm1 = vmmov %vm11467_vm0  ;;  %v3132_v39 = vld [vmem:[#allocation14 + $0x38] sm:$0xff]  ;;  %v3129_v1 = vld [vmem:[#allocation14 + $0x20] sm:$0xff] }
 0x59f   : > { %v2595_v27 = vsel %vm2592_vm10, %v2594_v45, %v2590_v44  ;;  %vm11485_vm10 = vmmov %vm11467_vm0  ;;  %3192 = vmatpush.msrb.mxu0 %v3132_v39 }
 0x5a0   : > { %v2598_v22 = vmul.f32 %v2595_v27, %v2558_v15  ;;  %v11496_v15 = vld [vmem:[#allocation49_spill] sm:$0xff] }
 0x5a1   : > { %3193 = vmatpush.msrb.mxu0 %v3131_v19 }
 0x5a2   : > { %6494 = vmatmul.msk.f32.gmra.mxu0 %vm11455_vm2, %v2598_v22  ;;  %vm11487_vm2 = vmmov %vm11467_vm0 }
 0x5a3   : > { %3194 = vmatpush.msrb.mxu0 %v3130_v46 }
 0x5a5   : > { %3195 = vmatpush.msrb.mxu0 %v3129_v1 }
 0x617   : > { %v2630_v56 = vpop.f32.mrf.mxu0 }
 0x618   : > { %v9160_v23 = vadd.f32 %v7016_v34, %v2630_v56 }
 0x61a   : > { %11456 = vst [vmem:[#allocation89_spill] sm:$0xff] %v9160_v23  ;;  %6495 = vmatmul.msk.f32.vlgmr.msrb.gmra.mxu3 %vm11457_vm5, %v9160_v23  ;;  %vm11489_vm5 = vmmov %vm11467_vm0 }
 0x61f   : > { %v2633_v0 = vpop.f32.mrf.mxu0 }
 0x620   : > { %v9164_v21 = vadd.f32 %v7016_v34, %v2633_v0 }
 0x622   : > { %11458 = vst [vmem:[#allocation88_spill] sm:$0xff] %v9164_v21  ;;  %6496 = vmatmul.msk.f32.gmra.mxu3 %vm11459_vm3, %v9164_v21  ;;  %vm11491_vm3 = vmmov %vm11467_vm0 }
 0x69d   : > { %v2664_v17 = vpop.f32.mrf.mxu3 }
 0x6a5   : > { %v2667_v6 = vpop.f32.mrf.mxu3 }
 0x6a6   : > { %v6988_v10 = vpack.i.bf16 %v2664_v17, %v2667_v6  ;;  %2751 = vmatpush.msrb.mxu2 %v2667_v6 }
 0x6a8   : > { %6989 = vrot.lane.b32.xlu2 %v6988_v10, %s7961_s2  ;;  %2752 = vmatpush.msrb.mxu2 %v2664_v17 }
 0x6a9   : > { %6511 = vmatmul.msk.f32.vlgmr.msrb.gmra.mxu2 %vm11461_vm12, %v11460_v32  ;;  %vm11493_vm12 = vmmov %vm11467_vm0 }
 0x6b0   : > { %3604 = vrot.lane.b32.xlu2 %v11462_v30, %s7962_s0 }
 0x6b1   : > { %6512 = vmatmul.msk.f32.gmra.mxu2 %vm11464_vm4, %v11463_v61  ;;  %vm11495_vm4 = vmmov %vm11467_vm0 }
 0x6b8   : > { %3606 = vrot.lane.b32.xlu2 %v11465_v47, %s7962_s0  ;;  %s6113_s0 = scalar_lea.hbm %s11886_s3, %s8137_s29 }
 0x6b9   : > { %6513 = vmatmul.msk.f32.gmra.mxu2 %vm11467_vm0, %v11466_v63  ;;  %s6117_s4 = sshll.u32 %s6113_s0, 4  ;;  %s6118_s4 = int_to_ptr.hbm [resolvable:$true] %s6117_s4 }
 0x6c1   : > { %6514 = vmatmul.msk.f32.gmra.mxu2 %vm11469_vm6, %v11468_v51  ;;  %vm11498_vm6 = vmmov %vm11467_vm0 }
 0x6c9   : > { %6515 = vmatmul.msk.f32.gmra.mxu2 %vm11471_vm15, %v11470_v48  ;;  %vm11500_vm15 = vmmov %vm11467_vm0 }
 0x6d1   : > { %6516 = vmatmul.msk.f32.gmra.mxu2 %vm11473_vm8, %v11472_v37  ;;  %vm11502_vm8 = vmmov %vm11467_vm0 }
 0x6d9   : > { %6517 = vmatmul.msk.f32.gmra.mxu2 %vm11475_vm11, %v11474_v59  ;;  %vm11504_vm11 = vmmov %vm11467_vm0 }
 0x6e1   : > { %6518 = vmatmul.msk.f32.gmra.mxu2 %vm11477_vm9, %v11476_v35  ;;  %vm11506_vm9 = vmmov %vm11467_vm0 }
 0x6e9   : > { %6519 = vmatmul.msk.f32.gmra.mxu2 %vm11479_vm13, %v11478_v62  ;;  %vm11508_vm13 = vmmov %vm11467_vm0 }
 0x6f1   : > { %6520 = vmatmul.msk.f32.gmra.mxu2 %vm11481_vm14, %v11480_v8  ;;  %vm11510_vm14 = vmmov %vm11467_vm0 }
 0x6f9   : > { %6521 = vmatmul.msk.f32.gmra.mxu2 %vm11483_vm1, %v11482_v5  ;;  %vm11512_vm1 = vmmov %vm11467_vm0 }
 0x701   : > { %6522 = vmatmul.msk.f32.gmra.mxu2 %vm11485_vm10, %v11484_v49  ;;  %vm11514_vm10 = vmmov %vm11467_vm0 }
 0x702   : > { %v6990_v18 = vpop.permute.xlu2 %6989 }
 0x703   : > { %v6991_v3 = vunpack.i.l.bf16 %v6990_v18  ;;  %v6992_v9 = vunpack.i.h.bf16 %v6990_v18 }
 0x705   : > { %2692 = vmatpush.msrb.mxu1 %v6991_v3  ;;  %v11519_v3 = vld [vmem:[#allocation76_spill] sm:$0xff] }
 0x707   : > { %2693 = vmatpush.msrb.mxu1 %v6992_v9  ;;  %v2803_v9 = vmul.f32 %v9230_v31, %v11519_v3 }
 0x708   : > { %6497 = vmatmul.msk.f32.vlgmr.msrb.gmra.mxu1 %vm11487_vm2, %v11486_v24  ;;  %vm11516_vm2 = vmmov %vm11467_vm0 }
 0x709   : > { %6523 = vmatmul.msk.f32.gmra.mxu2 %vm11489_vm5, %v11488_v11 }
 0x710   : > { %6498 = vmatmul.msk.f32.gmra.mxu1 %vm11491_vm3, %v11490_v33 }
 0x711   : > { %6524 = vmatmul.msk.f32.gmra.mxu2 %vm11493_vm12, %v11492_v4 }
 0x718   : > { %6499 = vmatmul.msk.f32.gmra.mxu1 %vm11495_vm4, %v11494_v43 }
 0x720   : > { %6500 = vmatmul.msk.f32.gmra.mxu1 %vm11467_vm0, %v11496_v15  ;;  %vm11522_vm0 = vcmask 261120  }
 0x728   : > { %6501 = vmatmul.msk.f32.gmra.mxu1 %vm11498_vm6, %v11497_v14 }
 0x72c   : > { %v2754_v16 = vpop.f32.mrf.mxu2 }
 0x730   : > { %6502 = vmatmul.msk.f32.gmra.mxu1 %vm11500_vm15, %v11499_v55 }
 0x734   : > { %v2757_v29 = vpop.f32.mrf.mxu2 }
 0x738   : > { %6503 = vmatmul.msk.f32.gmra.mxu1 %vm11502_vm8, %v11501_v41 }
 0x73c   : > { %v2760_v60 = vpop.f32.mrf.mxu2 }
 0x740   : > { %6504 = vmatmul.msk.f32.gmra.mxu1 %vm11504_vm11, %v11503_v38 }
 0x744   : > { %v2763_v52 = vpop.f32.mrf.mxu2 }
 0x748   : > { %6505 = vmatmul.msk.f32.gmra.mxu1 %vm11506_vm9, %v11505_v53  ;;  %vm11524_vm9 = vmmov %vm11522_vm0 }
 0x74c   : > { %v2766_v0 = vpop.f32.mrf.mxu2 }
 0x750   : > { %6506 = vmatmul.msk.f32.gmra.mxu1 %vm11508_vm13, %v11507_v13 }
 0x758   : > { %6507 = vmatmul.msk.f32.gmra.mxu1 %vm11510_vm14, %v11509_v36 }
 0x760   : > { %6508 = vmatmul.msk.f32.gmra.mxu1 %vm11512_vm1, %v11511_v54 }
 0x768   : > { %6509 = vmatmul.msk.f32.gmra.mxu1 %vm11514_vm10, %v11513_v26 }
 0x770   : > { %6510 = vmatmul.msk.f32.gmra.mxu1 %vm11516_vm2, %v11515_v57  ;;  %vm11526_vm2 = vmmov %vm11522_vm0 }
 0x785   : > { %v2695_v25 = vpop.f32.mrf.mxu1 }
 0x786   : > { %v2755_v58 = vadd.f32 %v2754_v16, %v2695_v25 }
 0x788   : > { %v2815_v42 = vadd.f32 %v2801_v12, %v2755_v58  ;;  %v2769_v12 = vpop.f32.mrf.mxu2 }
 0x78a   : > { %v2834_v45 = vadd.f32 %v9237_v20, %v2815_v42 }
 0x78c   : > { %v6527_v44 = vmul.f32 -1.442695, %v2834_v45 }
 0x78d   : > { %v2698_v27 = vpop.f32.mrf.mxu1 }
 0x78e   : > { %7152 = vpow2.f32 %v6527_v44  ;;  %v2758_v22 = vadd.f32 %v2757_v29, %v2698_v27  ;;  %v11520_v27 = vld [vmem:[#allocation75_spill] sm:$0xff] }
 0x790   : > { %v2816_v34 = vadd.f32 %v2802_v7, %v2758_v22  ;;  %v2804_v22 = vmul.f32 %v9230_v31, %v11520_v27 }
 0x792   : > { %v9243_v56 = vadd.f32 %v9237_v20, %v2816_v34 }
 0x794   : > { %v7153_v17 = vpop.eup %7152  ;;  %v6528_v6 = vmul.f32 -1.442695, %v9243_v56 }
 0x795   : > { %v2890_v10 = vadd.f32 1.0, %v7153_v17  ;;  %v2701_v18 = vpop.f32.mrf.mxu1 }
 0x796   : > { %7154 = vpow2.f32 %v6528_v6  ;;  %v2761_v16 = vadd.f32 %v2760_v60, %v2701_v18 }
 0x797   : > { %7156 = vrcp.f32 %v2890_v10  ;;  %v2913_v34 = vand.u32 2147483647, %v2890_v10  ;;  %v2915_v17 = vand.u32 2147483648, %v2890_v10  ;;  %vm2909_vm3 = vweird.f32 %v2890_v10 }
 0x798   : > { %v2817_v29 = vadd.f32 %v2803_v9, %v2761_v16 }
 0x799   : > { %vm2914_vm4 = vcmp.eq.f32.partialorder %v2913_v34, 8.507059e+37 }
 0x79a   : > { %v9249_v39 = vadd.f32 %v9237_v20, %v2817_v29 }
 0x79c   : > { %v7155_v25 = vpop.eup %7154  ;;  %v6529_v19 = vmul.f32 -1.442695, %v9249_v39 }
 0x79d   : > { %v7157_v58 = vpop.eup %7156  ;;  %v2891_v46 = vadd.f32 1.0, %v7155_v25  ;;  %v2704_v42 = vpop.f32.mrf.mxu1 }
 0x79e   : > { %v2905_v1 = vmul.f32 %v7157_v58, %v2890_v10  ;;  %7158 = vpow2.f32 %v6529_v19  ;;  %v2764_v44 = vadd.f32 %v2763_v52, %v2704_v42  ;;  %vm2910_vm5 = vweird.f32 %v7157_v58 }
 0x79f   : > { %7160 = vrcp.f32 %v2891_v46  ;;  %vm2911_vm12 = vmor %vm2909_vm3, %vm2910_vm5  ;;  %v2916_v52 = vor.u32 1.1754944e-38, %v2915_v17  ;;  %v2928_v50 = vand.u32 2147483647, %v2891_v46  ;;  %v2930_v57 = vand.u32 2147483648, %v2891_v46 }
 0x7a0   : > { %v2906_v60 = vsub.f32 1.0, %v2905_v1  ;;  %v2818_v7 = vadd.f32 %v2804_v22, %v2764_v44  ;;  %v11521_v1 = vld [vmem:[#allocation77_spill] sm:$0xff]  ;;  %vm2924_vm15 = vweird.f32 %v2891_v46 }
 0x7a1   : > { %v2805_v44 = vmul.f32 %v9230_v31, %v11521_v1  ;;  %vm2929_vm11 = vcmp.eq.f32.partialorder %v2928_v50, 8.507059e+37 }
 0x7a2   : > { %v2907_v6 = vmul.f32 %v7157_v58, %v2906_v60  ;;  %v9255_v18 = vadd.f32 %v9237_v20, %v2818_v7  ;;  %v2772_v7 = vpop.f32.mrf.mxu2 }
 0x7a4   : > { %v7159_v9 = vpop.eup %7158  ;;  %v2908_v16 = vadd.f32 %v7157_v58, %v2907_v6  ;;  %v6530_v29 = vmul.f32 -1.442695, %v9255_v18 }
 0x7a5   : > { %v7161_v25 = vpop.eup %7160  ;;  %v2892_v19 = vadd.f32 1.0, %v7159_v9  ;;  %v2707_v42 = vpop.f32.mrf.mxu1 }
 0x7a6   : > { %v2912_v22 = vsel %vm2911_vm12, %v7157_v58, %v2908_v16  ;;  %7162 = vpow2.f32 %v6530_v29  ;;  %v2767_v60 = vadd.f32 %v2766_v0, %v2707_v42  ;;  %v2920_v27 = vmul.f32 %v7161_v25, %v2891_v46 }
 0x7a7   : > { %v2917_v3 = vsel %vm2914_vm4, %v2916_v52, %v2912_v22  ;;  %7164 = vrcp.f32 %v2892_v19  ;;  %vm2925_vm6 = vweird.f32 %v7161_v25  ;;  %vm2939_vm14 = vweird.f32 %v2892_v19 }
 0x7a8   : > { %v3114_v6 = vmul.f32 %v2917_v3, %v2834_v45  ;;  %v2819_v10 = vadd.f32 %v2805_v44, %v2767_v60  ;;  %v2921_v2 = vsub.f32 1.0, %v2920_v27  ;;  %v11523_v45 = vld [vmem:[#allocation78_spill] sm:$0xff]  ;;  %vm2926_vm8 = vmor %vm2924_vm15, %vm2925_vm6  ;;  %v2931_v27 = vor.u32 1.1754944e-38, %v2930_v57 }
 0x7a9   : > { %v2806_v3 = vmul.f32 %v9230_v31, %v11523_v45 }
 0x7aa   : > { %v9261_v34 = vadd.f32 %v9237_v20, %v2819_v10  ;;  %6542 = vmatmul.msk.f32.vlgmr.msrb.gmra.mxu0 %vm11522_vm0, %v3114_v6  ;;  %v2922_v17 = vmul.f32 %v7161_v25, %v2921_v2  ;;  %v2775_v46 = vpop.f32.mrf.mxu2 }
 0x7ac   : > { %v7163_v9 = vpop.eup %7162  ;;  %v6531_v58 = vmul.f32 -1.442695, %v9261_v34  ;;  %v2923_v0 = vadd.f32 %v7161_v25, %v2922_v17  ;;  %v2943_v17 = vand.u32 2147483647, %v2892_v19 }
 0x7ad   : > { %v7165_v16 = vpop.eup %7164  ;;  %v2893_v29 = vadd.f32 1.0, %v7163_v9  ;;  %v2710_v52 = vpop.f32.mrf.mxu1  ;;  %v2945_v9 = vand.u32 2147483648, %v2892_v19 }
 0x7ae   : > { %7166 = vpow2.f32 %v6531_v58  ;;  %v2770_v42 = vadd.f32 %v2769_v12, %v2710_v52  ;;  %v2927_v44 = vsel %vm2926_vm8, %v7161_v25, %v2923_v0  ;;  %v2935_v22 = vmul.f32 %v7165_v16, %v2892_v19 }
 0x7af   : > { %7168 = vrcp.f32 %v2893_v29  ;;  %v2932_v2 = vsel %vm2929_vm11, %v2931_v27, %v2927_v44  ;;  %vm2940_vm13 = vweird.f32 %v7165_v16  ;;  %vm2944_vm10 = vcmp.eq.f32.partialorder %v2943_v17, 8.507059e+37 }
 0x7b0   : > { %v2820_v60 = vadd.f32 %v2806_v3, %v2770_v42  ;;  %v3115_v6 = vmul.f32 %v2932_v2, %v9243_v56  ;;  %v2936_v10 = vsub.f32 1.0, %v2935_v22  ;;  %v11525_v56 = vld [vmem:[#allocation79_spill] sm:$0xff]  ;;  %vm2941_vm1 = vmor %vm2939_vm14, %vm2940_vm13  ;;  %v2946_v27 = vor.u32 1.1754944e-38, %v2945_v9 }
 0x7b1   : > { %v2807_v3 = vmul.f32 %v9230_v31, %v11525_v56  ;;  %v2958_v19 = vand.u32 2147483647, %v2893_v29  ;;  %vm2954_vm3 = vweird.f32 %v2893_v29 }
 0x7b2   : > { %v9269_v1 = vadd.f32 %v9237_v20, %v2820_v60  ;;  %6543 = vmatmul.msk.f32.gmra.mxu0 %vm11524_vm9, %v3115_v6  ;;  %v2937_v50 = vmul.f32 %v7165_v16, %v2936_v10  ;;  %v2778_v17 = vpop.f32.mrf.mxu2  ;;  %vm11529_vm9 = vmmov %vm11522_vm0 }
 0x7b3   : > { %vm2959_vm4 = vcmp.eq.f32.partialorder %v2958_v19, 8.507059e+37 }
 0x7b4   : > { %v7167_v57 = vpop.eup %7166  ;;  %v6532_v12 = vmul.f32 -1.442695, %v9269_v1  ;;  %v2938_v25 = vadd.f32 %v7165_v16, %v2937_v50  ;;  %v2960_v50 = vand.u32 2147483648, %v2893_v29 }
 0x7b5   : > { %v7169_v58 = vpop.eup %7168  ;;  %v2894_v0 = vadd.f32 1.0, %v7167_v57  ;;  %v2713_v52 = vpop.f32.mrf.mxu1 }
 0x7b6   : > { %7170 = vpow2.f32 %v6532_v12  ;;  %v2773_v42 = vadd.f32 %v2772_v7, %v2713_v52  ;;  %v2942_v44 = vsel %vm2941_vm1, %v7165_v16, %v2938_v25  ;;  %v2950_v22 = vmul.f32 %v7169_v58, %v2893_v29 }
 0x7b7   : > { %7172 = vrcp.f32 %v2894_v0  ;;  %v2947_v2 = vsel %vm2944_vm10, %v2946_v27, %v2942_v44  ;;  %vm2955_vm5 = vweird.f32 %v7169_v58  ;;  %v2961_v27 = vor.u32 1.1754944e-38, %v2960_v50 }
 0x7b8   : > { %v2821_v60 = vadd.f32 %v2807_v3, %v2773_v42  ;;  %v3116_v6 = vmul.f32 %v2947_v2, %v9249_v39  ;;  %v2951_v10 = vsub.f32 1.0, %v2950_v22  ;;  %v11527_v39 = vld [vmem:[#allocation80_spill] sm:$0xff]  ;;  %vm2956_vm12 = vmor %vm2954_vm3, %vm2955_vm5  ;;  %v2973_v29 = vand.u32 2147483647, %v2894_v0 }
 0x7b9   : > { %v2808_v3 = vmul.f32 %v9230_v31, %v11527_v39  ;;  %vm2969_vm15 = vweird.f32 %v2894_v0 }
 0x7ba   : > { %v9277_v57 = vadd.f32 %v9237_v20, %v2821_v60  ;;  %6544 = vmatmul.msk.f32.gmra.mxu0 %vm11526_vm2, %v3116_v6  ;;  %v2952_v56 = vmul.f32 %v7169_v58, %v2951_v10  ;;  %v2975_v10 = vand.u32 2147483648, %v2894_v0  ;;  %vm2974_vm11 = vcmp.eq.f32.partialorder %v2973_v29, 8.507059e+37  ;;  %vm11531_vm2 = vmmov %vm11522_vm0 }
 0x7bc   : > { %v7171_v9 = vpop.eup %7170  ;;  %v6533_v7 = vmul.f32 -1.442695, %v9277_v57  ;;  %v2953_v16 = vadd.f32 %v7169_v58, %v2952_v56 }
 0x7bd   : > { %v7173_v12 = vpop.eup %7172  ;;  %v2895_v25 = vadd.f32 1.0, %v7171_v9  ;;  %v2716_v52 = vpop.f32.mrf.mxu1 }
 0x7be   : > { %7174 = vpow2.f32 %v6533_v7  ;;  %v2776_v42 = vadd.f32 %v2775_v46, %v2716_v52  ;;  %v2957_v44 = vsel %vm2956_vm12, %v7169_v58, %v2953_v16  ;;  %v2965_v22 = vmul.f32 %v7173_v12, %v2894_v0  ;;  %v2781_v7 = vpop.f32.mrf.mxu2 }
 0x7bf   : > { %7176 = vrcp.f32 %v2895_v25  ;;  %v2962_v2 = vsel %vm2959_vm4, %v2961_v27, %v2957_v44  ;;  %vm2970_vm6 = vweird.f32 %v7173_v12  ;;  %v2976_v27 = vor.u32 1.1754944e-38, %v2975_v10 }
 0x7c0   : > { %v2822_v60 = vadd.f32 %v2808_v3, %v2776_v42  ;;  %v3117_v6 = vmul.f32 %v2962_v2, %v9255_v18  ;;  %v2966_v56 = vsub.f32 1.0, %v2965_v22  ;;  %v11528_v18 = vld [vmem:[#allocation81_spill] sm:$0xff]  ;;  %vm2971_vm8 = vmor %vm2969_vm15, %vm2970_vm6  ;;  %vm2984_vm14 = vweird.f32 %v2895_v25 }
 0x7c1   : > { %v2809_v3 = vmul.f32 %v9230_v31, %v11528_v18 }
 0x7c2   : > { %v9285_v9 = vadd.f32 %v9237_v20, %v2822_v60  ;;  %6545 = vmatmul.msk.f32.gmra.mxu0 %vm11522_vm0, %v3117_v6  ;;  %v2967_v39 = vmul.f32 %v7173_v12, %v2966_v56  ;;  %v2988_v6 = vand.u32 2147483647, %v2895_v25  ;;  %v2990_v56 = vand.u32 2147483648, %v2895_v25 }
 0x7c4   : > { %v7175_v19 = vpop.eup %7174  ;;  %v6534_v46 = vmul.f32 -1.442695, %v9285_v9  ;;  %v2968_v58 = vadd.f32 %v7173_v12, %v2967_v39  ;;  %vm2989_vm10 = vcmp.eq.f32.partialorder %v2988_v6, 8.507059e+37 }
 0x7c5   : > { %v7177_v50 = vpop.eup %7176  ;;  %v2896_v16 = vadd.f32 1.0, %v7175_v19  ;;  %v2719_v52 = vpop.f32.mrf.mxu1 }
 0x7c6   : > { %7178 = vpow2.f32 %v6534_v46  ;;  %v2779_v42 = vadd.f32 %v2778_v17, %v2719_v52  ;;  %v2972_v44 = vsel %vm2971_vm8, %v7173_v12, %v2968_v58  ;;  %v2980_v22 = vmul.f32 %v7177_v50, %v2895_v25  ;;  %v11530_v52 = vld [vmem:[#allocation82_spill] sm:$0xff] }
 0x7c7   : > { %7180 = vrcp.f32 %v2896_v16  ;;  %v2977_v2 = vsel %vm2974_vm11, %v2976_v27, %v2972_v44  ;;  %vm2985_vm13 = vweird.f32 %v7177_v50  ;;  %vm2999_vm3 = vweird.f32 %v2896_v16 }
 0x7c8   : > { %v2823_v60 = vadd.f32 %v2809_v3, %v2779_v42  ;;  %v3118_v39 = vmul.f32 %v2977_v2, %v9261_v34  ;;  %v2981_v0 = vsub.f32 1.0, %v2980_v22  ;;  %v2810_v34 = vmul.f32 %v9230_v31, %v11530_v52  ;;  %vm2986_vm1 = vmor %vm2984_vm14, %vm2985_vm13  ;;  %v2784_v22 = vpop.f32.mrf.mxu2 }
 0x7c9   : > { %v2991_v3 = vor.u32 1.1754944e-38, %v2990_v56 }
 0x7ca   : > { %v9293_v19 = vadd.f32 %v9237_v20, %v2823_v60  ;;  %6546 = vmatmul.msk.f32.gmra.mxu0 %vm11529_vm9, %v3118_v39  ;;  %v2982_v18 = vmul.f32 %v7177_v50, %v2981_v0  ;;  %v3003_v39 = vand.u32 2147483647, %v2896_v16  ;;  %v3005_v0 = vand.u32 2147483648, %v2896_v16  ;;  %vm11534_vm9 = vmmov %vm11522_vm0 }
 0x7cc   : > { %v7179_v29 = vpop.eup %7178  ;;  %v6535_v17 = vmul.f32 -1.442695, %v9293_v19  ;;  %v2983_v12 = vadd.f32 %v7177_v50, %v2982_v18  ;;  %vm3004_vm4 = vcmp.eq.f32.partialorder %v3003_v39, 8.507059e+37 }
 0x7cd   : > { %v7181_v10 = vpop.eup %7180  ;;  %v2897_v46 = vadd.f32 1.0, %v7179_v29  ;;  %v2722_v58 = vpop.f32.mrf.mxu1 }
 0x7ce   : > { %7182 = vpow2.f32 %v6535_v17  ;;  %v2782_v27 = vadd.f32 %v2781_v7, %v2722_v58  ;;  %v2987_v42 = vsel %vm2986_vm1, %v7177_v50, %v2983_v12  ;;  %v2995_v44 = vmul.f32 %v7181_v10, %v2896_v16  ;;  %v11532_v12 = vld [vmem:[#allocation83_spill] sm:$0xff] }
 0x7cf   : > { %7184 = vrcp.f32 %v2897_v46  ;;  %v2992_v2 = vsel %vm2989_vm10, %v2991_v3, %v2987_v42  ;;  %vm3000_vm5 = vweird.f32 %v7181_v10  ;;  %v2811_v58 = vmul.f32 %v9230_v31, %v11532_v12 }
 0x7d0   : > { %v2824_v60 = vadd.f32 %v2810_v34, %v2782_v27  ;;  %v3119_v18 = vmul.f32 %v2992_v2, %v9269_v1  ;;  %v2996_v25 = vsub.f32 1.0, %v2995_v44  ;;  %vm3001_vm12 = vmor %vm2999_vm3, %vm3000_vm5  ;;  %v3006_v3 = vor.u32 1.1754944e-38, %v3005_v0  ;;  %v2787_v16 = vpop.f32.mrf.mxu2 }
 0x7d1   : > { %v3020_v52 = vand.u32 2147483648, %v2897_v46  ;;  %vm3014_vm15 = vweird.f32 %v2897_v46 }
 0x7d2   : > { %v9301_v29 = vadd.f32 %v9237_v20, %v2824_v60  ;;  %6547 = vmatmul.msk.f32.gmra.mxu0 %vm11531_vm2, %v3119_v18  ;;  %v2997_v6 = vmul.f32 %v7181_v10, %v2996_v25  ;;  %vm11536_vm2 = vmmov %vm11522_vm0 }
 0x7d4   : > { %v7183_v56 = vpop.eup %7182  ;;  %v6536_v50 = vmul.f32 -1.442695, %v9301_v29  ;;  %v2998_v7 = vadd.f32 %v7181_v10, %v2997_v6  ;;  %v3018_v6 = vand.u32 2147483647, %v2897_v46 }
 0x7d5   : > { %v7185_v17 = vpop.eup %7184  ;;  %v2898_v1 = vadd.f32 1.0, %v7183_v56  ;;  %v2725_v34 = vpop.f32.mrf.mxu1 }
 0x7d6   : > { %7186 = vpow2.f32 %v6536_v50  ;;  %v2785_v27 = vadd.f32 %v2784_v22, %v2725_v34  ;;  %v3002_v42 = vsel %vm3001_vm12, %v7181_v10, %v2998_v7  ;;  %v3010_v44 = vmul.f32 %v7185_v17, %v2897_v46 }
 0x7d7   : > { %7188 = vrcp.f32 %v2898_v1  ;;  %v3007_v2 = vsel %vm3004_vm4, %v3006_v3, %v3002_v42  ;;  %vm3015_vm6 = vweird.f32 %v7185_v17  ;;  %vm3019_vm11 = vcmp.eq.f32.partialorder %v3018_v6, 8.507059e+37 }
 0x7d8   : > { %v2825_v60 = vadd.f32 %v2811_v58, %v2785_v27  ;;  %v3120_v18 = vmul.f32 %v3007_v2, %v9277_v57  ;;  %v3011_v25 = vsub.f32 1.0, %v3010_v44  ;;  %v11533_v57 = vld [vmem:[#allocation84_spill] sm:$0xff]  ;;  %vm3016_vm8 = vmor %vm3014_vm15, %vm3015_vm6  ;;  %v3021_v34 = vor.u32 1.1754944e-38, %v3020_v52  ;;  %v2790_v52 = vpop.f32.mrf.mxu2 }
 0x7d9   : > { %v2812_v58 = vmul.f32 %v9230_v31, %v11533_v57  ;;  %v3033_v46 = vand.u32 2147483647, %v2898_v1  ;;  %vm3029_vm14 = vweird.f32 %v2898_v1 }
 0x7da   : > { %v9309_v12 = vadd.f32 %v9237_v20, %v2825_v60  ;;  %6548 = vmatmul.msk.f32.gmra.mxu0 %vm11522_vm0, %v3120_v18  ;;  %v3012_v39 = vmul.f32 %v7185_v17, %v3011_v25  ;;  %v3035_v25 = vand.u32 2147483648, %v2898_v1 }
 0x7db   : > { %vm3034_vm10 = vcmp.eq.f32.partialorder %v3033_v46, 8.507059e+37 }
 0x7dc   : > { %v7187_v0 = vpop.eup %7186  ;;  %v6537_v10 = vmul.f32 -1.442695, %v9309_v12  ;;  %v3013_v22 = vadd.f32 %v7185_v17, %v3012_v39 }
 0x7dd   : > { %v7189_v56 = vpop.eup %7188  ;;  %v2899_v50 = vadd.f32 1.0, %v7187_v0  ;;  %v2728_v7 = vpop.f32.mrf.mxu1 }
 0x7de   : > { %7190 = vpow2.f32 %v6537_v10  ;;  %v2788_v3 = vadd.f32 %v2787_v16, %v2728_v7  ;;  %v3017_v27 = vsel %vm3016_vm8, %v7185_v17, %v3013_v22  ;;  %v3025_v42 = vmul.f32 %v7189_v56, %v2898_v1 }
 0x7df   : > { %7192 = vrcp.f32 %v2899_v50  ;;  %v3022_v44 = vsel %vm3019_vm11, %v3021_v34, %v3017_v27  ;;  %vm3030_vm13 = vweird.f32 %v7189_v56  ;;  %v3036_v34 = vor.u32 1.1754944e-38, %v3035_v25 }
 0x7e0   : > { %v2826_v2 = vadd.f32 %v2812_v58, %v2788_v3  ;;  %v3121_v60 = vmul.f32 %v3022_v44, %v9285_v9  ;;  %v3026_v18 = vsub.f32 1.0, %v3025_v42  ;;  %v11535_v9 = vld [vmem:[#allocation85_spill] sm:$0xff]  ;;  %vm3031_vm1 = vmor %vm3029_vm14, %vm3030_vm13  ;;  %v3048_v1 = vand.u32 2147483647, %v2899_v50 }
 0x7e1   : > { %v2813_v58 = vmul.f32 %v9230_v31, %v11535_v9  ;;  %vm3044_vm3 = vweird.f32 %v2899_v50 }
 0x7e2   : > { %v9317_v39 = vadd.f32 %v9237_v20, %v2826_v2  ;;  %6549 = vmatmul.msk.f32.gmra.mxu0 %vm11534_vm9, %v3121_v60  ;;  %v3027_v0 = vmul.f32 %v7189_v56, %v3026_v18  ;;  %vm3049_vm4 = vcmp.eq.f32.partialorder %v3048_v1, 8.507059e+37  ;;  %vm11538_vm9 = vmmov %vm11522_vm0 }
 0x7e4   : > { %v7191_v6 = vpop.eup %7190  ;;  %v6538_v17 = vmul.f32 -1.442695, %v9317_v39  ;;  %v3028_v16 = vadd.f32 %v7189_v56, %v3027_v0  ;;  %v3050_v0 = vand.u32 2147483648, %v2899_v50 }
 0x7e5   : > { %v7193_v10 = vpop.eup %7192  ;;  %v2900_v22 = vadd.f32 1.0, %v7191_v6  ;;  %v2731_v7 = vpop.f32.mrf.mxu1 }
 0x7e6   : > { %7194 = vpow2.f32 %v6538_v17  ;;  %v2791_v3 = vadd.f32 %v2790_v52, %v2731_v7  ;;  %v3032_v27 = vsel %vm3031_vm1, %v7189_v56, %v3028_v16  ;;  %v3040_v42 = vmul.f32 %v7193_v10, %v2899_v50  ;;  %v2793_v17 = vpop.f32.mrf.mxu2 }
 0x7e7   : > { %7196 = vrcp.f32 %v2900_v22  ;;  %v3037_v44 = vsel %vm3034_vm10, %v3036_v34, %v3032_v27  ;;  %vm3045_vm5 = vweird.f32 %v7193_v10  ;;  %v3051_v34 = vor.u32 1.1754944e-38, %v3050_v0 }
 0x7e8   : > { %v2827_v2 = vadd.f32 %v2813_v58, %v2791_v3  ;;  %v3122_v60 = vmul.f32 %v3037_v44, %v9293_v19  ;;  %v3041_v18 = vsub.f32 1.0, %v3040_v42  ;;  %v11537_v19 = vld [vmem:[#allocation86_spill] sm:$0xff]  ;;  %vm3046_vm12 = vmor %vm3044_vm3, %vm3045_vm5  ;;  %v3063_v1 = vand.u32 2147483647, %v2900_v22 }
 0x7e9   : > { %v2814_v58 = vmul.f32 %v9230_v31, %v11537_v19  ;;  %vm3059_vm15 = vweird.f32 %v2900_v22 }
 0x7ea   : > { %v9325_v6 = vadd.f32 %v9237_v20, %v2827_v2  ;;  %6550 = vmatmul.msk.f32.gmra.mxu0 %vm11536_vm2, %v3122_v60  ;;  %v3042_v9 = vmul.f32 %v7193_v10, %v3041_v18  ;;  %v3065_v60 = vand.u32 2147483648, %v2900_v22  ;;  %vm3064_vm11 = vcmp.eq.f32.partialorder %v3063_v1, 8.507059e+37  ;;  %vm11539_vm2 = vmmov %vm11522_vm0 }
 0x7ec   : > { %v7195_v46 = vpop.eup %7194  ;;  %v6539_v25 = vmul.f32 -1.442695, %v9325_v6  ;;  %v3043_v56 = vadd.f32 %v7193_v10, %v3042_v9 }
 0x7ed   : > { %v7197_v52 = vpop.eup %7196  ;;  %v2901_v16 = vadd.f32 1.0, %v7195_v46  ;;  %v2734_v7 = vpop.f32.mrf.mxu1 }
 0x7ee   : > { %7198 = vpow2.f32 %v6539_v25  ;;  %v2794_v3 = vadd.f32 %v2793_v17, %v2734_v7  ;;  %v3047_v27 = vsel %vm3046_vm12, %v7193_v10, %v3043_v56  ;;  %v3055_v42 = vmul.f32 %v7197_v52, %v2900_v22 }
 0x7ef   : > { %7200 = vrcp.f32 %v2901_v16  ;;  %v3052_v44 = vsel %vm3049_vm4, %v3051_v34, %v3047_v27  ;;  %vm3060_vm6 = vweird.f32 %v7197_v52  ;;  %v3066_v17 = vor.u32 1.1754944e-38, %v3065_v60 }
 0x7f0   : > { %v2828_v2 = vadd.f32 %v2814_v58, %v2794_v3  ;;  %v3123_v9 = vmul.f32 %v3052_v44, %v9301_v29  ;;  %v3056_v50 = vsub.f32 1.0, %v3055_v42  ;;  %vm3061_vm8 = vmor %vm3059_vm15, %vm3060_vm6  ;;  %v3080_v3 = vand.u32 2147483648, %v2901_v16 }
 0x7f1   : > { %v3078_v42 = vand.u32 2147483647, %v2901_v16  ;;  %vm3074_vm14 = vweird.f32 %v2901_v16 }
 0x7f2   : > { %v9333_v18 = vadd.f32 %v9237_v20, %v2828_v2  ;;  %6551 = vmatmul.msk.f32.gmra.mxu0 %vm11522_vm0, %v3123_v9  ;;  %v3057_v31 = vmul.f32 %v7197_v52, %v3056_v50 }
 0x7f3   : > { %vm3079_vm10 = vcmp.eq.f32.partialorder %v3078_v42, 8.507059e+37 }
 0x7f4   : > { %v7199_v0 = vpop.eup %7198  ;;  %v6540_v46 = vmul.f32 -1.442695, %v9333_v18  ;;  %v3058_v10 = vadd.f32 %v7197_v52, %v3057_v31 }
 0x7f5   : > { %v7201_v25 = vpop.eup %7200  ;;  %v2902_v56 = vadd.f32 1.0, %v7199_v0 }
 0x7f6   : > { %7202 = vpow2.f32 %v6540_v46  ;;  %v3062_v29 = vsel %vm3061_vm8, %v7197_v52, %v3058_v10  ;;  %v3070_v7 = vmul.f32 %v7201_v25, %v2901_v16  ;;  %vm3075_vm13 = vweird.f32 %v7201_v25 }
 0x7f7   : > { %7204 = vrcp.f32 %v2902_v56  ;;  %v3067_v20 = vsel %vm3064_vm11, %v3066_v17, %v3062_v29  ;;  %vm3076_vm1 = vmor %vm3074_vm14, %vm3075_vm13  ;;  %v3081_v52 = vor.u32 1.1754944e-38, %v3080_v3  ;;  %v3095_v0 = vand.u32 2147483648, %v2902_v56 }
 0x7f8   : > { %v3124_v58 = vmul.f32 %v3067_v20, %v9309_v12  ;;  %v3071_v34 = vsub.f32 1.0, %v3070_v7  ;;  %v3093_v10 = vand.u32 2147483647, %v2902_v56  ;;  %vm3089_vm3 = vweird.f32 %v2902_v56 }
 0x7f9   : > { %v3096_v29 = vor.u32 1.1754944e-38, %v3095_v0 }
 0x7fa   : > { %6552 = vmatmul.msk.f32.gmra.mxu0 %vm11538_vm9, %v3124_v58  ;;  %v3072_v27 = vmul.f32 %v7201_v25, %v3071_v34  ;;  %vm3094_vm4 = vcmp.eq.f32.partialorder %v3093_v10, 8.507059e+37  ;;  %vm11540_vm9 = vmmov %vm11522_vm0 }
 0x7fc   : > { %v7203_v22 = vpop.eup %7202  ;;  %v3073_v44 = vadd.f32 %v7201_v25, %v3072_v27 }
 0x7fd   : > { %v7205_v2 = vpop.eup %7204  ;;  %v2903_v9 = vadd.f32 1.0, %v7203_v22 }
 0x7fe   : > { %v3077_v50 = vsel %vm3076_vm1, %v7201_v25, %v3073_v44  ;;  %v3085_v60 = vmul.f32 %v7205_v2, %v2902_v56  ;;  %vm3090_vm5 = vweird.f32 %v7205_v2 }
 0x7ff   : > { %7206 = vrcp.f32 %v2903_v9  ;;  %v3082_v31 = vsel %vm3079_vm10, %v3081_v52, %v3077_v50  ;;  %vm3091_vm12 = vmor %vm3089_vm3, %vm3090_vm5  ;;  %v3108_v27 = vand.u32 2147483647, %v2903_v9  ;;  %vm3104_vm15 = vweird.f32 %v2903_v9 }
 0x800   : > { %v3125_v12 = vmul.f32 %v3082_v31, %v9317_v39  ;;  %v3086_v1 = vsub.f32 1.0, %v3085_v60  ;;  %v3110_v39 = vand.u32 2147483648, %v2903_v9 }
 0x801   : > { %vm3109_vm11 = vcmp.eq.f32.partialorder %v3108_v27, 8.507059e+37 }
 0x802   : > { %6553 = vmatmul.msk.f32.gmra.mxu0 %vm11539_vm2, %v3125_v12  ;;  %v3087_v46 = vmul.f32 %v7205_v2, %v3086_v1  ;;  %v3111_v56 = vor.u32 1.1754944e-38, %v3110_v39 }
 0x804   : > { %v3088_v17 = vadd.f32 %v7205_v2, %v3087_v46 }
 0x805   : > { %v7207_v16 = vpop.eup %7206 }
 0x806   : > { %v3092_v7 = vsel %vm3091_vm12, %v7205_v2, %v3088_v17  ;;  %v3100_v25 = vmul.f32 %v7207_v16, %v2903_v9  ;;  %vm3105_vm6 = vweird.f32 %v7207_v16  ;;  %v9348_v9 = vld [vmem:[%s11135_s13 + $0x1] ss:$0 sm:$0xff] }
 0x807   : > { %v3097_v20 = vsel %vm3094_vm4, %v3096_v29, %v3092_v7  ;;  %vm3106_vm8 = vmor %vm3104_vm15, %vm3105_vm6 }
 0x808   : > { %v3126_v58 = vmul.f32 %v3097_v20, %v9325_v6  ;;  %v3101_v34 = vsub.f32 1.0, %v3100_v25 }
 0x80a   : > { %6554 = vmatmul.msk.f32.gmra.mxu0 %vm11522_vm0, %v3126_v58  ;;  %v3102_v3 = vmul.f32 %v7207_v16, %v3101_v34 }
 0x80c   : > { %v3103_v42 = vadd.f32 %v7207_v16, %v3102_v3 }
 0x80e   : > { %v3107_v22 = vsel %vm3106_vm8, %v7207_v16, %v3103_v42 }
 0x80f   : > { %v3112_v44 = vsel %vm3109_vm11, %v3111_v56, %v3107_v22 }
 0x810   : > { %v3127_v2 = vmul.f32 %v3112_v44, %v9333_v18 }
 0x812   : > { %6555 = vmatmul.msk.f32.gmra.mxu0 %vm11540_vm9, %v3127_v2 }
 0x827   : > { %v3197_v52 = vpop.f32.mrf.mxu0 }
 0x828   : > { %v9351_v17 = vadd.f32 %v9348_v9, %v3197_v52 }
 0x82a   : > { %11541 = vst [vmem:[#allocation39_spill] sm:$0xff] %v9351_v17  ;;  %v6556_v7 = vmul.f32 -1.442695, %v9351_v17 }
 0x82c   : > { %7208 = vpow2.f32 %v6556_v7 }
 0x82f   : > { %v3200_v6 = vpop.f32.mrf.mxu0 }
 0x830   : > { %v9354_v18 = vadd.f32 %v9348_v9, %v3200_v6 }
 0x832   : > { %11542 = vst [vmem:[#allocation87_spill] sm:$0xff] %v9354_v18  ;;  %v6557_v20 = vmul.f32 -1.442695, %v9354_v18 }
 0x834   : > { %7210 = vpow2.f32 %v6557_v20 }
 0x837   : > { %v3203_v50 = vpop.f32.mrf.mxu0 }
 0x838   : > { %v9357_v16 = vadd.f32 %v9348_v9, %v3203_v50 }
 0x83a   : > { %11543 = vst [vmem:[#allocation40_spill] sm:$0xff] %v9357_v16  ;;  %v6558_v34 = vmul.f32 -1.442695, %v9357_v16 }
 0x83c   : > { %7212 = vpow2.f32 %v6558_v34 }
 0x83f   : > { %v3206_v60 = vpop.f32.mrf.mxu0 }
 0x840   : > { %v9360_v29 = vadd.f32 %v9348_v9, %v3206_v60 }
 0x842   : > { %11544 = vst [vmem:[#allocation92_spill] sm:$0xff] %v9360_v29  ;;  %v6559_v3 = vmul.f32 -1.442695, %v9360_v29 }
 0x844   : > { %7214 = vpow2.f32 %v6559_v3 }
 0x847   : > { %v3209_v31 = vpop.f32.mrf.mxu0 }
 0x848   : > { %v9364_v25 = vadd.f32 %v9348_v9, %v3209_v31 }
 0x84a   : > { %11545 = vst [vmem:[#allocation93_spill] sm:$0xff] %v9364_v25  ;;  %v6560_v42 = vmul.f32 -1.442695, %v9364_v25 }
 0x84c   : > { %7216 = vpow2.f32 %v6560_v42 }
 0x84f   : > { %v3212_v12 = vpop.f32.mrf.mxu0 }
 0x850   : > { %v9369_v39 = vadd.f32 %v9348_v9, %v3212_v12  ;;  %v7209_v12 = vpop.eup %7208 }
 0x851   : > { %v9398_v34 = vadd.f32 1.0, %v7209_v12 }
 0x852   : > { %v6561_v44 = vmul.f32 -1.442695, %v9369_v39 }
 0x854   : > { %7218 = vpow2.f32 %v6561_v44 }
 0x857   : > { %v3215_v1 = vpop.f32.mrf.mxu0 }
 0x858   : > { %v9373_v27 = vadd.f32 %v9348_v9, %v3215_v1 }
 0x85a   : > { %v6562_v52 = vmul.f32 -1.442695, %v9373_v27 }
 0x85c   : > { %7220 = vpow2.f32 %v6562_v52 }
 0x85f   : > { %v3218_v0 = vpop.f32.mrf.mxu0 }
 0x860   : > { %v9377_v56 = vadd.f32 %v9348_v9, %v3218_v0 }
 0x862   : > { %v6563_v50 = vmul.f32 -1.442695, %v9377_v56 }
 0x864   : > { %7222 = vpow2.f32 %v6563_v50 }
 0x867   : > { %v3221_v46 = vpop.f32.mrf.mxu0 }
 0x868   : > { %v9380_v22 = vadd.f32 %v9348_v9, %v3221_v46  ;;  %v7211_v46 = vpop.eup %7210 }
 0x869   : > { %v7213_v7 = vpop.eup %7212  ;;  %v9400_v42 = vadd.f32 1.0, %v7211_v46 }
 0x86a   : > { %v6564_v60 = vmul.f32 -1.442695, %v9380_v22  ;;  %v9402_v44 = vadd.f32 1.0, %v7213_v7 }
 0x86c   : > { %7224 = vpow2.f32 %v6564_v60 }
 0x86f   : > { %v3224_v10 = vpop.f32.mrf.mxu0 }
 0x870   : > { %v9384_v2 = vadd.f32 %v9348_v9, %v3224_v10 }
 0x872   : > { %v6565_v1 = vmul.f32 -1.442695, %v9384_v2 }
 0x874   : > { %7226 = vpow2.f32 %v6565_v1 }
 0x877   : > { %v3227_v58 = vpop.f32.mrf.mxu0 }
 0x878   : > { %v9388_v6 = vadd.f32 %v9348_v9, %v3227_v58  ;;  %v7215_v58 = vpop.eup %7214 }
 0x879   : > { %v7217_v3 = vpop.eup %7216  ;;  %v9404_v19 = vadd.f32 1.0, %v7215_v58 }
 0x87a   : > { %v6566_v10 = vmul.f32 -1.442695, %v9388_v6  ;;  %v9407_v50 = vadd.f32 1.0, %v7217_v3 }
 0x87c   : > { %7228 = vpow2.f32 %v6566_v10 }
 0x87f   : > { %v3230_v31 = vpop.f32.mrf.mxu0 }
 0x880   : > { %v9394_v0 = vadd.f32 %v9348_v9, %v3230_v31  ;;  %v7219_v31 = vpop.eup %7218 }
 0x881   : > { %v7221_v52 = vpop.eup %7220  ;;  %v9414_v46 = vadd.f32 1.0, %v7219_v31 }
 0x882   : > { %v6567_v20 = vmul.f32 -1.442695, %v9394_v0  ;;  %v7223_v12 = vpop.eup %7222  ;;  %v9417_v7 = vadd.f32 1.0, %v7221_v52 }
 0x883   : > { %v7225_v1 = vpop.eup %7224  ;;  %v9421_v3 = vadd.f32 1.0, %v7223_v12 }
 0x884   : > { %7230 = vpow2.f32 %v6567_v20  ;;  %v7227_v10 = vpop.eup %7226 }
 0x885   : > { %7232 = vrcp.f32 %v9398_v34  ;;  %v7229_v58 = vpop.eup %7228  ;;  %v9428_v31 = vadd.f32 1.0, %v7227_v10 }
 0x886   : > { %7234 = vrcp.f32 %v9400_v42  ;;  %v9433_v52 = vadd.f32 1.0, %v7229_v58 }
 0x887   : > { %v3233_v57 = vpop.f32.mrf.mxu0  ;;  %7236 = vrcp.f32 %v9402_v44  ;;  %vm3435_vm10 = vweird.f32 %v9428_v31 }
 0x888   : > { %v9411_v60 = vadd.f32 %v9348_v9, %v3233_v57  ;;  %7238 = vrcp.f32 %v9404_v19  ;;  %v9423_v57 = vadd.f32 1.0, %v7225_v1  ;;  %vm3450_vm14 = vweird.f32 %v9433_v52 }
 0x889   : > { %7240 = vrcp.f32 %v9407_v50 }
 0x88a   : > { %v6568_v20 = vmul.f32 -1.442695, %v9411_v60  ;;  %v7231_v45 = vpop.eup %7230  ;;  %vm3420_vm4 = vweird.f32 %v9423_v57 }
 0x88b   : > { %v9425_v26 = vpop.eup %7232  ;;  %v9438_v12 = vadd.f32 1.0, %v7231_v45 }
 0x88c   : > { %7242 = vpow2.f32 %v6568_v20  ;;  %v9430_v54 = vpop.eup %7234  ;;  %v3296_v15 = vmul.f32 %v9425_v26, %v9398_v34 }
 0x88d   : > { %7244 = vrcp.f32 %v9414_v46  ;;  %v9435_v36 = vpop.eup %7236  ;;  %vm3465_vm15 = vweird.f32 %v9438_v12 }
 0x88e   : > { %7246 = vrcp.f32 %v9417_v7  ;;  %v9440_v20 = vpop.eup %7238  ;;  %v3297_v35 = vsub.f32 1.0, %v3296_v15 }
 0x88f   : > { %7248 = vrcp.f32 %v9421_v3  ;;  %v3236_v1 = vpop.f32.mrf.mxu0  ;;  %v9446_v13 = vpop.eup %7240  ;;  %v3341_v33 = vmul.f32 %v9440_v20, %v9404_v19 }
 0x890   : > { %7250 = vrcp.f32 %v9423_v57  ;;  %v9444_v10 = vadd.f32 %v9348_v9, %v3236_v1  ;;  %v3356_v11 = vmul.f32 %v9446_v13, %v9407_v50  ;;  %v9501_v17 = vmul.f32 %v9425_v26, %v3297_v35 }
 0x891   : > { %7252 = vrcp.f32 %v9428_v31  ;;  %v3342_v15 = vsub.f32 1.0, %v3341_v33 }
 0x892   : > { %v7243_v58 = vpop.eup %7242  ;;  %7254 = vrcp.f32 %v9433_v52  ;;  %v6569_v53 = vmul.f32 -1.442695, %v9444_v10  ;;  %v3357_v61 = vsub.f32 1.0, %v3356_v11 }
 0x893   : > { %v9451_v38 = vpop.eup %7244  ;;  %7256 = vrcp.f32 %v9438_v12  ;;  %v9454_v45 = vadd.f32 1.0, %v7243_v58  ;;  %v3311_v58 = vmul.f32 %v9430_v54, %v9400_v42  ;;  %v9510_v33 = vmul.f32 %v9440_v20, %v3342_v15 }
 0x894   : > { %v9456_v41 = vpop.eup %7246  ;;  %7258 = vpow2.f32 %v6569_v53  ;;  %v3326_v53 = vmul.f32 %v9435_v36, %v9402_v44  ;;  %v3371_v49 = vmul.f32 %v9451_v38, %v9414_v46 }
 0x895   : > { %v9458_v9 = vpop.eup %7248  ;;  %7260 = vrcp.f32 %v9454_v45  ;;  %v3386_v5 = vmul.f32 %v9456_v41, %v9417_v7  ;;  %v3312_v51 = vsub.f32 1.0, %v3311_v58  ;;  %vm3480_vm3 = vweird.f32 %v9454_v45 }
 0x896   : > { %v9461_v1 = vpop.eup %7250  ;;  %v3401_v8 = vmul.f32 %v9458_v9, %v9421_v3  ;;  %v3372_v32 = vsub.f32 1.0, %v3371_v49  ;;  %v3486_v49 = vand.u32 2147483648, %v9454_v45  ;;  %vm3406_vm12 = vweird.f32 %v9458_v9 }
 0x897   : > { %v9463_v55 = vpop.eup %7252  ;;  %v3416_v59 = vmul.f32 %v9461_v1, %v9423_v57  ;;  %v3387_v21 = vsub.f32 1.0, %v3386_v5  ;;  %v9504_v58 = vmul.f32 %v9430_v54, %v3312_v51  ;;  %vm3421_vm1 = vweird.f32 %v9461_v1 }
 0x898   : > { %v9465_v14 = vpop.eup %7254  ;;  %v3431_v63 = vmul.f32 %v9463_v55, %v9428_v31  ;;  %v3402_v23 = vsub.f32 1.0, %v3401_v8  ;;  %v9517_v35 = vmul.f32 %v9451_v38, %v3372_v32  ;;  %vm3436_vm13 = vweird.f32 %v9463_v55 }
 0x899   : > { %v9469_v43 = vpop.eup %7256  ;;  %v3446_v47 = vmul.f32 %v9465_v14, %v9433_v52  ;;  %v3417_v28 = vsub.f32 1.0, %v3416_v59  ;;  %v9520_v51 = vmul.f32 %v9456_v41, %v3387_v21  ;;  %v3454_v21 = vand.u32 2147483647, %v9433_v52 }
 0x89a   : > { %v7259_v4 = vpop.eup %7258  ;;  %v3461_v37 = vmul.f32 %v9469_v43, %v9438_v12  ;;  %v3432_v18 = vsub.f32 1.0, %v3431_v63  ;;  %vm3466_vm2 = vweird.f32 %v9469_v43  ;;  %vm3451_vm6 = vweird.f32 %v9465_v14 }
 0x89b   : > { %v9479_v24 = vpop.eup %7260  ;;  %v9487_v62 = vadd.f32 1.0, %v7259_v4  ;;  %v3327_v4 = vsub.f32 1.0, %v3326_v53  ;;  %v3447_v16 = vsub.f32 1.0, %v3446_v47  ;;  %v9523_v47 = vmul.f32 %v9458_v9, %v3402_v23  ;;  %vm9562_vm7 = vmor %vm3465_vm15, %vm3466_vm2 }
 0x89c   : > { %v3476_v48 = vmul.f32 %v9479_v24, %v9454_v45  ;;  %v3462_v40 = vsub.f32 1.0, %v3461_v37  ;;  %v3418_v8 = vmul.f32 %v9461_v1, %v3417_v28  ;;  %v3433_v5 = vmul.f32 %v9463_v55, %v3432_v18  ;;  %vm9583_vm9 = vmor %vm3450_vm14, %vm3451_vm6 }
 0x89d   : > { %7262 = vrcp.f32 %v9487_v62  ;;  %v9507_v29 = vmul.f32 %v9435_v36, %v3327_v4  ;;  %v3448_v32 = vmul.f32 %v9465_v14, %v3447_v16  ;;  %vm3481_vm5 = vweird.f32 %v9479_v24  ;;  %vm9600_vm14 = vmor %vm3435_vm10, %vm3436_vm13 }
 0x89e   : > { %v3477_v30 = vsub.f32 1.0, %v3476_v48  ;;  %v9513_v48 = vmul.f32 %v9446_v13, %v3357_v61  ;;  %v3463_v61 = vmul.f32 %v9469_v43, %v3462_v40  ;;  %v3484_v23 = vand.u32 2147483647, %v9454_v45  ;;  %vm9553_vm8 = vmor %vm3480_vm3, %vm3481_vm5 }
 0x89f   : > { %v3501_v11 = vand.u32 2147483648, %v9487_v62  ;;  %v3499_v53 = vand.u32 2147483647, %v9487_v62  ;;  %v3469_v4 = vand.u32 2147483647, %v9438_v12  ;;  %v3471_v45 = vand.u32 2147483648, %v9438_v12  ;;  %vm9618_vm13 = vmor %vm3420_vm4, %vm3421_vm1 }
 0x8a0   : > { %v3478_v59 = vmul.f32 %v9479_v24, %v3477_v30  ;;  %v3464_v18 = vadd.f32 %v9469_v43, %v3463_v61  ;;  %vm3495_vm5 = vweird.f32 %v9487_v62  ;;  %v3456_v63 = vand.u32 2147483648, %v9433_v52 }
 0x8a1   : > { %v3487_v25 = vor.u32 1.1754944e-38, %v3486_v49  ;;  %vm3376_vm2 = vweird.f32 %v9451_v38  ;;  %vm3390_vm15 = vweird.f32 %v9417_v7  ;;  %vm3500_vm11 = vcmp.eq.f32.partialorder %v3499_v53, 8.507059e+37 }
 0x8a2   : > { %v3479_v28 = vadd.f32 %v9479_v24, %v3478_v59  ;;  %v3449_v59 = vadd.f32 %v9465_v14, %v3448_v32  ;;  %v3502_v32 = vor.u32 1.1754944e-38, %v3501_v11  ;;  %v3468_v15 = vsel %vm9562_vm7, %v9469_v43, %v3464_v18 }
 0x8a3   : > { %v7263_v37 = vpop.eup %7262  ;;  %vm3375_vm7 = vweird.f32 %v9414_v46  ;;  %v3419_v43 = vadd.f32 %v9461_v1, %v3418_v8  ;;  %v3426_v18 = vand.u32 2147483648, %v9423_v57  ;;  %v3457_v8 = vor.u32 1.1754944e-38, %v3456_v63 }
 0x8a4   : > { %v3491_v30 = vmul.f32 %v7263_v37, %v9487_v62  ;;  %vm3496_vm0 = vweird.f32 %v7263_v37  ;;  %v3483_v12 = vsel %vm9553_vm8, %v9479_v24, %v3479_v28  ;;  %vm3485_vm8 = vcmp.eq.f32.partialorder %v3484_v23, 8.507059e+37 }
 0x8a5   : > { %vm3497_vm3 = vmor %vm3495_vm5, %vm3496_vm0  ;;  %v3441_v62 = vand.u32 2147483648, %v9428_v31  ;;  %v3472_v28 = vor.u32 1.1754944e-38, %v3471_v45  ;;  %v3488_v49 = vsel %vm3485_vm8, %v3487_v25, %v3483_v12  ;;  %vm3361_vm0 = vweird.f32 %v9446_v13 }
 0x8a6   : > { %v3492_v40 = vsub.f32 1.0, %v3491_v30  ;;  %vm3470_vm5 = vcmp.eq.f32.partialorder %v3469_v4, 8.507059e+37  ;;  %v3424_v23 = vand.u32 2147483647, %v9423_v57  ;;  %vm3346_vm6 = vweird.f32 %v9440_v20 }
 0x8a7   : > { %v3517_v53 = vmul.f32 %v3488_v49, %v9411_v60  ;;  %v3409_v4 = vand.u32 2147483647, %v9421_v3  ;;  %v3411_v63 = vand.u32 2147483648, %v9421_v3  ;;  %vm3331_vm10 = vweird.f32 %v9435_v36 }
 0x8a8   : > { %v3493_v16 = vmul.f32 %v7263_v37, %v3492_v40  ;;  %v3434_v40 = vadd.f32 %v9463_v55, %v3433_v5  ;;  %v3423_v60 = vsel %vm9618_vm13, %v9461_v1, %v3419_v43  ;;  %v3394_v61 = vand.u32 2147483647, %v9417_v7 }
 0x8a9   : > { %v3396_v12 = vand.u32 2147483648, %v9417_v7  ;;  %vm11557_vm1 = vweird.f32 %v9421_v3  ;;  %v3366_v5 = vand.u32 2147483648, %v9407_v50  ;;  %v3349_v43 = vand.u32 2147483647, %v9404_v19 }
 0x8aa   : > { %v3494_v30 = vadd.f32 %v7263_v37, %v3493_v16  ;;  %v3473_v16 = vsel %vm3470_vm5, %v3472_v28, %v3468_v15  ;;  %vm9638_vm4 = vmor %vm11557_vm1, %vm3406_vm12  ;;  %vm3316_vm5 = vweird.f32 %v9430_v54  ;;  %vm11560_vm12 = vweird.f32 %v9456_v41  ;;  %v11580_v15 = vld [vmem:[#allocation90_spill] sm:$0xff]  ;;  %v11584_v28 = vld [vmem:[#allocation89_spill] sm:$0xff] }
 0x8ab   : > { %v3516_v57 = vmul.f32 %v3473_v16, %v9394_v0  ;;  %v3374_v0 = vadd.f32 %v9451_v38, %v9517_v35  ;;  %vm9656_vm13 = vmor %vm3390_vm15, %vm11560_vm12  ;;  %v3412_v35 = vor.u32 1.1754944e-38, %v3411_v63  ;;  %vm3315_vm1 = vweird.f32 %v9400_v42 }
 0x8ac   : > { %v3498_v24 = vsel %vm3497_vm3, %v7263_v37, %v3494_v30  ;;  %v3453_v37 = vsel %vm9583_vm9, %v9465_v14, %v3449_v59  ;;  %v3404_v14 = vadd.f32 %v9458_v9, %v9523_v47  ;;  %vm3455_vm9 = vcmp.eq.f32.partialorder %v3454_v21, 8.507059e+37  ;;  %vm9674_vm15 = vmor %vm3375_vm7, %vm3376_vm2 }
 0x8ad   : > { %v3503_v11 = vsel %vm3500_vm11, %v3502_v32, %v3498_v24  ;;  %vm3360_vm11 = vweird.f32 %v9407_v50  ;;  %v3442_v47 = vor.u32 1.1754944e-38, %v3441_v62  ;;  %v3458_v59 = vsel %vm3455_vm9, %v3457_v8, %v3453_v37  ;;  %v7019_v37 = vld [vmem:[%s11138_s16 + $0x1] ss:$0 sm:$0xff] }
 0x8ae   : > { %v3518_v52 = vmul.f32 %v3503_v11, %v9444_v10  ;;  %v3438_v10 = vsel %vm9600_vm14, %v9463_v55, %v3434_v40  ;;  %vm3345_vm3 = vweird.f32 %v9404_v19  ;;  %v3389_v55 = vadd.f32 %v9456_v41, %v9520_v51  ;;  %vm9690_vm2 = vmor %vm3360_vm11, %vm3361_vm0 }
 0x8af   : > { %v11556_v21 = vand.u32 2147483647, %v9428_v31  ;;  %v3427_v30 = vor.u32 1.1754944e-38, %v3426_v18  ;;  %vm3330_vm14 = vweird.f32 %v9402_v44  ;;  %v3408_v31 = vsel %vm9638_vm4, %v9458_v9, %v3404_v14  ;;  %vm9706_vm0 = vmor %vm3345_vm3, %vm3346_vm6 }
 0x8b0   : > { %3521 = vmatpush.msra.mxu3 %v3518_v52  ;;  %vm3425_vm9 = vcmp.eq.f32.partialorder %v3424_v23, 8.507059e+37  ;;  %v3515_v3 = vmul.f32 %v3458_v59, %v9388_v6  ;;  %v3379_v40 = vand.u32 2147483647, %v9414_v46  ;;  %v3381_v32 = vand.u32 2147483648, %v9414_v46  ;;  %vm9722_vm6 = vmor %vm3330_vm14, %vm3331_vm10 }
 0x8b1   : > { %vm3440_vm8 = vcmp.eq.f32.partialorder %v11556_v21, 8.507059e+37  ;;  %v3428_v24 = vsel %vm3425_vm9, %v3427_v30, %v3423_v60  ;;  %v3359_v6 = vadd.f32 %v9446_v13, %v9513_v48  ;;  %v3393_v9 = vsel %vm9656_vm13, %v9456_v41, %v3389_v55  ;;  %vm9738_vm10 = vmor %vm3315_vm1, %vm3316_vm5  ;;  %v11574_v21 = vld [vmem:[#allocation92_spill] sm:$0xff]  ;;  %v11576_v30 = vld [vmem:[#allocation87_spill] sm:$0xff] }
 0x8b2   : > { %3522 = vmatpush.msra.mxu3 %v3517_v53  ;;  %v3443_v1 = vsel %vm3440_vm8, %v3442_v47, %v3438_v10  ;;  %vm3301_vm8 = vweird.f32 %v9425_v26  ;;  %vm3410_vm4 = vcmp.eq.f32.partialorder %v3409_v4, 8.507059e+37  ;;  %v3364_v62 = vand.u32 2147483647, %v9407_v50  ;;  %v11573_v47 = vld [vmem:[#allocation93_spill] sm:$0xff] }
 0x8b3   : > { %v3514_v7 = vmul.f32 %v3443_v1, %v9384_v2  ;;  %v3397_v48 = vor.u32 1.1754944e-38, %v3396_v12  ;;  %v3413_v49 = vsel %vm3410_vm4, %v3412_v35, %v3408_v31  ;;  %v3344_v41 = vadd.f32 %v9440_v20, %v9510_v33  ;;  %v11575_v12 = vld [vmem:[#allocation40_spill] sm:$0xff]  ;;  %v3548_v35 = vld [vmem:[#allocation17 + $0x20] sm:$0xff] }
 0x8b4   : > { %3523 = vmatpush.msra.mxu3 %v3516_v57  ;;  %v3378_v2 = vsel %vm9674_vm15, %v9451_v38, %v3374_v0  ;;  %vm3395_vm9 = vcmp.eq.f32.partialorder %v3394_v61, 8.507059e+37  ;;  %v3513_v11 = vmul.f32 %v3428_v24, %v9380_v22  ;;  %v3351_v46 = vand.u32 2147483648, %v9404_v19  ;;  %v11577_v0 = vld [vmem:[#allocation39_spill] sm:$0xff]  ;;  %v3546_v24 = vld [vmem:[#allocation15 + $0x38] sm:$0xff] }
 0x8b5   : > { %v3382_v33 = vor.u32 1.1754944e-38, %v3381_v32  ;;  %v3398_v52 = vsel %vm3395_vm9, %v3397_v48, %v3393_v9  ;;  %v3329_v38 = vadd.f32 %v9435_v36, %v9507_v29  ;;  %v3363_v22 = vsel %vm9690_vm2, %v9446_v13, %v3359_v6  ;;  %v3549_v32 = vld [vmem:[#allocation17 + $0x28] sm:$0xff]  ;;  %v3545_v6 = vld [vmem:[#allocation15 + $0x30] sm:$0xff] }
 0x8b6   : > { %3524 = vmatpush.msra.mxu3 %v3515_v3  ;;  %vm3380_vm7 = vcmp.eq.f32.partialorder %v3379_v40, 8.507059e+37  ;;  %v3512_v23 = vmul.f32 %v3413_v49, %v9377_v56  ;;  %v3334_v18 = vand.u32 2147483647, %v9402_v44  ;;  %v3336_v50 = vand.u32 2147483648, %v9402_v44  ;;  %v3551_v3 = vld [vmem:[#allocation17 + $0x38] sm:$0xff]  ;;  %v3550_v40 = vld [vmem:[#allocation17 + $0x30] sm:$0xff] }
 0x8b7   : > { %v3367_v29 = vor.u32 1.1754944e-38, %v3366_v5  ;;  %v3383_v8 = vsel %vm3380_vm7, %v3382_v33, %v3378_v2  ;;  %v3314_v13 = vadd.f32 %v9430_v54, %v9504_v58  ;;  %v3348_v56 = vsel %vm9706_vm0, %v9440_v20, %v3344_v41  ;;  %v3544_v9 = vld [vmem:[#allocation15 + $0x28] sm:$0xff]  ;;  %v11586_v48 = vld [vmem:[#allocation88_spill] sm:$0xff] }
 0x8b8   : > { %3525 = vmatpush.msra.mxu3 %v3514_v7  ;;  %vm3365_vm11 = vcmp.eq.f32.partialorder %v3364_v62, 8.507059e+37  ;;  %v3511_v16 = vmul.f32 %v3398_v52, %v9373_v27  ;;  %v3319_v14 = vand.u32 2147483647, %v9400_v42  ;;  %v3321_v19 = vand.u32 2147483648, %v9400_v42  ;;  %v3543_v7 = vld [vmem:[#allocation15 + $0x20] sm:$0xff]  ;;  %v3663_v2 = vld [vmem:[#allocation18 + $0x38] sm:$0xff] }
 0x8b9   : > { %v3352_v58 = vor.u32 1.1754944e-38, %v3351_v46  ;;  %v3368_v53 = vsel %vm3365_vm11, %v3367_v29, %v3363_v22  ;;  %v3299_v20 = vadd.f32 %v9425_v26, %v9501_v17  ;;  %v3333_v27 = vsel %vm9722_vm6, %v9435_v36, %v3329_v38  ;;  %v3662_v33 = vld [vmem:[#allocation18 + $0x30] sm:$0xff]  ;;  %v3661_v38 = vld [vmem:[#allocation18 + $0x28] sm:$0xff]  ;;  %v3660_v22 = vld [vmem:[#allocation18 + $0x20] sm:$0xff] }
 0x8ba   : > { %3526 = vmatpush.msra.mxu3 %v3513_v11  ;;  %vm3350_vm3 = vcmp.eq.f32.partialorder %v3349_v43, 8.507059e+37  ;;  %v3510_v4 = vmul.f32 %v3383_v8, %v9369_v39  ;;  %vm3300_vm12 = vweird.f32 %v9398_v34  ;;  %v3306_v44 = vand.u32 2147483648, %v9398_v34  ;;  %v3605_v11 = vpop.permute.xlu2 %3604 }
 0x8bb   : > { %v3337_v17 = vor.u32 1.1754944e-38, %v3336_v50  ;;  %v3353_v45 = vsel %vm3350_vm3, %v3352_v58, %v3348_v56  ;;  %v3304_v36 = vand.u32 2147483647, %v9398_v34  ;;  %v3318_v39 = vsel %vm9738_vm10, %v9430_v54, %v3314_v13  ;;  %vm3302_vm13 = vmor %vm3300_vm12, %vm3301_vm8  ;;  %v3702_v56 = vld [vmem:[#allocation12 + $0x58] sm:$0xff] }
 0x8bc   : > { %3527 = vmatpush.msra.mxu3 %v3512_v23  ;;  %vm3335_vm14 = vcmp.eq.f32.partialorder %v3334_v18, 8.507059e+37  ;;  %v3509_v59 = vmul.f32 %v3368_v53, %v11573_v47  ;;  %v3322_v42 = vor.u32 1.1754944e-38, %v3321_v19  ;;  %v3303_v60 = vsel %vm3302_vm13, %v9425_v26, %v3299_v20  ;;  %v11578_v26 = vld [vmem:[#allocation91_spill] sm:$0xff] }
 0x8bd   : > { %v3338_v55 = vsel %vm3335_vm14, %v3337_v17, %v3333_v27  ;;  %vm3320_vm5 = vcmp.eq.f32.partialorder %v3319_v14, 8.507059e+37  ;;  %v3508_v57 = vmul.f32 %v3353_v45, %v11574_v21  ;;  %v3307_v34 = vor.u32 1.1754944e-38, %v3306_v44 }
 0x8be   : > { %3528 = vmatpush.msra.mxu3 %v3511_v16  ;;  %v3323_v61 = vsel %vm3320_vm5, %v3322_v42, %v3318_v39  ;;  %vm3305_vm1 = vcmp.eq.f32.partialorder %v3304_v36, 8.507059e+37  ;;  %v3507_v54 = vmul.f32 %v3338_v55, %v11575_v12  ;;  %vm11579_vm8 = vcmask 916480   ;;  %v3701_v16 = vld [vmem:[#allocation12 + $0x50] sm:$0xff] }
 0x8bf   : > { %v3308_v51 = vsel %vm3305_vm1, %v3307_v34, %v3303_v60  ;;  %v3506_v1 = vmul.f32 %v3323_v61, %v11576_v30  ;;  %vm11581_vm4 = vmmov %vm11579_vm8  ;;  %vm11582_vm15 = vcmask 261120  }
 0x8c0   : > { %3529 = vmatpush.msra.mxu3 %v3510_v4  ;;  %v3505_v31 = vmul.f32 %v3308_v51, %v11577_v0  ;;  %vm11583_vm9 = vmmov %vm11582_vm15  ;;  %v3699_v0 = vld [vmem:[#allocation12 + $0x40] sm:$0xff] }
 0x8c1   : > { %vm11585_vm2 = vmmov %vm11583_vm9 }
 0x8c2   : > { %3530 = vmatpush.msra.mxu3 %v3509_v59  ;;  %vm11587_vm7 = vmmov %vm11585_vm2  ;;  %v3607_v29 = vpop.permute.xlu2 %3606 }
 0x8c3   : > { %vm11588_vm12 = vmmov %vm11585_vm2 }
 0x8c4   : > { %3531 = vmatpush.msra.mxu3 %v3508_v57  ;;  %vm11589_vm1 = vmmov %vm11585_vm2 }
 0x8c6   : > { %3532 = vmatpush.msra.mxu3 %v3507_v54 }
 0x8c8   : > { %3533 = vmatpush.msra.mxu3 %v3506_v1  ;;  %v3700_v1 = vld [vmem:[#allocation12 + $0x48] sm:$0xff] }
 0x8ca   : > { %3534 = vmatpush.msra.mxu3 %v3505_v31  ;;  %v7020_v31 = vld [vmem:[%s11140_s18 + $0x1] ss:$0 sm:$0xff] }
 0x8cb   : > { %6570 = vmatmul.msk.f32.vlgmr.msra.gmra.mxu3 %vm11579_vm8, %v11578_v26  ;;  %vm11591_vm8 = vmmov %vm11589_vm1 }
 0x8cc   : > { %3570 = vmatpush.msrb.mxu3 %v3551_v3 }
 0x8ce   : > { %3571 = vmatpush.msrb.mxu3 %v3550_v40 }
 0x8d0   : > { %3572 = vmatpush.msrb.mxu3 %v3549_v32 }
 0x8d2   : > { %3573 = vmatpush.msrb.mxu3 %v3548_v35 }
 0x8d3   : > { %6571 = vmatmul.msk.f32.gmra.mxu3 %vm11581_vm4, %v11580_v15  ;;  %vm11593_vm4 = vmmov %vm11589_vm1 }
 0x8d4   : > { %3593 = vmatpush.msra.mxu3 %v3546_v24 }
 0x8d6   : > { %3594 = vmatpush.msra.mxu3 %v3545_v6 }
 0x8d8   : > { %3595 = vmatpush.msra.mxu3 %v3544_v9 }
 0x8da   : > { %3596 = vmatpush.msra.mxu3 %v3543_v7  ;;  %v11594_v7 = vld [vmem:[#allocation44_spill] sm:$0xff] }
 0x94e   : > { %v3536_v62 = vpop.f32.mrf.mxu3 }
 0x94f   : > { %6572 = vmatmul.msk.f32.vlgmr.msrb.gmra.mxu3 %vm11582_vm15, %v3536_v62  ;;  %vm11595_vm15 = vcmask 130048   ;;  %v11596_v62 = vld [vmem:[#allocation41_spill] sm:$0xff] }
 0x950   : > { %3687 = vmatpush.msrb.mxu3 %v3663_v2  ;;  %v11606_v2 = vld [vmem:[#allocation54_spill] sm:$0xff] }
 0x952   : > { %3688 = vmatpush.msrb.mxu3 %v3662_v33  ;;  %v11616_v33 = vld [vmem:[#allocation64_spill] sm:$0xff] }
 0x954   : > { %3689 = vmatpush.msrb.mxu3 %v3661_v38 }
 0x956   : > { %v3539_v5 = vpop.f32.mrf.mxu3  ;;  %3690 = vmatpush.msrb.mxu3 %v3660_v22 }
 0x957   : > { %6573 = vmatmul.msk.f32.gmra.mxu3 %vm11583_vm9, %v3539_v5  ;;  %v11597_v5 = vld [vmem:[#allocation46_spill] sm:$0xff]  ;;  %vm11598_vm9 = vmmov %vm11595_vm15 }
 0x95f   : > { %6574 = vmatmul.msk.f32.vlgmr.msra.gmra.mxu3 %vm11585_vm2, %v11584_v28  ;;  %v11599_v28 = vld [vmem:[#allocation42_spill] sm:$0xff]  ;;  %vm11601_vm2 = vmmov %vm11598_vm9 }
 0x960   : > { %3721 = vmatpush.msra.mxu3 %v3702_v56  ;;  %v11632_v56 = vld [vmem:[#allocation51_spill] sm:$0xff] }
 0x962   : > { %3722 = vmatpush.msra.mxu3 %v3701_v16  ;;  %v11634_v16 = vld [vmem:[#allocation53_spill] sm:$0xff] }
 0x964   : > { %3723 = vmatpush.msra.mxu3 %v3700_v1  ;;  %v11652_v1 = vld [vmem:[#allocation74_spill] sm:$0xff] }
 0x966   : > { %3724 = vmatpush.msra.mxu3 %v3699_v0 }
 0x967   : > { %6575 = vmatmul.msk.f32.gmra.mxu3 %vm11587_vm7, %v11586_v48  ;;  %v11600_v48 = vld [vmem:[#allocation48_spill] sm:$0xff]  ;;  %vm11603_vm7 = vmmov %vm11601_vm2 }
 0x9d2   : > { %v3575_v49 = vpop.f32.mrf.mxu3 }
 0x9da   : > { %v3578_v41 = vpop.f32.mrf.mxu3 }
 0x9e2   : > { %v3598_v43 = vpop.f32.mrf.mxu3 }
 0x9e3   : > { %v3599_v46 = vadd.f32 %v3598_v43, %v3575_v49  ;;  %v11602_v49 = vld [vmem:[#allocation50_spill] sm:$0xff] }
 0x9e4   : > { %v11610_v43 = vld [vmem:[#allocation58_spill] sm:$0xff] }
 0x9e5   : > { %v3610_v52 = vadd.f32 %v3605_v11, %v3599_v46  ;;  %v11608_v11 = vld [vmem:[#allocation56_spill] sm:$0xff] }
 0x9e6   : > { %v11612_v46 = vld [vmem:[#allocation60_spill] sm:$0xff] }
 0x9e7   : > { %v3617_v23 = vadd.f32 %v7019_v37, %v3610_v52  ;;  %v11618_v52 = vld [vmem:[#allocation66_spill] sm:$0xff] }
 0x9e9   : > { %v6577_v18 = vmul.f32 -1.442695, %v3617_v23 }
 0x9ea   : > { %v3601_v50 = vpop.f32.mrf.mxu3 }
 0x9eb   : > { %7264 = vpow2.f32 %v6577_v18  ;;  %v3602_v25 = vadd.f32 %v3601_v50, %v3578_v41  ;;  %v11604_v41 = vld [vmem:[#allocation52_spill] sm:$0xff]  ;;  %v11620_v18 = vld [vmem:[#allocation43_spill] sm:$0xff] }
 0x9ec   : > { %v11622_v50 = vld [vmem:[#allocation68_spill] sm:$0xff] }
 0x9ed   : > { %v3611_v8 = vadd.f32 %v3607_v29, %v3602_v25  ;;  %v11624_v25 = vld [vmem:[#allocation45_spill] sm:$0xff]  ;;  %v11626_v29 = vld [vmem:[#allocation70_spill] sm:$0xff] }
 0x9ef   : > { %v3618_v13 = vadd.f32 %v7019_v37, %v3611_v8  ;;  %v11614_v37 = vld [vmem:[#allocation62_spill] sm:$0xff]  ;;  %v11628_v8 = vld [vmem:[#allocation47_spill] sm:$0xff] }
 0x9f1   : > { %v7265_v14 = vpop.eup %7264  ;;  %v6578_v19 = vmul.f32 -1.442695, %v3618_v13 }
 0x9f2   : > { %v3625_v10 = vadd.f32 1.0, %v7265_v14  ;;  %v11636_v14 = vld [vmem:[#allocation55_spill] sm:$0xff] }
 0x9f3   : > { %7266 = vpow2.f32 %v6578_v19  ;;  %v11637_v19 = vld [vmem:[#allocation57_spill] sm:$0xff] }
 0x9f4   : > { %7268 = vrcp.f32 %v3625_v10  ;;  %v3638_v44 = vand.u32 2147483648, %v3625_v10  ;;  %v3636_v17 = vand.u32 2147483647, %v3625_v10  ;;  %vm3632_vm11 = vweird.f32 %v3625_v10 }
 0x9f6   : > { %v3639_v39 = vor.u32 1.1754944e-38, %v3638_v44  ;;  %vm3637_vm3 = vcmp.eq.f32.partialorder %v3636_v17, 8.507059e+37 }
 0x9f9   : > { %v7267_v58 = vpop.eup %7266 }
 0x9fa   : > { %v7269_v53 = vpop.eup %7268  ;;  %v3626_v20 = vadd.f32 1.0, %v7267_v58  ;;  %v11641_v58 = vld [vmem:[#allocation61_spill] sm:$0xff] }
 0x9fb   : > { %v3628_v27 = vmul.f32 %v7269_v53, %v3625_v10  ;;  %vm3633_vm0 = vweird.f32 %v7269_v53  ;;  %v11639_v10 = vld [vmem:[#allocation59_spill] sm:$0xff] }
 0x9fc   : > { %7270 = vrcp.f32 %v3626_v20  ;;  %vm3634_vm6 = vmor %vm3632_vm11, %vm3633_vm0  ;;  %v3653_v21 = vand.u32 2147483648, %v3626_v20  ;;  %v3651_v34 = vand.u32 2147483647, %v3626_v20  ;;  %vm3647_vm14 = vweird.f32 %v3626_v20 }
 0x9fd   : > { %v3629_v4 = vsub.f32 1.0, %v3628_v27  ;;  %vm11605_vm0 = vmmov %vm11601_vm2  ;;  %v11647_v27 = vld [vmem:[#allocation67_spill] sm:$0xff] }
 0x9fe   : > { %v3654_v12 = vor.u32 1.1754944e-38, %v3653_v21  ;;  %vm3652_vm5 = vcmp.eq.f32.partialorder %v3651_v34, 8.507059e+37  ;;  %vm11607_vm11 = vmmov %vm11605_vm0 }
 0x9ff   : > { %v3630_v63 = vmul.f32 %v7269_v53, %v3629_v4  ;;  %v11649_v4 = vld [vmem:[#allocation69_spill] sm:$0xff] }
 0xa01   : > { %v3631_v45 = vadd.f32 %v7269_v53, %v3630_v63 }
 0xa02   : > { %v7271_v36 = vpop.eup %7270 }
 0xa03   : > { %v3635_v47 = vsel %vm3634_vm6, %v7269_v53, %v3631_v45  ;;  %v3643_v59 = vmul.f32 %v7271_v36, %v3626_v20  ;;  %vm3648_vm10 = vweird.f32 %v7271_v36  ;;  %vm11609_vm6 = vmmov %vm11605_vm0  ;;  %v11643_v53 = vld [vmem:[#allocation63_spill] sm:$0xff]  ;;  %v11645_v20 = vld [vmem:[#allocation65_spill] sm:$0xff] }
 0xa04   : > { %v3640_v42 = vsel %vm3637_vm3, %v3639_v39, %v3635_v47  ;;  %vm3649_vm13 = vmor %vm3647_vm14, %vm3648_vm10  ;;  %v9842_v45 = vld [vmem:[%s11397_s15 + $0x2] ss:$0 sm:$0xff] }
 0xa05   : > { %v3657_v55 = vmul.f32 %v3640_v42, %v3617_v23  ;;  %v3644_v60 = vsub.f32 1.0, %v3643_v59  ;;  %vm11611_vm3 = vmmov %vm11605_vm0  ;;  %v11651_v59 = vld [vmem:[#allocation72_spill] sm:$0xff]  ;;  %v3864_v0 = vmul.f32 %v9842_v45, %v11652_v1 }
 0xa06   : > { %vm11615_vm10 = vmmov %vm11605_vm0  ;;  %v3863_v42 = vmul.f32 %v9842_v45, %v11651_v59 }
 0xa07   : > { %6580 = vmatmul.msk.f32.vlgmr.msrb.gmra.mxu3 %vm11588_vm12, %v3657_v55  ;;  %v3645_v57 = vmul.f32 %v7271_v36, %v3644_v60  ;;  %vm11613_vm12 = vmmov %vm11605_vm0  ;;  %v9849_v55 = vld [vmem:[%s11399_s24 + $0x2] ss:$0 sm:$0xff]  ;;  %v4193_v60 = vld [vmem:[#allocation14 + $0x50] sm:$0xff] }
 0xa08   : > { %vm11617_vm14 = vmmov %vm11605_vm0 }
 0xa09   : > { %v3646_v61 = vadd.f32 %v7271_v36, %v3645_v57  ;;  %v4192_v57 = vld [vmem:[#allocation14 + $0x48] sm:$0xff] }
 0xa0b   : > { %v3650_v54 = vsel %vm3649_vm13, %v7271_v36, %v3646_v61  ;;  %vm11619_vm13 = vmmov %vm11605_vm0  ;;  %v4194_v36 = vld [vmem:[#allocation14 + $0x58] sm:$0xff]  ;;  %v4191_v61 = vld [vmem:[#allocation14 + $0x40] sm:$0xff] }
 0xa0c   : > { %v3655_v51 = vsel %vm3652_vm5, %v3654_v12, %v3650_v54  ;;  %vm11621_vm5 = vmmov %vm11605_vm0  ;;  %4254 = vmatpush.msra.mxu2 %v4194_v36 }
 0xa0d   : > { %v3658_v30 = vmul.f32 %v3655_v51, %v3618_v13  ;;  %v11630_v13 = vld [vmem:[#allocation49_spill] sm:$0xff] }
 0xa0e   : > { %4255 = vmatpush.msra.mxu2 %v4193_v60 }
 0xa0f   : > { %6581 = vmatmul.msk.f32.gmra.mxu3 %vm11589_vm1, %v3658_v30  ;;  %vm11623_vm1 = vmmov %vm11605_vm0 }
 0xa10   : > { %4256 = vmatpush.msra.mxu2 %v4192_v57  ;;  %v11654_v57 = vld [vmem:[#allocation75_spill] sm:$0xff] }
 0xa12   : > { %4257 = vmatpush.msra.mxu2 %v4191_v61  ;;  %v3866_v61 = vmul.f32 %v9842_v45, %v11654_v57 }
 0xa8a   : > { %v3692_v3 = vpop.f32.mrf.mxu3 }
 0xa8b   : > { %v9772_v40 = vadd.f32 %v7020_v31, %v3692_v3 }
 0xa8d   : > { %11590 = vst [vmem:[#allocation93_spill] sm:$0xff] %v9772_v40  ;;  %6582 = vmatmul.msk.f32.vlgmr.msra.gmra.mxu3 %vm11591_vm8, %v9772_v40  ;;  %vm11625_vm8 = vmmov %vm11605_vm0 }
 0xa92   : > { %v3695_v32 = vpop.f32.mrf.mxu3 }
 0xa93   : > { %v9776_v35 = vadd.f32 %v7020_v31, %v3695_v32 }
 0xa95   : > { %11592 = vst [vmem:[#allocation92_spill] sm:$0xff] %v9776_v35  ;;  %6583 = vmatmul.msk.f32.gmra.mxu3 %vm11593_vm4, %v9776_v35  ;;  %vm11627_vm4 = vmmov %vm11605_vm0 }
 0xb10   : > { %v3726_v24 = vpop.f32.mrf.mxu3 }
 0xb18   : > { %v3729_v6 = vpop.f32.mrf.mxu3 }
 0xb19   : > { %v6993_v9 = vpack.i.bf16 %v3726_v24, %v3729_v6  ;;  %3813 = vmatpush.msra.mxu1 %v3729_v6 }
 0xb1b   : > { %6994 = vrot.lane.b32.xlu2 %v6993_v9, %s7961_s2  ;;  %3814 = vmatpush.msra.mxu1 %v3726_v24 }
 0xb1c   : > { %6598 = vmatmul.msk.f32.vlgmr.msra.gmra.mxu1 %vm11595_vm15, %v11594_v7  ;;  %vm11629_vm15 = vmmov %vm11605_vm0 }
 0xb23   : > { %4666 = vrot.lane.b32.xlu2 %v11596_v62, %s7963_s7 }
 0xb24   : > { %6599 = vmatmul.msk.f32.gmra.mxu1 %vm11598_vm9, %v11597_v5  ;;  %vm11631_vm9 = vmmov %vm11605_vm0 }
 0xb2b   : > { %4668 = vrot.lane.b32.xlu2 %v11599_v28, %s7963_s7  ;;  %v11653_v28 = vld [vmem:[#allocation76_spill] sm:$0xff]  ;;  %s11887_s7 = smov %s11886_s3 }
 0xb2c   : > { %6600 = vmatmul.msk.f32.gmra.mxu1 %vm11601_vm2, %v11600_v48  ;;  %vm11633_vm2 = vmmov %vm11605_vm0  ;;  %s7848_s14 = scalar_lea.hbm %s11887_s7, 2 }
 0xb34   : > { %6601 = vmatmul.msk.f32.gmra.mxu1 %vm11603_vm7, %v11602_v49  ;;  %vm11635_vm7 = vmmov %vm11605_vm0 }
 0xb3c   : > { %6602 = vmatmul.msk.f32.gmra.mxu1 %vm11605_vm0, %v11604_v41 }
 0xb44   : > { %6603 = vmatmul.msk.f32.gmra.mxu1 %vm11607_vm11, %v11606_v2  ;;  %vm11638_vm11 = vmmov %vm11605_vm0 }
 0xb4c   : > { %6604 = vmatmul.msk.f32.gmra.mxu1 %vm11609_vm6, %v11608_v11  ;;  %vm11640_vm6 = vmmov %vm11605_vm0 }
 0xb54   : > { %6605 = vmatmul.msk.f32.gmra.mxu1 %vm11611_vm3, %v11610_v43  ;;  %vm11642_vm3 = vmmov %vm11605_vm0 }
 0xb5c   : > { %6606 = vmatmul.msk.f32.gmra.mxu1 %vm11613_vm12, %v11612_v46  ;;  %vm11644_vm12 = vmmov %vm11605_vm0 }
 0xb64   : > { %6607 = vmatmul.msk.f32.gmra.mxu1 %vm11615_vm10, %v11614_v37  ;;  %vm11646_vm10 = vmmov %vm11605_vm0 }
 0xb6c   : > { %6608 = vmatmul.msk.f32.gmra.mxu1 %vm11617_vm14, %v11616_v33  ;;  %vm11648_vm14 = vmmov %vm11605_vm0 }
 0xb74   : > { %6609 = vmatmul.msk.f32.gmra.mxu1 %vm11619_vm13, %v11618_v52  ;;  %vm11650_vm13 = vmmov %vm11605_vm0 }
 0xb75   : > { %v6995_v38 = vpop.permute.xlu2 %6994 }
 0xb76   : > { %v6996_v22 = vunpack.i.l.bf16 %v6995_v38  ;;  %v6997_v23 = vunpack.i.h.bf16 %v6995_v38  ;;  %v3865_v38 = vmul.f32 %v9842_v45, %v11653_v28 }
 0xb78   : > { %3754 = vmatpush.msrb.mxu3 %v6996_v22 }
 0xb7a   : > { %3755 = vmatpush.msrb.mxu3 %v6997_v23 }
 0xb7b   : > { %6584 = vmatmul.msk.f32.vlgmr.msrb.gmra.mxu3 %vm11621_vm5, %v11620_v18 }
 0xb7c   : > { %6610 = vmatmul.msk.f32.gmra.mxu1 %vm11623_vm1, %v11622_v50 }
 0xb83   : > { %6585 = vmatmul.msk.f32.gmra.mxu3 %vm11625_vm8, %v11624_v25 }
 0xb84   : > { %6611 = vmatmul.msk.f32.gmra.mxu1 %vm11627_vm4, %v11626_v29 }
 0xb8b   : > { %6586 = vmatmul.msk.f32.gmra.mxu3 %vm11629_vm15, %v11628_v8  ;;  %vm11656_vm15 = vcmask 261120  }
 0xb93   : > { %6587 = vmatmul.msk.f32.gmra.mxu3 %vm11631_vm9, %v11630_v13 }
 0xb99   : > { %v3816_v44 = vpop.f32.mrf.mxu1 }
 0xb9b   : > { %6588 = vmatmul.msk.f32.gmra.mxu3 %vm11633_vm2, %v11632_v56 }
 0xba1   : > { %v3819_v63 = vpop.f32.mrf.mxu1 }
 0xba3   : > { %6589 = vmatmul.msk.f32.gmra.mxu3 %vm11635_vm7, %v11634_v16 }
 0xba9   : > { %v3822_v17 = vpop.f32.mrf.mxu1 }
 0xbab   : > { %6590 = vmatmul.msk.f32.gmra.mxu3 %vm11605_vm0, %v11636_v14 }
 0xbb1   : > { %v3825_v12 = vpop.f32.mrf.mxu1 }
 0xbb3   : > { %6591 = vmatmul.msk.f32.gmra.mxu3 %vm11638_vm11, %v11637_v19  ;;  %vm11658_vm11 = vmmov %vm11656_vm15 }
 0xbb9   : > { %v3828_v6 = vpop.f32.mrf.mxu1 }
 0xbbb   : > { %6592 = vmatmul.msk.f32.gmra.mxu3 %vm11640_vm6, %v11639_v10 }
 0xbc3   : > { %6593 = vmatmul.msk.f32.gmra.mxu3 %vm11642_vm3, %v11641_v58 }
 0xbcb   : > { %6594 = vmatmul.msk.f32.gmra.mxu3 %vm11644_vm12, %v11643_v53 }
 0xbd3   : > { %6595 = vmatmul.msk.f32.gmra.mxu3 %vm11646_vm10, %v11645_v20 }
 0xbdb   : > { %6596 = vmatmul.msk.f32.gmra.mxu3 %vm11648_vm14, %v11647_v27  ;;  %vm11660_vm14 = vmmov %vm11658_vm11 }
 0xbe3   : > { %6597 = vmatmul.msk.f32.gmra.mxu3 %vm11650_vm13, %v11649_v4 }
 0xbfe   : > { %v3757_v39 = vpop.f32.mrf.mxu3 }
 0xbff   : > { %v3817_v47 = vadd.f32 %v3816_v44, %v3757_v39 }
 0xc01   : > { %v3877_v21 = vadd.f32 %v3863_v42, %v3817_v47 }
 0xc03   : > { %v3896_v34 = vadd.f32 %v9849_v55, %v3877_v21 }
 0xc05   : > { %v6614_v54 = vmul.f32 -1.442695, %v3896_v34 }
 0xc06   : > { %v3760_v51 = vpop.f32.mrf.mxu3 }
 0xc07   : > { %7272 = vpow2.f32 %v6614_v54  ;;  %v3820_v30 = vadd.f32 %v3819_v63, %v3760_v51  ;;  %v3831_v54 = vpop.f32.mrf.mxu1 }
 0xc09   : > { %v3878_v31 = vadd.f32 %v3864_v0, %v3820_v30 }
 0xc0b   : > { %v9855_v3 = vadd.f32 %v9849_v55, %v3878_v31 }
 0xc0d   : > { %v7273_v32 = vpop.eup %7272  ;;  %v6615_v24 = vmul.f32 -1.442695, %v9855_v3 }
 0xc0e   : > { %v3952_v9 = vadd.f32 1.0, %v7273_v32  ;;  %v3763_v62 = vpop.f32.mrf.mxu3 }
 0xc0f   : > { %7274 = vpow2.f32 %v6615_v24  ;;  %v3823_v22 = vadd.f32 %v3822_v17, %v3763_v62  ;;  %v3834_v57 = vpop.f32.mrf.mxu1 }
 0xc10   : > { %7276 = vrcp.f32 %v3952_v9  ;;  %v3975_v30 = vand.u32 2147483647, %v3952_v9  ;;  %v3977_v0 = vand.u32 2147483648, %v3952_v9  ;;  %vm3971_vm1 = vweird.f32 %v3952_v9 }
 0xc11   : > { %v3879_v23 = vadd.f32 %v3865_v38, %v3823_v22 }
 0xc12   : > { %vm3976_vm4 = vcmp.eq.f32.partialorder %v3975_v30, 8.507059e+37  ;;  %v3978_v22 = vor.u32 1.1754944e-38, %v3977_v0 }
 0xc13   : > { %v9861_v44 = vadd.f32 %v9849_v55, %v3879_v23 }
 0xc15   : > { %v7275_v63 = vpop.eup %7274  ;;  %v6616_v36 = vmul.f32 -1.442695, %v9861_v44 }
 0xc16   : > { %v7277_v39 = vpop.eup %7276  ;;  %v3953_v47 = vadd.f32 1.0, %v7275_v63  ;;  %v3766_v42 = vpop.f32.mrf.mxu3 }
 0xc17   : > { %v3967_v60 = vmul.f32 %v7277_v39, %v3952_v9  ;;  %7278 = vpow2.f32 %v6616_v36  ;;  %v3826_v21 = vadd.f32 %v3825_v12, %v3766_v42  ;;  %vm3972_vm5 = vweird.f32 %v7277_v39  ;;  %v11655_v36 = vld [vmem:[#allocation77_spill] sm:$0xff] }
 0xc18   : > { %7280 = vrcp.f32 %v3953_v47  ;;  %vm3973_vm8 = vmor %vm3971_vm1, %vm3972_vm5  ;;  %v3867_v42 = vmul.f32 %v9842_v45, %v11655_v36  ;;  %v3990_v28 = vand.u32 2147483647, %v3953_v47  ;;  %v3992_v1 = vand.u32 2147483648, %v3953_v47 }
 0xc19   : > { %v3968_v17 = vsub.f32 1.0, %v3967_v60  ;;  %v3880_v51 = vadd.f32 %v3866_v61, %v3826_v21  ;;  %vm3986_vm2 = vweird.f32 %v3953_v47 }
 0xc1a   : > { %vm3991_vm0 = vcmp.eq.f32.partialorder %v3990_v28, 8.507059e+37 }
 0xc1b   : > { %v3969_v31 = vmul.f32 %v7277_v39, %v3968_v17  ;;  %v9867_v32 = vadd.f32 %v9849_v55, %v3880_v51 }
 0xc1d   : > { %v7279_v24 = vpop.eup %7278  ;;  %v3970_v62 = vadd.f32 %v7277_v39, %v3969_v31  ;;  %v6617_v38 = vmul.f32 -1.442695, %v9867_v32 }
 0xc1e   : > { %v7281_v12 = vpop.eup %7280  ;;  %v3954_v23 = vadd.f32 1.0, %v7279_v24  ;;  %v3769_v63 = vpop.f32.mrf.mxu3 }
 0xc1f   : > { %v3974_v60 = vsel %vm3973_vm8, %v7277_v39, %v3970_v62  ;;  %7282 = vpow2.f32 %v6617_v38  ;;  %v3829_v21 = vadd.f32 %v3828_v6, %v3769_v63  ;;  %v3982_v61 = vmul.f32 %v7281_v12, %v3953_v47 }
 0xc20   : > { %v3979_v17 = vsel %vm3976_vm4, %v3978_v22, %v3974_v60  ;;  %7284 = vrcp.f32 %v3954_v23  ;;  %vm3987_vm9 = vweird.f32 %v7281_v12  ;;  %v11657_v22 = vld [vmem:[#allocation78_spill] sm:$0xff]  ;;  %v4005_v28 = vand.u32 2147483647, %v3954_v23 }
 0xc21   : > { %v4176_v51 = vmul.f32 %v3979_v17, %v3896_v34  ;;  %v3881_v31 = vadd.f32 %v3867_v42, %v3829_v21  ;;  %v3983_v9 = vsub.f32 1.0, %v3982_v61  ;;  %v3868_v63 = vmul.f32 %v9842_v45, %v11657_v22  ;;  %vm3988_vm7 = vmor %vm3986_vm2, %vm3987_vm9 }
 0xc22   : > { %v3993_v42 = vor.u32 1.1754944e-38, %v3992_v1  ;;  %v3837_v1 = vpop.f32.mrf.mxu1  ;;  %vm4001_vm3 = vweird.f32 %v3954_v23  ;;  %vm4006_vm10 = vcmp.eq.f32.partialorder %v4005_v28, 8.507059e+37  ;;  %vm11662_vm9 = vmmov %vm11658_vm11 }
 0xc23   : > { %v9873_v30 = vadd.f32 %v9849_v55, %v3881_v31  ;;  %6629 = vmatmul.msk.f32.vlgmr.msra.gmra.mxu2 %vm11656_vm15, %v4176_v51  ;;  %v3984_v0 = vmul.f32 %v7281_v12, %v3983_v9  ;;  %v4007_v9 = vand.u32 2147483648, %v3954_v23 }
 0xc25   : > { %v7283_v24 = vpop.eup %7282  ;;  %v6618_v39 = vmul.f32 -1.442695, %v9873_v30  ;;  %v3985_v6 = vadd.f32 %v7281_v12, %v3984_v0 }
 0xc26   : > { %v7285_v62 = vpop.eup %7284  ;;  %v9877_v38 = vadd.f32 1.0, %v7283_v24  ;;  %v3772_v34 = vpop.f32.mrf.mxu3 }
 0xc27   : > { %7286 = vpow2.f32 %v6618_v39  ;;  %v3832_v60 = vadd.f32 %v3831_v54, %v3772_v34  ;;  %v3989_v21 = vsel %vm3988_vm7, %v7281_v12, %v3985_v6  ;;  %v3997_v61 = vmul.f32 %v7285_v62, %v3954_v23 }
 0xc28   : > { %7288 = vrcp.f32 %v9877_v38  ;;  %v3994_v17 = vsel %vm3991_vm0, %v3993_v42, %v3989_v21  ;;  %vm4002_vm6 = vweird.f32 %v7285_v62  ;;  %v4020_v28 = vand.u32 2147483647, %v9877_v38 }
 0xc29   : > { %v3882_v51 = vadd.f32 %v3868_v63, %v3832_v60  ;;  %v4177_v47 = vmul.f32 %v3994_v17, %v9855_v3  ;;  %v3998_v31 = vsub.f32 1.0, %v3997_v61  ;;  %v11659_v3 = vld [vmem:[#allocation79_spill] sm:$0xff]  ;;  %vm4003_vm12 = vmor %vm4001_vm3, %vm4002_vm6  ;;  %v4008_v60 = vor.u32 1.1754944e-38, %v4007_v9 }
 0xc2a   : > { %v3869_v42 = vmul.f32 %v9842_v45, %v11659_v3  ;;  %v4022_v9 = vand.u32 2147483648, %v9877_v38  ;;  %vm4016_vm5 = vweird.f32 %v9877_v38  ;;  %vm4021_vm8 = vcmp.eq.f32.partialorder %v4020_v28, 8.507059e+37  ;;  %vm11664_vm6 = vmmov %vm11662_vm9 }
 0xc2b   : > { %v9884_v0 = vadd.f32 %v9849_v55, %v3882_v51  ;;  %6630 = vmatmul.msk.f32.gmra.mxu2 %vm11658_vm11, %v4177_v47  ;;  %v3999_v24 = vmul.f32 %v7285_v62, %v3998_v31 }
 0xc2d   : > { %v7287_v54 = vpop.eup %7286  ;;  %v6619_v12 = vmul.f32 -1.442695, %v9884_v0  ;;  %v4000_v39 = vadd.f32 %v7285_v62, %v3999_v24 }
 0xc2e   : > { %v7289_v6 = vpop.eup %7288  ;;  %v3956_v34 = vadd.f32 1.0, %v7287_v54  ;;  %v3775_v63 = vpop.f32.mrf.mxu3 }
 0xc2f   : > { %7290 = vpow2.f32 %v6619_v12  ;;  %v3835_v21 = vadd.f32 %v3834_v57, %v3775_v63  ;;  %v4004_v61 = vsel %vm4003_vm12, %v7285_v62, %v4000_v39  ;;  %v4012_v17 = vmul.f32 %v7289_v6, %v9877_v38  ;;  %v3840_v63 = vpop.f32.mrf.mxu1 }
 0xc30   : > { %7292 = vrcp.f32 %v3956_v34  ;;  %v4009_v47 = vsel %vm4006_vm10, %v4008_v60, %v4004_v61  ;;  %vm4017_vm13 = vweird.f32 %v7289_v6  ;;  %v4037_v3 = vand.u32 2147483648, %v3956_v34 }
 0xc31   : > { %v3883_v51 = vadd.f32 %v3869_v42, %v3835_v21  ;;  %v4013_v31 = vsub.f32 1.0, %v4012_v17  ;;  %v4178_v23 = vmul.f32 %v4009_v47, %v9861_v44  ;;  %v11661_v44 = vld [vmem:[#allocation80_spill] sm:$0xff]  ;;  %vm4018_vm1 = vmor %vm4016_vm5, %vm4017_vm13  ;;  %vm4031_vm15 = vweird.f32 %v3956_v34 }
 0xc32   : > { %v3870_v21 = vmul.f32 %v9842_v45, %v11661_v44  ;;  %vm11666_vm13 = vmmov %vm11664_vm6 }
 0xc33   : > { %v9893_v24 = vadd.f32 %v9849_v55, %v3883_v51  ;;  %v4014_v54 = vmul.f32 %v7289_v6, %v4013_v31  ;;  %6631 = vmatmul.msk.f32.gmra.mxu2 %vm11660_vm14, %v4178_v23  ;;  %v4023_v51 = vor.u32 1.1754944e-38, %v4022_v9 }
 0xc35   : > { %v7291_v12 = vpop.eup %7290  ;;  %v6620_v57 = vmul.f32 -1.442695, %v9893_v24  ;;  %v4015_v62 = vadd.f32 %v7289_v6, %v4014_v54  ;;  %v4035_v54 = vand.u32 2147483647, %v3956_v34 }
 0xc36   : > { %v7293_v39 = vpop.eup %7292  ;;  %v3957_v42 = vadd.f32 1.0, %v7291_v12  ;;  %v3778_v60 = vpop.f32.mrf.mxu3 }
 0xc37   : > { %v4027_v61 = vmul.f32 %v7293_v39, %v3956_v34  ;;  %7294 = vpow2.f32 %v6620_v57  ;;  %v3838_v17 = vadd.f32 %v3837_v1, %v3778_v60  ;;  %v4019_v23 = vsel %vm4018_vm1, %v7289_v6, %v4015_v62 }
 0xc38   : > { %7296 = vrcp.f32 %v3957_v42  ;;  %v4024_v22 = vsel %vm4021_vm8, %v4023_v51, %v4019_v23  ;;  %vm4032_vm4 = vweird.f32 %v7293_v39  ;;  %v4038_v6 = vor.u32 1.1754944e-38, %v4037_v3 }
 0xc39   : > { %v4028_v47 = vsub.f32 1.0, %v4027_v61  ;;  %v3884_v31 = vadd.f32 %v3870_v21, %v3838_v17  ;;  %v4179_v57 = vmul.f32 %v4024_v22, %v9867_v32  ;;  %vm4033_vm2 = vmor %vm4031_vm15, %vm4032_vm4  ;;  %vm4036_vm7 = vcmp.eq.f32.partialorder %v4035_v54, 8.507059e+37  ;;  %v3843_v17 = vpop.f32.mrf.mxu1 }
 0xc3a   : > { %v4052_v23 = vand.u32 2147483648, %v3957_v42  ;;  %v4050_v3 = vand.u32 2147483647, %v3957_v42  ;;  %vm4046_vm11 = vweird.f32 %v3957_v42  ;;  %vm11668_vm15 = vmmov %vm11664_vm6 }
 0xc3b   : > { %v4029_v12 = vmul.f32 %v7293_v39, %v4028_v47  ;;  %v9903_v36 = vadd.f32 %v9849_v55, %v3884_v31  ;;  %6632 = vmatmul.msk.f32.gmra.mxu2 %vm11662_vm9, %v4179_v57  ;;  %v11663_v47 = vld [vmem:[#allocation81_spill] sm:$0xff] }
 0xc3c   : > { %v3871_v31 = vmul.f32 %v9842_v45, %v11663_v47  ;;  %vm4051_vm12 = vcmp.eq.f32.partialorder %v4050_v3, 8.507059e+37 }
 0xc3d   : > { %v7295_v1 = vpop.eup %7294  ;;  %v4030_v60 = vadd.f32 %v7293_v39, %v4029_v12  ;;  %v6621_v38 = vmul.f32 -1.442695, %v9903_v36 }
 0xc3e   : > { %v7297_v9 = vpop.eup %7296  ;;  %v3958_v62 = vadd.f32 1.0, %v7295_v1  ;;  %v3781_v28 = vpop.f32.mrf.mxu3 }
 0xc3f   : > { %v4034_v21 = vsel %vm4033_vm2, %v7293_v39, %v4030_v60  ;;  %v4042_v61 = vmul.f32 %v7297_v9, %v3957_v42  ;;  %7298 = vpow2.f32 %v6621_v38  ;;  %v3841_v34 = vadd.f32 %v3840_v63, %v3781_v28 }
 0xc40   : > { %v4039_v51 = vsel %vm4036_vm7, %v4038_v6, %v4034_v21  ;;  %7300 = vrcp.f32 %v3958_v62  ;;  %vm4047_vm0 = vweird.f32 %v7297_v9  ;;  %vm4061_vm14 = vweird.f32 %v3958_v62 }
 0xc41   : > { %v4180_v32 = vmul.f32 %v4039_v51, %v9873_v30  ;;  %v4043_v22 = vsub.f32 1.0, %v4042_v61  ;;  %v3885_v57 = vadd.f32 %v3871_v31, %v3841_v34  ;;  %vm4048_vm3 = vmor %vm4046_vm11, %vm4047_vm0  ;;  %v4053_v30 = vor.u32 1.1754944e-38, %v4052_v23 }
 0xc42   : > { %v4067_v34 = vand.u32 2147483648, %v3958_v62  ;;  %vm11670_vm0 = vmmov %vm11664_vm6 }
 0xc43   : > { %v4044_v12 = vmul.f32 %v7297_v9, %v4043_v22  ;;  %v9912_v54 = vadd.f32 %v9849_v55, %v3885_v57  ;;  %6633 = vmatmul.msk.f32.gmra.mxu2 %vm11664_vm6, %v4180_v32  ;;  %v3846_v22 = vpop.f32.mrf.mxu1  ;;  %v11665_v32 = vld [vmem:[#allocation82_spill] sm:$0xff]  ;;  %v4065_v57 = vand.u32 2147483647, %v3958_v62 }
 0xc45   : > { %v7299_v1 = vpop.eup %7298  ;;  %v4045_v39 = vadd.f32 %v7297_v9, %v4044_v12  ;;  %v6622_v21 = vmul.f32 -1.442695, %v9912_v54  ;;  %v3872_v12 = vmul.f32 %v9842_v45, %v11665_v32  ;;  %vm4066_vm1 = vcmp.eq.f32.partialorder %v4065_v57, 8.507059e+37 }
 0xc46   : > { %v7301_v60 = vpop.eup %7300  ;;  %v3959_v63 = vadd.f32 1.0, %v7299_v1  ;;  %v3784_v38 = vpop.f32.mrf.mxu3 }
 0xc47   : > { %v4049_v6 = vsel %vm4048_vm3, %v7297_v9, %v4045_v39  ;;  %v4057_v28 = vmul.f32 %v7301_v60, %v3958_v62  ;;  %v3844_v31 = vadd.f32 %v3843_v17, %v3784_v38  ;;  %vm4062_vm10 = vweird.f32 %v7301_v60  ;;  %v11667_v39 = vld [vmem:[#allocation83_spill] sm:$0xff] }
 0xc48   : > { %v4054_v61 = vsel %vm4051_vm12, %v4053_v30, %v4049_v6  ;;  %7302 = vrcp.f32 %v3959_v63  ;;  %vm4063_vm5 = vmor %vm4061_vm14, %vm4062_vm10  ;;  %v4068_v30 = vor.u32 1.1754944e-38, %v4067_v34  ;;  %v4082_v32 = vand.u32 2147483648, %v3959_v63 }
 0xc49   : > { %v4181_v51 = vmul.f32 %v4054_v61, %v9884_v0  ;;  %v4058_v42 = vsub.f32 1.0, %v4057_v28  ;;  %7304 = vpow2.f32 %v6622_v21  ;;  %v3886_v9 = vadd.f32 %v3872_v12, %v3844_v31  ;;  %vm11672_vm12 = vmmov %vm11670_vm0 }
 0xc4a   : > { %v3873_v0 = vmul.f32 %v9842_v45, %v11667_v39  ;;  %v4080_v39 = vand.u32 2147483647, %v3959_v63  ;;  %vm4076_vm4 = vweird.f32 %v3959_v63 }
 0xc4b   : > { %v4059_v23 = vmul.f32 %v7301_v60, %v4058_v42  ;;  %6634 = vmatmul.msk.f32.gmra.mxu2 %vm11666_vm13, %v4181_v51  ;;  %v9923_v6 = vadd.f32 %v9849_v55, %v3886_v9 }
 0xc4c   : > { %vm4081_vm2 = vcmp.eq.f32.partialorder %v4080_v39, 8.507059e+37 }
 0xc4d   : > { %v4060_v3 = vadd.f32 %v7301_v60, %v4059_v23  ;;  %v6623_v62 = vmul.f32 -1.442695, %v9923_v6 }
 0xc4e   : > { %v7303_v1 = vpop.eup %7302  ;;  %v3787_v17 = vpop.f32.mrf.mxu3 }
 0xc4f   : > { %v7305_v38 = vpop.eup %7304  ;;  %v4064_v28 = vsel %vm4063_vm5, %v7301_v60, %v4060_v3  ;;  %v4072_v21 = vmul.f32 %v7303_v1, %v3959_v63  ;;  %v3847_v61 = vadd.f32 %v3846_v22, %v3787_v17  ;;  %vm4077_vm8 = vweird.f32 %v7303_v1  ;;  %v3849_v60 = vpop.f32.mrf.mxu1 }
 0xc50   : > { %v4069_v42 = vsel %vm4066_vm1, %v4068_v30, %v4064_v28  ;;  %v3960_v31 = vadd.f32 1.0, %v7305_v38  ;;  %vm4078_vm9 = vmor %vm4076_vm4, %vm4077_vm8 }
 0xc51   : > { %v4182_v51 = vmul.f32 %v4069_v42, %v9893_v24  ;;  %v4073_v12 = vsub.f32 1.0, %v4072_v21  ;;  %v3887_v23 = vadd.f32 %v3873_v0, %v3847_v61  ;;  %v4083_v24 = vor.u32 1.1754944e-38, %v4082_v32  ;;  %v11669_v0 = vld [vmem:[#allocation84_spill] sm:$0xff] }
 0xc52   : > { %7306 = vrcp.f32 %v3960_v31  ;;  %v3874_v30 = vmul.f32 %v9842_v45, %v11669_v0  ;;  %v4097_v32 = vand.u32 2147483648, %v3960_v31  ;;  %vm4091_vm11 = vweird.f32 %v3960_v31 }
 0xc53   : > { %v4074_v34 = vmul.f32 %v7303_v1, %v4073_v12  ;;  %7308 = vpow2.f32 %v6623_v62  ;;  %v9928_v9 = vadd.f32 %v9849_v55, %v3887_v23  ;;  %6635 = vmatmul.msk.f32.gmra.mxu2 %vm11668_vm15, %v4182_v51 }
 0xc55   : > { %v4075_v57 = vadd.f32 %v7303_v1, %v4074_v34  ;;  %v6624_v22 = vmul.f32 -1.442695, %v9928_v9 }
 0xc56   : > { %v3790_v3 = vpop.f32.mrf.mxu3 }
 0xc57   : > { %v4079_v17 = vsel %vm4078_vm9, %v7303_v1, %v4075_v57  ;;  %7310 = vpow2.f32 %v6624_v22  ;;  %v3850_v38 = vadd.f32 %v3849_v60, %v3790_v3  ;;  %v4095_v1 = vand.u32 2147483647, %v3960_v31  ;;  %v3852_v60 = vpop.f32.mrf.mxu1  ;;  %v11671_v22 = vld [vmem:[#allocation85_spill] sm:$0xff]  ;;  %vm11674_vm9 = vmmov %vm11670_vm0 }
 0xc58   : > { %v7307_v28 = vpop.eup %7306  ;;  %v4084_v21 = vsel %vm4081_vm2, %v4083_v24, %v4079_v17  ;;  %v3875_v24 = vmul.f32 %v9842_v45, %v11671_v22  ;;  %v4098_v17 = vor.u32 1.1754944e-38, %v4097_v32 }
 0xc59   : > { %v7309_v61 = vpop.eup %7308  ;;  %v4183_v42 = vmul.f32 %v4084_v21, %v9903_v36  ;;  %v4087_v63 = vmul.f32 %v7307_v28, %v3960_v31  ;;  %v3888_v62 = vadd.f32 %v3874_v30, %v3850_v38  ;;  %vm4092_vm7 = vweird.f32 %v7307_v28 }
 0xc5a   : > { %v3961_v12 = vadd.f32 1.0, %v7309_v61  ;;  %vm4093_vm6 = vmor %vm4091_vm11, %vm4092_vm7  ;;  %vm4096_vm3 = vcmp.eq.f32.partialorder %v4095_v1, 8.507059e+37 }
 0xc5b   : > { %v4088_v23 = vsub.f32 1.0, %v4087_v63  ;;  %v9936_v51 = vadd.f32 %v9849_v55, %v3888_v62  ;;  %6636 = vmatmul.msk.f32.gmra.mxu2 %vm11670_vm0, %v4183_v42 }
 0xc5c   : > { %7312 = vrcp.f32 %v3961_v12  ;;  %v4110_v32 = vand.u32 2147483647, %v3961_v12  ;;  %vm4106_vm14 = vweird.f32 %v3961_v12 }
 0xc5d   : > { %v7311_v34 = vpop.eup %7310  ;;  %v4089_v0 = vmul.f32 %v7307_v28, %v4088_v23  ;;  %v6625_v39 = vmul.f32 -1.442695, %v9936_v51 }
 0xc5e   : > { %v3962_v57 = vadd.f32 1.0, %v7311_v34  ;;  %v3793_v36 = vpop.f32.mrf.mxu3  ;;  %vm4111_vm5 = vcmp.eq.f32.partialorder %v4110_v32, 8.507059e+37 }
 0xc5f   : > { %v4090_v3 = vadd.f32 %v7307_v28, %v4089_v0  ;;  %7314 = vpow2.f32 %v6625_v39  ;;  %v3853_v30 = vadd.f32 %v3852_v60, %v3793_v36  ;;  %v4112_v39 = vand.u32 2147483648, %v3961_v12 }
 0xc60   : > { %7316 = vrcp.f32 %v3962_v57  ;;  %vm4121_vm8 = vweird.f32 %v3962_v57 }
 0xc61   : > { %v4094_v38 = vsel %vm4093_vm6, %v7307_v28, %v4090_v3  ;;  %v3889_v21 = vadd.f32 %v3875_v24, %v3853_v30  ;;  %v11673_v24 = vld [vmem:[#allocation86_spill] sm:$0xff]  ;;  %vm11675_vm6 = vmmov %vm11674_vm9 }
 0xc62   : > { %v7313_v61 = vpop.eup %7312  ;;  %v4099_v63 = vsel %vm4096_vm3, %v4098_v17, %v4094_v38  ;;  %v3876_v3 = vmul.f32 %v9842_v45, %v11673_v24 }
 0xc63   : > { %v4184_v42 = vmul.f32 %v4099_v63, %v9912_v54  ;;  %v4102_v62 = vmul.f32 %v7313_v61, %v3961_v12  ;;  %v9944_v23 = vadd.f32 %v9849_v55, %v3889_v21  ;;  %vm4107_vm10 = vweird.f32 %v7313_v61  ;;  %v3855_v54 = vpop.f32.mrf.mxu1 }
 0xc64   : > { %vm4108_vm13 = vmor %vm4106_vm14, %vm4107_vm10  ;;  %v4113_v21 = vor.u32 1.1754944e-38, %v4112_v39  ;;  %v4125_v63 = vand.u32 2147483647, %v3962_v57 }
 0xc65   : > { %v7315_v34 = vpop.eup %7314  ;;  %v4103_v22 = vsub.f32 1.0, %v4102_v62  ;;  %v6626_v31 = vmul.f32 -1.442695, %v9944_v23  ;;  %6637 = vmatmul.msk.f32.gmra.mxu2 %vm11672_vm12, %v4184_v42  ;;  %v4127_v42 = vand.u32 2147483648, %v3962_v57 }
 0xc66   : > { %v7317_v0 = vpop.eup %7316  ;;  %v3963_v28 = vadd.f32 1.0, %v7315_v34  ;;  %v3796_v1 = vpop.f32.mrf.mxu3  ;;  %vm4126_vm15 = vcmp.eq.f32.partialorder %v4125_v63, 8.507059e+37 }
 0xc67   : > { %v4104_v60 = vmul.f32 %v7313_v61, %v4103_v22  ;;  %v4117_v36 = vmul.f32 %v7317_v0, %v3962_v57  ;;  %7318 = vpow2.f32 %v6626_v31  ;;  %v3856_v38 = vadd.f32 %v3855_v54, %v3796_v1 }
 0xc68   : > { %7320 = vrcp.f32 %v3963_v28  ;;  %vm4122_vm1 = vweird.f32 %v7317_v0  ;;  %v4128_v1 = vor.u32 1.1754944e-38, %v4127_v42  ;;  %v4140_v57 = vand.u32 2147483647, %v3963_v28 }
 0xc69   : > { %v4105_v30 = vadd.f32 %v7313_v61, %v4104_v60  ;;  %v4118_v17 = vsub.f32 1.0, %v4117_v36  ;;  %v3890_v22 = vadd.f32 %v3876_v3, %v3856_v38  ;;  %vm4123_vm4 = vmor %vm4121_vm8, %vm4122_vm1  ;;  %vm4136_vm7 = vweird.f32 %v3963_v28 }
 0xc6a   : > { %vm4141_vm11 = vcmp.eq.f32.partialorder %v4140_v57, 8.507059e+37  ;;  %vm11677_vm8 = vmmov %vm11675_vm6 }
 0xc6b   : > { %v4109_v62 = vsel %vm4108_vm13, %v7313_v61, %v4105_v30  ;;  %v4119_v34 = vmul.f32 %v7317_v0, %v4118_v17  ;;  %v9952_v45 = vadd.f32 %v9849_v55, %v3890_v22  ;;  %vm11676_vm13 = vmmov %vm11675_vm6 }
 0xc6c   : > { %v4114_v47 = vsel %vm4111_vm5, %v4113_v21, %v4109_v62 }
 0xc6d   : > { %v7319_v31 = vpop.eup %7318  ;;  %v4185_v44 = vmul.f32 %v4114_v47, %v9923_v6  ;;  %v4120_v59 = vadd.f32 %v7317_v0, %v4119_v34  ;;  %v6627_v61 = vmul.f32 -1.442695, %v9952_v45  ;;  %v4142_v47 = vand.u32 2147483648, %v3963_v28 }
 0xc6e   : > { %v7321_v12 = vpop.eup %7320  ;;  %v3964_v32 = vadd.f32 1.0, %v7319_v31 }
 0xc6f   : > { %v4124_v39 = vsel %vm4123_vm4, %v7317_v0, %v4120_v59  ;;  %v4132_v60 = vmul.f32 %v7321_v12, %v3963_v28  ;;  %6638 = vmatmul.msk.f32.gmra.mxu2 %vm11674_vm9, %v4185_v44  ;;  %vm4137_vm2 = vweird.f32 %v7321_v12  ;;  %v4143_v59 = vor.u32 1.1754944e-38, %v4142_v47  ;;  %vm11678_vm9 = vmmov %vm11675_vm6 }
 0xc70   : > { %v4129_v36 = vsel %vm4126_vm15, %v4128_v1, %v4124_v39  ;;  %7322 = vrcp.f32 %v3964_v32  ;;  %vm4138_vm0 = vmor %vm4136_vm7, %vm4137_vm2  ;;  %v4157_v42 = vand.u32 2147483648, %v3964_v32  ;;  %v4155_v34 = vand.u32 2147483647, %v3964_v32 }
 0xc71   : > { %v4133_v54 = vsub.f32 1.0, %v4132_v60  ;;  %7324 = vpow2.f32 %v6627_v61  ;;  %v4186_v6 = vmul.f32 %v4129_v36, %v9928_v9  ;;  %vm4151_vm12 = vweird.f32 %v3964_v32 }
 0xc72   : > { %v4158_v22 = vor.u32 1.1754944e-38, %v4157_v42  ;;  %vm4156_vm14 = vcmp.eq.f32.partialorder %v4155_v34, 8.507059e+37 }
 0xc73   : > { %v4134_v55 = vmul.f32 %v7321_v12, %v4133_v54 }
 0xc75   : > { %v4135_v3 = vadd.f32 %v7321_v12, %v4134_v55 }
 0xc76   : > { %v7323_v30 = vpop.eup %7322 }
 0xc77   : > { %v7325_v0 = vpop.eup %7324  ;;  %v4139_v17 = vsel %vm4138_vm0, %v7321_v12, %v4135_v3  ;;  %v4147_v38 = vmul.f32 %v7323_v30, %v3964_v32  ;;  %6639 = vmatmul.msk.f32.gmra.mxu2 %vm11675_vm6, %v4186_v6  ;;  %vm4152_vm3 = vweird.f32 %v7323_v30 }
 0xc78   : > { %v4144_v44 = vsel %vm4141_vm11, %v4143_v59, %v4139_v17  ;;  %v3965_v21 = vadd.f32 1.0, %v7325_v0  ;;  %vm4153_vm10 = vmor %vm4151_vm12, %vm4152_vm3 }
 0xc79   : > { %v4148_v63 = vsub.f32 1.0, %v4147_v38  ;;  %v4187_v9 = vmul.f32 %v4144_v44, %v9936_v51 }
 0xc7a   : > { %7326 = vrcp.f32 %v3965_v21  ;;  %v4172_v36 = vand.u32 2147483648, %v3965_v21  ;;  %v4170_v51 = vand.u32 2147483647, %v3965_v21  ;;  %vm4166_vm1 = vweird.f32 %v3965_v21 }
 0xc7b   : > { %v4149_v62 = vmul.f32 %v7323_v30, %v4148_v63  ;;  %v9967_v63 = vld [vmem:[%s11135_s13 + $0x2] ss:$0 sm:$0xff] }
 0xc7c   : > { %v4173_v32 = vor.u32 1.1754944e-38, %v4172_v36  ;;  %vm4171_vm15 = vcmp.eq.f32.partialorder %v4170_v51, 8.507059e+37 }
 0xc7d   : > { %v4150_v28 = vadd.f32 %v7323_v30, %v4149_v62 }
 0xc7f   : > { %v4154_v31 = vsel %vm4153_vm10, %v7323_v30, %v4150_v28  ;;  %6640 = vmatmul.msk.f32.gmra.mxu2 %vm11676_vm13, %v4187_v9 }
 0xc80   : > { %v7327_v12 = vpop.eup %7326  ;;  %v4159_v1 = vsel %vm4156_vm14, %v4158_v22, %v4154_v31 }
 0xc81   : > { %v4162_v39 = vmul.f32 %v7327_v12, %v3965_v21  ;;  %v4188_v60 = vmul.f32 %v4159_v1, %v9944_v23  ;;  %vm4167_vm5 = vweird.f32 %v7327_v12 }
 0xc82   : > { %vm4168_vm4 = vmor %vm4166_vm1, %vm4167_vm5 }
 0xc83   : > { %v4163_v61 = vsub.f32 1.0, %v4162_v39 }
 0xc85   : > { %v4164_v54 = vmul.f32 %v7327_v12, %v4163_v61 }
 0xc87   : > { %v4165_v47 = vadd.f32 %v7327_v12, %v4164_v54  ;;  %6641 = vmatmul.msk.f32.gmra.mxu2 %vm11677_vm8, %v4188_v60 }
 0xc89   : > { %v4169_v6 = vsel %vm4168_vm4, %v7327_v12, %v4165_v47 }
 0xc8a   : > { %v4174_v55 = vsel %vm4171_vm15, %v4173_v32, %v4169_v6 }
 0xc8b   : > { %v4189_v57 = vmul.f32 %v4174_v55, %v9952_v45 }
 0xc8f   : > { %6642 = vmatmul.msk.f32.gmra.mxu2 %vm11678_vm9, %v4189_v57 }
 0xca6   : > { %v4259_v3 = vpop.f32.mrf.mxu2 }
 0xca7   : > { %v9970_v9 = vadd.f32 %v9967_v63, %v4259_v3 }
 0xca9   : > { %11679 = vst [vmem:[#allocation40_spill] sm:$0xff] %v9970_v9  ;;  %v6643_v28 = vmul.f32 -1.442695, %v9970_v9 }
 0xcab   : > { %7328 = vpow2.f32 %v6643_v28 }
 0xcae   : > { %v4262_v23 = vpop.f32.mrf.mxu2 }
 0xcaf   : > { %v9973_v45 = vadd.f32 %v9967_v63, %v4262_v23 }
 0xcb1   : > { %11680 = vst [vmem:[#allocation87_spill] sm:$0xff] %v9973_v45  ;;  %v6644_v31 = vmul.f32 -1.442695, %v9973_v45 }
 0xcb3   : > { %7330 = vpow2.f32 %v6644_v31 }
 0xcb6   : > { %v4265_v30 = vpop.f32.mrf.mxu2 }
 0xcb7   : > { %v9976_v62 = vadd.f32 %v9967_v63, %v4265_v30  ;;  %v7329_v30 = vpop.eup %7328 }
 0xcb8   : > { %v10017_v28 = vadd.f32 1.0, %v7329_v30 }
 0xcb9   : > { %11681 = vst [vmem:[#allocation39_spill] sm:$0xff] %v9976_v62  ;;  %v6645_v1 = vmul.f32 -1.442695, %v9976_v62 }
 0xcbb   : > { %7332 = vpow2.f32 %v6645_v1 }
 0xcbe   : > { %v4268_v59 = vpop.f32.mrf.mxu2 }
 0xcbf   : > { %v9979_v34 = vadd.f32 %v9967_v63, %v4268_v59 }
 0xcc1   : > { %11682 = vst [vmem:[#allocation89_spill] sm:$0xff] %v9979_v34  ;;  %v6646_v60 = vmul.f32 -1.442695, %v9979_v34 }
 0xcc3   : > { %7334 = vpow2.f32 %v6646_v60 }
 0xcc6   : > { %v4271_v0 = vpop.f32.mrf.mxu2 }
 0xcc7   : > { %v9983_v22 = vadd.f32 %v9967_v63, %v4271_v0 }
 0xcc9   : > { %11683 = vst [vmem:[#allocation88_spill] sm:$0xff] %v9983_v22  ;;  %v6647_v36 = vmul.f32 -1.442695, %v9983_v22 }
 0xccb   : > { %7336 = vpow2.f32 %v6647_v36 }
 0xcce   : > { %v4274_v17 = vpop.f32.mrf.mxu2 }
 0xccf   : > { %v9988_v39 = vadd.f32 %v9967_v63, %v4274_v17  ;;  %v7331_v17 = vpop.eup %7330 }
 0xcd1   : > { %v6648_v47 = vmul.f32 -1.442695, %v9988_v39 }
 0xcd3   : > { %7338 = vpow2.f32 %v6648_v47 }
 0xcd6   : > { %v4277_v38 = vpop.f32.mrf.mxu2 }
 0xcd7   : > { %v9992_v61 = vadd.f32 %v9967_v63, %v4277_v38 }
 0xcd9   : > { %v6649_v6 = vmul.f32 -1.442695, %v9992_v61 }
 0xcdb   : > { %7340 = vpow2.f32 %v6649_v6 }
 0xcde   : > { %v4280_v44 = vpop.f32.mrf.mxu2 }
 0xcdf   : > { %v9996_v54 = vadd.f32 %v9967_v63, %v4280_v44  ;;  %v7333_v44 = vpop.eup %7332 }
 0xce0   : > { %v10021_v1 = vadd.f32 1.0, %v7333_v44 }
 0xce1   : > { %v6650_v57 = vmul.f32 -1.442695, %v9996_v54 }
 0xce3   : > { %7342 = vpow2.f32 %v6650_v57 }
 0xce8   : > { %v4283_v21 = vpop.f32.mrf.mxu2 }
 0xce9   : > { %v9999_v51 = vadd.f32 %v9967_v63, %v4283_v21 }
 0xceb   : > { %v6651_v3 = vmul.f32 -1.442695, %v9999_v51 }
 0xced   : > { %7344 = vpow2.f32 %v6651_v3 }
 0xcf2   : > { %v4286_v42 = vpop.f32.mrf.mxu2 }
 0xcf3   : > { %v10003_v32 = vadd.f32 %v9967_v63, %v4286_v42  ;;  %v7335_v42 = vpop.eup %7334 }
 0xcf4   : > { %v7337_v31 = vpop.eup %7336  ;;  %v10023_v36 = vadd.f32 1.0, %v7335_v42 }
 0xcf5   : > { %v6652_v59 = vmul.f32 -1.442695, %v10003_v32  ;;  %v7339_v60 = vpop.eup %7338  ;;  %v10026_v6 = vadd.f32 1.0, %v7337_v31 }
 0xcf6   : > { %v7341_v47 = vpop.eup %7340 }
 0xcf7   : > { %7346 = vpow2.f32 %v6652_v59  ;;  %v10033_v59 = vadd.f32 1.0, %v7339_v60 }
 0xcfa   : > { %v4289_v12 = vpop.f32.mrf.mxu2 }
 0xcfb   : > { %v10007_v55 = vadd.f32 %v9967_v63, %v4289_v12  ;;  %v10019_v12 = vadd.f32 1.0, %v7331_v17 }
 0xcfd   : > { %v6653_v38 = vmul.f32 -1.442695, %v10007_v55 }
 0xcff   : > { %7348 = vpow2.f32 %v6653_v38  ;;  %v10036_v38 = vadd.f32 1.0, %v7341_v47 }
 0xd02   : > { %v4292_v23 = vpop.f32.mrf.mxu2 }
 0xd03   : > { %v10013_v0 = vadd.f32 %v9967_v63, %v4292_v23  ;;  %v7343_v23 = vpop.eup %7342 }
 0xd04   : > { %v7345_v30 = vpop.eup %7344  ;;  %v10040_v42 = vadd.f32 1.0, %v7343_v23 }
 0xd05   : > { %v6654_v21 = vmul.f32 -1.442695, %v10013_v0  ;;  %v7347_v17 = vpop.eup %7346 }
 0xd06   : > { %v10047_v60 = vadd.f32 1.0, %v7347_v17 }
 0xd07   : > { %7350 = vpow2.f32 %v6654_v21  ;;  %v7349_v21 = vpop.eup %7348 }
 0xd08   : > { %7352 = vrcp.f32 %v10017_v28  ;;  %v10052_v47 = vadd.f32 1.0, %v7349_v21  ;;  %vm4497_vm11 = vweird.f32 %v10047_v60 }
 0xd09   : > { %7354 = vrcp.f32 %v10019_v12 }
 0xd0a   : > { %v4295_v57 = vpop.f32.mrf.mxu2  ;;  %7356 = vrcp.f32 %v10021_v1  ;;  %vm4512_vm7 = vweird.f32 %v10052_v47 }
 0xd0b   : > { %v10030_v3 = vadd.f32 %v9967_v63, %v4295_v57  ;;  %7358 = vrcp.f32 %v10023_v36  ;;  %v10042_v57 = vadd.f32 1.0, %v7345_v30 }
 0xd0c   : > { %7360 = vrcp.f32 %v10026_v6 }
 0xd0d   : > { %v6655_v44 = vmul.f32 -1.442695, %v10030_v3  ;;  %v7351_v31 = vpop.eup %7350  ;;  %vm4482_vm14 = vweird.f32 %v10042_v57 }
 0xd0e   : > { %v10044_v24 = vpop.eup %7352  ;;  %v10057_v23 = vadd.f32 1.0, %v7351_v31 }
 0xd0f   : > { %7362 = vpow2.f32 %v6655_v44  ;;  %v10049_v4 = vpop.eup %7354  ;;  %v4358_v16 = vmul.f32 %v10044_v24, %v10017_v28 }
 0xd10   : > { %7364 = vrcp.f32 %v10033_v59  ;;  %v10054_v27 = vpop.eup %7356  ;;  %vm4527_vm1 = vweird.f32 %v10057_v23 }
 0xd11   : > { %7366 = vrcp.f32 %v10036_v38  ;;  %v10059_v44 = vpop.eup %7358  ;;  %v4359_v37 = vsub.f32 1.0, %v4358_v16 }
 0xd12   : > { %7368 = vrcp.f32 %v10040_v42  ;;  %v4298_v30 = vpop.f32.mrf.mxu2  ;;  %v10065_v20 = vpop.eup %7360  ;;  %v4403_v8 = vmul.f32 %v10059_v44, %v10023_v36 }
 0xd13   : > { %7370 = vrcp.f32 %v10042_v57  ;;  %v10063_v17 = vadd.f32 %v9967_v63, %v4298_v30  ;;  %v4418_v29 = vmul.f32 %v10065_v20, %v10026_v6  ;;  %v10120_v9 = vmul.f32 %v10044_v24, %v4359_v37 }
 0xd14   : > { %7372 = vrcp.f32 %v10047_v60  ;;  %v4404_v16 = vsub.f32 1.0, %v4403_v8 }
 0xd15   : > { %v7363_v21 = vpop.eup %7362  ;;  %7374 = vrcp.f32 %v10052_v47  ;;  %v6656_v53 = vmul.f32 -1.442695, %v10063_v17  ;;  %v4419_v48 = vsub.f32 1.0, %v4418_v29 }
 0xd16   : > { %v10070_v58 = vpop.eup %7364  ;;  %7376 = vrcp.f32 %v10057_v23  ;;  %v10073_v31 = vadd.f32 1.0, %v7363_v21  ;;  %v4373_v21 = vmul.f32 %v10049_v4, %v10019_v12  ;;  %v10129_v8 = vmul.f32 %v10059_v44, %v4404_v16 }
 0xd17   : > { %v10075_v10 = vpop.eup %7366  ;;  %7378 = vpow2.f32 %v6656_v53  ;;  %v4388_v53 = vmul.f32 %v10054_v27, %v10021_v1  ;;  %v4433_v50 = vmul.f32 %v10070_v58, %v10033_v59 }
 0xd18   : > { %v10077_v63 = vpop.eup %7368  ;;  %7380 = vrcp.f32 %v10073_v31  ;;  %v4448_v18 = vmul.f32 %v10075_v10, %v10036_v38  ;;  %v4374_v2 = vsub.f32 1.0, %v4373_v21  ;;  %vm4542_vm12 = vweird.f32 %v10073_v31 }
 0xd19   : > { %v10080_v30 = vpop.eup %7370  ;;  %v4463_v52 = vmul.f32 %v10077_v63, %v10040_v42  ;;  %v4434_v7 = vsub.f32 1.0, %v4433_v50  ;;  %v4548_v50 = vand.u32 2147483648, %v10073_v31  ;;  %vm4468_vm10 = vweird.f32 %v10077_v63 }
 0xd1a   : > { %v10082_v19 = vpop.eup %7372  ;;  %v4478_v46 = vmul.f32 %v10080_v30, %v10042_v57  ;;  %v4449_v35 = vsub.f32 1.0, %v4448_v18  ;;  %v10123_v21 = vmul.f32 %v10049_v4, %v4374_v2  ;;  %vm4483_vm0 = vweird.f32 %v10080_v30 }
 0xd1b   : > { %v10084_v14 = vpop.eup %7374  ;;  %v4493_v41 = vmul.f32 %v10082_v19, %v10047_v60  ;;  %v4464_v40 = vsub.f32 1.0, %v4463_v52  ;;  %v10136_v37 = vmul.f32 %v10070_v58, %v4434_v7  ;;  %vm4498_vm2 = vweird.f32 %v10082_v19 }
 0xd1c   : > { %v10088_v56 = vpop.eup %7376  ;;  %v4508_v49 = vmul.f32 %v10084_v14, %v10052_v47  ;;  %v4479_v15 = vsub.f32 1.0, %v4478_v46  ;;  %v10139_v2 = vmul.f32 %v10075_v10, %v4449_v35  ;;  %v4516_v35 = vand.u32 2147483647, %v10052_v47 }
 0xd1d   : > { %v7379_v13 = vpop.eup %7378  ;;  %v4523_v43 = vmul.f32 %v10088_v56, %v10057_v23  ;;  %v4494_v45 = vsub.f32 1.0, %v4493_v41  ;;  %vm4528_vm6 = vweird.f32 %v10088_v56  ;;  %vm4513_vm5 = vweird.f32 %v10084_v14 }
 0xd1e   : > { %v10098_v25 = vpop.eup %7380  ;;  %v10106_v33 = vadd.f32 1.0, %v7379_v13  ;;  %v4389_v13 = vsub.f32 1.0, %v4388_v53  ;;  %v4509_v62 = vsub.f32 1.0, %v4508_v49  ;;  %v10142_v49 = vmul.f32 %v10077_v63, %v4464_v40  ;;  %vm10181_vm9 = vmor %vm4527_vm1, %vm4528_vm6 }
 0xd1f   : > { %v4538_v11 = vmul.f32 %v10098_v25, %v10073_v31  ;;  %v4524_v26 = vsub.f32 1.0, %v4523_v43  ;;  %v4480_v52 = vmul.f32 %v10080_v30, %v4479_v15  ;;  %v4495_v18 = vmul.f32 %v10082_v19, %v4494_v45  ;;  %vm10202_vm15 = vmor %vm4512_vm7, %vm4513_vm5 }
 0xd20   : > { %7382 = vrcp.f32 %v10106_v33  ;;  %v10126_v34 = vmul.f32 %v10054_v27, %v4389_v13  ;;  %v4510_v7 = vmul.f32 %v10084_v14, %v4509_v62  ;;  %vm4543_vm3 = vweird.f32 %v10098_v25  ;;  %vm10219_vm7 = vmor %vm4497_vm11, %vm4498_vm2 }
 0xd21   : > { %v4539_v5 = vsub.f32 1.0, %v4538_v11  ;;  %v10132_v11 = vmul.f32 %v10065_v20, %v4419_v48  ;;  %v4525_v48 = vmul.f32 %v10088_v56, %v4524_v26  ;;  %v4546_v40 = vand.u32 2147483647, %v10073_v31  ;;  %vm10172_vm8 = vmor %vm4542_vm12, %vm4543_vm3 }
 0xd22   : > { %v4563_v29 = vand.u32 2147483648, %v10106_v33  ;;  %v4561_v53 = vand.u32 2147483647, %v10106_v33  ;;  %v4531_v13 = vand.u32 2147483647, %v10057_v23  ;;  %v4533_v31 = vand.u32 2147483648, %v10057_v23  ;;  %vm10237_vm2 = vmor %vm4482_vm14, %vm4483_vm0 }
 0xd23   : > { %v4540_v46 = vmul.f32 %v10098_v25, %v4539_v5  ;;  %v4526_v45 = vadd.f32 %v10088_v56, %v4525_v48  ;;  %vm4557_vm3 = vweird.f32 %v10106_v33  ;;  %v4518_v41 = vand.u32 2147483648, %v10052_v47 }
 0xd24   : > { %v4549_v22 = vor.u32 1.1754944e-38, %v4548_v50  ;;  %vm4438_vm6 = vweird.f32 %v10070_v58  ;;  %vm4452_vm1 = vweird.f32 %v10036_v38  ;;  %vm4562_vm4 = vcmp.eq.f32.partialorder %v4561_v53, 8.507059e+37 }
 0xd25   : > { %v4541_v15 = vadd.f32 %v10098_v25, %v4540_v46  ;;  %v4511_v46 = vadd.f32 %v10084_v14, %v4510_v7  ;;  %v4564_v7 = vor.u32 1.1754944e-38, %v4563_v29  ;;  %v4530_v16 = vsel %vm10181_vm9, %v10088_v56, %v4526_v45 }
 0xd26   : > { %v7383_v43 = vpop.eup %7382  ;;  %vm4437_vm9 = vweird.f32 %v10033_v59  ;;  %v4481_v56 = vadd.f32 %v10080_v30, %v4480_v52  ;;  %v4488_v45 = vand.u32 2147483648, %v10042_v57  ;;  %v4519_v52 = vor.u32 1.1754944e-38, %v4518_v41 }
 0xd27   : > { %v4553_v5 = vmul.f32 %v7383_v43, %v10106_v33  ;;  %vm4558_vm13 = vweird.f32 %v7383_v43  ;;  %v4545_v23 = vsel %vm10172_vm8, %v10098_v25, %v4541_v15  ;;  %vm4547_vm8 = vcmp.eq.f32.partialorder %v4546_v40, 8.507059e+37 }
 0xd28   : > { %vm4559_vm12 = vmor %vm4557_vm3, %vm4558_vm13  ;;  %v4503_v33 = vand.u32 2147483648, %v10047_v60  ;;  %v4534_v15 = vor.u32 1.1754944e-38, %v4533_v31  ;;  %v4550_v50 = vsel %vm4547_vm8, %v4549_v22, %v4545_v23  ;;  %vm4423_vm13 = vweird.f32 %v10065_v20 }
 0xd29   : > { %v4554_v26 = vsub.f32 1.0, %v4553_v5  ;;  %vm4532_vm3 = vcmp.eq.f32.partialorder %v4531_v13, 8.507059e+37  ;;  %v4486_v40 = vand.u32 2147483647, %v10042_v57  ;;  %vm4408_vm5 = vweird.f32 %v10059_v44 }
 0xd2a   : > { %v4579_v53 = vmul.f32 %v4550_v50, %v10030_v3  ;;  %v4471_v13 = vand.u32 2147483647, %v10040_v42  ;;  %v4473_v41 = vand.u32 2147483648, %v10040_v42  ;;  %vm4393_vm11 = vweird.f32 %v10054_v27 }
 0xd2b   : > { %v4555_v62 = vmul.f32 %v7383_v43, %v4554_v26  ;;  %v4496_v26 = vadd.f32 %v10082_v19, %v4495_v18  ;;  %v4485_v3 = vsel %vm10237_vm2, %v10080_v30, %v4481_v56  ;;  %v4456_v48 = vand.u32 2147483647, %v10036_v38 }
 0xd2c   : > { %v4458_v23 = vand.u32 2147483648, %v10036_v38  ;;  %vm11695_vm0 = vweird.f32 %v10040_v42  ;;  %v4428_v18 = vand.u32 2147483648, %v10026_v6  ;;  %v4411_v56 = vand.u32 2147483647, %v10023_v36 }
 0xd2d   : > { %v4556_v5 = vadd.f32 %v7383_v43, %v4555_v62  ;;  %v4535_v62 = vsel %vm4532_vm3, %v4534_v15, %v4530_v16  ;;  %vm10257_vm14 = vmor %vm11695_vm0, %vm4468_vm10  ;;  %vm4378_vm3 = vweird.f32 %v10049_v4  ;;  %vm11698_vm10 = vweird.f32 %v10075_v10  ;;  %v11718_v16 = vld [vmem:[#allocation90_spill] sm:$0xff]  ;;  %v11722_v15 = vld [vmem:[#allocation93_spill] sm:$0xff] }
 0xd2e   : > { %v4578_v57 = vmul.f32 %v4535_v62, %v10013_v0  ;;  %v4436_v0 = vadd.f32 %v10070_v58, %v10136_v37  ;;  %vm10275_vm2 = vmor %vm4452_vm1, %vm11698_vm10  ;;  %v4474_v37 = vor.u32 1.1754944e-38, %v4473_v41  ;;  %vm4377_vm0 = vweird.f32 %v10019_v12 }
 0xd2f   : > { %v4560_v25 = vsel %vm4559_vm12, %v7383_v43, %v4556_v5  ;;  %v4515_v43 = vsel %vm10202_vm15, %v10084_v14, %v4511_v46  ;;  %v4466_v14 = vadd.f32 %v10077_v63, %v10142_v49  ;;  %vm4517_vm15 = vcmp.eq.f32.partialorder %v4516_v35, 8.507059e+37  ;;  %vm10293_vm1 = vmor %vm4437_vm9, %vm4438_vm6 }
 0xd30   : > { %v4565_v29 = vsel %vm4562_vm4, %v4564_v7, %v4560_v25  ;;  %vm4422_vm4 = vweird.f32 %v10026_v6  ;;  %v4504_v49 = vor.u32 1.1754944e-38, %v4503_v33  ;;  %v4520_v46 = vsel %vm4517_vm15, %v4519_v52, %v4515_v43 }
 0xd31   : > { %v4580_v47 = vmul.f32 %v4565_v29, %v10063_v17  ;;  %v4500_v17 = vsel %vm10219_vm7, %v10082_v19, %v4496_v26  ;;  %vm4407_vm12 = vweird.f32 %v10023_v36  ;;  %v4451_v19 = vadd.f32 %v10075_v10, %v10139_v2  ;;  %vm10309_vm6 = vmor %vm4422_vm4, %vm4423_vm13 }
 0xd32   : > { %v11694_v35 = vand.u32 2147483647, %v10047_v60  ;;  %v4489_v5 = vor.u32 1.1754944e-38, %v4488_v45  ;;  %vm4392_vm7 = vweird.f32 %v10021_v1  ;;  %v4470_v60 = vsel %vm10257_vm14, %v10077_v63, %v4466_v14  ;;  %vm10325_vm13 = vmor %vm4407_vm12, %vm4408_vm5 }
 0xd33   : > { %4583 = vmatpush.msra.mxu0 %v4580_v47  ;;  %vm4487_vm15 = vcmp.eq.f32.partialorder %v4486_v40, 8.507059e+37  ;;  %v4577_v42 = vmul.f32 %v4520_v46, %v10007_v55  ;;  %v4441_v26 = vand.u32 2147483647, %v10033_v59  ;;  %v4443_v7 = vand.u32 2147483648, %v10033_v59  ;;  %vm10341_vm5 = vmor %vm4392_vm7, %vm4393_vm11 }
 0xd34   : > { %vm4502_vm8 = vcmp.eq.f32.partialorder %v11694_v35, 8.507059e+37  ;;  %v4490_v25 = vsel %vm4487_vm15, %v4489_v5, %v4485_v3  ;;  %v4421_v55 = vadd.f32 %v10065_v20, %v10132_v11  ;;  %v4455_v63 = vsel %vm10275_vm2, %v10075_v10, %v4451_v19  ;;  %vm10357_vm11 = vmor %vm4377_vm0, %vm4378_vm3  ;;  %v11712_v35 = vld [vmem:[#allocation89_spill] sm:$0xff]  ;;  %v11714_v5 = vld [vmem:[#allocation87_spill] sm:$0xff] }
 0xd35   : > { %4584 = vmatpush.msra.mxu0 %v4579_v53  ;;  %v4505_v30 = vsel %vm4502_vm8, %v4504_v49, %v4500_v17  ;;  %vm4363_vm8 = vweird.f32 %v10044_v24  ;;  %vm4472_vm14 = vcmp.eq.f32.partialorder %v4471_v13, 8.507059e+37  ;;  %v4426_v33 = vand.u32 2147483647, %v10026_v6  ;;  %v11711_v49 = vld [vmem:[#allocation88_spill] sm:$0xff] }
 0xd36   : > { %v4576_v38 = vmul.f32 %v4505_v30, %v10003_v32  ;;  %v4459_v11 = vor.u32 1.1754944e-38, %v4458_v23  ;;  %v4475_v50 = vsel %vm4472_vm14, %v4474_v37, %v4470_v60  ;;  %v4406_v10 = vadd.f32 %v10059_v44, %v10129_v8  ;;  %v11713_v23 = vld [vmem:[#allocation39_spill] sm:$0xff]  ;;  %v4610_v37 = vld [vmem:[#allocation17 + $0x40] sm:$0xff] }
 0xd37   : > { %4585 = vmatpush.msra.mxu0 %v4578_v57  ;;  %v4440_v32 = vsel %vm10293_vm1, %v10070_v58, %v4436_v0  ;;  %vm4457_vm15 = vcmp.eq.f32.partialorder %v4456_v48, 8.507059e+37  ;;  %v4575_v29 = vmul.f32 %v4490_v25, %v9999_v51  ;;  %v4413_v59 = vand.u32 2147483648, %v10023_v36  ;;  %v11715_v0 = vld [vmem:[#allocation40_spill] sm:$0xff] }
 0xd38   : > { %v4444_v8 = vor.u32 1.1754944e-38, %v4443_v7  ;;  %v4460_v47 = vsel %vm4457_vm15, %v4459_v11, %v4455_v63  ;;  %v4391_v58 = vadd.f32 %v10054_v27, %v10126_v34  ;;  %v4425_v51 = vsel %vm10309_vm6, %v10065_v20, %v4421_v55  ;;  %v4611_v7 = vld [vmem:[#allocation17 + $0x48] sm:$0xff]  ;;  %v4608_v25 = vld [vmem:[#allocation15 + $0x58] sm:$0xff]  ;;  %v4607_v55 = vld [vmem:[#allocation15 + $0x50] sm:$0xff] }
 0xd39   : > { %4586 = vmatpush.msra.mxu0 %v4577_v42  ;;  %vm4442_vm9 = vcmp.eq.f32.partialorder %v4441_v26, 8.507059e+37  ;;  %v4574_v40 = vmul.f32 %v4475_v50, %v9996_v54  ;;  %v4396_v45 = vand.u32 2147483647, %v10021_v1  ;;  %v4398_v6 = vand.u32 2147483648, %v10021_v1  ;;  %v4613_v42 = vld [vmem:[#allocation17 + $0x58] sm:$0xff]  ;;  %v4612_v26 = vld [vmem:[#allocation17 + $0x50] sm:$0xff] }
 0xd3a   : > { %v4429_v34 = vor.u32 1.1754944e-38, %v4428_v18  ;;  %v4445_v52 = vsel %vm4442_vm9, %v4444_v8, %v4440_v32  ;;  %v4376_v20 = vadd.f32 %v10049_v4, %v10123_v21  ;;  %v4410_v54 = vsel %vm10325_vm13, %v10059_v44, %v4406_v10  ;;  %v4606_v63 = vld [vmem:[#allocation15 + $0x48] sm:$0xff]  ;;  %v11724_v11 = vld [vmem:[#allocation92_spill] sm:$0xff] }
 0xd3b   : > { %4587 = vmatpush.msra.mxu0 %v4576_v38  ;;  %vm4427_vm4 = vcmp.eq.f32.partialorder %v4426_v33, 8.507059e+37  ;;  %v4573_v62 = vmul.f32 %v4460_v47, %v9992_v61  ;;  %v4381_v14 = vand.u32 2147483647, %v10019_v12  ;;  %v4383_v36 = vand.u32 2147483648, %v10019_v12  ;;  %v4605_v38 = vld [vmem:[#allocation15 + $0x40] sm:$0xff]  ;;  %v4725_v32 = vld [vmem:[#allocation18 + $0x58] sm:$0xff] }
 0xd3c   : > { %v4414_v21 = vor.u32 1.1754944e-38, %v4413_v59  ;;  %v4430_v53 = vsel %vm4427_vm4, %v4429_v34, %v4425_v51  ;;  %v4361_v44 = vadd.f32 %v10044_v24, %v10120_v9  ;;  %v4395_v61 = vsel %vm10341_vm5, %v10054_v27, %v4391_v58  ;;  %v4724_v59 = vld [vmem:[#allocation18 + $0x50] sm:$0xff]  ;;  %v7023_v8 = vld [vmem:[%s11138_s16 + $0x2] ss:$0 sm:$0xff]  ;;  %v4722_v51 = vld [vmem:[#allocation18 + $0x40] sm:$0xff] }
 0xd3d   : > { %4588 = vmatpush.msra.mxu0 %v4575_v29  ;;  %vm4412_vm12 = vcmp.eq.f32.partialorder %v4411_v56, 8.507059e+37  ;;  %v4572_v13 = vmul.f32 %v4445_v52, %v9988_v39  ;;  %vm4362_vm10 = vweird.f32 %v10017_v28  ;;  %v4368_v1 = vand.u32 2147483648, %v10017_v28  ;;  %v4667_v29 = vpop.permute.xlu2 %4666  ;;  %v4723_v47 = vld [vmem:[#allocation18 + $0x48] sm:$0xff] }
 0xd3e   : > { %v4399_v9 = vor.u32 1.1754944e-38, %v4398_v6  ;;  %v4415_v31 = vsel %vm4412_vm12, %v4414_v21, %v4410_v54  ;;  %v4366_v27 = vand.u32 2147483647, %v10017_v28  ;;  %v4380_v39 = vsel %vm10357_vm11, %v10049_v4, %v4376_v20  ;;  %vm4364_vm2 = vmor %vm4362_vm10, %vm4363_vm8  ;;  %v4764_v54 = vld [vmem:[#allocation12 + $0x78] sm:$0xff] }
 0xd3f   : > { %4589 = vmatpush.msra.mxu0 %v4574_v40  ;;  %vm4397_vm7 = vcmp.eq.f32.partialorder %v4396_v45, 8.507059e+37  ;;  %v4571_v46 = vmul.f32 %v4430_v53, %v11711_v49  ;;  %v4384_v12 = vor.u32 1.1754944e-38, %v4383_v36  ;;  %v4365_v3 = vsel %vm4364_vm2, %v10044_v24, %v4361_v44  ;;  %v11716_v24 = vld [vmem:[#allocation91_spill] sm:$0xff] }
 0xd40   : > { %v4400_v19 = vsel %vm4397_vm7, %v4399_v9, %v4395_v61  ;;  %vm4382_vm3 = vcmp.eq.f32.partialorder %v4381_v14, 8.507059e+37  ;;  %v4570_v57 = vmul.f32 %v4415_v31, %v11712_v35  ;;  %v4369_v28 = vor.u32 1.1754944e-38, %v4368_v1 }
 0xd41   : > { %4590 = vmatpush.msra.mxu0 %v4573_v62  ;;  %v4385_v48 = vsel %vm4382_vm3, %v4384_v12, %v4380_v39  ;;  %vm4367_vm0 = vcmp.eq.f32.partialorder %v4366_v27, 8.507059e+37  ;;  %v4569_v4 = vmul.f32 %v4400_v19, %v11713_v23  ;;  %vm11717_vm8 = vcmask 916480   ;;  %v4763_v62 = vld [vmem:[#allocation12 + $0x70] sm:$0xff] }
 0xd42   : > { %v4370_v2 = vsel %vm4367_vm0, %v4369_v28, %v4365_v3  ;;  %v4568_v30 = vmul.f32 %v4385_v48, %v11714_v5  ;;  %vm11719_vm14 = vmmov %vm11717_vm8  ;;  %vm11720_vm1 = vcmask 261120  }
 0xd43   : > { %4591 = vmatpush.msra.mxu0 %v4572_v13  ;;  %v4567_v60 = vmul.f32 %v4370_v2, %v11715_v0  ;;  %vm11721_vm15 = vmmov %vm11720_vm1  ;;  %v4761_v0 = vld [vmem:[#allocation12 + $0x60] sm:$0xff] }
 0xd44   : > { %vm11723_vm6 = vmmov %vm11720_vm1 }
 0xd45   : > { %4592 = vmatpush.msra.mxu0 %v4571_v46  ;;  %vm11725_vm9 = vmmov %vm11720_vm1  ;;  %v4669_v34 = vpop.permute.xlu2 %4668 }
 0xd46   : > { %vm11726_vm11 = vmmov %vm11720_vm1 }
 0xd47   : > { %4593 = vmatpush.msra.mxu0 %v4570_v57  ;;  %vm11727_vm0 = vmmov %vm11720_vm1 }
 0xd49   : > { %4594 = vmatpush.msra.mxu0 %v4569_v4 }
 0xd4b   : > { %4595 = vmatpush.msra.mxu0 %v4568_v30  ;;  %v4762_v30 = vld [vmem:[#allocation12 + $0x68] sm:$0xff] }
 0xd4d   : > { %4596 = vmatpush.msra.mxu0 %v4567_v60  ;;  %v7024_v60 = vld [vmem:[%s11140_s18 + $0x2] ss:$0 sm:$0xff] }
 0xd4e   : > { %6657 = vmatmul.msk.f32.vlgmr.msra.gmra.mxu0 %vm11717_vm8, %v11716_v24  ;;  %vm11729_vm8 = vmmov %vm11727_vm0 }
 0xd4f   : > { %4632 = vmatpush.msrb.mxu0 %v4613_v42 }
 0xd51   : > { %4633 = vmatpush.msrb.mxu0 %v4612_v26 }
 0xd53   : > { %4634 = vmatpush.msrb.mxu0 %v4611_v7 }
 0xd55   : > { %4635 = vmatpush.msrb.mxu0 %v4610_v37 }
 0xd56   : > { %6658 = vmatmul.msk.f32.gmra.mxu0 %vm11719_vm14, %v11718_v16  ;;  %vm11731_vm14 = vmmov %vm11727_vm0 }
 0xd57   : > { %4655 = vmatpush.msra.mxu0 %v4608_v25 }
 0xd59   : > { %4656 = vmatpush.msra.mxu0 %v4607_v55 }
 0xd5b   : > { %4657 = vmatpush.msra.mxu0 %v4606_v63 }
 0xd5d   : > { %4658 = vmatpush.msra.mxu0 %v4605_v38  ;;  %v11732_v38 = vld [vmem:[#allocation44_spill] sm:$0xff] }
 0xdcb   : > { %v4598_v33 = vpop.f32.mrf.mxu0 }
 0xdcc   : > { %6659 = vmatmul.msk.f32.vlgmr.msrb.gmra.mxu0 %vm11720_vm1, %v4598_v33  ;;  %vm11733_vm1 = vcmask 130048   ;;  %v11734_v33 = vld [vmem:[#allocation46_spill] sm:$0xff] }
 0xdcd   : > { %4749 = vmatpush.msrb.mxu0 %v4725_v32  ;;  %v11746_v32 = vld [vmem:[#allocation58_spill] sm:$0xff] }
 0xdcf   : > { %4750 = vmatpush.msrb.mxu0 %v4724_v59  ;;  %v11752_v59 = vld [vmem:[#allocation64_spill] sm:$0xff] }
 0xdd1   : > { %4751 = vmatpush.msrb.mxu0 %v4723_v47 }
 0xdd3   : > { %v4601_v18 = vpop.f32.mrf.mxu0  ;;  %4752 = vmatpush.msrb.mxu0 %v4722_v51  ;;  %v11756_v51 = vld [vmem:[#allocation43_spill] sm:$0xff] }
 0xdd4   : > { %6660 = vmatmul.msk.f32.gmra.mxu0 %vm11721_vm15, %v4601_v18  ;;  %vm11735_vm15 = vmmov %vm11733_vm1  ;;  %v11736_v18 = vld [vmem:[#allocation48_spill] sm:$0xff] }
 0xddc   : > { %6661 = vmatmul.msk.f32.vlgmr.msra.gmra.mxu0 %vm11723_vm6, %v11722_v15  ;;  %vm11737_vm6 = vmmov %vm11733_vm1  ;;  %v11738_v15 = vld [vmem:[#allocation50_spill] sm:$0xff] }
 0xddd   : > { %4783 = vmatpush.msra.mxu0 %v4764_v54  ;;  %v11772_v54 = vld [vmem:[#allocation55_spill] sm:$0xff] }
 0xddf   : > { %4784 = vmatpush.msra.mxu0 %v4763_v62  ;;  %v11774_v62 = vld [vmem:[#allocation57_spill] sm:$0xff] }
 0xde1   : > { %4785 = vmatpush.msra.mxu0 %v4762_v30 }
 0xde3   : > { %4786 = vmatpush.msra.mxu0 %v4761_v0 }
 0xde4   : > { %6662 = vmatmul.msk.f32.gmra.mxu0 %vm11725_vm9, %v11724_v11  ;;  %vm11739_vm9 = vmmov %vm11733_vm1  ;;  %v11740_v11 = vld [vmem:[#allocation52_spill] sm:$0xff] }
 0xe49   : > { %v4637_v50 = vpop.f32.mrf.mxu0 }
 0xe51   : > { %v4640_v10 = vpop.f32.mrf.mxu0 }
 0xe59   : > { %v4660_v56 = vpop.f32.mrf.mxu0 }
 0xe5a   : > { %v4661_v43 = vadd.f32 %v4660_v56, %v4637_v50  ;;  %v11742_v50 = vld [vmem:[#allocation54_spill] sm:$0xff] }
 0xe5b   : > { %v11750_v56 = vld [vmem:[#allocation62_spill] sm:$0xff] }
 0xe5c   : > { %v4672_v58 = vadd.f32 %v4667_v29, %v4661_v43  ;;  %v11748_v29 = vld [vmem:[#allocation60_spill] sm:$0xff]  ;;  %v11754_v43 = vld [vmem:[#allocation66_spill] sm:$0xff] }
 0xe5e   : > { %v4679_v40 = vadd.f32 %v7023_v8, %v4672_v58 }
 0xe60   : > { %v6664_v45 = vmul.f32 -1.442695, %v4679_v40 }
 0xe61   : > { %v4663_v6 = vpop.f32.mrf.mxu0 }
 0xe62   : > { %7384 = vpow2.f32 %v6664_v45  ;;  %v4664_v22 = vadd.f32 %v4663_v6, %v4640_v10  ;;  %v11744_v10 = vld [vmem:[#allocation56_spill] sm:$0xff]  ;;  %v11760_v45 = vld [vmem:[#allocation45_spill] sm:$0xff]  ;;  %v11762_v6 = vld [vmem:[#allocation70_spill] sm:$0xff] }
 0xe64   : > { %v4673_v52 = vadd.f32 %v4669_v34, %v4664_v22  ;;  %v11764_v22 = vld [vmem:[#allocation47_spill] sm:$0xff]  ;;  %v11766_v34 = vld [vmem:[#allocation49_spill] sm:$0xff] }
 0xe66   : > { %v4680_v20 = vadd.f32 %v7023_v8, %v4673_v52  ;;  %v11768_v52 = vld [vmem:[#allocation51_spill] sm:$0xff] }
 0xe68   : > { %v7385_v14 = vpop.eup %7384  ;;  %v6665_v36 = vmul.f32 -1.442695, %v4680_v20 }
 0xe69   : > { %v4687_v17 = vadd.f32 1.0, %v7385_v14  ;;  %v11776_v14 = vld [vmem:[#allocation59_spill] sm:$0xff] }
 0xe6a   : > { %7386 = vpow2.f32 %v6665_v36  ;;  %v11778_v36 = vld [vmem:[#allocation61_spill] sm:$0xff] }
 0xe6b   : > { %7388 = vrcp.f32 %v4687_v17  ;;  %v4700_v1 = vand.u32 2147483648, %v4687_v17  ;;  %v4698_v9 = vand.u32 2147483647, %v4687_v17  ;;  %vm4694_vm4 = vweird.f32 %v4687_v17 }
 0xe6d   : > { %v4701_v39 = vor.u32 1.1754944e-38, %v4700_v1  ;;  %vm4699_vm12 = vcmp.eq.f32.partialorder %v4698_v9, 8.507059e+37  ;;  %v5256_v9 = vld [vmem:[#allocation14 + $0x78] sm:$0xff] }
 0xe6e   : > { %5316 = vmatpush.msrb.mxu1 %v5256_v9  ;;  %v11792_v9 = vld [vmem:[#allocation77_spill] sm:$0xff] }
 0xe70   : > { %v7387_v21 = vpop.eup %7386 }
 0xe71   : > { %v7389_v53 = vpop.eup %7388  ;;  %v4688_v44 = vadd.f32 1.0, %v7387_v21  ;;  %v11782_v21 = vld [vmem:[#allocation65_spill] sm:$0xff] }
 0xe72   : > { %v4690_v61 = vmul.f32 %v7389_v53, %v4687_v17  ;;  %vm4695_vm13 = vweird.f32 %v7389_v53  ;;  %v11780_v17 = vld [vmem:[#allocation63_spill] sm:$0xff] }
 0xe73   : > { %7390 = vrcp.f32 %v4688_v44  ;;  %vm4696_vm5 = vmor %vm4694_vm4, %vm4695_vm13  ;;  %v4715_v35 = vand.u32 2147483648, %v4688_v44  ;;  %v4713_v28 = vand.u32 2147483647, %v4688_v44  ;;  %vm4709_vm7 = vweird.f32 %v4688_v44 }
 0xe74   : > { %v4691_v13 = vsub.f32 1.0, %v4690_v61  ;;  %vm11741_vm13 = vmmov %vm11733_vm1  ;;  %v11786_v61 = vld [vmem:[#allocation69_spill] sm:$0xff] }
 0xe75   : > { %v4716_v23 = vor.u32 1.1754944e-38, %v4715_v35  ;;  %vm4714_vm3 = vcmp.eq.f32.partialorder %v4713_v28, 8.507059e+37  ;;  %vm11743_vm4 = vmmov %vm11733_vm1  ;;  %v5253_v28 = vld [vmem:[#allocation14 + $0x60] sm:$0xff] }
 0xe76   : > { %v4692_v41 = vmul.f32 %v7389_v53, %v4691_v13 }
 0xe78   : > { %v4693_v31 = vadd.f32 %v7389_v53, %v4692_v41  ;;  %v10459_v41 = vld [vmem:[%s11397_s15 + $0x3] ss:$0 sm:$0xff] }
 0xe79   : > { %v7391_v27 = vpop.eup %7390 }
 0xe7a   : > { %v4697_v49 = vsel %vm4696_vm5, %v7389_v53, %v4693_v31  ;;  %v4705_v46 = vmul.f32 %v7391_v27, %v4688_v44  ;;  %vm4710_vm10 = vweird.f32 %v7391_v27  ;;  %vm11745_vm5 = vmmov %vm11733_vm1  ;;  %v11784_v53 = vld [vmem:[#allocation67_spill] sm:$0xff] }
 0xe7b   : > { %v4702_v12 = vsel %vm4699_vm12, %v4701_v39, %v4697_v49  ;;  %vm4711_vm2 = vmor %vm4709_vm7, %vm4710_vm10  ;;  %v11788_v39 = vld [vmem:[#allocation72_spill] sm:$0xff] }
 0xe7c   : > { %v4719_v19 = vmul.f32 %v4702_v12, %v4679_v40  ;;  %v4706_v3 = vsub.f32 1.0, %v4705_v46  ;;  %vm11747_vm12 = vmmov %vm11733_vm1  ;;  %v11758_v40 = vld [vmem:[#allocation68_spill] sm:$0xff]  ;;  %v4925_v49 = vmul.f32 %v10459_v41, %v11788_v39  ;;  %v10466_v46 = vld [vmem:[%s11399_s24 + $0x3] ss:$0 sm:$0xff] }
 0xe7d   : > { %vm11749_vm10 = vmmov %vm11733_vm1  ;;  %v5255_v12 = vld [vmem:[#allocation14 + $0x70] sm:$0xff] }
 0xe7e   : > { %v4707_v57 = vmul.f32 %v7391_v27, %v4706_v3  ;;  %6667 = vmatmul.msk.f32.vlgmr.msrb.gmra.mxu0 %vm11726_vm11, %v4719_v19  ;;  %vm11751_vm11 = vmmov %vm11733_vm1  ;;  %5317 = vmatpush.msrb.mxu1 %v5255_v12  ;;  %v5254_v3 = vld [vmem:[#allocation14 + $0x68] sm:$0xff] }
 0xe7f   : > { %vm11753_vm7 = vmmov %vm11733_vm1 }
 0xe80   : > { %v4708_v48 = vadd.f32 %v7391_v27, %v4707_v57  ;;  %5318 = vmatpush.msrb.mxu1 %v5254_v3 }
 0xe82   : > { %v4712_v4 = vsel %vm4711_vm2, %v7391_v27, %v4708_v48  ;;  %vm11755_vm2 = vmmov %vm11733_vm1  ;;  %5319 = vmatpush.msrb.mxu1 %v5253_v28 }
 0xe83   : > { %v4717_v2 = vsel %vm4714_vm3, %v4716_v23, %v4712_v4  ;;  %vm11757_vm3 = vmmov %vm11733_vm1 }
 0xe84   : > { %v4720_v5 = vmul.f32 %v4717_v2, %v4680_v20  ;;  %v11770_v20 = vld [vmem:[#allocation53_spill] sm:$0xff]  ;;  %v11789_v2 = vld [vmem:[#allocation74_spill] sm:$0xff] }
 0xe86   : > { %6668 = vmatmul.msk.f32.gmra.mxu0 %vm11727_vm0, %v4720_v5  ;;  %vm11759_vm0 = vmmov %vm11733_vm1  ;;  %v4926_v5 = vmul.f32 %v10459_v41, %v11789_v2 }
 0xefb   : > { %v4754_v42 = vpop.f32.mrf.mxu0 }
 0xefc   : > { %v10391_v26 = vadd.f32 %v7024_v60, %v4754_v42 }
 0xefe   : > { %11728 = vst [vmem:[#allocation41_spill] sm:$0xff] %v10391_v26  ;;  %6669 = vmatmul.msk.f32.vlgmr.msra.gmra.mxu0 %vm11729_vm8, %v10391_v26  ;;  %vm11761_vm8 = vmmov %vm11759_vm0 }
 0xf03   : > { %v4757_v7 = vpop.f32.mrf.mxu0 }
 0xf04   : > { %v10395_v37 = vadd.f32 %v7024_v60, %v4757_v7 }
 0xf06   : > { %11730 = vst [vmem:[#allocation42_spill] sm:$0xff] %v10395_v37  ;;  %6670 = vmatmul.msk.f32.gmra.mxu0 %vm11731_vm14, %v10395_v37  ;;  %vm11763_vm14 = vmmov %vm11759_vm0 }
 0xf7b   : > { %v4788_v25 = vpop.f32.mrf.mxu0 }
 0xf83   : > { %v4791_v55 = vpop.f32.mrf.mxu0 }
 0xf84   : > { %v6998_v63 = vpack.i.bf16 %v4788_v25, %v4791_v55  ;;  %4875 = vmatpush.msra.mxu3 %v4791_v55 }
 0xf86   : > { %6999 = vrot.lane.b32.xlu2 %v6998_v63, %s7961_s2  ;;  %4876 = vmatpush.msra.mxu3 %v4788_v25  ;;  %v11790_v63 = vld [vmem:[#allocation76_spill] sm:$0xff] }
 0xf87   : > { %6685 = vmatmul.msk.f32.vlgmr.msra.gmra.mxu3 %vm11733_vm1, %v11732_v38  ;;  %vm11765_vm1 = vmmov %vm11759_vm0  ;;  %v4927_v38 = vmul.f32 %v10459_v41, %v11790_v63  ;;  %v11794_v63 = vld [vmem:[#allocation78_spill] sm:$0xff] }
 0xf8f   : > { %6686 = vmatmul.msk.f32.gmra.mxu3 %vm11735_vm15, %v11734_v33  ;;  %vm11767_vm15 = vmmov %vm11759_vm0 }
 0xf97   : > { %6687 = vmatmul.msk.f32.gmra.mxu3 %vm11737_vm6, %v11736_v18  ;;  %vm11769_vm6 = vmmov %vm11759_vm0 }
 0xf9f   : > { %6688 = vmatmul.msk.f32.gmra.mxu3 %vm11739_vm9, %v11738_v15  ;;  %vm11771_vm9 = vmmov %vm11759_vm0 }
 0xfa7   : > { %6689 = vmatmul.msk.f32.gmra.mxu3 %vm11741_vm13, %v11740_v11  ;;  %vm11773_vm13 = vmmov %vm11759_vm0 }
 0xfaf   : > { %6690 = vmatmul.msk.f32.gmra.mxu3 %vm11743_vm4, %v11742_v50  ;;  %vm11775_vm4 = vmmov %vm11759_vm0 }
 0xfb7   : > { %6691 = vmatmul.msk.f32.gmra.mxu3 %vm11745_vm5, %v11744_v10  ;;  %vm11777_vm5 = vmmov %vm11759_vm0 }
 0xfbf   : > { %6692 = vmatmul.msk.f32.gmra.mxu3 %vm11747_vm12, %v11746_v32  ;;  %vm11779_vm12 = vmmov %vm11759_vm0 }
 0xfc7   : > { %6693 = vmatmul.msk.f32.gmra.mxu3 %vm11749_vm10, %v11748_v29  ;;  %vm11781_vm10 = vmmov %vm11759_vm0 }
 0xfcf   : > { %6694 = vmatmul.msk.f32.gmra.mxu3 %vm11751_vm11, %v11750_v56  ;;  %vm11783_vm11 = vmmov %vm11759_vm0 }
 0xfd7   : > { %6695 = vmatmul.msk.f32.gmra.mxu3 %vm11753_vm7, %v11752_v59  ;;  %vm11785_vm7 = vmmov %vm11759_vm0 }
 0xfdf   : > { %6696 = vmatmul.msk.f32.gmra.mxu3 %vm11755_vm2, %v11754_v43  ;;  %vm11787_vm2 = vmmov %vm11759_vm0 }
 0xfe0   : > { %v7000_v8 = vpop.permute.xlu2 %6999 }
 0xfe1   : > { %v7001_v47 = vunpack.i.l.bf16 %v7000_v8  ;;  %v7002_v58 = vunpack.i.h.bf16 %v7000_v8  ;;  %v11791_v8 = vld [vmem:[#allocation75_spill] sm:$0xff] }
 0xfe3   : > { %4816 = vmatpush.msrb.mxu0 %v7001_v47  ;;  %v4928_v47 = vmul.f32 %v10459_v41, %v11791_v8 }
 0xfe5   : > { %4817 = vmatpush.msrb.mxu0 %v7002_v58 }
 0xfe6   : > { %6671 = vmatmul.msk.f32.vlgmr.msrb.gmra.mxu0 %vm11757_vm3, %v11756_v51 }
 0xfe7   : > { %6697 = vmatmul.msk.f32.gmra.mxu3 %vm11759_vm0, %v11758_v40 }
 0xfee   : > { %6672 = vmatmul.msk.f32.gmra.mxu0 %vm11761_vm8, %v11760_v45 }
 0xfef   : > { %6698 = vmatmul.msk.f32.gmra.mxu3 %vm11763_vm14, %v11762_v6 }
 0xff6   : > { %6673 = vmatmul.msk.f32.gmra.mxu0 %vm11765_vm1, %v11764_v22 }
 0xffe   : > { %6674 = vmatmul.msk.f32.gmra.mxu0 %vm11767_vm15, %v11766_v34  ;;  %vm11793_vm15 = vcmask 261120  }
0x1006   : > { %6675 = vmatmul.msk.f32.gmra.mxu0 %vm11769_vm6, %v11768_v52 }
0x100a   : > { %v4878_v44 = vpop.f32.mrf.mxu3 }
0x100e   : > { %6676 = vmatmul.msk.f32.gmra.mxu0 %vm11771_vm9, %v11770_v20 }
0x1012   : > { %v4881_v13 = vpop.f32.mrf.mxu3 }
0x1016   : > { %6677 = vmatmul.msk.f32.gmra.mxu0 %vm11773_vm13, %v11772_v54 }
0x101a   : > { %v4884_v1 = vpop.f32.mrf.mxu3 }
0x101e   : > { %6678 = vmatmul.msk.f32.gmra.mxu0 %vm11775_vm4, %v11774_v62 }
0x1022   : > { %v4887_v35 = vpop.f32.mrf.mxu3 }
0x1026   : > { %6679 = vmatmul.msk.f32.gmra.mxu0 %vm11777_vm5, %v11776_v14  ;;  %vm11795_vm5 = vmmov %vm11793_vm15 }
0x102a   : > { %v4890_v60 = vpop.f32.mrf.mxu3 }
0x102e   : > { %6680 = vmatmul.msk.f32.gmra.mxu0 %vm11779_vm12, %v11778_v36 }
0x1032   : > { %v4893_v32 = vpop.f32.mrf.mxu3 }
0x1036   : > { %6681 = vmatmul.msk.f32.gmra.mxu0 %vm11781_vm10, %v11780_v17 }
0x103e   : > { %6682 = vmatmul.msk.f32.gmra.mxu0 %vm11783_vm11, %v11782_v21 }
0x1046   : > { %6683 = vmatmul.msk.f32.gmra.mxu0 %vm11785_vm7, %v11784_v53  ;;  %v4896_v53 = vpop.f32.mrf.mxu3 }
0x104e   : > { %6684 = vmatmul.msk.f32.gmra.mxu0 %vm11787_vm2, %v11786_v61  ;;  %vm11797_vm2 = vmmov %vm11795_vm5 }
0x1063   : > { %v4819_v31 = vpop.f32.mrf.mxu0 }
0x1064   : > { %v4879_v27 = vadd.f32 %v4878_v44, %v4819_v31  ;;  %v4929_v31 = vmul.f32 %v10459_v41, %v11792_v9 }
0x1066   : > { %v4939_v19 = vadd.f32 %v4925_v49, %v4879_v27 }
0x1068   : > { %v4958_v57 = vadd.f32 %v10466_v46, %v4939_v19 }
0x106a   : > { %v6701_v48 = vmul.f32 -1.442695, %v4958_v57 }
0x106b   : > { %v4822_v23 = vpop.f32.mrf.mxu0 }
0x106c   : > { %7392 = vpow2.f32 %v6701_v48  ;;  %v4882_v4 = vadd.f32 %v4881_v13, %v4822_v23 }
0x106e   : > { %v4940_v30 = vadd.f32 %v4926_v5, %v4882_v4 }
0x1070   : > { %v10472_v0 = vadd.f32 %v10466_v46, %v4940_v30 }
0x1072   : > { %v7393_v42 = vpop.eup %7392  ;;  %v6702_v7 = vmul.f32 -1.442695, %v10472_v0 }
0x1073   : > { %v5014_v25 = vadd.f32 1.0, %v7393_v42  ;;  %v4825_v55 = vpop.f32.mrf.mxu0 }
0x1074   : > { %7394 = vpow2.f32 %v6702_v7  ;;  %v4885_v33 = vadd.f32 %v4884_v1, %v4825_v55  ;;  %v4899_v7 = vpop.f32.mrf.mxu3 }
0x1075   : > { %7396 = vrcp.f32 %v5014_v25  ;;  %v5039_v40 = vand.u32 2147483648, %v5014_v25  ;;  %v5037_v6 = vand.u32 2147483647, %v5014_v25  ;;  %vm5033_vm0 = vweird.f32 %v5014_v25 }
0x1076   : > { %v4941_v18 = vadd.f32 %v4927_v38, %v4885_v33  ;;  %v4930_v38 = vmul.f32 %v10459_v41, %v11794_v63 }
0x1077   : > { %v5040_v62 = vor.u32 1.1754944e-38, %v5039_v40  ;;  %vm5038_vm14 = vcmp.eq.f32.partialorder %v5037_v6, 8.507059e+37 }
0x1078   : > { %v10478_v15 = vadd.f32 %v10466_v46, %v4941_v18 }
0x107a   : > { %v7395_v11 = vpop.eup %7394  ;;  %v6703_v50 = vmul.f32 -1.442695, %v10478_v15 }
0x107b   : > { %v7397_v10 = vpop.eup %7396  ;;  %v5015_v29 = vadd.f32 1.0, %v7395_v11  ;;  %v4828_v56 = vpop.f32.mrf.mxu0 }
0x107c   : > { %v5029_v59 = vmul.f32 %v7397_v10, %v5014_v25  ;;  %7398 = vpow2.f32 %v6703_v50  ;;  %v4888_v43 = vadd.f32 %v4887_v35, %v4828_v56  ;;  %vm5034_vm3 = vweird.f32 %v7397_v10 }
0x107d   : > { %7400 = vrcp.f32 %v5015_v29  ;;  %vm5035_vm8 = vmor %vm5033_vm0, %vm5034_vm3  ;;  %v5054_v27 = vand.u32 2147483648, %v5015_v29  ;;  %v5052_v49 = vand.u32 2147483647, %v5015_v29  ;;  %vm5048_vm6 = vweird.f32 %v5015_v29 }
0x107e   : > { %v5030_v58 = vsub.f32 1.0, %v5029_v59  ;;  %v4942_v51 = vadd.f32 %v4928_v47, %v4888_v43  ;;  %v11796_v59 = vld [vmem:[#allocation79_spill] sm:$0xff] }
0x107f   : > { %vm5053_vm13 = vcmp.eq.f32.partialorder %v5052_v49, 8.507059e+37 }
0x1080   : > { %v5031_v45 = vmul.f32 %v7397_v10, %v5030_v58  ;;  %v10484_v22 = vadd.f32 %v10466_v46, %v4942_v51 }
0x1082   : > { %v7399_v34 = vpop.eup %7398  ;;  %v5032_v52 = vadd.f32 %v7397_v10, %v5031_v45  ;;  %v6704_v20 = vmul.f32 -1.442695, %v10484_v22 }
0x1083   : > { %v7401_v54 = vpop.eup %7400  ;;  %v5016_v14 = vadd.f32 1.0, %v7399_v34  ;;  %v4831_v36 = vpop.f32.mrf.mxu0 }
0x1084   : > { %v5036_v17 = vsel %vm5035_vm8, %v7397_v10, %v5032_v52  ;;  %v5044_v21 = vmul.f32 %v7401_v54, %v5015_v29  ;;  %7402 = vpow2.f32 %v6704_v20  ;;  %v4891_v1 = vadd.f32 %v4890_v60, %v4831_v36  ;;  %v4902_v36 = vpop.f32.mrf.mxu3 }
0x1085   : > { %v5041_v44 = vsel %vm5038_vm14, %v5040_v62, %v5036_v17  ;;  %7404 = vrcp.f32 %v5016_v14  ;;  %vm5049_vm1 = vweird.f32 %v7401_v54  ;;  %v5069_v25 = vand.u32 2147483648, %v5016_v14  ;;  %vm11799_vm14 = vmmov %vm11797_vm2 }
0x1086   : > { %v5238_v61 = vmul.f32 %v5041_v44, %v4958_v57  ;;  %v5045_v13 = vsub.f32 1.0, %v5044_v21  ;;  %v4943_v12 = vadd.f32 %v4929_v31, %v4891_v1  ;;  %vm5050_vm9 = vmor %vm5048_vm6, %vm5049_vm1  ;;  %v5055_v57 = vor.u32 1.1754944e-38, %v5054_v27  ;;  %v11798_v44 = vld [vmem:[#allocation80_spill] sm:$0xff] }
0x1087   : > { %v5067_v18 = vand.u32 2147483647, %v5016_v14  ;;  %vm5063_vm12 = vweird.f32 %v5016_v14  ;;  %v5070_v29 = vor.u32 1.1754944e-38, %v5069_v25 }
0x1088   : > { %v5046_v39 = vmul.f32 %v7401_v54, %v5045_v13  ;;  %6716 = vmatmul.msk.f32.vlgmr.msrb.gmra.mxu1 %vm11793_vm15, %v5238_v61  ;;  %v10491_v35 = vadd.f32 %v10466_v46, %v4943_v12  ;;  %v4932_v61 = vmul.f32 %v10459_v41, %v11798_v44 }
0x1089   : > { %vm5068_vm11 = vcmp.eq.f32.partialorder %v5067_v18, 8.507059e+37 }
0x108a   : > { %v7403_v19 = vpop.eup %7402  ;;  %v5047_v3 = vadd.f32 %v7401_v54, %v5046_v39  ;;  %v6705_v5 = vmul.f32 -1.442695, %v10491_v35 }
0x108b   : > { %v7405_v28 = vpop.eup %7404  ;;  %v5017_v48 = vadd.f32 1.0, %v7403_v19  ;;  %v4834_v23 = vpop.f32.mrf.mxu0 }
0x108c   : > { %v5051_v4 = vsel %vm5050_vm9, %v7401_v54, %v5047_v3  ;;  %v5059_v2 = vmul.f32 %v7405_v28, %v5016_v14  ;;  %v4894_v55 = vadd.f32 %v4893_v32, %v4834_v23  ;;  %vm5064_vm4 = vweird.f32 %v7405_v28 }
0x108d   : > { %v5056_v30 = vsel %vm5053_vm13, %v5055_v57, %v5051_v4  ;;  %7406 = vrcp.f32 %v5017_v48  ;;  %vm5065_vm10 = vmor %vm5063_vm12, %vm5064_vm4  ;;  %v4931_v32 = vmul.f32 %v10459_v41, %v11796_v59  ;;  %v5082_v20 = vand.u32 2147483647, %v5017_v48 }
0x108e   : > { %v5239_v60 = vmul.f32 %v5056_v30, %v10472_v0  ;;  %v5060_v42 = vsub.f32 1.0, %v5059_v2  ;;  %7408 = vpow2.f32 %v6705_v5  ;;  %v4944_v11 = vadd.f32 %v4930_v38, %v4894_v55  ;;  %v4905_v5 = vpop.f32.mrf.mxu3  ;;  %vm11801_vm13 = vmmov %vm11797_vm2 }
0x108f   : > { %v5084_v54 = vand.u32 2147483648, %v5017_v48  ;;  %vm5078_vm3 = vweird.f32 %v5017_v48  ;;  %vm5083_vm8 = vcmp.eq.f32.partialorder %v5082_v20, 8.507059e+37 }
0x1090   : > { %v5061_v33 = vmul.f32 %v7405_v28, %v5060_v42  ;;  %6717 = vmatmul.msk.f32.gmra.mxu1 %vm11795_vm5, %v5239_v60  ;;  %v10499_v0 = vadd.f32 %v10466_v46, %v4944_v11  ;;  %v11800_v60 = vld [vmem:[#allocation81_spill] sm:$0xff] }
0x1091   : > { %v4933_v42 = vmul.f32 %v10459_v41, %v11800_v60 }
0x1092   : > { %v5062_v50 = vadd.f32 %v7405_v28, %v5061_v33  ;;  %v6706_v45 = vmul.f32 -1.442695, %v10499_v0 }
0x1093   : > { %v7407_v10 = vpop.eup %7406  ;;  %v4837_v56 = vpop.f32.mrf.mxu0 }
0x1094   : > { %v7409_v43 = vpop.eup %7408  ;;  %v5066_v8 = vsel %vm5065_vm10, %v7405_v28, %v5062_v50  ;;  %v5074_v47 = vmul.f32 %v7407_v10, %v5017_v48  ;;  %v4897_v58 = vadd.f32 %v4896_v53, %v4837_v56  ;;  %vm5079_vm7 = vweird.f32 %v7407_v10 }
0x1095   : > { %v5071_v51 = vsel %vm5068_vm11, %v5070_v29, %v5066_v8  ;;  %v5018_v40 = vadd.f32 1.0, %v7409_v43  ;;  %vm5080_vm0 = vmor %vm5078_vm3, %vm5079_vm7 }
0x1096   : > { %v5240_v6 = vmul.f32 %v5071_v51, %v10478_v15  ;;  %v5075_v34 = vsub.f32 1.0, %v5074_v47  ;;  %v4945_v52 = vadd.f32 %v4931_v32, %v4897_v58  ;;  %v5085_v15 = vor.u32 1.1754944e-38, %v5084_v54 }
0x1097   : > { %7410 = vrcp.f32 %v5018_v40  ;;  %v5099_v57 = vand.u32 2147483648, %v5018_v40  ;;  %v5097_v4 = vand.u32 2147483647, %v5018_v40  ;;  %vm5093_vm15 = vweird.f32 %v5018_v40 }
0x1098   : > { %v5076_v62 = vmul.f32 %v7407_v10, %v5075_v34  ;;  %7412 = vpow2.f32 %v6706_v45  ;;  %v10506_v14 = vadd.f32 %v10466_v46, %v4945_v52  ;;  %6718 = vmatmul.msk.f32.gmra.mxu1 %vm11797_vm2, %v5240_v6  ;;  %v11802_v45 = vld [vmem:[#allocation82_spill] sm:$0xff] }
0x1099   : > { %v5100_v55 = vor.u32 1.1754944e-38, %v5099_v57  ;;  %vm5098_vm9 = vcmp.eq.f32.partialorder %v5097_v4, 8.507059e+37  ;;  %v4934_v6 = vmul.f32 %v10459_v41, %v11802_v45  ;;  %v11804_v57 = vld [vmem:[#allocation83_spill] sm:$0xff] }
0x109a   : > { %v5077_v17 = vadd.f32 %v7407_v10, %v5076_v62  ;;  %v6707_v21 = vmul.f32 -1.442695, %v10506_v14 }
0x109b   : > { %v4840_v53 = vpop.f32.mrf.mxu0 }
0x109c   : > { %v5081_v13 = vsel %vm5080_vm0, %v7407_v10, %v5077_v17  ;;  %7414 = vpow2.f32 %v6707_v21  ;;  %v4900_v1 = vadd.f32 %v4899_v7, %v4840_v53  ;;  %vm11803_vm0 = vmmov %vm11801_vm13 }
0x109d   : > { %v7411_v9 = vpop.eup %7410  ;;  %v5086_v31 = vsel %vm5083_vm8, %v5085_v15, %v5081_v13 }
0x109e   : > { %v7413_v27 = vpop.eup %7412  ;;  %v5241_v39 = vmul.f32 %v5086_v31, %v10484_v22  ;;  %v5089_v49 = vmul.f32 %v7411_v9, %v5018_v40  ;;  %v4946_v12 = vadd.f32 %v4932_v61, %v4900_v1  ;;  %vm5094_vm1 = vweird.f32 %v7411_v9 }
0x109f   : > { %v5019_v19 = vadd.f32 1.0, %v7413_v27  ;;  %vm5095_vm6 = vmor %vm5093_vm15, %vm5094_vm1 }
0x10a0   : > { %v5090_v3 = vsub.f32 1.0, %v5089_v49  ;;  %v10514_v28 = vadd.f32 %v10466_v46, %v4946_v12  ;;  %6719 = vmatmul.msk.f32.gmra.mxu1 %vm11799_vm14, %v5241_v39 }
0x10a1   : > { %7416 = vrcp.f32 %v5019_v19  ;;  %v5112_v43 = vand.u32 2147483647, %v5019_v19  ;;  %v5114_v8 = vand.u32 2147483648, %v5019_v19  ;;  %vm5108_vm5 = vweird.f32 %v5019_v19 }
0x10a2   : > { %v7415_v48 = vpop.eup %7414  ;;  %v5091_v23 = vmul.f32 %v7411_v9, %v5090_v3  ;;  %v6708_v2 = vmul.f32 -1.442695, %v10514_v28 }
0x10a3   : > { %v5020_v30 = vadd.f32 1.0, %v7415_v48  ;;  %v4843_v22 = vpop.f32.mrf.mxu0  ;;  %vm5113_vm10 = vcmp.eq.f32.partialorder %v5112_v43, 8.507059e+37  ;;  %v5115_v54 = vor.u32 1.1754944e-38, %v5114_v8  ;;  %v4935_v48 = vmul.f32 %v10459_v41, %v11804_v57  ;;  %v11809_v57 = vld [vmem:[#allocation86_spill] sm:$0xff] }
0x10a4   : > { %v5092_v7 = vadd.f32 %v7411_v9, %v5091_v23  ;;  %7418 = vpow2.f32 %v6708_v2  ;;  %v4903_v25 = vadd.f32 %v4902_v36, %v4843_v22 }
0x10a5   : > { %7420 = vrcp.f32 %v5020_v30  ;;  %v5127_v62 = vand.u32 2147483647, %v5020_v30  ;;  %v5129_v36 = vand.u32 2147483648, %v5020_v30  ;;  %vm5123_vm7 = vweird.f32 %v5020_v30 }
0x10a6   : > { %v5096_v63 = vsel %vm5095_vm6, %v7411_v9, %v5092_v7  ;;  %v4947_v38 = vadd.f32 %v4933_v42, %v4903_v25  ;;  %vm11806_vm6 = vmmov %vm11803_vm0 }
0x10a7   : > { %v7417_v33 = vpop.eup %7416  ;;  %v5101_v18 = vsel %vm5098_vm9, %v5100_v55, %v5096_v63  ;;  %v5130_v31 = vor.u32 1.1754944e-38, %v5129_v36  ;;  %vm5128_vm3 = vcmp.eq.f32.partialorder %v5127_v62, 8.507059e+37 }
0x10a8   : > { %v5242_v11 = vmul.f32 %v5101_v18, %v10491_v35  ;;  %v5104_v50 = vmul.f32 %v7417_v33, %v5019_v19  ;;  %v10522_v10 = vadd.f32 %v10466_v46, %v4947_v38  ;;  %vm5109_vm4 = vweird.f32 %v7417_v33  ;;  %v4908_v35 = vpop.f32.mrf.mxu3  ;;  %v11805_v38 = vld [vmem:[#allocation84_spill] sm:$0xff] }
0x10a9   : > { %vm5110_vm12 = vmor %vm5108_vm5, %vm5109_vm4 }
0x10aa   : > { %v7419_v29 = vpop.eup %7418  ;;  %v5105_v56 = vsub.f32 1.0, %v5104_v50  ;;  %v6709_v59 = vmul.f32 -1.442695, %v10522_v10  ;;  %6720 = vmatmul.msk.f32.gmra.mxu1 %vm11801_vm13, %v5242_v11 }
0x10ab   : > { %v7421_v32 = vpop.eup %7420  ;;  %v5021_v47 = vadd.f32 1.0, %v7419_v29  ;;  %v4846_v58 = vpop.f32.mrf.mxu0 }
0x10ac   : > { %v5106_v51 = vmul.f32 %v7417_v33, %v5105_v56  ;;  %v5119_v40 = vmul.f32 %v7421_v32, %v5020_v30  ;;  %7422 = vpow2.f32 %v6709_v59  ;;  %v4906_v20 = vadd.f32 %v4905_v5, %v4846_v58 }
0x10ad   : > { %7424 = vrcp.f32 %v5021_v47  ;;  %vm5124_vm11 = vweird.f32 %v7421_v32  ;;  %v5144_v4 = vand.u32 2147483648, %v5021_v47  ;;  %v5142_v22 = vand.u32 2147483647, %v5021_v47 }
0x10ae   : > { %v5107_v34 = vadd.f32 %v7417_v33, %v5106_v51  ;;  %v5120_v52 = vsub.f32 1.0, %v5119_v40  ;;  %v4948_v15 = vadd.f32 %v4934_v6, %v4906_v20  ;;  %vm5125_vm2 = vmor %vm5123_vm7, %vm5124_vm11  ;;  %vm5138_vm14 = vweird.f32 %v5021_v47  ;;  %v11807_v20 = vld [vmem:[#allocation85_spill] sm:$0xff] }
0x10af   : > { %v5145_v25 = vor.u32 1.1754944e-38, %v5144_v4  ;;  %vm5143_vm15 = vcmp.eq.f32.partialorder %v5142_v22, 8.507059e+37  ;;  %vm11810_vm7 = vmmov %vm11803_vm0 }
0x10b0   : > { %v5111_v17 = vsel %vm5110_vm12, %v7417_v33, %v5107_v34  ;;  %v5121_v21 = vmul.f32 %v7421_v32, %v5120_v52  ;;  %v10530_v1 = vadd.f32 %v10466_v46, %v4948_v15  ;;  %v4911_v23 = vpop.f32.mrf.mxu3  ;;  %v4936_v33 = vmul.f32 %v10459_v41, %v11805_v38  ;;  %vm11808_vm12 = vmmov %vm11803_vm0 }
0x10b1   : > { %v5116_v53 = vsel %vm5113_vm10, %v5115_v54, %v5111_v17  ;;  %v4937_v54 = vmul.f32 %v10459_v41, %v11807_v20 }
0x10b2   : > { %v7423_v44 = vpop.eup %7422  ;;  %v5243_v61 = vmul.f32 %v5116_v53, %v10499_v0  ;;  %v5122_v13 = vadd.f32 %v7421_v32, %v5121_v21  ;;  %v6710_v19 = vmul.f32 -1.442695, %v10530_v1 }
0x10b3   : > { %v7425_v9 = vpop.eup %7424  ;;  %v5022_v27 = vadd.f32 1.0, %v7423_v44  ;;  %v4849_v39 = vpop.f32.mrf.mxu0 }
0x10b4   : > { %v5126_v49 = vsel %vm5125_vm2, %v7421_v32, %v5122_v13  ;;  %v5134_v12 = vmul.f32 %v7425_v9, %v5021_v47  ;;  %6721 = vmatmul.msk.f32.gmra.mxu1 %vm11803_vm0, %v5243_v61  ;;  %v4909_v2 = vadd.f32 %v4908_v35, %v4849_v39  ;;  %vm5139_vm8 = vweird.f32 %v7425_v9 }
0x10b5   : > { %v5131_v3 = vsel %vm5128_vm3, %v5130_v31, %v5126_v49  ;;  %7426 = vrcp.f32 %v5022_v27  ;;  %vm5140_vm1 = vmor %vm5138_vm14, %vm5139_vm8  ;;  %v5157_v8 = vand.u32 2147483647, %v5022_v27  ;;  %v5159_v47 = vand.u32 2147483648, %v5022_v27 }
0x10b6   : > { %v5135_v0 = vsub.f32 1.0, %v5134_v12  ;;  %7428 = vpow2.f32 %v6710_v19  ;;  %v5244_v5 = vmul.f32 %v5131_v3, %v10506_v14  ;;  %v4949_v60 = vadd.f32 %v4935_v48, %v4909_v2  ;;  %vm11811_vm8 = vmmov %vm11806_vm6 }
0x10b7   : > { %vm5153_vm13 = vweird.f32 %v5022_v27  ;;  %v5160_v34 = vor.u32 1.1754944e-38, %v5159_v47  ;;  %vm5158_vm5 = vcmp.eq.f32.partialorder %v5157_v8, 8.507059e+37  ;;  %v4938_v48 = vmul.f32 %v10459_v41, %v11809_v57 }
0x10b8   : > { %v5136_v30 = vmul.f32 %v7425_v9, %v5135_v0  ;;  %v10538_v55 = vadd.f32 %v10466_v46, %v4949_v60  ;;  %v4914_v35 = vpop.f32.mrf.mxu3 }
0x10ba   : > { %v5137_v42 = vadd.f32 %v7425_v9, %v5136_v30  ;;  %v6711_v59 = vmul.f32 -1.442695, %v10538_v55 }
0x10bb   : > { %v7427_v7 = vpop.eup %7426  ;;  %v4852_v63 = vpop.f32.mrf.mxu0 }
0x10bc   : > { %v7429_v18 = vpop.eup %7428  ;;  %v5141_v11 = vsel %vm5140_vm1, %v7425_v9, %v5137_v42  ;;  %v5149_v14 = vmul.f32 %v7427_v7, %v5022_v27  ;;  %6722 = vmatmul.msk.f32.gmra.mxu1 %vm11806_vm6, %v5244_v5  ;;  %v4912_v50 = vadd.f32 %v4911_v23, %v4852_v63  ;;  %vm5154_vm9 = vweird.f32 %v7427_v7 }
0x10bd   : > { %v5146_v29 = vsel %vm5143_vm15, %v5145_v25, %v5141_v11  ;;  %v5023_v56 = vadd.f32 1.0, %v7429_v18  ;;  %vm5155_vm4 = vmor %vm5153_vm13, %vm5154_vm9 }
0x10be   : > { %v5150_v32 = vsub.f32 1.0, %v5149_v14  ;;  %v4950_v43 = vadd.f32 %v4936_v33, %v4912_v50  ;;  %v5245_v58 = vmul.f32 %v5146_v29, %v10514_v28 }
0x10bf   : > { %7430 = vrcp.f32 %v5023_v56  ;;  %v5174_v31 = vand.u32 2147483648, %v5023_v56  ;;  %v5172_v49 = vand.u32 2147483647, %v5023_v56  ;;  %vm5168_vm11 = vweird.f32 %v5023_v56 }
0x10c0   : > { %v5151_v51 = vmul.f32 %v7427_v7, %v5150_v32  ;;  %7432 = vpow2.f32 %v6711_v59  ;;  %v10546_v40 = vadd.f32 %v10466_v46, %v4950_v43  ;;  %v4917_v19 = vpop.f32.mrf.mxu3 }
0x10c1   : > { %v5175_v4 = vor.u32 1.1754944e-38, %v5174_v31  ;;  %vm5173_vm3 = vcmp.eq.f32.partialorder %v5172_v49, 8.507059e+37 }
0x10c2   : > { %v5152_v45 = vadd.f32 %v7427_v7, %v5151_v51  ;;  %v6712_v6 = vmul.f32 -1.442695, %v10546_v40 }
0x10c3   : > { %v4855_v52 = vpop.f32.mrf.mxu0 }
0x10c4   : > { %v5156_v62 = vsel %vm5155_vm4, %v7427_v7, %v5152_v45  ;;  %7434 = vpow2.f32 %v6712_v6  ;;  %6723 = vmatmul.msk.f32.gmra.mxu1 %vm11808_vm12, %v5245_v58  ;;  %v4915_v28 = vadd.f32 %v4914_v35, %v4855_v52 }
0x10c5   : > { %v7431_v36 = vpop.eup %7430  ;;  %v5161_v17 = vsel %vm5158_vm5, %v5160_v34, %v5156_v62  ;;  %vm11812_vm5 = vmmov %vm11810_vm7 }
0x10c6   : > { %v7433_v21 = vpop.eup %7432  ;;  %v5164_v15 = vmul.f32 %v7431_v36, %v5023_v56  ;;  %v4951_v53 = vadd.f32 %v4937_v54, %v4915_v28  ;;  %v5246_v61 = vmul.f32 %v5161_v17, %v10522_v10  ;;  %vm5169_vm10 = vweird.f32 %v7431_v36 }
0x10c7   : > { %v5024_v44 = vadd.f32 1.0, %v7433_v21  ;;  %vm5170_vm2 = vmor %vm5168_vm11, %vm5169_vm10 }
0x10c8   : > { %v5165_v13 = vsub.f32 1.0, %v5164_v15  ;;  %v10554_v9 = vadd.f32 %v10466_v46, %v4951_v53 }
0x10c9   : > { %7436 = vrcp.f32 %v5024_v44  ;;  %v5187_v33 = vand.u32 2147483647, %v5024_v44  ;;  %v5189_v18 = vand.u32 2147483648, %v5024_v44  ;;  %vm5183_vm14 = vweird.f32 %v5024_v44 }
0x10ca   : > { %v7435_v27 = vpop.eup %7434  ;;  %v5166_v39 = vmul.f32 %v7431_v36, %v5165_v13  ;;  %v6713_v12 = vmul.f32 -1.442695, %v10554_v9 }
0x10cb   : > { %v5025_v3 = vadd.f32 1.0, %v7435_v27  ;;  %v4858_v0 = vpop.f32.mrf.mxu0  ;;  %vm5188_vm15 = vcmp.eq.f32.partialorder %v5187_v33, 8.507059e+37 }
0x10cc   : > { %v5167_v23 = vadd.f32 %v7431_v36, %v5166_v39  ;;  %7438 = vpow2.f32 %v6713_v12  ;;  %6724 = vmatmul.msk.f32.gmra.mxu1 %vm11810_vm7, %v5246_v61  ;;  %v4918_v10 = vadd.f32 %v4917_v19, %v4858_v0 }
0x10cd   : > { %7440 = vrcp.f32 %v5025_v3  ;;  %v5204_v56 = vand.u32 2147483648, %v5025_v3  ;;  %v5202_v43 = vand.u32 2147483647, %v5025_v3  ;;  %vm5198_vm9 = vweird.f32 %v5025_v3 }
0x10ce   : > { %v5171_v2 = vsel %vm5170_vm2, %v7431_v36, %v5167_v23  ;;  %v4952_v5 = vadd.f32 %v4938_v48, %v4918_v10  ;;  %vm11813_vm2 = vmmov %vm11812_vm5 }
0x10cf   : > { %v7437_v30 = vpop.eup %7436  ;;  %v5176_v22 = vsel %vm5173_vm3, %v5175_v4, %v5171_v2  ;;  %v5205_v45 = vor.u32 1.1754944e-38, %v5204_v56  ;;  %vm5203_vm4 = vcmp.eq.f32.partialorder %v5202_v43, 8.507059e+37 }
0x10d0   : > { %v5247_v60 = vmul.f32 %v5176_v22, %v10530_v1  ;;  %v5179_v42 = vmul.f32 %v7437_v30, %v5024_v44  ;;  %v10562_v7 = vadd.f32 %v10466_v46, %v4952_v5  ;;  %vm5184_vm0 = vweird.f32 %v7437_v30  ;;  %v10577_v22 = vld [vmem:[%s11135_s13 + $0x3] ss:$0 sm:$0xff] }
0x10d1   : > { %vm5185_vm1 = vmor %vm5183_vm14, %vm5184_vm0  ;;  %v5190_v46 = vor.u32 1.1754944e-38, %v5189_v18 }
0x10d2   : > { %v7439_v41 = vpop.eup %7438  ;;  %v5180_v25 = vsub.f32 1.0, %v5179_v42  ;;  %v6714_v63 = vmul.f32 -1.442695, %v10562_v7 }
0x10d3   : > { %v7441_v38 = vpop.eup %7440  ;;  %v5026_v11 = vadd.f32 1.0, %v7439_v41 }
0x10d4   : > { %v5181_v14 = vmul.f32 %v7437_v30, %v5180_v25  ;;  %v5194_v50 = vmul.f32 %v7441_v38, %v5025_v3  ;;  %7442 = vpow2.f32 %v6714_v63  ;;  %6725 = vmatmul.msk.f32.gmra.mxu1 %vm11811_vm8, %v5247_v60  ;;  %vm5199_vm6 = vweird.f32 %v7441_v38 }
0x10d5   : > { %7444 = vrcp.f32 %v5026_v11  ;;  %vm5200_vm13 = vmor %vm5198_vm9, %vm5199_vm6  ;;  %v5219_v62 = vand.u32 2147483648, %v5026_v11  ;;  %vm5213_vm10 = vweird.f32 %v5026_v11 }
0x10d6   : > { %v5182_v1 = vadd.f32 %v7437_v30, %v5181_v14  ;;  %v5195_v29 = vsub.f32 1.0, %v5194_v50 }
0x10d7   : > { %v5220_v15 = vor.u32 1.1754944e-38, %v5219_v62 }
0x10d8   : > { %v5186_v59 = vsel %vm5185_vm1, %v7437_v30, %v5182_v1  ;;  %v5196_v32 = vmul.f32 %v7441_v38, %v5195_v29  ;;  %vm11814_vm1 = vmmov %vm11813_vm2 }
0x10d9   : > { %v5191_v8 = vsel %vm5188_vm15, %v5190_v46, %v5186_v59  ;;  %vm11815_vm15 = vmmov %vm11814_vm1 }
0x10da   : > { %v7443_v47 = vpop.eup %7442  ;;  %v5248_v58 = vmul.f32 %v5191_v8, %v10538_v55  ;;  %v5197_v51 = vadd.f32 %v7441_v38, %v5196_v32  ;;  %v5217_v55 = vand.u32 2147483647, %v5026_v11 }
0x10db   : > { %v7445_v35 = vpop.eup %7444  ;;  %v5027_v6 = vadd.f32 1.0, %v7443_v47 }
0x10dc   : > { %v5201_v34 = vsel %vm5200_vm13, %v7441_v38, %v5197_v51  ;;  %v5209_v52 = vmul.f32 %v7445_v35, %v5026_v11  ;;  %6726 = vmatmul.msk.f32.gmra.mxu1 %vm11812_vm5, %v5248_v58  ;;  %vm5214_vm12 = vweird.f32 %v7445_v35  ;;  %vm5218_vm7 = vcmp.eq.f32.partialorder %v5217_v55, 8.507059e+37 }
0x10dd   : > { %v5206_v20 = vsel %vm5203_vm4, %v5205_v45, %v5201_v34  ;;  %7446 = vrcp.f32 %v5027_v6  ;;  %vm5215_vm11 = vmor %vm5213_vm10, %vm5214_vm12  ;;  %v5234_v31 = vand.u32 2147483648, %v5027_v6  ;;  %vm5228_vm0 = vweird.f32 %v5027_v6 }
0x10de   : > { %v5210_v54 = vsub.f32 1.0, %v5209_v52  ;;  %v5249_v28 = vmul.f32 %v5206_v20, %v10546_v40  ;;  %v5232_v40 = vand.u32 2147483647, %v5027_v6 }
0x10df   : > { %v5235_v12 = vor.u32 1.1754944e-38, %v5234_v31 }
0x10e0   : > { %v5211_v36 = vmul.f32 %v7445_v35, %v5210_v54  ;;  %vm5233_vm14 = vcmp.eq.f32.partialorder %v5232_v40, 8.507059e+37 }
0x10e2   : > { %v5212_v17 = vadd.f32 %v7445_v35, %v5211_v36 }
0x10e3   : > { %v7447_v21 = vpop.eup %7446 }
0x10e4   : > { %v5216_v53 = vsel %vm5215_vm11, %v7445_v35, %v5212_v17  ;;  %v5224_v44 = vmul.f32 %v7447_v21, %v5027_v6  ;;  %6727 = vmatmul.msk.f32.gmra.mxu1 %vm11813_vm2, %v5249_v28  ;;  %vm5229_vm3 = vweird.f32 %v7447_v21 }
0x10e5   : > { %v5221_v61 = vsel %vm5218_vm7, %v5220_v15, %v5216_v53  ;;  %vm5230_vm8 = vmor %vm5228_vm0, %vm5229_vm3 }
0x10e6   : > { %v5225_v13 = vsub.f32 1.0, %v5224_v44  ;;  %v5250_v27 = vmul.f32 %v5221_v61, %v10554_v9 }
0x10e8   : > { %v5226_v39 = vmul.f32 %v7447_v21, %v5225_v13 }
0x10ea   : > { %v5227_v49 = vadd.f32 %v7447_v21, %v5226_v39 }
0x10ec   : > { %v5231_v19 = vsel %vm5230_vm8, %v7447_v21, %v5227_v49  ;;  %6728 = vmatmul.msk.f32.gmra.mxu1 %vm11814_vm1, %v5250_v27 }
0x10ed   : > { %v5236_v3 = vsel %vm5233_vm14, %v5235_v12, %v5231_v19 }
0x10ee   : > { %v5251_v0 = vmul.f32 %v5236_v3, %v10562_v7 }
0x10f4   : > { %6729 = vmatmul.msk.f32.gmra.mxu1 %vm11815_vm15, %v5251_v0 }
0x1105   : > { %v5321_v57 = vpop.f32.mrf.mxu1 }
0x1106   : > { %v10580_v42 = vadd.f32 %v10577_v22, %v5321_v57 }
0x1108   : > { %11816 = vst [vmem:[#allocation88_spill] sm:$0xff] %v10580_v42  ;;  %v6730_v63 = vmul.f32 -1.442695, %v10580_v42 }
0x110a   : > { %7448 = vpow2.f32 %v6730_v63 }
0x110d   : > { %v5324_v48 = vpop.f32.mrf.mxu1 }
0x110e   : > { %v10583_v7 = vadd.f32 %v10577_v22, %v5324_v48 }
0x1110   : > { %11817 = vst [vmem:[#allocation89_spill] sm:$0xff] %v10583_v7  ;;  %v6731_v33 = vmul.f32 -1.442695, %v10583_v7  ;;  %v7449_v35 = vpop.eup %7448 }
0x1111   : > { %v10627_v28 = vadd.f32 1.0, %v7449_v35 }
0x1112   : > { %7450 = vpow2.f32 %v6731_v33 }
0x1115   : > { %v5327_v23 = vpop.f32.mrf.mxu1 }
0x1116   : > { %v10586_v41 = vadd.f32 %v10577_v22, %v5327_v23 }
0x1118   : > { %11818 = vst [vmem:[#allocation39_spill] sm:$0xff] %v10586_v41  ;;  %v6732_v11 = vmul.f32 -1.442695, %v10586_v41  ;;  %v7451_v34 = vpop.eup %7450 }
0x1119   : > { %v10629_v55 = vadd.f32 1.0, %v7451_v34 }
0x111a   : > { %7452 = vpow2.f32 %v6732_v11 }
0x111d   : > { %v5330_v9 = vpop.f32.mrf.mxu1 }
0x111e   : > { %v10589_v25 = vadd.f32 %v10577_v22, %v5330_v9 }
0x1120   : > { %11819 = vst [vmem:[#allocation87_spill] sm:$0xff] %v10589_v25  ;;  %v6733_v50 = vmul.f32 -1.442695, %v10589_v25  ;;  %v7453_v20 = vpop.eup %7452 }
0x1121   : > { %v10631_v17 = vadd.f32 1.0, %v7453_v20 }
0x1122   : > { %7454 = vpow2.f32 %v6733_v50 }
0x1127   : > { %v5333_v10 = vpop.f32.mrf.mxu1 }
0x1128   : > { %v10593_v38 = vadd.f32 %v10577_v22, %v5333_v10  ;;  %v7455_v62 = vpop.eup %7454 }
0x1129   : > { %v10633_v15 = vadd.f32 1.0, %v7455_v62 }
0x112a   : > { %11820 = vst [vmem:[#allocation40_spill] sm:$0xff] %v10593_v38  ;;  %v6734_v29 = vmul.f32 -1.442695, %v10593_v38 }
0x112c   : > { %7456 = vpow2.f32 %v6734_v29 }
0x1131   : > { %v5336_v4 = vpop.f32.mrf.mxu1 }
0x1132   : > { %v10598_v14 = vadd.f32 %v10577_v22, %v5336_v4  ;;  %v7457_v36 = vpop.eup %7456 }
0x1133   : > { %v10636_v44 = vadd.f32 1.0, %v7457_v36 }
0x1134   : > { %v6735_v59 = vmul.f32 -1.442695, %v10598_v14 }
0x1136   : > { %7458 = vpow2.f32 %v6735_v59 }
0x1139   : > { %v5339_v2 = vpop.f32.mrf.mxu1 }
0x113a   : > { %v10602_v1 = vadd.f32 %v10577_v22, %v5339_v2 }
0x113c   : > { %v6736_v43 = vmul.f32 -1.442695, %v10602_v1  ;;  %v7459_v21 = vpop.eup %7458 }
0x113d   : > { %v10643_v39 = vadd.f32 1.0, %v7459_v21 }
0x113e   : > { %7460 = vpow2.f32 %v6736_v43 }
0x1141   : > { %v5342_v5 = vpop.f32.mrf.mxu1 }
0x1142   : > { %v10606_v46 = vadd.f32 %v10577_v22, %v5342_v5 }
0x1144   : > { %v6737_v47 = vmul.f32 -1.442695, %v10606_v46  ;;  %v7461_v53 = vpop.eup %7460 }
0x1145   : > { %v10646_v49 = vadd.f32 1.0, %v7461_v53 }
0x1146   : > { %7462 = vpow2.f32 %v6737_v47 }
0x1149   : > { %v5345_v30 = vpop.f32.mrf.mxu1 }
0x114a   : > { %v10609_v56 = vadd.f32 %v10577_v22, %v5345_v30 }
0x114c   : > { %v6738_v58 = vmul.f32 -1.442695, %v10609_v56  ;;  %v7463_v13 = vpop.eup %7462 }
0x114d   : > { %v10650_v3 = vadd.f32 1.0, %v7463_v13 }
0x114e   : > { %7464 = vpow2.f32 %v6738_v58 }
0x1151   : > { %v5348_v60 = vpop.f32.mrf.mxu1 }
0x1152   : > { %v10613_v32 = vadd.f32 %v10577_v22, %v5348_v60 }
0x1154   : > { %v6739_v45 = vmul.f32 -1.442695, %v10613_v32  ;;  %v7465_v27 = vpop.eup %7464 }
0x1155   : > { %v10652_v57 = vadd.f32 1.0, %v7465_v27 }
0x1156   : > { %7466 = vpow2.f32 %v6739_v45 }
0x1157   : > { %vm5544_vm7 = vweird.f32 %v10652_v57 }
0x1159   : > { %v5351_v18 = vpop.f32.mrf.mxu1 }
0x115a   : > { %v10617_v8 = vadd.f32 %v10577_v22, %v5351_v18 }
0x115c   : > { %v6740_v52 = vmul.f32 -1.442695, %v10617_v8  ;;  %v7467_v40 = vpop.eup %7466 }
0x115d   : > { %v10657_v23 = vadd.f32 1.0, %v7467_v40 }
0x115e   : > { %7468 = vpow2.f32 %v6740_v52 }
0x115f   : > { %vm5559_vm4 = vweird.f32 %v10657_v23 }
0x1161   : > { %v5354_v51 = vpop.f32.mrf.mxu1 }
0x1162   : > { %v10623_v6 = vadd.f32 %v10577_v22, %v5354_v51 }
0x1164   : > { %v6741_v54 = vmul.f32 -1.442695, %v10623_v6  ;;  %v7469_v19 = vpop.eup %7468 }
0x1165   : > { %v10662_v10 = vadd.f32 1.0, %v7469_v19 }
0x1166   : > { %7470 = vpow2.f32 %v6741_v54 }
0x1167   : > { %7472 = vrcp.f32 %v10627_v28  ;;  %vm5574_vm9 = vweird.f32 %v10662_v10 }
0x1168   : > { %7474 = vrcp.f32 %v10629_v55 }
0x1169   : > { %v5357_v61 = vpop.f32.mrf.mxu1  ;;  %7476 = vrcp.f32 %v10631_v17 }
0x116a   : > { %v10640_v31 = vadd.f32 %v10577_v22, %v5357_v61  ;;  %7478 = vrcp.f32 %v10633_v15 }
0x116b   : > { %7480 = vrcp.f32 %v10636_v44 }
0x116c   : > { %v6742_v12 = vmul.f32 -1.442695, %v10640_v31  ;;  %v7471_v0 = vpop.eup %7470 }
0x116d   : > { %v10654_v48 = vpop.eup %7472  ;;  %v10667_v2 = vadd.f32 1.0, %v7471_v0 }
0x116e   : > { %7482 = vpow2.f32 %v6742_v12  ;;  %v10659_v9 = vpop.eup %7474  ;;  %v5420_v58 = vmul.f32 %v10654_v48, %v10627_v28 }
0x116f   : > { %7484 = vrcp.f32 %v10643_v39  ;;  %v10664_v4 = vpop.eup %7476  ;;  %v5435_v35 = vmul.f32 %v10659_v9, %v10629_v55  ;;  %vm5589_vm0 = vweird.f32 %v10667_v2 }
0x1170   : > { %7486 = vrcp.f32 %v10646_v49  ;;  %v10669_v30 = vpop.eup %7478  ;;  %v5450_v34 = vmul.f32 %v10664_v4, %v10631_v17  ;;  %v5421_v61 = vsub.f32 1.0, %v5420_v58 }
0x1171   : > { %7488 = vrcp.f32 %v10650_v3  ;;  %v5360_v5 = vpop.f32.mrf.mxu1  ;;  %v10675_v63 = vpop.eup %7480  ;;  %v5465_v52 = vmul.f32 %v10669_v30, %v10633_v15  ;;  %v5436_v12 = vsub.f32 1.0, %v5435_v35 }
0x1172   : > { %7490 = vrcp.f32 %v10652_v57  ;;  %v10673_v60 = vadd.f32 %v10577_v22, %v5360_v5  ;;  %v5480_v20 = vmul.f32 %v10675_v63, %v10636_v44  ;;  %v5451_v5 = vsub.f32 1.0, %v5450_v34 }
0x1173   : > { %7492 = vrcp.f32 %v10657_v23  ;;  %v10730_v42 = vmul.f32 %v10654_v48, %v5421_v61  ;;  %v10733_v35 = vmul.f32 %v10659_v9, %v5436_v12 }
0x1174   : > { %v7483_v33 = vpop.eup %7482  ;;  %7494 = vrcp.f32 %v10662_v10  ;;  %v6743_v18 = vmul.f32 -1.442695, %v10673_v60  ;;  %v10736_v25 = vmul.f32 %v10664_v4, %v5451_v5 }
0x1175   : > { %v10680_v11 = vpop.eup %7484  ;;  %7496 = vrcp.f32 %v10667_v2  ;;  %v10683_v50 = vadd.f32 1.0, %v7483_v33  ;;  %v5466_v33 = vsub.f32 1.0, %v5465_v52 }
0x1176   : > { %v10685_v29 = vpop.eup %7486  ;;  %7498 = vpow2.f32 %v6743_v18  ;;  %v5495_v62 = vmul.f32 %v10680_v11, %v10643_v39  ;;  %v5481_v18 = vsub.f32 1.0, %v5480_v20 }
0x1177   : > { %v10687_v22 = vpop.eup %7488  ;;  %7500 = vrcp.f32 %v10683_v50  ;;  %v5510_v36 = vmul.f32 %v10685_v29, %v10646_v49  ;;  %v10739_v34 = vmul.f32 %v10669_v30, %v5466_v33  ;;  %vm5604_vm10 = vweird.f32 %v10683_v50 }
0x1178   : > { %v10690_v59 = vpop.eup %7490  ;;  %v5525_v21 = vmul.f32 %v10687_v22, %v10650_v3  ;;  %v10742_v52 = vmul.f32 %v10675_v63, %v5481_v18  ;;  %vm5530_vm11 = vweird.f32 %v10687_v22 }
0x1179   : > { %v10692_v43 = vpop.eup %7492  ;;  %v5540_v13 = vmul.f32 %v10690_v59, %v10652_v57  ;;  %v5511_v37 = vsub.f32 1.0, %v5510_v36  ;;  %vm5545_vm13 = vweird.f32 %v10690_v59 }
0x117a   : > { %v10694_v47 = vpop.eup %7494  ;;  %v5555_v19 = vmul.f32 %v10692_v43, %v10657_v23  ;;  %v5526_v26 = vsub.f32 1.0, %v5525_v21  ;;  %vm5560_vm6 = vweird.f32 %v10692_v43 }
0x117b   : > { %v10698_v51 = vpop.eup %7496  ;;  %v5570_v0 = vmul.f32 %v10694_v47, %v10662_v10  ;;  %v5541_v16 = vsub.f32 1.0, %v5540_v13  ;;  %v10749_v21 = vmul.f32 %v10685_v29, %v5511_v37  ;;  %v5578_v37 = vand.u32 2147483647, %v10662_v10 }
0x117c   : > { %v7499_v45 = vpop.eup %7498  ;;  %v5585_v27 = vmul.f32 %v10698_v51, %v10667_v2  ;;  %v5556_v7 = vsub.f32 1.0, %v5555_v19  ;;  %v10752_v61 = vmul.f32 %v10687_v22, %v5526_v26  ;;  %vm5590_vm5 = vweird.f32 %v10698_v51 }
0x117d   : > { %v10708_v54 = vpop.eup %7500  ;;  %v10716_v53 = vadd.f32 1.0, %v7499_v45  ;;  %v5496_v45 = vsub.f32 1.0, %v5495_v62  ;;  %v5571_v41 = vsub.f32 1.0, %v5570_v0  ;;  %v5608_v26 = vand.u32 2147483647, %v10683_v50  ;;  %vm10791_vm15 = vmor %vm5589_vm0, %vm5590_vm5 }
0x117e   : > { %v5600_v40 = vmul.f32 %v10708_v54, %v10683_v50  ;;  %v5586_v24 = vsub.f32 1.0, %v5585_v27  ;;  %v5542_v27 = vmul.f32 %v10690_v59, %v5541_v16  ;;  %v5557_v19 = vmul.f32 %v10692_v43, %v5556_v7 }
0x117f   : > { %7502 = vrcp.f32 %v10716_v53  ;;  %v10746_v36 = vmul.f32 %v10680_v11, %v5496_v45  ;;  %v5572_v0 = vmul.f32 %v10694_v47, %v5571_v41  ;;  %vm5605_vm12 = vweird.f32 %v10708_v54 }
0x1180   : > { %v5601_v58 = vsub.f32 1.0, %v5600_v40  ;;  %v5587_v40 = vmul.f32 %v10698_v51, %v5586_v24  ;;  %v5610_v7 = vand.u32 2147483648, %v10683_v50  ;;  %v5625_v41 = vand.u32 2147483648, %v10716_v53  ;;  %vm10782_vm8 = vmor %vm5604_vm10, %vm5605_vm12 }
0x1181   : > { %v5623_v18 = vand.u32 2147483647, %v10716_v53  ;;  %vm5575_vm3 = vweird.f32 %v10694_v47  ;;  %v5595_v50 = vand.u32 2147483648, %v10667_v2  ;;  %vm5619_vm12 = vweird.f32 %v10716_v53 }
0x1182   : > { %v5602_v20 = vmul.f32 %v10708_v54, %v5601_v58  ;;  %v5588_v5 = vadd.f32 %v10698_v51, %v5587_v40  ;;  %v5593_v58 = vand.u32 2147483647, %v10667_v2  ;;  %v5580_v13 = vand.u32 2147483648, %v10662_v10  ;;  %vm10812_vm1 = vmor %vm5574_vm9, %vm5575_vm3 }
0x1183   : > { %v5611_v38 = vor.u32 1.1754944e-38, %v5610_v7  ;;  %vm5500_vm5 = vweird.f32 %v10680_v11  ;;  %vm5514_vm0 = vweird.f32 %v10646_v49  ;;  %vm5624_vm14 = vcmp.eq.f32.partialorder %v5623_v18, 8.507059e+37  ;;  %vm10829_vm9 = vmor %vm5559_vm4, %vm5560_vm6 }
0x1184   : > { %v5603_v16 = vadd.f32 %v10708_v54, %v5602_v20  ;;  %v5573_v20 = vadd.f32 %v10694_v47, %v5572_v0  ;;  %v5626_v0 = vor.u32 1.1754944e-38, %v5625_v41  ;;  %v5592_v45 = vsel %vm10791_vm15, %v10698_v51, %v5588_v5  ;;  %vm10847_vm6 = vmor %vm5544_vm7, %vm5545_vm13 }
0x1185   : > { %v7503_v62 = vpop.eup %7502  ;;  %vm5499_vm15 = vweird.f32 %v10643_v39  ;;  %v5543_v51 = vadd.f32 %v10690_v59, %v5542_v27  ;;  %v5550_v5 = vand.u32 2147483648, %v10652_v57  ;;  %v5581_v27 = vor.u32 1.1754944e-38, %v5580_v13 }
0x1186   : > { %v5615_v12 = vmul.f32 %v7503_v62, %v10716_v53  ;;  %vm5620_vm2 = vweird.f32 %v7503_v62  ;;  %v5607_v2 = vsel %vm10782_vm8, %v10708_v54, %v5603_v16  ;;  %vm5609_vm8 = vcmp.eq.f32.partialorder %v5608_v26, 8.507059e+37 }
0x1187   : > { %vm5621_vm10 = vmor %vm5619_vm12, %vm5620_vm2  ;;  %v5565_v53 = vand.u32 2147483648, %v10657_v23  ;;  %v5596_v16 = vor.u32 1.1754944e-38, %v5595_v50  ;;  %v5612_v7 = vsel %vm5609_vm8, %v5611_v38, %v5607_v2  ;;  %vm5485_vm2 = vweird.f32 %v10675_v63 }
0x1188   : > { %v5616_v24 = vsub.f32 1.0, %v5615_v12  ;;  %vm5594_vm12 = vcmp.eq.f32.partialorder %v5593_v58, 8.507059e+37  ;;  %v5548_v26 = vand.u32 2147483647, %v10652_v57  ;;  %vm5470_vm3 = vweird.f32 %v10669_v30 }
0x1189   : > { %v5641_v18 = vmul.f32 %v5612_v7, %v10640_v31  ;;  %v5533_v58 = vand.u32 2147483647, %v10650_v3  ;;  %v5535_v13 = vand.u32 2147483648, %v10650_v3  ;;  %vm5455_vm4 = vweird.f32 %v10664_v4 }
0x118a   : > { %v5617_v33 = vmul.f32 %v7503_v62, %v5616_v24  ;;  %v5558_v24 = vadd.f32 %v10692_v43, %v5557_v19  ;;  %v5513_v31 = vadd.f32 %v10685_v29, %v10749_v21  ;;  %v5518_v40 = vand.u32 2147483647, %v10646_v49 }
0x118b   : > { %v5520_v2 = vand.u32 2147483648, %v10646_v49  ;;  %vm11832_vm13 = vweird.f32 %v10650_v3  ;;  %v5490_v19 = vand.u32 2147483648, %v10636_v44 }
0x118c   : > { %v5618_v12 = vadd.f32 %v7503_v62, %v5617_v33  ;;  %v5597_v33 = vsel %vm5594_vm12, %v5596_v16, %v5592_v45  ;;  %vm10867_vm7 = vmor %vm11832_vm13, %vm5530_vm11  ;;  %vm5440_vm12 = vweird.f32 %v10659_v9  ;;  %vm11835_vm11 = vweird.f32 %v10685_v29  ;;  %v11855_v45 = vld [vmem:[#allocation90_spill] sm:$0xff]  ;;  %v11859_v16 = vld [vmem:[#allocation41_spill] sm:$0xff] }
0x118d   : > { %v5640_v57 = vmul.f32 %v5597_v33, %v10623_v6  ;;  %v5498_v6 = vadd.f32 %v10680_v11, %v10746_v36  ;;  %v5536_v36 = vor.u32 1.1754944e-38, %v5535_v13  ;;  %vm5439_vm13 = vweird.f32 %v10629_v55 }
0x118e   : > { %v5622_v54 = vsel %vm5621_vm10, %v7503_v62, %v5618_v12  ;;  %v5577_v62 = vsel %vm10812_vm1, %v10694_v47, %v5573_v20  ;;  %v5562_v47 = vsel %vm10829_vm9, %v10692_v43, %v5558_v24  ;;  %vm5579_vm1 = vcmp.eq.f32.partialorder %v5578_v37, 8.507059e+37 }
0x118f   : > { %v5627_v41 = vsel %vm5624_vm14, %v5626_v0, %v5622_v54  ;;  %vm5484_vm14 = vweird.f32 %v10636_v44  ;;  %v5582_v20 = vsel %vm5579_vm1, %v5581_v27, %v5577_v62  ;;  %vm5469_vm10 = vweird.f32 %v10633_v15  ;;  %v7027_v62 = vld [vmem:[%s11138_s16 + $0x3] ss:$0 sm:$0xff] }
0x1190   : > { %v5642_v10 = vmul.f32 %v5627_v41, %v10673_v60  ;;  %v5528_v60 = vadd.f32 %v10687_v22, %v10752_v61  ;;  %v5566_v61 = vor.u32 1.1754944e-38, %v5565_v53  ;;  %v5547_v43 = vsel %vm10847_vm6, %v10690_v59, %v5543_v51  ;;  %vm10885_vm6 = vmor %vm5514_vm0, %vm11835_vm11 }
0x1191   : > { %v11831_v37 = vand.u32 2147483647, %v10657_v23  ;;  %v5551_v12 = vor.u32 1.1754944e-38, %v5550_v5  ;;  %vm5454_vm9 = vweird.f32 %v10631_v17  ;;  %vm5549_vm1 = vcmp.eq.f32.partialorder %v5548_v26, 8.507059e+37  ;;  %vm10903_vm0 = vmor %vm5499_vm15, %vm5500_vm5 }
0x1192   : > { %5645 = vmatpush.msrb.mxu2 %v5642_v10  ;;  %v5532_v23 = vsel %vm10867_vm7, %v10687_v22, %v5528_v60  ;;  %v5639_v3 = vmul.f32 %v5582_v20, %v10617_v8  ;;  %v5503_v24 = vand.u32 2147483647, %v10643_v39  ;;  %v5505_v0 = vand.u32 2147483648, %v10643_v39  ;;  %vm10919_vm5 = vmor %vm5484_vm14, %vm5485_vm2 }
0x1193   : > { %vm5564_vm8 = vcmp.eq.f32.partialorder %v11831_v37, 8.507059e+37  ;;  %v5552_v54 = vsel %vm5549_vm1, %v5551_v12, %v5547_v43  ;;  %v5483_v8 = vadd.f32 %v10675_v63, %v10742_v52  ;;  %v5517_v22 = vsel %vm10885_vm6, %v10685_v29, %v5513_v31  ;;  %vm10935_vm2 = vmor %vm5469_vm10, %vm5470_vm3  ;;  %v11849_v37 = vld [vmem:[#allocation87_spill] sm:$0xff]  ;;  %v11851_v12 = vld [vmem:[#allocation89_spill] sm:$0xff] }
0x1194   : > { %5646 = vmatpush.msrb.mxu2 %v5641_v18  ;;  %v5567_v59 = vsel %vm5564_vm8, %v5566_v61, %v5562_v47  ;;  %vm5425_vm8 = vweird.f32 %v10654_v48  ;;  %vm5534_vm7 = vcmp.eq.f32.partialorder %v5533_v58, 8.507059e+37  ;;  %v5488_v53 = vand.u32 2147483647, %v10636_v44  ;;  %vm10951_vm3 = vmor %vm5454_vm9, %vm5455_vm4  ;;  %v11848_v61 = vld [vmem:[#allocation40_spill] sm:$0xff] }
0x1195   : > { %v5638_v49 = vmul.f32 %v5567_v59, %v10613_v32  ;;  %v5521_v52 = vor.u32 1.1754944e-38, %v5520_v2  ;;  %v5537_v7 = vsel %vm5534_vm7, %v5536_v36, %v5532_v23  ;;  %v5468_v29 = vadd.f32 %v10669_v30, %v10739_v34  ;;  %vm10967_vm4 = vmor %vm5439_vm13, %vm5440_vm12  ;;  %v11850_v2 = vld [vmem:[#allocation39_spill] sm:$0xff]  ;;  %v5672_v36 = vld [vmem:[#allocation17 + $0x60] sm:$0xff] }
0x1196   : > { %5647 = vmatpush.msrb.mxu2 %v5640_v57  ;;  %v5502_v32 = vsel %vm10903_vm0, %v10680_v11, %v5498_v6  ;;  %vm5519_vm1 = vcmp.eq.f32.partialorder %v5518_v40, 8.507059e+37  ;;  %v5637_v41 = vmul.f32 %v5552_v54, %v10609_v56  ;;  %v5473_v51 = vand.u32 2147483647, %v10633_v15  ;;  %v11852_v6 = vld [vmem:[#allocation88_spill] sm:$0xff] }
0x1197   : > { %v5475_v39 = vand.u32 2147483648, %v10633_v15  ;;  %v5506_v34 = vor.u32 1.1754944e-38, %v5505_v0  ;;  %v5522_v10 = vsel %vm5519_vm1, %v5521_v52, %v5517_v22  ;;  %v5453_v11 = vadd.f32 %v10664_v4, %v10736_v25  ;;  %v5673_v0 = vld [vmem:[#allocation17 + $0x68] sm:$0xff]  ;;  %v5670_v54 = vld [vmem:[#allocation15 + $0x78] sm:$0xff] }
0x1198   : > { %5648 = vmatpush.msrb.mxu2 %v5639_v3  ;;  %v5487_v56 = vsel %vm10919_vm5, %v10675_v63, %v5483_v8  ;;  %vm5504_vm15 = vcmp.eq.f32.partialorder %v5503_v24, 8.507059e+37  ;;  %v5636_v26 = vmul.f32 %v5537_v7, %v10606_v46  ;;  %v5458_v5 = vand.u32 2147483647, %v10631_v17  ;;  %v5675_v3 = vld [vmem:[#allocation17 + $0x78] sm:$0xff]  ;;  %v5674_v24 = vld [vmem:[#allocation17 + $0x70] sm:$0xff]  ;;  %v5668_v22 = vld [vmem:[#allocation15 + $0x68] sm:$0xff] }
0x1199   : > { %v5460_v44 = vand.u32 2147483648, %v10631_v17  ;;  %v5491_v25 = vor.u32 1.1754944e-38, %v5490_v19  ;;  %v5507_v27 = vsel %vm5504_vm15, %v5506_v34, %v5502_v32  ;;  %v5438_v63 = vadd.f32 %v10659_v9, %v10733_v35  ;;  %v5669_v8 = vld [vmem:[#allocation15 + $0x70] sm:$0xff]  ;;  %v11861_v52 = vld [vmem:[#allocation42_spill] sm:$0xff]  ;;  %v5781_v32 = vld [vmem:[#allocation18 + $0x78] sm:$0xff] }
0x119a   : > { %5649 = vmatpush.msrb.mxu2 %v5638_v49  ;;  %v5472_v46 = vsel %vm10935_vm2, %v10669_v30, %v5468_v29  ;;  %vm5489_vm14 = vcmp.eq.f32.partialorder %v5488_v53, 8.507059e+37  ;;  %v5635_v33 = vmul.f32 %v5522_v10, %v10602_v1  ;;  %v5443_v60 = vand.u32 2147483647, %v10629_v55  ;;  %v5667_v49 = vld [vmem:[#allocation15 + $0x60] sm:$0xff]  ;;  %v5779_v34 = vld [vmem:[#allocation18 + $0x68] sm:$0xff] }
0x119b   : > { %v5445_v15 = vand.u32 2147483648, %v10629_v55  ;;  %v5476_v35 = vor.u32 1.1754944e-38, %v5475_v39  ;;  %v5492_v18 = vsel %vm5489_vm14, %v5491_v25, %v5487_v56  ;;  %v5423_v30 = vadd.f32 %v10654_v48, %v10730_v42  ;;  %v11863_v10 = vld [vmem:[#allocation71_spill] sm:$0xff]  ;;  %v5778_v56 = vld [vmem:[#allocation18 + $0x60] sm:$0xff] }
0x119c   : > { %5650 = vmatpush.msrb.mxu2 %v5637_v41  ;;  %v5457_v1 = vsel %vm10951_vm3, %v10664_v4, %v5453_v11  ;;  %vm5474_vm10 = vcmp.eq.f32.partialorder %v5473_v51, 8.507059e+37  ;;  %v5634_v58 = vmul.f32 %v5507_v27, %v10598_v14  ;;  %vm5424_vm11 = vweird.f32 %v10627_v28  ;;  %v5780_v51 = vld [vmem:[#allocation18 + $0x70] sm:$0xff]  ;;  %v11864_v25 = vld [vmem:[#allocation73_spill] sm:$0xff] }
0x119d   : > { %v5430_v17 = vand.u32 2147483648, %v10627_v28  ;;  %v5461_v42 = vor.u32 1.1754944e-38, %v5460_v44  ;;  %v5477_v50 = vsel %vm5474_vm10, %v5476_v35, %v5472_v46  ;;  %v5428_v4 = vand.u32 2147483647, %v10627_v28  ;;  %vm5426_vm6 = vmor %vm5424_vm11, %vm5425_vm8  ;;  %v5819_v46 = vld [vmem:[%s11141_s19 + $0x18] sm:$0xff] }
0x119e   : > { %5651 = vmatpush.msrb.mxu2 %v5636_v26  ;;  %v5442_v14 = vsel %vm10967_vm4, %v10659_v9, %v5438_v63  ;;  %vm5459_vm9 = vcmp.eq.f32.partialorder %v5458_v5, 8.507059e+37  ;;  %v5633_v20 = vmul.f32 %v5492_v18, %v11848_v61  ;;  %v5446_v55 = vor.u32 1.1754944e-38, %v5445_v15 }
0x119f   : > { %v5462_v31 = vsel %vm5459_vm9, %v5461_v42, %v5457_v1  ;;  %v5427_v43 = vsel %vm5426_vm6, %v10654_v48, %v5423_v30  ;;  %vm5444_vm12 = vcmp.eq.f32.partialorder %v5443_v60, 8.507059e+37  ;;  %v5632_v57 = vmul.f32 %v5477_v50, %v11849_v37  ;;  %v11853_v48 = vld [vmem:[#allocation91_spill] sm:$0xff] }
0x11a0   : > { %5652 = vmatpush.msrb.mxu2 %v5635_v33  ;;  %v5431_v28 = vor.u32 1.1754944e-38, %v5430_v17  ;;  %v5447_v40 = vsel %vm5444_vm12, %v5446_v55, %v5442_v14  ;;  %vm5429_vm13 = vcmp.eq.f32.partialorder %v5428_v4, 8.507059e+37  ;;  %v5631_v9 = vmul.f32 %v5462_v31, %v11850_v2  ;;  %v5818_v33 = vld [vmem:[%s11141_s19 + $0x10] sm:$0xff] }
0x11a1   : > { %v5630_v59 = vmul.f32 %v5447_v40, %v11851_v12  ;;  %vm11854_vm8 = vcmask 916480   ;;  %vm11857_vm0 = vcmask 261120  }
0x11a2   : > { %5653 = vmatpush.msrb.mxu2 %v5634_v58  ;;  %v5432_v21 = vsel %vm5429_vm13, %v5431_v28, %v5427_v43  ;;  %vm11856_vm7 = vmmov %vm11854_vm8 }
0x11a3   : > { %v5629_v23 = vmul.f32 %v5432_v21, %v11852_v6  ;;  %vm11858_vm1 = vmmov %vm11857_vm0  ;;  %v5816_v6 = vld [vmem:[%s11141_s19] sm:$0xff] }
0x11a4   : > { %5654 = vmatpush.msrb.mxu2 %v5633_v20  ;;  %vm11860_vm5 = vmmov %vm11857_vm0 }
0x11a5   : > { %vm11862_vm15 = vmmov %vm11857_vm0 }
0x11a6   : > { %5655 = vmatpush.msrb.mxu2 %v5632_v57  ;;  %vm11865_vm4 = vmmov %vm11857_vm0 }
0x11a7   : > { %vm11866_vm13 = vmmov %vm11857_vm0 }
0x11a8   : > { %5656 = vmatpush.msrb.mxu2 %v5631_v9 }
0x11aa   : > { %5657 = vmatpush.msrb.mxu2 %v5630_v59  ;;  %v5817_v59 = vld [vmem:[%s11141_s19 + $0x8] sm:$0xff] }
0x11ac   : > { %5658 = vmatpush.msrb.mxu2 %v5629_v23  ;;  %v7028_v23 = vld [vmem:[%s11140_s18 + $0x3] ss:$0 sm:$0xff] }
0x11ad   : > { %6744 = vmatmul.msk.f32.vlgmr.msrb.gmra.mxu2 %vm11854_vm8, %v11853_v48  ;;  %vm11867_vm8 = vmmov %vm11857_vm0 }
0x11ae   : > { %5694 = vmatpush.msra.mxu2 %v5675_v3 }
0x11b0   : > { %5695 = vmatpush.msra.mxu2 %v5674_v24 }
0x11b2   : > { %5696 = vmatpush.msra.mxu2 %v5673_v0 }
0x11b4   : > { %5697 = vmatpush.msra.mxu2 %v5672_v36  ;;  %v5895_v36 = vld [vmem:[%s11143_s21 + $0x10] sm:$0xff] }
0x11b5   : > { %6745 = vmatmul.msk.f32.gmra.mxu2 %vm11856_vm7, %v11855_v45  ;;  %vm11868_vm7 = vmmov %vm11857_vm0  ;;  %v5896_v45 = vld [vmem:[%s11143_s21 + $0x18] sm:$0xff] }
0x11b6   : > { %5717 = vmatpush.msrb.mxu2 %v5670_v54  ;;  %v7029_v54 = vld [vmem:[%s11142_s20] ss:$0 sm:$0xff] }
0x11b8   : > { %5718 = vmatpush.msrb.mxu2 %v5669_v8  ;;  %v5894_v8 = vld [vmem:[%s11143_s21 + $0x8] sm:$0xff] }
0x11ba   : > { %5719 = vmatpush.msrb.mxu2 %v5668_v22 }
0x11bc   : > { %5720 = vmatpush.msrb.mxu2 %v5667_v49  ;;  %v5893_v49 = vld [vmem:[%s11143_s21] sm:$0xff] }
0x1230   : > { %v5660_v53 = vpop.f32.mrf.mxu2 }
0x1231   : > { %6746 = vmatmul.msk.f32.vlgmr.msra.gmra.mxu2 %vm11857_vm0, %v5660_v53 }
0x1232   : > { %5805 = vmatpush.msra.mxu2 %v5781_v32  ;;  %v7964_v32 = vmov 0  }
0x1233   : > { %7003 = vset.pattern.permute.xlu2 %v7964_v32  ;;  %7004 = vset.pattern.permute.xlu0 %v7964_v32 }
0x1234   : > { %5806 = vmatpush.msra.mxu2 %v5780_v51 }
0x1236   : > { %5807 = vmatpush.msra.mxu2 %v5779_v34 }
0x1238   : > { %v5663_v19 = vpop.f32.mrf.mxu2  ;;  %5808 = vmatpush.msra.mxu2 %v5778_v56 }
0x1239   : > { %6747 = vmatmul.msk.f32.gmra.mxu2 %vm11858_vm1, %v5663_v19 }
0x1241   : > { %6748 = vmatmul.msk.f32.vlgmr.msrb.gmra.mxu2 %vm11860_vm5, %v11859_v16 }
0x1242   : > { %5842 = vmatpush.msrb.mxu2 %v5819_v46 }
0x1244   : > { %5843 = vmatpush.msrb.mxu2 %v5818_v33 }
0x1246   : > { %5844 = vmatpush.msrb.mxu2 %v5817_v59 }
0x1248   : > { %5845 = vmatpush.msrb.mxu2 %v5816_v6 }
0x1249   : > { %6749 = vmatmul.msk.f32.gmra.mxu2 %vm11862_vm15, %v11861_v52 }
0x12b4   : > { %v5699_v7 = vpop.f32.mrf.mxu2 }
0x12bc   : > { %v5702_v29 = vpop.f32.mrf.mxu2 }
0x12c4   : > { %v5722_v41 = vpop.f32.mrf.mxu2 }
0x12c5   : > { %v5723_v39 = vadd.f32 %v5722_v41, %v5699_v7  ;;  %v5930_v7 = vld [vmem:[%s1133_s27] sm:$0xff] }
0x12c6   : > { %5934 = vperm.xlu2 %7003, %v5930_v7  }
0x12c7   : > { %v5728_v11 = vadd.f32 %v5723_v39, %v11863_v10 }
0x12c9   : > { %v5735_v26 = vadd.f32 %v7027_v62, %v5728_v11 }
0x12cb   : > { %v6751_v5 = vmul.f32 -1.442695, %v5735_v26 }
0x12cc   : > { %v5725_v44 = vpop.f32.mrf.mxu2 }
0x12cd   : > { %7504 = vpow2.f32 %v6751_v5  ;;  %v5726_v38 = vadd.f32 %v5725_v44, %v5702_v29  ;;  %v5947_v29 = vld [vmem:[%s11870_s9 + $0x18] sm:$0xff]  ;;  %v6023_v44 = vld [vmem:[#allocation2] sm:$0x1]  ;;  %s7842_s9 = sshra.s32 %s6118_s4, 4  ;;  %s7843_s9 = int_to_ptr.hbm [resolvable:$true] %s7842_s9 }
0x12ce   : > { %5970 = vmatpush.msra.mxu0 %v5947_v29  ;;  %p7849_p3 = scmp.lt.s32.totalorder %s7843_s9, %s11887_s7 }
0x12cf   : > { %v5729_v27 = vadd.f32 %v5726_v38, %v11864_v25 }
0x12d1   : > { %v5736_v63 = vadd.f32 %v7027_v62, %v5729_v27  ;;  %v5931_v62 = vld [vmem:[%s1133_s27 + $0x8] sm:$0xff] }
0x12d2   : > { %5939 = vperm.xlu2 %7003, %v5931_v62  }
0x12d3   : > { %v7505_v60 = vpop.eup %7504  ;;  %v6752_v15 = vmul.f32 -1.442695, %v5736_v63 }
0x12d4   : > { %v5743_v47 = vadd.f32 1.0, %v7505_v60 }
0x12d5   : > { %7506 = vpow2.f32 %v6752_v15 }
0x12d6   : > { %7508 = vrcp.f32 %v5743_v47  ;;  %v5756_v17 = vand.u32 2147483648, %v5743_v47  ;;  %v5754_v42 = vand.u32 2147483647, %v5743_v47  ;;  %vm5750_vm14 = vweird.f32 %v5743_v47 }
0x12d8   : > { %v5757_v14 = vor.u32 1.1754944e-38, %v5756_v17  ;;  %vm5755_vm10 = vcmp.eq.f32.partialorder %v5754_v42, 8.507059e+37 }
0x12da   : > { %6026 = vperm.xlu2 %7003, %v6023_v44   ;;  %v6022_v44 = vld [vmem:[%s11879_s28] sm:$0x1] }
0x12db   : > { %v7507_v35 = vpop.eup %7506 }
0x12dc   : > { %v7509_v18 = vpop.eup %7508  ;;  %v5744_v30 = vadd.f32 1.0, %v7507_v35 }
0x12dd   : > { %v5746_v1 = vmul.f32 %v7509_v18, %v5743_v47  ;;  %vm5751_vm2 = vweird.f32 %v7509_v18 }
0x12de   : > { %7510 = vrcp.f32 %v5744_v30  ;;  %vm5752_vm3 = vmor %vm5750_vm14, %vm5751_vm2  ;;  %v5771_v37 = vand.u32 2147483648, %v5744_v30  ;;  %v5769_v28 = vand.u32 2147483647, %v5744_v30  ;;  %vm5765_vm9 = vweird.f32 %v5744_v30 }
0x12df   : > { %v5747_v58 = vsub.f32 1.0, %v5746_v1  ;;  %vm11872_vm14 = vmmov %vm11865_vm4 }
0x12e0   : > { %v5772_v2 = vor.u32 1.1754944e-38, %v5771_v37  ;;  %vm5770_vm12 = vcmp.eq.f32.partialorder %v5769_v28, 8.507059e+37 }
0x12e1   : > { %v5748_v13 = vmul.f32 %v7509_v18, %v5747_v58 }
0x12e3   : > { %v5749_v50 = vadd.f32 %v7509_v18, %v5748_v13 }
0x12e4   : > { %v7511_v4 = vpop.eup %7510 }
0x12e5   : > { %v5753_v61 = vsel %vm5752_vm3, %v7509_v18, %v5749_v50  ;;  %v5761_v20 = vmul.f32 %v7511_v4, %v5744_v30  ;;  %vm5766_vm11 = vweird.f32 %v7511_v4 }
0x12e6   : > { %v5758_v55 = vsel %vm5755_vm10, %v5757_v14, %v5753_v61  ;;  %vm5767_vm6 = vmor %vm5765_vm9, %vm5766_vm11  ;;  %v5945_v14 = vld [vmem:[%s11871_s6 + $0x8] sm:$0xff]  ;;  %v5944_v61 = vld [vmem:[%s11871_s6] sm:$0xff] }
0x12e7   : > { %v5775_v31 = vmul.f32 %v5758_v55, %v5735_v26  ;;  %v5762_v43 = vsub.f32 1.0, %v5761_v20  ;;  %v7030_v20 = vld [vmem:[%s11873_s23] ss:$0 sm:$0xff]  ;;  %vm11874_vm9 = vmmov %vm11865_vm4  ;;  %s1110_s23 = scalar_lea.vmem [#allocation20], %s8314_s10 }
0x12e8   : > { %s6115_s27 = sshll.u32 %s1110_s23, 4  ;;  %s6116_s27 = int_to_ptr.vmem [resolvable:$true] %s6115_s27 }
0x12e9   : > { %v5763_v57 = vmul.f32 %v7511_v4, %v5762_v43  ;;  %6754 = vmatmul.msk.f32.vlgmr.msra.gmra.mxu2 %vm11865_vm4, %v5775_v31 }
0x12ea   : > { %5919 = vmatpush.msra.mxu2 %v5896_v45 }
0x12eb   : > { %v5764_v40 = vadd.f32 %v7511_v4, %v5763_v57 }
0x12ec   : > { %5920 = vmatpush.msra.mxu2 %v5895_v36 }
0x12ed   : > { %v5768_v9 = vsel %vm5767_vm6, %v7511_v4, %v5764_v40  ;;  %v5946_v4 = vld [vmem:[%s11871_s6 + $0x10] sm:$0xff]  ;;  %vm11875_vm6 = vmmov %vm11865_vm4 }
0x12ee   : > { %v5773_v21 = vsel %vm5770_vm12, %v5772_v2, %v5768_v9  ;;  %5921 = vmatpush.msra.mxu2 %v5894_v8  ;;  %5971 = vmatpush.msra.mxu0 %v5946_v4  ;;  %v7031_v9 = vld [vmem:[%s11876_s5] ss:$0 sm:$0xff]  ;;  %s6101_s5 = scalar_lea.sflag [#allocation5], %s8314_s10 }
0x12ef   : > { %v5776_v12 = vmul.f32 %v5773_v21, %v5736_v63 }
0x12f0   : > { %5922 = vmatpush.msra.mxu2 %v5893_v49  ;;  %5972 = vmatpush.msra.mxu0 %v5945_v14 }
0x12f1   : > { %6755 = vmatmul.msk.f32.gmra.mxu2 %vm11866_vm13, %v5776_v12 }
0x12f2   : > { %5973 = vmatpush.msra.mxu0 %v5944_v61 }
0x1320   : > { %v5935_v31 = vpop.permute.xlu2 %5934 }
0x132c   : > { %v5940_v40 = vpop.permute.xlu2 %5939 }
0x136c   : > { %v5810_v3 = vpop.f32.mrf.mxu2 }
0x136d   : > { %v5811_v48 = vadd.f32 %v7028_v23, %v5810_v3 }
0x136f   : > { %6756 = vmatmul.msk.f32.vlgmr.msrb.gmra.mxu2 %vm11867_vm8, %v5811_v48 }
0x1374   : > { %v5813_v24 = vpop.f32.mrf.mxu2 }
0x1375   : > { %v5814_v0 = vadd.f32 %v7028_v23, %v5813_v24 }
0x1377   : > { %6757 = vmatmul.msk.f32.gmra.mxu2 %vm11868_vm7, %v5814_v0 }
0x13f2   : > { %v5847_v22 = vpop.f32.mrf.mxu2 }
0x13f3   : > { %v5848_v53 = vadd.f32 %v7029_v54, %v5847_v22 }
0x13f5   : > { %v6758_v19 = vmul.f32 -1.442695, %v5848_v53 }
0x13f7   : > { %7512 = vpow2.f32 %v6758_v19 }
0x13fa   : > { %v5850_v16 = vpop.f32.mrf.mxu2 }
0x13fb   : > { %v5851_v52 = vadd.f32 %v7029_v54, %v5850_v16 }
0x13fd   : > { %v7513_v41 = vpop.eup %7512  ;;  %v6759_v51 = vmul.f32 -1.442695, %v5851_v52 }
0x13fe   : > { %v5859_v39 = vadd.f32 1.0, %v7513_v41 }
0x13ff   : > { %7514 = vpow2.f32 %v6759_v51 }
0x1400   : > { %7516 = vrcp.f32 %v5859_v39  ;;  %v5872_v5 = vand.u32 2147483648, %v5859_v39  ;;  %v5870_v25 = vand.u32 2147483647, %v5859_v39  ;;  %vm5866_vm1 = vweird.f32 %v5859_v39 }
0x1402   : > { %v5873_v46 = vor.u32 1.1754944e-38, %v5872_v5  ;;  %vm5871_vm15 = vcmp.eq.f32.partialorder %v5870_v25, 8.507059e+37 }
0x1405   : > { %v7515_v34 = vpop.eup %7514 }
0x1406   : > { %v7517_v10 = vpop.eup %7516  ;;  %v5860_v11 = vadd.f32 1.0, %v7515_v34 }
0x1407   : > { %v5862_v56 = vmul.f32 %v7517_v10, %v5859_v39  ;;  %vm5867_vm0 = vweird.f32 %v7517_v10 }
0x1408   : > { %7518 = vrcp.f32 %v5860_v11  ;;  %vm5868_vm5 = vmor %vm5866_vm1, %vm5867_vm0  ;;  %v5887_v18 = vand.u32 2147483648, %v5860_v11  ;;  %v5885_v1 = vand.u32 2147483647, %v5860_v11  ;;  %vm5881_vm3 = vweird.f32 %v5860_v11 }
0x1409   : > { %v5863_v26 = vsub.f32 1.0, %v5862_v56 }
0x140a   : > { %v5888_v17 = vor.u32 1.1754944e-38, %v5887_v18  ;;  %vm5886_vm11 = vcmp.eq.f32.partialorder %v5885_v1, 8.507059e+37  ;;  %v6021_v18 = vld [vmem:[%s984_s1] sm:$0x1]  ;;  %s7844_s1 = scalar_lea.hbm %s7843_s9, 1 }
0x140b   : > { %v5864_v38 = vmul.f32 %v7517_v10, %v5863_v26  ;;  %p7845_p10 = scmp.ne.s32.totalorder %s7843_s9, %s7844_s1  ;;  %p7850_p8 = scmp.lt.s32.totalorder %s7848_s14, %s7844_s1 }
0x140d   : > { %v5865_v27 = vadd.f32 %v7517_v10, %v5864_v38  ;;  %v11881_v38 = vld [vmem:[#allocation38_spill] sm:$0xff]  ;;  %p7846_p6 = pnand %p7845_p10, %p8195_p0  ;;  %p7851_p9 = por %p7850_p8, %p7849_p3 }
0x140e   : > { %v7519_v63 = vpop.eup %7518  ;;  %v6066_v25 = vadd.s32 1, %v11881_v38 }
0x140f   : > { %v5869_v33 = vsel %vm5868_vm5, %v7517_v10, %v5865_v27  ;;  %v5877_v60 = vmul.f32 %v7519_v63, %v5860_v11  ;;  %vm5882_vm2 = vweird.f32 %v7519_v63  ;;  %v11882_v27 = vlaneseq  ;;  %p7847_p11 = pneg %p7846_p6 }
0x1410   : > { %v5874_v15 = vsel %vm5871_vm15, %v5873_v46, %v5869_v33  ;;  %vm5883_vm10 = vmor %vm5881_vm3, %vm5882_vm2  ;;  %v6064_v46 = vmul.u32 8, %v11881_v38  ;;  %v6067_v33 = vmul.u32 8, %v6066_v25 }
0x1411   : > { %v5891_v47 = vmul.f32 %v5874_v15, %v5848_v53  ;;  %v5878_v35 = vsub.f32 1.0, %v5877_v60  ;;  %vm11877_vm2 = vmmov %vm11865_vm4  ;;  %v11883_v60 = vmov 0.0   ;;  %p7852_p12 = pnand %p7851_p9, %p7847_p11 }
0x1412   : > { %vm11880_vm3 = vmmov %vm11877_vm2 }
0x1413   : > { %v5879_v30 = vmul.f32 %v7519_v63, %v5878_v35  ;;  %6760 = vmatmul.msk.f32.vlgmr.msra.gmra.mxu2 %vm11872_vm14, %v5891_v47  ;;  %vm11878_vm14 = vmmov %vm11877_vm2  ;;  %v6027_v47 = vpop.permute.xlu2 %6026 }
0x1414   : > { %v6029_v35 = vperm.slane %v6027_v47, 0 }
0x1415   : > { %v5880_v58 = vadd.f32 %v7519_v63, %v5879_v30 }
0x1417   : > { %v5884_v13 = vsel %vm5883_vm10, %v7519_v63, %v5880_v58  ;;  %v6063_v63 = vand.u32 127, %v11882_v27 }
0x1418   : > { %v5889_v42 = vsel %vm5886_vm11, %v5888_v17, %v5884_v13 }
0x1419   : > { %v5892_v50 = vmul.f32 %v5889_v42, %v5851_v52  ;;  %vm6065_vm10 = vcmp.ge.s32.totalorder %v6063_v63, %v6064_v46  ;;  %vm6068_vm11 = vcmp.lt.s32.totalorder %v6063_v63, %v6067_v33 }
0x141b   : > { %6761 = vmatmul.msk.f32.gmra.mxu2 %vm11865_vm4, %v5892_v50  ;;  %vm6069_vm4 = vmand %vm6065_vm10, %vm6068_vm11 }
0x141c   : > { %v6769_v15 = vsel %vm6069_vm4, 1.0, %v11883_v60 }
0x1496   : > { %v5924_v55 = vpop.f32.mrf.mxu2 }
0x1497   : > { %v5925_v43 = vadd.f32 %v7030_v20, %v5924_v55 }
0x1499   : > { %v5942_v37 = vmul.f32 %v5935_v31, %v5925_v43 }
0x149b   : > { %6762 = vmatmul.msk.f32.vlgmr.msra.gmra.mxu0 %vm11874_vm9, %v5942_v37  ;;  %vm11884_vm9 = vcmask 130048  }
0x149c   : > { %6770 = vmatpush.xpose.msk.msrb.mxu0 %vm11884_vm9, %v6769_v15 }
0x149e   : > { %v5927_v57 = vpop.f32.mrf.mxu2 }
0x149f   : > { %v5928_v28 = vadd.f32 %v7030_v20, %v5927_v57 }
0x14a1   : > { %v5943_v2 = vmul.f32 %v5940_v40, %v5928_v28 }
0x14a3   : > { %6763 = vmatmul.msk.f32.gmra.mxu0 %vm11875_vm6, %v5943_v2  ;;  %vm6060_vm6 = vcmask 122880  }
0x1518   : > { %v5975_v21 = vpop.f32.mrf.mxu0 }
0x1519   : > { %v5976_v12 = vadd.f32 %v7031_v9, %v5975_v21 }
0x151b   : > { %v6764_v59 = vmul.f32 -1.442695, %v5976_v12 }
0x151d   : > { %7520 = vpow2.f32 %v6764_v59 }
0x1520   : > { %v5978_v6 = vpop.f32.mrf.mxu0 }
0x1521   : > { %v5979_v23 = vadd.f32 %v7031_v9, %v5978_v6 }
0x1523   : > { %v7521_v3 = vpop.eup %7520  ;;  %v6765_v48 = vmul.f32 -1.442695, %v5979_v23 }
0x1524   : > { %v5987_v24 = vadd.f32 1.0, %v7521_v3 }
0x1525   : > { %7522 = vpow2.f32 %v6765_v48 }
0x1526   : > { %7524 = vrcp.f32 %v5987_v24  ;;  %vm5994_vm8 = vweird.f32 %v5987_v24  ;;  %v6000_v32 = vand.u32 2147483648, %v5987_v24  ;;  %v5998_v41 = vand.u32 2147483647, %v5987_v24 }
0x1528   : > { %v6001_v10 = vor.u32 1.1754944e-38, %v6000_v32  ;;  %vm5999_vm15 = vcmp.eq.f32.partialorder %v5998_v41, 8.507059e+37 }
0x152b   : > { %v7523_v0 = vpop.eup %7522 }
0x152c   : > { %v7525_v45 = vpop.eup %7524  ;;  %v5988_v36 = vadd.f32 1.0, %v7523_v0 }
0x152d   : > { %v5990_v54 = vmul.f32 %v7525_v45, %v5987_v24  ;;  %vm5995_vm12 = vweird.f32 %v7525_v45 }
0x152e   : > { %7526 = vrcp.f32 %v5988_v36  ;;  %v6015_v16 = vand.u32 2147483648, %v5988_v36  ;;  %v6013_v29 = vand.u32 2147483647, %v5988_v36  ;;  %vm5996_vm7 = vmor %vm5994_vm8, %vm5995_vm12  ;;  %vm6009_vm0 = vweird.f32 %v5988_v36 }
0x152f   : > { %v5991_v8 = vsub.f32 1.0, %v5990_v54  ;;  %vm11888_vm12 = vmmov %vm11884_vm9 }
0x1530   : > { %v6016_v39 = vor.u32 1.1754944e-38, %v6015_v16  ;;  %vm6014_vm5 = vcmp.eq.f32.partialorder %v6013_v29, 8.507059e+37 }
0x1531   : > { %v5992_v49 = vmul.f32 %v7525_v45, %v5991_v8 }
0x1533   : > { %v5993_v52 = vadd.f32 %v7525_v45, %v5992_v49 }
0x1534   : > { %v7527_v22 = vpop.eup %7526 }
0x1535   : > { %v6005_v53 = vmul.f32 %v7527_v22, %v5988_v36  ;;  %vm6010_vm13 = vweird.f32 %v7527_v22  ;;  %v5997_v62 = vsel %vm5996_vm7, %v7525_v45, %v5993_v52 }
0x1536   : > { %vm6011_vm1 = vmor %vm6009_vm0, %vm6010_vm13  ;;  %v6002_v26 = vsel %vm5999_vm15, %v6001_v10, %v5997_v62 }
0x1537   : > { %v6006_v19 = vsub.f32 1.0, %v6005_v53  ;;  %v6019_v5 = vmul.f32 %v6002_v26, %v5976_v12 }
0x1539   : > { %v6007_v7 = vmul.f32 %v7527_v22, %v6006_v19 }
0x153b   : > { %v6008_v51 = vadd.f32 %v7527_v22, %v6007_v7 }
0x153d   : > { %v6012_v34 = vsel %vm6011_vm1, %v7527_v22, %v6008_v51 }
0x153e   : > { %v6017_v11 = vsel %vm6014_vm5, %v6016_v39, %v6012_v34 }
0x153f   : > { %v6020_v56 = vmul.f32 %v6017_v11, %v5979_v23 }
0x1541   : > { %6766 = vmatpush.xpose.msk.msrb.mxu2 %vm11877_vm2, %v6020_v56 }
0x1545   : > { %6767 = vmatpush.xpose.msk.msrb.mxu2 %vm11878_vm14, %v6019_v5 }
0x1548   : > { %6768 = vmatmul.msk.f32.vlgmr.msrb.gmra.mxu2 %vm11880_vm3, %v6022_v44 }
0x15cb   : > { %v6056_v30 = vpop.f32.mrf.mxu2 }
0x15cc   : > { %v6057_v1 = vadd.f32 %v6056_v30, %v6029_v35 }
0x15ce   : > { %v6059_v58 = vmul.f32 %v6057_v1, %v6021_v18 }
0x15d0   : > { %6771 = vmatmul.msk.f32.vlgmr.msrb.gmra.mxu0 %vm11888_vm12, %v6059_v58  ;;  %6061 = vst.msk [vmem:[%s1110_s23] sm:$0x1] %vm6060_vm6, %v6059_v58 }
0x15d1   : > { %7855 = shalt.err (!%p7852_p12)
}
0x15d2   : > { %6807 = dma.vmem_to_hbm [thread:$0]  (%p8195_p0), %s6116_s27, 16, %s6118_s4, %s6101_s5   ;;  %vm6098_vm13 = vcmask 8192  }
0x15d3   : > { %s11889_s6 = sld [smem:[#allocation114_spill]]  ;;  %s1116_s28 = scalar_lea.vmem [#allocation21], %s8314_s10 }
0x15d4   : > { %s6128_s8 = sshll.u32 %s1116_s28, 4  ;;  %s6105_s9 = scalar_lea.sflag [#allocation22], %s8314_s10  ;;  %s6129_s8 = int_to_ptr.vmem [resolvable:$true] %s6128_s8 }
0x15d9   : > { %s6126_s22 = scalar_lea.hbm %s11889_s6, %s8137_s29  ;;  %s7876_s29 = scalar_lea.hbm %s11889_s6, 2 }
0x15da   : > { %s6130_s11 = sshll.u32 %s6126_s22, 4  ;;  %s6131_s11 = int_to_ptr.hbm [resolvable:$true] %s6130_s11 }
0x15db   : > { %s7870_s1 = sshra.s32 %s6131_s11, 4  ;;  %s7871_s1 = int_to_ptr.hbm [resolvable:$true] %s7870_s1 }
0x15dc   : > { %s7872_s14 = scalar_lea.hbm %s7871_s1, 1  ;;  %p7877_p1 = scmp.lt.s32.totalorder %s7871_s1, %s11889_s6 }
0x15dd   : > { %p7873_p2 = scmp.ne.s32.totalorder %s7871_s1, %s7872_s14  ;;  %p7878_p7 = scmp.lt.s32.totalorder %s7876_s29, %s7872_s14 }
0x15df   : > { %p7874_p5 = pnand %p7873_p2, %p8195_p0  ;;  %p7879_p10 = por %p7878_p7, %p7877_p1 }
0x15e1   : > { %p7875_p13 = pneg %p7874_p5 }
0x15e3   : > { %p7880_p6 = pnand %p7879_p10, %p7875_p13 }
0x164d   : > { %v6095_v17 = vpop.f32.mrf.mxu0 }
0x164e   : > { %6099 = vst.msk [vmem:[%s1116_s28] sm:$0x1] %vm6098_vm13, %v6095_v17 }
0x164f   : > { %7883 = shalt.err (!%p7880_p6)
}
0x1650   : > { %6808 = dma.vmem_to_hbm [thread:$0]  (%p8195_p0), %s6129_s8, 16, %s6131_s11, %s6105_s9  }
0x1651 PF: > { %s11890_s10 = sld [smem:[#allocation32_spill]]  ;;  %p11892_p11 = scmp.ge.s32.totalorder %s7950_s26, 2 }
0x1653   : > { %p6844_p3 = pnand %p11892_p11, %p8203_p4 }
0x1655   : > { %p6845_p8 = pneg %p6844_p3 }
0x1657   : > { %s6142_s0 = sand.u32 1, %s11890_s10  }
0x1658   : > { %s6143_s23 = scalar_lea.sflag [#allocation5], %s6142_s0 }
0x1659   : > { %7929 = dma.done.wait (%p6845_p8), %s6143_s23, 16  }
0x165a   : > { %7931 = vsyncadd (%p6845_p8), %s6143_s23, 4294967280  ;;  %s6152_s22 = scalar_lea.sflag [#allocation22], %s6142_s0 }
0x165b   : > { %7933 = dma.done.wait (%p6845_p8), %s6152_s22, 16  }
0x165c   : > { %7935 = vsyncadd (%p6845_p8), %s6152_s22, 4294967280  ;;  %s11893_s26 = sld [smem:[#allocation34_spill]]  ;;  %s11896_s9 = smov %s7942_s30 }
0x165d   : > { %s11894_s28 = sld [smem:[#allocation33_spill]] }
0x165e   : > { %s11895_s3 = sld [smem:[#allocation35_spill]] }
0x1662   : > { %p56_p0 = scmp.ge.s32.totalorder %s11893_s26, 4  }
0x1663   : > { %s11897_s30 = smov %s11894_s28 }
0x1664   :  { %58 = sbr.rel (!%p56_p0) target bundleno = 36 (0x24), region = 290 }
0x1669   :  { %6157 = vsyncpa [#allocation4], 1 }
0x166a   :  { %6159 = vsyncpa [#allocation4 + $0x1], 1 }
0x166b   :  { %6160 = vsyncpa [#allocation7], 1 }
0x166c   :  { %6162 = vsyncpa [#allocation7 + $0x1], 1 }
0x166d   :  { %6163 = vsyncpa [#allocation10], 1 }
0x166e   :  { %6165 = vsyncpa [#allocation10 + $0x1], 1 }
0x166f   :  { %6166 = vsyncpa [#allocation13], 1 }
0x1670   :  { %6167 = vsyncpa [#allocation16], 1 }
0x1671   :  { %6168 = vsyncpa [#allocation19], 1 }
0x1672   :  { %6169 = vsyncpa [#allocation5], 1 }
0x1673   :  { %6171 = vsyncpa [#allocation5 + $0x1], 1 }
0x1674   :  { %6172 = vsyncpa [#allocation22], 1 }
0x1675   :  { %6174 = vsyncpa [#allocation22 + $0x1], 1 }

</bundles_post_ra>
